<compile_context>
chip_gen: v6e
topology: v6e:2x2x1
jax: 0.10.0
libtpu: 0.0.40
codegen_flags: <defaults>
</compile_context>

<pallas_src>
import functools
import numpy as np
import jax
import jax.numpy as jnp
from jax.experimental import pallas as pl
from jax.experimental.pallas import tpu as pltpu

SA_HIDDEN = 512
_PAR = pltpu.CompilerParams(dimension_semantics=("parallel",))


def _pick_tile(m):
    # Largest row tile that divides m; caps VMEM per step (safe for v7x 64 MiB VMEM too).
    for t in (512, 256, 128, 64, 32, 16, 8):
        if m % t == 0:
            return t
    return m


# ----------------------------------------------------------------------------- linear kernels

def _linear_kernel(*refs, act_in, act_out, has_mask, has_add):
    it = iter(refs)
    x_ref = next(it)
    a_ref = next(it) if has_add else None
    w_ref = next(it)
    b_ref = next(it)
    m_ref = next(it) if has_mask else None
    o_ref = next(it)

    x = x_ref[...]
    if has_add:
        x = x + a_ref[...]
    if act_in == "relu":
        x = jnp.maximum(x, 0.0)
    y = jnp.dot(x.astype(jnp.bfloat16), w_ref[...],
                preferred_element_type=jnp.float32) + b_ref[...]
    if act_out == "relu":
        y = jnp.maximum(y, 0.0)
    elif act_out == "sigmoid":
        y = jax.nn.sigmoid(y)
    if has_mask:
        y = y * m_ref[...]
    o_ref[...] = y


def linear(x, w, b, act_in="none", act_out="none", mask=None, x_add=None):
    """y = act_out(act_in(x [+ x_add]) @ W + b) [* mask].  W bf16 [K,N], b f32 (1,N)."""
    lead = x.shape[:-1]
    m = int(np.prod(lead)) if lead else 1
    k = x.shape[-1]
    n = w.shape[1]
    tm = _pick_tile(m)
    has_mask = mask is not None
    has_add = x_add is not None

    args = [x.reshape(m, k)]
    specs = [pl.BlockSpec((tm, k), lambda i: (i, 0))]
    if has_add:
        args.append(x_add.reshape(m, k))
        specs.append(pl.BlockSpec((tm, k), lambda i: (i, 0)))
    args += [w, b]
    specs += [pl.BlockSpec((k, n), lambda i: (0, 0)),
              pl.BlockSpec((1, n), lambda i: (0, 0))]
    if has_mask:
        args.append(mask.reshape(m, 1).astype(jnp.float32))
        specs.append(pl.BlockSpec((tm, 1), lambda i: (i, 0)))

    out = pl.pallas_call(
        functools.partial(_linear_kernel, act_in=act_in, act_out=act_out,
                          has_mask=has_mask, has_add=has_add),
        grid=(m // tm,),
        in_specs=specs,
        out_specs=pl.BlockSpec((tm, n), lambda i: (i, 0)),
        out_shape=jax.ShapeDtypeStruct((m, n), jnp.float32),
        compiler_params=_PAR,
    )(*args)
    return out.reshape(lead + (n,))


def _linear3_kernel(x1_ref, x2_ref, x3_ref, w1_ref, w2_ref, w3_ref, b_ref, o_ref):
    y = jnp.dot(x1_ref[...].astype(jnp.bfloat16), w1_ref[...],
                preferred_element_type=jnp.float32)
    y = y + jnp.dot(x2_ref[...].astype(jnp.bfloat16), w2_ref[...],
                    preferred_element_type=jnp.float32)
    y = y + jnp.dot(x3_ref[...].astype(jnp.bfloat16), w3_ref[...],
                    preferred_element_type=jnp.float32)
    o_ref[...] = y + b_ref[...]


def linear3(x1, x2, x3, ws, b):
    """Fused projection of concat([x1,x2,x3], -1) without materializing the concat."""
    w1, w2, w3 = ws
    lead = x1.shape[:-1]
    m = int(np.prod(lead))
    k1, k2, k3 = x1.shape[-1], x2.shape[-1], x3.shape[-1]
    n = w1.shape[1]
    tm = _pick_tile(m)
    out = pl.pallas_call(
        _linear3_kernel,
        grid=(m // tm,),
        in_specs=[pl.BlockSpec((tm, k1), lambda i: (i, 0)),
                  pl.BlockSpec((tm, k2), lambda i: (i, 0)),
                  pl.BlockSpec((tm, k3), lambda i: (i, 0)),
                  pl.BlockSpec((k1, n), lambda i: (0, 0)),
                  pl.BlockSpec((k2, n), lambda i: (0, 0)),
                  pl.BlockSpec((k3, n), lambda i: (0, 0)),
                  pl.BlockSpec((1, n), lambda i: (0, 0))],
        out_specs=pl.BlockSpec((tm, n), lambda i: (i, 0)),
        out_shape=jax.ShapeDtypeStruct((m, n), jnp.float32),
        compiler_params=_PAR,
    )(x1.reshape(m, k1), x2.reshape(m, k2), x3.reshape(m, k3), w1, w2, w3, b)
    return out.reshape(lead + (n,))


# ----------------------------------------------------------------------------- layernorm (+ residual)

def _ln_res_kernel(x_ref, d_ref, g_ref, b_ref, o_ref, *, eps):
    x = x_ref[...] + d_ref[...]
    mu = jnp.mean(x, axis=-1, keepdims=True)
    xc = x - mu
    var = jnp.mean(xc * xc, axis=-1, keepdims=True)
    o_ref[...] = xc * jax.lax.rsqrt(var + eps) * g_ref[...] + b_ref[...]


def layernorm_residual(x, d, g, b, eps=1e-5):
    lead = x.shape[:-1]
    m = int(np.prod(lead))
    n = x.shape[-1]
    tm = _pick_tile(m)
    out = pl.pallas_call(
        functools.partial(_ln_res_kernel, eps=eps),
        grid=(m // tm,),
        in_specs=[pl.BlockSpec((tm, n), lambda i: (i, 0)),
                  pl.BlockSpec((tm, n), lambda i: (i, 0)),
                  pl.BlockSpec((1, n), lambda i: (0, 0)),
                  pl.BlockSpec((1, n), lambda i: (0, 0))],
        out_specs=pl.BlockSpec((tm, n), lambda i: (i, 0)),
        out_shape=jax.ShapeDtypeStruct((m, n), jnp.float32),
        compiler_params=_PAR,
    )(x.reshape(m, n), d.reshape(m, n), g, b)
    return out.reshape(x.shape)


# ----------------------------------------------------------------------------- attention kernels

def _attend_heads(q, k, v, mask, inv_scale, sa=None):
    """q:[H,Lq,dh] k,v:[H,Lk,dh] (f32), mask:[1,Lk], sa:[Lq,Lk] or None -> [H,Lq,dh] f32.
    Exact torch op order: (QK^T) [*sa] -> masked_fill(-1e9) -> /scale -> softmax -> @V."""
    logits = jax.lax.dot_general(
        q.astype(jnp.bfloat16), k.astype(jnp.bfloat16),
        (((2,), (2,)), ((0,), (0,))), preferred_element_type=jnp.float32)   # [H, Lq, Lk]
    if sa is not None:
        logits = logits * sa[None, :, :]
    logits = jnp.where(mask[None, :, :] == 0.0, jnp.float32(-1e9), logits) * inv_scale
    mx = jnp.max(logits, axis=-1, keepdims=True)
    e = jnp.exp(logits - mx)
    p = e * pl.reciprocal(jnp.sum(e, axis=-1, keepdims=True), approx=True)
    return jax.lax.dot_general(
        p.astype(jnp.bfloat16), v.astype(jnp.bfloat16),
        (((2,), (1,)), ((0,), (0,))), preferred_element_type=jnp.float32)   # [H, Lq, dh]


def _inter_attn_kernel(vq, qq, cq, vk, qk, ck, vv, qv, cv,
                       qm, vm, cm, sacv, savc,
                       o_q2v, o_v2q, o_c2q, o_q2c, o_c2v, o_v2c, *, inv_scale):
    o_q2v[...] = _attend_heads(vq[...], qk[...], qv[...], qm[...], inv_scale)
    o_v2q[...] = _attend_heads(qq[...], vk[...], vv[...], vm[...], inv_scale)
    o_c2q[...] = _attend_heads(qq[...], ck[...], cv[...], cm[...], inv_scale)
    o_q2c[...] = _attend_heads(cq[...], qk[...], qv[...], qm[...], inv_scale)
    o_c2v[...] = _attend_heads(vq[...], ck[...], cv[...], cm[...], inv_scale, sa=sacv[...])
    o_v2c[...] = _attend_heads(cq[...], vk[...], vv[...], vm[...], inv_scale, sa=savc[...])


def _intra_attn_kernel(vq, vk, vv, qq, qk, qv, cq, ck, cv,
                       g_q4v, g_v4q, vm, qm, cm,
                       o_v, o_q, o_c, *, inv_scale):
    gq4v = 1.0 + g_q4v[...]          # [H, 1, dh]
    gv4q = 1.0 + g_v4q[...]
    o_v[...] = _attend_heads(gq4v * vq[...], gq4v * vk[...], vv[...], vm[...], inv_scale)
    o_q[...] = _attend_heads(gv4q * qq[...], gv4q * qk[...], qv[...], qm[...], inv_scale)
    o_c[...] = _attend_heads(cq[...], ck[...], cv[...], cm[...], inv_scale)


def _bspec(*dims):
    # Batch dim squeezed out of the kernel view; grid iterates over batch.
    return pl.BlockSpec((None,) + dims, lambda b: (b,) + (0,) * len(dims))


def to_heads(x, num_head):
    b, l, d = x.shape
    return x.reshape(b, l, num_head, d // num_head).transpose(0, 2, 1, 3)


def from_heads(x):
    b, h, l, dh = x.shape
    return x.transpose(0, 2, 1, 3).reshape(b, l, h * dh)


def inter_attention(vqh, qqh, cqh, vkh, qkh, ckh, vvh, qvh, cvh,
                    qm, vm, cm, sa_cv, sa_vc, inv_scale):
    B, H, n, dh = vqh.shape
    Lq = qqh.shape[2]
    m = cqh.shape[2]
    nk = vkh.shape[2]
    mk = ckh.shape[2]
    out_shape = (jax.ShapeDtypeStruct((B, H, n, dh), jnp.float32),   # q2v
                 jax.ShapeDtypeStruct((B, H, Lq, dh), jnp.float32),  # v2q
                 jax.ShapeDtypeStruct((B, H, Lq, dh), jnp.float32),  # c2q
                 jax.ShapeDtypeStruct((B, H, m, dh), jnp.float32),   # q2c
                 jax.ShapeDtypeStruct((B, H, n, dh), jnp.float32),   # c2v
                 jax.ShapeDtypeStruct((B, H, m, dh), jnp.float32))   # v2c
    return pl.pallas_call(
        functools.partial(_inter_attn_kernel, inv_scale=inv_scale),
        grid=(B,),
        in_specs=[_bspec(H, n, dh), _bspec(H, Lq, dh), _bspec(H, m, dh),
                  _bspec(H, nk, dh), _bspec(H, Lq, dh), _bspec(H, mk, dh),
                  _bspec(H, nk, dh), _bspec(H, Lq, dh), _bspec(H, mk, dh),
                  _bspec(1, Lq), _bspec(1, nk), _bspec(1, mk),
                  _bspec(n, mk), _bspec(m, nk)],
        out_specs=(_bspec(H, n, dh), _bspec(H, Lq, dh), _bspec(H, Lq, dh),
                   _bspec(H, m, dh), _bspec(H, n, dh), _bspec(H, m, dh)),
        out_shape=out_shape,
        compiler_params=_PAR,
    )(vqh, qqh, cqh, vkh, qkh, ckh, vvh, qvh, cvh, qm, vm, cm, sa_cv, sa_vc)


def intra_attention(vq, vk, vv, qq, qk, qv, cq, ck, cv,
                    g_q4v, g_v4q, vm, qm, cm, inv_scale):
    B, H, n, dh = vq.shape
    nk = vk.shape[2]
    Lq = qq.shape[2]
    m = cq.shape[2]
    mk = ck.shape[2]
    out_shape = (jax.ShapeDtypeStruct((B, H, n, dh), jnp.float32),
                 jax.ShapeDtypeStruct((B, H, Lq, dh), jnp.float32),
                 jax.ShapeDtypeStruct((B, H, m, dh), jnp.float32))
    return pl.pallas_call(
        functools.partial(_intra_attn_kernel, inv_scale=inv_scale),
        grid=(B,),
        in_specs=[_bspec(H, n, dh), _bspec(H, nk, dh), _bspec(H, nk, dh),
                  _bspec(H, Lq, dh), _bspec(H, Lq, dh), _bspec(H, Lq, dh),
                  _bspec(H, m, dh), _bspec(H, mk, dh), _bspec(H, mk, dh),
                  _bspec(H, 1, dh), _bspec(H, 1, dh),
                  _bspec(1, nk), _bspec(1, Lq), _bspec(1, mk)],
        out_specs=(_bspec(H, n, dh), _bspec(H, Lq, dh), _bspec(H, m, dh)),
        out_shape=out_shape,
        compiler_params=_PAR,
    )(vq, vk, vv, qq, qk, qv, cq, ck, cv, g_q4v, g_v4q, vm, qm, cm)


# ------------------------------------------------------------------- Spatial_attention (fused MLP)

def _spatial_mlp_kernel(s_ref, w1_ref, b1_ref, w2_ref, b2_ref, o_ref):
    tr, m1, f = s_ref.shape
    s2 = s_ref[...].reshape(tr * m1, f)
    h = jnp.dot(s2.astype(jnp.bfloat16), w1_ref[...],
                preferred_element_type=jnp.float32) + b1_ref[...]
    h = jnp.maximum(h, 0.0)                              # hidden [tr*m1, 512] stays in VMEM
    h3 = h.reshape(tr, m1, h.shape[-1])
    logits = jnp.sum(h3 * w2_ref[...], axis=-1) + b2_ref[...]
    o_ref[...] = jax.nn.sigmoid(logits) + 1.0            # lane-dense [tr, m1] output


def spatial_attention_fwd(p, b1, b2):
    """b1:[B,n1,4] b2:[B,m1,4] -> [B,n1,m1] (sigmoid(MLP(geom feats)) + 1)."""
    def area(box):
        w = jnp.maximum(box[..., 2] - box[..., 0], 0.0)
        h = jnp.maximum(box[..., 3] - box[..., 1], 0.0)
        return w * h

    min_pt = jnp.maximum(b1[:, :, None, 0:2], b2[:, None, :, 0:2])
    max_pt = jnp.minimum(b1[:, :, None, 2:4], b2[:, None, :, 2:4])
    inter_wh = jnp.maximum(max_pt - min_pt, 0.0)
    inter = inter_wh[..., 0] * inter_wh[..., 1]
    iou = inter / (area(b1)[:, :, None] + area(b2)[:, None, :] - inter + 1e-12)

    def aug(b):
        w = b[..., 2] - b[..., 0]
        h = b[..., 3] - b[..., 1]
        cx = (b[..., 0] + b[..., 2]) * 0.5
        cy = (b[..., 1] + b[..., 3]) * 0.5
        return jnp.concatenate([b, w[..., None], h[..., None], cx[..., None], cy[..., None]], axis=-1)

    b1a, b2a = aug(b1), aug(b2)
    B, n1, _ = b1.shape
    m1 = b2.shape[1]
    s_i = jnp.concatenate([
        jnp.broadcast_to(b1a[:, :, None, :], (B, n1, m1, 8)),
        jnp.broadcast_to(b2a[:, None, :, :], (B, n1, m1, 8)),
        iou[..., None],
    ], axis=-1)                                          # [B, n1, m1, 17]

    R = B * n1
    s_r = s_i.reshape(R, m1, 17)
    tr = _pick_tile(R)
    out = pl.pallas_call(
        _spatial_mlp_kernel,
        grid=(R // tr,),
        in_specs=[pl.BlockSpec((tr, m1, 17), lambda i: (i, 0, 0)),
                  pl.BlockSpec((17, SA_HIDDEN), lambda i: (0, 0)),
                  pl.BlockSpec((1, SA_HIDDEN), lambda i: (0, 0)),
                  pl.BlockSpec((1, 1, SA_HIDDEN), lambda i: (0, 0, 0)),
                  pl.BlockSpec((1, 1), lambda i: (0, 0))],
        out_specs=pl.BlockSpec((tr, m1), lambda i: (i, 0)),
        out_shape=jax.ShapeDtypeStruct((R, m1), jnp.float32),
        compiler_params=_PAR,
    )(s_r, p["sa_w1"], p["sa_b1"], p["sa_w2"], p["sa_b2"])
    return out.reshape(B, n1, m1)


# ------------------------------------------------------------------- InterModalityUpdate

def inter_forward(p, v, q, c, v_mask, q_mask, c_mask, vbbox, cbbox, num_head, O):
    B = v.shape[0]
    H = num_head

    v_trans = linear(v, *p["v_lin"], act_in="relu", mask=v_mask)
    q_trans = linear(q, *p["q_lin"], act_in="relu", mask=q_mask)
    c_trans = linear(c, *p["c_lin"], act_in="relu", mask=c_mask)
    v_k, v_q, v_v = jnp.split(v_trans, 3, axis=2)
    q_k, q_q, q_v = jnp.split(q_trans, 3, axis=2)
    c_k, c_q, c_v = jnp.split(c_trans, 3, axis=2)

    sqrtO = float(np.sqrt(O))
    m_v_k = sqrtO * jnp.broadcast_to(p["m_v_k"], (B, 1, O))
    m_v_v = jnp.broadcast_to(p["m_v_v"], (B, 1, O))          # sqrt(mv) = 1
    m_v_b = jnp.broadcast_to(p["m_v_b"], (B, 1, 4))
    v_k_e = jnp.concatenate([m_v_k, v_k], axis=1)
    v_v_e = jnp.concatenate([m_v_v, v_v], axis=1)
    vbbox_e = jnp.concatenate([m_v_b, vbbox], axis=1)
    v_mask_e = jnp.concatenate([jnp.ones((B, 1), jnp.float32), v_mask], axis=1)

    m_c_k = sqrtO * jnp.broadcast_to(p["m_c_k"], (B, 1, O))
    m_c_v = jnp.broadcast_to(p["m_c_v"], (B, 1, O))
    m_c_b = jnp.broadcast_to(p["m_c_b"], (B, 1, 4))
    c_k_e = jnp.concatenate([m_c_k, c_k], axis=1)
    c_v_e = jnp.concatenate([m_c_v, c_v], axis=1)
    cbbox_e = jnp.concatenate([m_c_b, cbbox], axis=1)
    c_mask_e = jnp.concatenate([jnp.ones((B, 1), jnp.float32), c_mask], axis=1)

    sa = spatial_attention_fwd(p, vbbox_e, cbbox_e)          # [B, n+1, m+1]
    sa_cv = sa[:, 1:, :]                                     # [B, n, m+1]
    sa_vc = jnp.swapaxes(sa, 1, 2)[:, 1:, :]                 # [B, m, n+1]

    inv_scale = 1.0 / float((O // H) ** 0.5)
    outs = inter_attention(
        to_heads(v_q, H), to_heads(q_q, H), to_heads(c_q, H),
        to_heads(v_k_e, H), to_heads(q_k, H), to_heads(c_k_e, H),
        to_heads(v_v_e, H), to_heads(q_v, H), to_heads(c_v_e, H),
        q_mask[:, None, :], v_mask_e[:, None, :], c_mask_e[:, None, :],
        sa_cv, sa_vc, inv_scale)
    q2v_u, v2q_u, c2q_u, q2c_u, c2v_u, v2c_u = [from_heads(o) for o in outs]

    updated_v = linear3(v, q2v_u, c2v_u, *p["v_out"])
    updated_q = linear3(q, v2q_u, c2q_u, *p["q_out"])
    updated_c = linear3(c, v2c_u, q2c_u, *p["c_out"])
    return updated_v, updated_q, updated_c


# --------------------------------------------------------------- DyIntraModalityUpdate

def intra_forward(p, v, q, c, v_mask, q_mask, c_mask, num_head, O):
    B = v.shape[0]
    H = num_head
    dh = O // H

    v_mean = (v * v_mask[:, :, None]).sum(1) / v_mask.sum(1)[:, None]
    q_mean = (q * q_mask[:, :, None]).sum(1) / q_mask.sum(1)[:, None]
    v4q_gate = linear(v_mean, *p["v4q_gate"], act_in="relu", act_out="sigmoid")  # [B, O]
    q4v_gate = linear(q_mean, *p["q4v_gate"], act_in="relu", act_out="sigmoid")
    g_v4q = v4q_gate.reshape(B, 1, H, dh).transpose(0, 2, 1, 3)                  # [B, H, 1, dh]
    g_q4v = q4v_gate.reshape(B, 1, H, dh).transpose(0, 2, 1, 3)

    v_trans = linear(v, *p["v_lin"], act_in="relu", mask=v_mask)
    q_trans = linear(q, *p["q_lin"], act_in="relu", mask=q_mask)
    c_trans = linear(c, *p["c_lin"], act_in="relu", mask=c_mask)
    v_k, v_q, v_v = jnp.split(v_trans, 3, axis=2)
    q_k, q_q, q_v = jnp.split(q_trans, 3, axis=2)
    c_k, c_q, c_v = jnp.split(c_trans, 3, axis=2)

    sqrtO = float(np.sqrt(O))
    m_v_k = sqrtO * jnp.broadcast_to(p["m_v_k"], (B, 1, O))
    m_v_v = jnp.broadcast_to(p["m_v_v"], (B, 1, O))
    v_k_e = jnp.concatenate([m_v_k, v_k], axis=1)
    v_v_e = jnp.concatenate([m_v_v, v_v], axis=1)
    v_mask_e = jnp.concatenate([jnp.ones((B, 1), jnp.float32), v_mask], axis=1)

    m_c_k = sqrtO * jnp.broadcast_to(p["m_c_k"], (B, 1, O))
    m_c_v = jnp.broadcast_to(p["m_c_v"], (B, 1, O))
    c_k_e = jnp.concatenate([m_c_k, c_k], axis=1)
    c_v_e = jnp.concatenate([m_c_v, c_v], axis=1)
    c_mask_e = jnp.concatenate([jnp.ones((B, 1), jnp.float32), c_mask], axis=1)

    inv_scale = 1.0 / float((O // H) ** 0.5)
    v_u_h, q_u_h, c_u_h = intra_attention(
        to_heads(v_q, H), to_heads(v_k_e, H), to_heads(v_v_e, H),
        to_heads(q_q, H), to_heads(q_k, H), to_heads(q_v, H),
        to_heads(c_q, H), to_heads(c_k_e, H), to_heads(c_v_e, H),
        g_q4v, g_v4q,
        v_mask_e[:, None, :], q_mask[:, None, :], c_mask_e[:, None, :],
        inv_scale)
    v_u, q_u, c_u = from_heads(v_u_h), from_heads(q_u_h), from_heads(c_u_h)

    updated_v = linear(v, *p["v_out"], x_add=v_u)
    updated_q = linear(q, *p["q_out"], x_add=q_u)
    updated_c = linear(c, *p["c_out"], x_add=c_u)
    return updated_v, updated_q, updated_c


# ----------------------------------------------------------------------------- MultiBlock

def multiblock_forward(params, v, q, c, v_mask, q_mask, c_mask, vbbox, cbbox,
                       num_inter_head, num_intra_head, O):
    v = linear(v, *params["v_lin"])
    q = linear(q, *params["q_lin"])
    c = linear(c, *params["c_lin"])
    results = []
    for blk in params["blocks"]:
        v1, q1, c1 = inter_forward(blk["inter"], v, q, c, v_mask, q_mask, c_mask,
                                   vbbox, cbbox, num_inter_head, O)
        v = layernorm_residual(v, v1, *params["ln1v"])
        q = layernorm_residual(q, q1, *params["ln1q"])
        c = layernorm_residual(c, c1, *params["ln1c"])
        v2, q2, c2 = intra_forward(blk["intra"], v, q, c, v_mask, q_mask, c_mask,
                                   num_intra_head, O)
        v = layernorm_residual(v, v2, *params["ln2v"])
        q = layernorm_residual(q, q2, *params["ln2q"])
        c = layernorm_residual(c, c2, *params["ln2c"])
        results.append((v, q, c))
    return results


# ----------------------------------------------------------------------------- init (pre-cast params)

def init_linear(key, din, dout, scale=0.1):
    kw, kb = jax.random.split(key)
    w = (jax.random.normal(kw, (din, dout), jnp.float32) * scale).astype(jnp.bfloat16)
    b = (jax.random.normal(kb, (dout,), jnp.float32) * scale).reshape(1, dout)
    return w, b


def init_linear3(key, d1, d2, d3, dout, scale=0.1):
    k1, k2, k3, kb = jax.random.split(key, 4)
    ws = tuple((jax.random.normal(k, (d, dout), jnp.float32) * scale).astype(jnp.bfloat16)
               for k, d in ((k1, d1), (k2, d2), (k3, d3)))
    b = (jax.random.normal(kb, (dout,), jnp.float32) * scale).reshape(1, dout)
    return ws, b


def init_inter(key, O):
    ks = jax.random.split(key, 14)
    sa_w1, sa_b1 = init_linear(ks[12], 17, SA_HIDDEN)
    sa_w2f = jax.random.normal(ks[13], (SA_HIDDEN,), jnp.float32) * 0.1
    sa_b2f = jax.random.normal(jax.random.fold_in(ks[13], 1), (1,), jnp.float32) * 0.1
    return {
        "v_lin": init_linear(ks[0], O, 3 * O),
        "q_lin": init_linear(ks[1], O, 3 * O),
        "c_lin": init_linear(ks[2], O, 3 * O),
        "m_v_k": jax.random.normal(ks[3], (1, 1, O), jnp.float32) * 0.1,
        "m_v_v": jax.random.normal(ks[4], (1, 1, O), jnp.float32) * 0.1,
        "m_v_b": jax.random.uniform(ks[5], (1, 1, 4), jnp.float32),
        "m_c_k": jax.random.normal(ks[6], (1, 1, O), jnp.float32) * 0.1,
        "m_c_v": jax.random.normal(ks[7], (1, 1, O), jnp.float32) * 0.1,
        "m_c_b": jax.random.uniform(ks[8], (1, 1, 4), jnp.float32),
        "v_out": init_linear3(ks[9], O, O, O, O),
        "q_out": init_linear3(ks[10], O, O, O, O),
        "c_out": init_linear3(ks[11], O, O, O, O),
        "sa_w1": sa_w1,                               # [17, 512] bf16
        "sa_b1": sa_b1,                               # (1, 512) f32
        "sa_w2": sa_w2f.reshape(1, 1, SA_HIDDEN),     # (1, 1, 512) f32 (lane-reduce weight)
        "sa_b2": sa_b2f.reshape(1, 1),                # (1, 1) f32
    }


def init_intra(key, O):
    ks = jax.random.split(key, 12)
    return {
        "v4q_gate": init_linear(ks[0], O, O),
        "q4v_gate": init_linear(ks[1], O, O),
        "v_lin": init_linear(ks[2], O, 3 * O),
        "q_lin": init_linear(ks[3], O, 3 * O),
        "c_lin": init_linear(ks[4], O, 3 * O),
        "m_v_k": jax.random.normal(ks[5], (1, 1, O), jnp.float32) * 0.1,
        "m_v_v": jax.random.normal(ks[6], (1, 1, O), jnp.float32) * 0.1,
        "m_c_k": jax.random.normal(ks[7], (1, 1, O), jnp.float32) * 0.1,
        "m_c_v": jax.random.normal(ks[8], (1, 1, O), jnp.float32) * 0.1,
        "v_out": init_linear(ks[9], O, O),
        "q_out": init_linear(ks[10], O, O),
        "c_out": init_linear(ks[11], O, O),
    }


def init_multiblock(key, v_size, q_size, c_size, O, num_block):
    ks = jax.random.split(key, 3 + num_block)
    ln = lambda: (jnp.ones((1, O), jnp.float32), jnp.zeros((1, O), jnp.float32))
    params = {
        "v_lin": init_linear(ks[0], v_size, O),
        "q_lin": init_linear(ks[1], q_size, O),
        "c_lin": init_linear(ks[2], c_size, O),
        # Shared across blocks (matches the reference MultiBlock, which owns one set).
        "ln1v": ln(), "ln1q": ln(), "ln1c": ln(),
        "ln2v": ln(), "ln2q": ln(), "ln2c": ln(),
        "blocks": [],
    }
    for i in range(num_block):
        bk = jax.random.split(ks[3 + i], 2)
        params["blocks"].append({"inter": init_inter(bk[0], O), "intra": init_intra(bk[1], O)})
    return params


def make_boxes(key, B, n):
    k1, k2 = jax.random.split(key)
    xy = jax.random.uniform(k1, (B, n, 2), jnp.float32)
    wh = jax.random.uniform(k2, (B, n, 2), jnp.float32) * 0.5 + 0.05
    return jnp.concatenate([xy, xy + wh], axis=-1)   # valid x1<x2, y1<y2


# ----------------------------------------------------------------------------- main

if __name__ == "__main__":
    key = jax.random.PRNGKey(0)
    B, num_obj, max_len, max_len_c = 2, 8, 6, 7
    v_size = q_size = c_size = 32
    output_size = 16
    num_inter_head = 2
    num_intra_head = 2
    num_block = 1

    keys = jax.random.split(key, 10)
    params = init_multiblock(keys[0], v_size, q_size, c_size, output_size, num_block)

    v = jax.random.normal(keys[1], (B, num_obj, v_size), jnp.float32)
    q = jax.random.normal(keys[2], (B, max_len, q_size), jnp.float32)
    c = jax.random.normal(keys[3], (B, max_len_c, c_size), jnp.float32)
    v_mask = jnp.concatenate([jnp.ones((B, num_obj - 2)), jnp.zeros((B, 2))], axis=1).astype(jnp.float32)
    q_mask = jnp.concatenate([jnp.ones((B, max_len - 1)), jnp.zeros((B, 1))], axis=1).astype(jnp.float32)
    c_mask = jnp.concatenate([jnp.ones((B, max_len_c - 2)), jnp.zeros((B, 2))], axis=1).astype(jnp.float32)
    vbbox = make_boxes(keys[4], B, num_obj)
    cbbox = make_boxes(keys[5], B, max_len_c)

    fwd = jax.jit(functools.partial(multiblock_forward,
                                    num_inter_head=num_inter_head,
                                    num_intra_head=num_intra_head,
                                    O=output_size))
    out = fwd(params, v, q, c, v_mask, q_mask, c_mask, vbbox, cbbox)
    out = jax.block_until_ready(out)

    (vo, qo, co) = out[0]
    assert vo.shape == (B, num_obj, output_size)
    assert qo.shape == (B, max_len, output_size)
    assert co.shape == (B, max_len_c, output_size)
    assert all(bool(jnp.all(jnp.isfinite(x))) for x in (vo, qo, co))
    print("KERNEL_OK")
</pallas_src>

<mosaic_0001>
module attributes {stable_mosaic.version = 11 : i64} {
  func.func @_spatial_mlp_kernel(%arg0: i32, %arg1: memref<18x8x17xf32, #tpu.memory_space<vmem>>, %arg2: memref<17x512xbf16, #tpu.memory_space<vmem>>, %arg3: memref<1x512xf32, #tpu.memory_space<vmem>>, %arg4: memref<1x1x512xf32, #tpu.memory_space<vmem>>, %arg5: memref<1x1xf32, #tpu.memory_space<vmem>>, %arg6: memref<18x8xf32, #tpu.memory_space<vmem>>) attributes {dimension_semantics = [#tpu.dimension_semantics<parallel>], iteration_bounds = array<i64: 1>, scalar_prefetch = 0 : i64, scratch_operands = 0 : i64, tpu.core_type = #tpu.core_type<tc>, window_params = [{transform_indices = @transform_0, window_bounds = array<i64: 18, 8, 17>}, {pipeline_mode = #tpu.pipeline_mode<synchronous>, transform_indices = @transform_1, window_bounds = array<i64: 17, 512>}, {pipeline_mode = #tpu.pipeline_mode<synchronous>, transform_indices = @transform_2, window_bounds = array<i64: 1, 512>}, {pipeline_mode = #tpu.pipeline_mode<synchronous>, transform_indices = @transform_3, window_bounds = array<i64: 1, 1, 512>}, {pipeline_mode = #tpu.pipeline_mode<synchronous>, transform_indices = @transform_4, window_bounds = array<i64: 1, 1>}, {transform_indices = @transform_5, window_bounds = array<i64: 18, 8>}]} {
    %c0 = arith.constant 0 : index
    %c0_0 = arith.constant 0 : index
    %c0_1 = arith.constant 0 : index
    %0 = vector.load %arg1[%c0, %c0_0, %c0_1] : memref<18x8x17xf32, #tpu.memory_space<vmem>>, vector<18x8x17xf32>
    %1 = vector.shape_cast %0 : vector<18x8x17xf32> to vector<144x17xf32>
    %2 = arith.truncf %1 : vector<144x17xf32> to vector<144x17xbf16>
    %c0_2 = arith.constant 0 : index
    %c0_3 = arith.constant 0 : index
    %3 = vector.load %arg2[%c0_2, %c0_3] : memref<17x512xbf16, #tpu.memory_space<vmem>>, vector<17x512xbf16>
    %cst = arith.constant dense<0.000000e+00> : vector<144x512xf32>
    %4 = tpu.matmul %2, %3, %cst {dimension_numbers = #tpu.dot_dimension_numbers<[1], [0], [0], [1], [0, 0, 1, 1], [], []>} : vector<144x17xbf16>, vector<17x512xbf16>, vector<144x512xf32> -> vector<144x512xf32>
    %c0_4 = arith.constant 0 : index
    %c0_5 = arith.constant 0 : index
    %5 = vector.load %arg3[%c0_4, %c0_5] : memref<1x512xf32, #tpu.memory_space<vmem>>, vector<1x512xf32>
    %6 = vector.broadcast %5 : vector<1x512xf32> to vector<144x512xf32>
    %7 = arith.addf %4, %6 : vector<144x512xf32>
    %cst_6 = arith.constant 0.000000e+00 : f32
    %8 = vector.broadcast %cst_6 : f32 to vector<144x512xf32>
    %9 = arith.maximumf %7, %8 : vector<144x512xf32>
    %10 = vector.shape_cast %9 : vector<144x512xf32> to vector<18x8x512xf32>
    %c0_7 = arith.constant 0 : index
    %c0_8 = arith.constant 0 : index
    %c0_9 = arith.constant 0 : index
    %11 = vector.load %arg4[%c0_7, %c0_8, %c0_9] : memref<1x1x512xf32, #tpu.memory_space<vmem>>, vector<1x1x512xf32>
    %12 = vector.broadcast %11 : vector<1x1x512xf32> to vector<18x8x512xf32>
    %13 = arith.mulf %10, %12 : vector<18x8x512xf32>
    %cst_10 = arith.constant dense<0.000000e+00> : vector<18x8xf32>
    %14 = vector.multi_reduction <add>, %13, %cst_10 [2] : vector<18x8x512xf32> to vector<18x8xf32>
    %c0_11 = arith.constant 0 : index
    %c0_12 = arith.constant 0 : index
    %15 = vector.load %arg5[%c0_11, %c0_12] : memref<1x1xf32, #tpu.memory_space<vmem>>, vector<1x1xf32>
    %16 = vector.broadcast %15 : vector<1x1xf32> to vector<18x8xf32>
    %17 = arith.addf %14, %16 : vector<18x8xf32>
    %18 = arith.negf %17 : vector<18x8xf32>
    %19 = math.exp %18 : vector<18x8xf32>
    %cst_13 = arith.constant 1.000000e+00 : f32
    %20 = vector.broadcast %cst_13 : f32 to vector<18x8xf32>
    %21 = arith.addf %20, %19 : vector<18x8xf32>
    %22 = arith.divf %20, %21 : vector<18x8xf32>
    %cst_14 = arith.constant 1.000000e+00 : f32
    %23 = vector.broadcast %cst_14 : f32 to vector<18x8xf32>
    %24 = arith.addf %22, %23 : vector<18x8xf32>
    %c0_15 = arith.constant 0 : index
    %c0_16 = arith.constant 0 : index
    %25 = vector.load %arg6[%c0_15, %c0_16] : memref<18x8xf32, #tpu.memory_space<vmem>>, vector<18x8xf32>
    tpu.vector_store %arg6[%c0_15, %c0_16], %24 {strides = array<i32>} : memref<18x8xf32, #tpu.memory_space<vmem>>, vector<18x8xf32>,
    return
  }
  func.func @transform_0(%arg0: i32) -> (i32, i32, i32) {
    %c0_i32 = arith.constant 0 : i32
    %c0_i32_0 = arith.constant 0 : i32
    %c0_i32_1 = arith.constant 0 : i32
    return %arg0, %c0_i32, %c0_i32_0 : i32, i32, i32
  }
  func.func @transform_1(%arg0: i32) -> (i32, i32) {
    %c0_i32 = arith.constant 0 : i32
    %c0_i32_0 = arith.constant 0 : i32
    %c0_i32_1 = arith.constant 0 : i32
    return %c0_i32, %c0_i32_0 : i32, i32
  }
  func.func @transform_2(%arg0: i32) -> (i32, i32) {
    %c0_i32 = arith.constant 0 : i32
    %c0_i32_0 = arith.constant 0 : i32
    %c0_i32_1 = arith.constant 0 : i32
    return %c0_i32, %c0_i32_0 : i32, i32
  }
  func.func @transform_3(%arg0: i32) -> (i32, i32, i32) {
    %c0_i32 = arith.constant 0 : i32
    %c0_i32_0 = arith.constant 0 : i32
    %c0_i32_1 = arith.constant 0 : i32
    %c0_i32_2 = arith.constant 0 : i32
    return %c0_i32, %c0_i32_0, %c0_i32_1 : i32, i32, i32
  }
  func.func @transform_4(%arg0: i32) -> (i32, i32) {
    %c0_i32 = arith.constant 0 : i32
    %c0_i32_0 = arith.constant 0 : i32
    %c0_i32_1 = arith.constant 0 : i32
    return %c0_i32, %c0_i32_0 : i32, i32
  }
  func.func @transform_5(%arg0: i32) -> (i32, i32) {
    %c0_i32 = arith.constant 0 : i32
    %c0_i32_0 = arith.constant 0 : i32
    return %arg0, %c0_i32 : i32, i32
  }
}

module attributes {stable_mosaic.version = 11 : i64} {
  func.func @_linear_kernel(%arg0: i32, %arg1: memref<16x32xf32, #tpu.memory_space<vmem>>, %arg2: memref<32x16xbf16, #tpu.memory_space<vmem>>, %arg3: memref<1x16xf32, #tpu.memory_space<vmem>>, %arg4: memref<16x16xf32, #tpu.memory_space<vmem>>) attributes {dimension_semantics = [#tpu.dimension_semantics<parallel>], iteration_bounds = array<i64: 1>, scalar_prefetch = 0 : i64, scratch_operands = 0 : i64, tpu.core_type = #tpu.core_type<tc>, window_params = [{transform_indices = @transform_0, window_bounds = array<i64: 16, 32>}, {pipeline_mode = #tpu.pipeline_mode<synchronous>, transform_indices = @transform_1, window_bounds = array<i64: 32, 16>}, {pipeline_mode = #tpu.pipeline_mode<synchronous>, transform_indices = @transform_2, window_bounds = array<i64: 1, 16>}, {transform_indices = @transform_3, window_bounds = array<i64: 16, 16>}]} {
    %c0 = arith.constant 0 : index
    %c0_0 = arith.constant 0 : index
    %0 = vector.load %arg1[%c0, %c0_0] : memref<16x32xf32, #tpu.memory_space<vmem>>, vector<16x32xf32>
    %1 = arith.truncf %0 : vector<16x32xf32> to vector<16x32xbf16>
    %c0_1 = arith.constant 0 : index
    %c0_2 = arith.constant 0 : index
    %2 = vector.load %arg2[%c0_1, %c0_2] : memref<32x16xbf16, #tpu.memory_space<vmem>>, vector<32x16xbf16>
    %cst = arith.constant dense<0.000000e+00> : vector<16x16xf32>
    %3 = tpu.matmul %1, %2, %cst {dimension_numbers = #tpu.dot_dimension_numbers<[1], [0], [0], [1], [0, 0, 1, 1], [], []>} : vector<16x32xbf16>, vector<32x16xbf16>, vector<16x16xf32> -> vector<16x16xf32>
    %c0_3 = arith.constant 0 : index
    %c0_4 = arith.constant 0 : index
    %4 = vector.load %arg3[%c0_3, %c0_4] : memref<1x16xf32, #tpu.memory_space<vmem>>, vector<1x16xf32>
    %5 = vector.broadcast %4 : vector<1x16xf32> to vector<16x16xf32>
    %6 = arith.addf %3, %5 : vector<16x16xf32>
    %c0_5 = arith.constant 0 : index
    %c0_6 = arith.constant 0 : index
    %7 = vector.load %arg4[%c0_5, %c0_6] : memref<16x16xf32, #tpu.memory_space<vmem>>, vector<16x16xf32>
    tpu.vector_store %arg4[%c0_5, %c0_6], %6 {strides = array<i32>} : memref<16x16xf32, #tpu.memory_space<vmem>>, vector<16x16xf32>,
    return
  }
  func.func @transform_0(%arg0: i32) -> (i32, i32) {
    %c0_i32 = arith.constant 0 : i32
    %c0_i32_0 = arith.constant 0 : i32
    return %arg0, %c0_i32 : i32, i32
  }
  func.func @transform_1(%arg0: i32) -> (i32, i32) {
    %c0_i32 = arith.constant 0 : i32
    %c0_i32_0 = arith.constant 0 : i32
    %c0_i32_1 = arith.constant 0 : i32
    return %c0_i32, %c0_i32_0 : i32, i32
  }
  func.func @transform_2(%arg0: i32) -> (i32, i32) {
    %c0_i32 = arith.constant 0 : i32
    %c0_i32_0 = arith.constant 0 : i32
    %c0_i32_1 = arith.constant 0 : i32
    return %c0_i32, %c0_i32_0 : i32, i32
  }
  func.func @transform_3(%arg0: i32) -> (i32, i32) {
    %c0_i32 = arith.constant 0 : i32
    %c0_i32_0 = arith.constant 0 : i32
    return %arg0, %c0_i32 : i32, i32
  }
}

module attributes {stable_mosaic.version = 11 : i64} {
  func.func @_linear_kernel(%arg0: i32, %arg1: memref<16x16xf32, #tpu.memory_space<vmem>>, %arg2: memref<16x48xbf16, #tpu.memory_space<vmem>>, %arg3: memref<1x48xf32, #tpu.memory_space<vmem>>, %arg4: memref<16x1xf32, #tpu.memory_space<vmem>>, %arg5: memref<16x48xf32, #tpu.memory_space<vmem>>) attributes {dimension_semantics = [#tpu.dimension_semantics<parallel>], iteration_bounds = array<i64: 1>, scalar_prefetch = 0 : i64, scratch_operands = 0 : i64, tpu.core_type = #tpu.core_type<tc>, window_params = [{transform_indices = @transform_0, window_bounds = array<i64: 16, 16>}, {pipeline_mode = #tpu.pipeline_mode<synchronous>, transform_indices = @transform_1, window_bounds = array<i64: 16, 48>}, {pipeline_mode = #tpu.pipeline_mode<synchronous>, transform_indices = @transform_2, window_bounds = array<i64: 1, 48>}, {transform_indices = @transform_3, window_bounds = array<i64: 16, 1>}, {transform_indices = @transform_4, window_bounds = array<i64: 16, 48>}]} {
    %c0 = arith.constant 0 : index
    %c0_0 = arith.constant 0 : index
    %0 = vector.load %arg1[%c0, %c0_0] : memref<16x16xf32, #tpu.memory_space<vmem>>, vector<16x16xf32>
    %cst = arith.constant 0.000000e+00 : f32
    %1 = vector.broadcast %cst : f32 to vector<16x16xf32>
    %2 = arith.maximumf %0, %1 : vector<16x16xf32>
    %3 = arith.truncf %2 : vector<16x16xf32> to vector<16x16xbf16>
    %c0_1 = arith.constant 0 : index
    %c0_2 = arith.constant 0 : index
    %4 = vector.load %arg2[%c0_1, %c0_2] : memref<16x48xbf16, #tpu.memory_space<vmem>>, vector<16x48xbf16>
    %cst_3 = arith.constant dense<0.000000e+00> : vector<16x48xf32>
    %5 = tpu.matmul %3, %4, %cst_3 {dimension_numbers = #tpu.dot_dimension_numbers<[1], [0], [0], [1], [0, 0, 1, 1], [], []>} : vector<16x16xbf16>, vector<16x48xbf16>, vector<16x48xf32> -> vector<16x48xf32>
    %c0_4 = arith.constant 0 : index
    %c0_5 = arith.constant 0 : index
    %6 = vector.load %arg3[%c0_4, %c0_5] : memref<1x48xf32, #tpu.memory_space<vmem>>, vector<1x48xf32>
    %7 = vector.broadcast %6 : vector<1x48xf32> to vector<16x48xf32>
    %8 = arith.addf %5, %7 : vector<16x48xf32>
    %c0_6 = arith.constant 0 : index
    %c0_7 = arith.constant 0 : index
    %9 = vector.load %arg4[%c0_6, %c0_7] : memref<16x1xf32, #tpu.memory_space<vmem>>, vector<16x1xf32>
    %10 = vector.broadcast %9 : vector<16x1xf32> to vector<16x48xf32>
    %11 = arith.mulf %8, %10 : vector<16x48xf32>
    %c0_8 = arith.constant 0 : index
    %c0_9 = arith.constant 0 : index
    %12 = vector.load %arg5[%c0_8, %c0_9] : memref<16x48xf32, #tpu.memory_space<vmem>>, vector<16x48xf32>
    tpu.vector_store %arg5[%c0_8, %c0_9], %11 {strides = array<i32>} : memref<16x48xf32, #tpu.memory_space<vmem>>, vector<16x48xf32>,
    return
  }
  func.func @transform_0(%arg0: i32) -> (i32, i32) {
    %c0_i32 = arith.constant 0 : i32
    %c0_i32_0 = arith.constant 0 : i32
    return %arg0, %c0_i32 : i32, i32
  }
  func.func @transform_1(%arg0: i32) -> (i32, i32) {
    %c0_i32 = arith.constant 0 : i32
    %c0_i32_0 = arith.constant 0 : i32
    %c0_i32_1 = arith.constant 0 : i32
    return %c0_i32, %c0_i32_0 : i32, i32
  }
  func.func @transform_2(%arg0: i32) -> (i32, i32) {
    %c0_i32 = arith.constant 0 : i32
    %c0_i32_0 = arith.constant 0 : i32
    %c0_i32_1 = arith.constant 0 : i32
    return %c0_i32, %c0_i32_0 : i32, i32
  }
  func.func @transform_3(%arg0: i32) -> (i32, i32) {
    %c0_i32 = arith.constant 0 : i32
    %c0_i32_0 = arith.constant 0 : i32
    return %arg0, %c0_i32 : i32, i32
  }
  func.func @transform_4(%arg0: i32) -> (i32, i32) {
    %c0_i32 = arith.constant 0 : i32
    %c0_i32_0 = arith.constant 0 : i32
    return %arg0, %c0_i32 : i32, i32
  }
}

module attributes {stable_mosaic.version = 11 : i64} {
  func.func @_linear_kernel(%arg0: i32, %arg1: memref<12x32xf32, #tpu.memory_space<vmem>>, %arg2: memref<32x16xbf16, #tpu.memory_space<vmem>>, %arg3: memref<1x16xf32, #tpu.memory_space<vmem>>, %arg4: memref<12x16xf32, #tpu.memory_space<vmem>>) attributes {dimension_semantics = [#tpu.dimension_semantics<parallel>], iteration_bounds = array<i64: 1>, scalar_prefetch = 0 : i64, scratch_operands = 0 : i64, tpu.core_type = #tpu.core_type<tc>, window_params = [{transform_indices = @transform_0, window_bounds = array<i64: 12, 32>}, {pipeline_mode = #tpu.pipeline_mode<synchronous>, transform_indices = @transform_1, window_bounds = array<i64: 32, 16>}, {pipeline_mode = #tpu.pipeline_mode<synchronous>, transform_indices = @transform_2, window_bounds = array<i64: 1, 16>}, {transform_indices = @transform_3, window_bounds = array<i64: 12, 16>}]} {
    %c0 = arith.constant 0 : index
    %c0_0 = arith.constant 0 : index
    %0 = vector.load %arg1[%c0, %c0_0] : memref<12x32xf32, #tpu.memory_space<vmem>>, vector<12x32xf32>
    %1 = arith.truncf %0 : vector<12x32xf32> to vector<12x32xbf16>
    %c0_1 = arith.constant 0 : index
    %c0_2 = arith.constant 0 : index
    %2 = vector.load %arg2[%c0_1, %c0_2] : memref<32x16xbf16, #tpu.memory_space<vmem>>, vector<32x16xbf16>
    %cst = arith.constant dense<0.000000e+00> : vector<12x16xf32>
    %3 = tpu.matmul %1, %2, %cst {dimension_numbers = #tpu.dot_dimension_numbers<[1], [0], [0], [1], [0, 0, 1, 1], [], []>} : vector<12x32xbf16>, vector<32x16xbf16>, vector<12x16xf32> -> vector<12x16xf32>
    %c0_3 = arith.constant 0 : index
    %c0_4 = arith.constant 0 : index
    %4 = vector.load %arg3[%c0_3, %c0_4] : memref<1x16xf32, #tpu.memory_space<vmem>>, vector<1x16xf32>
    %5 = vector.broadcast %4 : vector<1x16xf32> to vector<12x16xf32>
    %6 = arith.addf %3, %5 : vector<12x16xf32>
    %c0_5 = arith.constant 0 : index
    %c0_6 = arith.constant 0 : index
    %7 = vector.load %arg4[%c0_5, %c0_6] : memref<12x16xf32, #tpu.memory_space<vmem>>, vector<12x16xf32>
    tpu.vector_store %arg4[%c0_5, %c0_6], %6 {strides = array<i32>} : memref<12x16xf32, #tpu.memory_space<vmem>>, vector<12x16xf32>,
    return
  }
  func.func @transform_0(%arg0: i32) -> (i32, i32) {
    %c0_i32 = arith.constant 0 : i32
    %c0_i32_0 = arith.constant 0 : i32
    return %arg0, %c0_i32 : i32, i32
  }
  func.func @transform_1(%arg0: i32) -> (i32, i32) {
    %c0_i32 = arith.constant 0 : i32
    %c0_i32_0 = arith.constant 0 : i32
    %c0_i32_1 = arith.constant 0 : i32
    return %c0_i32, %c0_i32_0 : i32, i32
  }
  func.func @transform_2(%arg0: i32) -> (i32, i32) {
    %c0_i32 = arith.constant 0 : i32
    %c0_i32_0 = arith.constant 0 : i32
    %c0_i32_1 = arith.constant 0 : i32
    return %c0_i32, %c0_i32_0 : i32, i32
  }
  func.func @transform_3(%arg0: i32) -> (i32, i32) {
    %c0_i32 = arith.constant 0 : i32
    %c0_i32_0 = arith.constant 0 : i32
    return %arg0, %c0_i32 : i32, i32
  }
}

module attributes {stable_mosaic.version = 11 : i64} {
  func.func @_linear_kernel(%arg0: i32, %arg1: memref<12x16xf32, #tpu.memory_space<vmem>>, %arg2: memref<16x48xbf16, #tpu.memory_space<vmem>>, %arg3: memref<1x48xf32, #tpu.memory_space<vmem>>, %arg4: memref<12x1xf32, #tpu.memory_space<vmem>>, %arg5: memref<12x48xf32, #tpu.memory_space<vmem>>) attributes {dimension_semantics = [#tpu.dimension_semantics<parallel>], iteration_bounds = array<i64: 1>, scalar_prefetch = 0 : i64, scratch_operands = 0 : i64, tpu.core_type = #tpu.core_type<tc>, window_params = [{transform_indices = @transform_0, window_bounds = array<i64: 12, 16>}, {pipeline_mode = #tpu.pipeline_mode<synchronous>, transform_indices = @transform_1, window_bounds = array<i64: 16, 48>}, {pipeline_mode = #tpu.pipeline_mode<synchronous>, transform_indices = @transform_2, window_bounds = array<i64: 1, 48>}, {transform_indices = @transform_3, window_bounds = array<i64: 12, 1>}, {transform_indices = @transform_4, window_bounds = array<i64: 12, 48>}]} {
    %c0 = arith.constant 0 : index
    %c0_0 = arith.constant 0 : index
    %0 = vector.load %arg1[%c0, %c0_0] : memref<12x16xf32, #tpu.memory_space<vmem>>, vector<12x16xf32>
    %cst = arith.constant 0.000000e+00 : f32
    %1 = vector.broadcast %cst : f32 to vector<12x16xf32>
    %2 = arith.maximumf %0, %1 : vector<12x16xf32>
    %3 = arith.truncf %2 : vector<12x16xf32> to vector<12x16xbf16>
    %c0_1 = arith.constant 0 : index
    %c0_2 = arith.constant 0 : index
    %4 = vector.load %arg2[%c0_1, %c0_2] : memref<16x48xbf16, #tpu.memory_space<vmem>>, vector<16x48xbf16>
    %cst_3 = arith.constant dense<0.000000e+00> : vector<12x48xf32>
    %5 = tpu.matmul %3, %4, %cst_3 {dimension_numbers = #tpu.dot_dimension_numbers<[1], [0], [0], [1], [0, 0, 1, 1], [], []>} : vector<12x16xbf16>, vector<16x48xbf16>, vector<12x48xf32> -> vector<12x48xf32>
    %c0_4 = arith.constant 0 : index
    %c0_5 = arith.constant 0 : index
    %6 = vector.load %arg3[%c0_4, %c0_5] : memref<1x48xf32, #tpu.memory_space<vmem>>, vector<1x48xf32>
    %7 = vector.broadcast %6 : vector<1x48xf32> to vector<12x48xf32>
    %8 = arith.addf %5, %7 : vector<12x48xf32>
    %c0_6 = arith.constant 0 : index
    %c0_7 = arith.constant 0 : index
    %9 = vector.load %arg4[%c0_6, %c0_7] : memref<12x1xf32, #tpu.memory_space<vmem>>, vector<12x1xf32>
    %10 = vector.broadcast %9 : vector<12x1xf32> to vector<12x48xf32>
    %11 = arith.mulf %8, %10 : vector<12x48xf32>
    %c0_8 = arith.constant 0 : index
    %c0_9 = arith.constant 0 : index
    %12 = vector.load %arg5[%c0_8, %c0_9] : memref<12x48xf32, #tpu.memory_space<vmem>>, vector<12x48xf32>
    tpu.vector_store %arg5[%c0_8, %c0_9], %11 {strides = array<i32>} : memref<12x48xf32, #tpu.memory_space<vmem>>, vector<12x48xf32>,
    return
  }
  func.func @transform_0(%arg0: i32) -> (i32, i32) {
    %c0_i32 = arith.constant 0 : i32
    %c0_i32_0 = arith.constant 0 : i32
    return %arg0, %c0_i32 : i32, i32
  }
  func.func @transform_1(%arg0: i32) -> (i32, i32) {
    %c0_i32 = arith.constant 0 : i32
    %c0_i32_0 = arith.constant 0 : i32
    %c0_i32_1 = arith.constant 0 : i32
    return %c0_i32, %c0_i32_0 : i32, i32
  }
  func.func @transform_2(%arg0: i32) -> (i32, i32) {
    %c0_i32 = arith.constant 0 : i32
    %c0_i32_0 = arith.constant 0 : i32
    %c0_i32_1 = arith.constant 0 : i32
    return %c0_i32, %c0_i32_0 : i32, i32
  }
  func.func @transform_3(%arg0: i32) -> (i32, i32) {
    %c0_i32 = arith.constant 0 : i32
    %c0_i32_0 = arith.constant 0 : i32
    return %arg0, %c0_i32 : i32, i32
  }
  func.func @transform_4(%arg0: i32) -> (i32, i32) {
    %c0_i32 = arith.constant 0 : i32
    %c0_i32_0 = arith.constant 0 : i32
    return %arg0, %c0_i32 : i32, i32
  }
}

module attributes {stable_mosaic.version = 11 : i64} {
  func.func @_linear_kernel(%arg0: i32, %arg1: memref<14x16xf32, #tpu.memory_space<vmem>>, %arg2: memref<16x48xbf16, #tpu.memory_space<vmem>>, %arg3: memref<1x48xf32, #tpu.memory_space<vmem>>, %arg4: memref<14x1xf32, #tpu.memory_space<vmem>>, %arg5: memref<14x48xf32, #tpu.memory_space<vmem>>) attributes {dimension_semantics = [#tpu.dimension_semantics<parallel>], iteration_bounds = array<i64: 1>, scalar_prefetch = 0 : i64, scratch_operands = 0 : i64, tpu.core_type = #tpu.core_type<tc>, window_params = [{transform_indices = @transform_0, window_bounds = array<i64: 14, 16>}, {pipeline_mode = #tpu.pipeline_mode<synchronous>, transform_indices = @transform_1, window_bounds = array<i64: 16, 48>}, {pipeline_mode = #tpu.pipeline_mode<synchronous>, transform_indices = @transform_2, window_bounds = array<i64: 1, 48>}, {transform_indices = @transform_3, window_bounds = array<i64: 14, 1>}, {transform_indices = @transform_4, window_bounds = array<i64: 14, 48>}]} {
    %c0 = arith.constant 0 : index
    %c0_0 = arith.constant 0 : index
    %0 = vector.load %arg1[%c0, %c0_0] : memref<14x16xf32, #tpu.memory_space<vmem>>, vector<14x16xf32>
    %cst = arith.constant 0.000000e+00 : f32
    %1 = vector.broadcast %cst : f32 to vector<14x16xf32>
    %2 = arith.maximumf %0, %1 : vector<14x16xf32>
    %3 = arith.truncf %2 : vector<14x16xf32> to vector<14x16xbf16>
    %c0_1 = arith.constant 0 : index
    %c0_2 = arith.constant 0 : index
    %4 = vector.load %arg2[%c0_1, %c0_2] : memref<16x48xbf16, #tpu.memory_space<vmem>>, vector<16x48xbf16>
    %cst_3 = arith.constant dense<0.000000e+00> : vector<14x48xf32>
    %5 = tpu.matmul %3, %4, %cst_3 {dimension_numbers = #tpu.dot_dimension_numbers<[1], [0], [0], [1], [0, 0, 1, 1], [], []>} : vector<14x16xbf16>, vector<16x48xbf16>, vector<14x48xf32> -> vector<14x48xf32>
    %c0_4 = arith.constant 0 : index
    %c0_5 = arith.constant 0 : index
    %6 = vector.load %arg3[%c0_4, %c0_5] : memref<1x48xf32, #tpu.memory_space<vmem>>, vector<1x48xf32>
    %7 = vector.broadcast %6 : vector<1x48xf32> to vector<14x48xf32>
    %8 = arith.addf %5, %7 : vector<14x48xf32>
    %c0_6 = arith.constant 0 : index
    %c0_7 = arith.constant 0 : index
    %9 = vector.load %arg4[%c0_6, %c0_7] : memref<14x1xf32, #tpu.memory_space<vmem>>, vector<14x1xf32>
    %10 = vector.broadcast %9 : vector<14x1xf32> to vector<14x48xf32>
    %11 = arith.mulf %8, %10 : vector<14x48xf32>
    %c0_8 = arith.constant 0 : index
    %c0_9 = arith.constant 0 : index
    %12 = vector.load %arg5[%c0_8, %c0_9] : memref<14x48xf32, #tpu.memory_space<vmem>>, vector<14x48xf32>
    tpu.vector_store %arg5[%c0_8, %c0_9], %11 {strides = array<i32>} : memref<14x48xf32, #tpu.memory_space<vmem>>, vector<14x48xf32>,
    return
  }
  func.func @transform_0(%arg0: i32) -> (i32, i32) {
    %c0_i32 = arith.constant 0 : i32
    %c0_i32_0 = arith.constant 0 : i32
    return %arg0, %c0_i32 : i32, i32
  }
  func.func @transform_1(%arg0: i32) -> (i32, i32) {
    %c0_i32 = arith.constant 0 : i32
    %c0_i32_0 = arith.constant 0 : i32
    %c0_i32_1 = arith.constant 0 : i32
    return %c0_i32, %c0_i32_0 : i32, i32
  }
  func.func @transform_2(%arg0: i32) -> (i32, i32) {
    %c0_i32 = arith.constant 0 : i32
    %c0_i32_0 = arith.constant 0 : i32
    %c0_i32_1 = arith.constant 0 : i32
    return %c0_i32, %c0_i32_0 : i32, i32
  }
  func.func @transform_3(%arg0: i32) -> (i32, i32) {
    %c0_i32 = arith.constant 0 : i32
    %c0_i32_0 = arith.constant 0 : i32
    return %arg0, %c0_i32 : i32, i32
  }
  func.func @transform_4(%arg0: i32) -> (i32, i32) {
    %c0_i32 = arith.constant 0 : i32
    %c0_i32_0 = arith.constant 0 : i32
    return %arg0, %c0_i32 : i32, i32
  }
}

module attributes {stable_mosaic.version = 11 : i64} {
  func.func @_linear_kernel(%arg0: i32, %arg1: memref<14x32xf32, #tpu.memory_space<vmem>>, %arg2: memref<32x16xbf16, #tpu.memory_space<vmem>>, %arg3: memref<1x16xf32, #tpu.memory_space<vmem>>, %arg4: memref<14x16xf32, #tpu.memory_space<vmem>>) attributes {dimension_semantics = [#tpu.dimension_semantics<parallel>], iteration_bounds = array<i64: 1>, scalar_prefetch = 0 : i64, scratch_operands = 0 : i64, tpu.core_type = #tpu.core_type<tc>, window_params = [{transform_indices = @transform_0, window_bounds = array<i64: 14, 32>}, {pipeline_mode = #tpu.pipeline_mode<synchronous>, transform_indices = @transform_1, window_bounds = array<i64: 32, 16>}, {pipeline_mode = #tpu.pipeline_mode<synchronous>, transform_indices = @transform_2, window_bounds = array<i64: 1, 16>}, {transform_indices = @transform_3, window_bounds = array<i64: 14, 16>}]} {
    %c0 = arith.constant 0 : index
    %c0_0 = arith.constant 0 : index
    %0 = vector.load %arg1[%c0, %c0_0] : memref<14x32xf32, #tpu.memory_space<vmem>>, vector<14x32xf32>
    %1 = arith.truncf %0 : vector<14x32xf32> to vector<14x32xbf16>
    %c0_1 = arith.constant 0 : index
    %c0_2 = arith.constant 0 : index
    %2 = vector.load %arg2[%c0_1, %c0_2] : memref<32x16xbf16, #tpu.memory_space<vmem>>, vector<32x16xbf16>
    %cst = arith.constant dense<0.000000e+00> : vector<14x16xf32>
    %3 = tpu.matmul %1, %2, %cst {dimension_numbers = #tpu.dot_dimension_numbers<[1], [0], [0], [1], [0, 0, 1, 1], [], []>} : vector<14x32xbf16>, vector<32x16xbf16>, vector<14x16xf32> -> vector<14x16xf32>
    %c0_3 = arith.constant 0 : index
    %c0_4 = arith.constant 0 : index
    %4 = vector.load %arg3[%c0_3, %c0_4] : memref<1x16xf32, #tpu.memory_space<vmem>>, vector<1x16xf32>
    %5 = vector.broadcast %4 : vector<1x16xf32> to vector<14x16xf32>
    %6 = arith.addf %3, %5 : vector<14x16xf32>
    %c0_5 = arith.constant 0 : index
    %c0_6 = arith.constant 0 : index
    %7 = vector.load %arg4[%c0_5, %c0_6] : memref<14x16xf32, #tpu.memory_space<vmem>>, vector<14x16xf32>
    tpu.vector_store %arg4[%c0_5, %c0_6], %6 {strides = array<i32>} : memref<14x16xf32, #tpu.memory_space<vmem>>, vector<14x16xf32>,
    return
  }
  func.func @transform_0(%arg0: i32) -> (i32, i32) {
    %c0_i32 = arith.constant 0 : i32
    %c0_i32_0 = arith.constant 0 : i32
    return %arg0, %c0_i32 : i32, i32
  }
  func.func @transform_1(%arg0: i32) -> (i32, i32) {
    %c0_i32 = arith.constant 0 : i32
    %c0_i32_0 = arith.constant 0 : i32
    %c0_i32_1 = arith.constant 0 : i32
    return %c0_i32, %c0_i32_0 : i32, i32
  }
  func.func @transform_2(%arg0: i32) -> (i32, i32) {
    %c0_i32 = arith.constant 0 : i32
    %c0_i32_0 = arith.constant 0 : i32
    %c0_i32_1 = arith.constant 0 : i32
    return %c0_i32, %c0_i32_0 : i32, i32
  }
  func.func @transform_3(%arg0: i32) -> (i32, i32) {
    %c0_i32 = arith.constant 0 : i32
    %c0_i32_0 = arith.constant 0 : i32
    return %arg0, %c0_i32 : i32, i32
  }
}

module attributes {stable_mosaic.version = 11 : i64} {
  func.func @_inter_attn_kernel(%arg0: i32, %arg1: memref<1x2x8x8xf32, #tpu.memory_space<vmem>>, %arg2: memref<1x2x6x8xf32, #tpu.memory_space<vmem>>, %arg3: memref<1x2x7x8xf32, #tpu.memory_space<vmem>>, %arg4: memref<1x2x9x8xf32, #tpu.memory_space<vmem>>, %arg5: memref<1x2x6x8xf32, #tpu.memory_space<vmem>>, %arg6: memref<1x2x8x8xf32, #tpu.memory_space<vmem>>, %arg7: memref<1x2x9x8xf32, #tpu.memory_space<vmem>>, %arg8: memref<1x2x6x8xf32, #tpu.memory_space<vmem>>, %arg9: memref<1x2x8x8xf32, #tpu.memory_space<vmem>>, %arg10: memref<1x1x6xf32, #tpu.memory_space<vmem>>, %arg11: memref<1x1x9xf32, #tpu.memory_space<vmem>>, %arg12: memref<1x1x8xf32, #tpu.memory_space<vmem>>, %arg13: memref<1x8x8xf32, #tpu.memory_space<vmem>>, %arg14: memref<1x7x9xf32, #tpu.memory_space<vmem>>, %arg15: memref<1x2x8x8xf32, #tpu.memory_space<vmem>>, %arg16: memref<1x2x6x8xf32, #tpu.memory_space<vmem>>, %arg17: memref<1x2x6x8xf32, #tpu.memory_space<vmem>>, %arg18: memref<1x2x7x8xf32, #tpu.memory_space<vmem>>, %arg19: memref<1x2x8x8xf32, #tpu.memory_space<vmem>>, %arg20: memref<1x2x7x8xf32, #tpu.memory_space<vmem>>) attributes {dimension_semantics = [#tpu.dimension_semantics<parallel>], iteration_bounds = array<i64: 2>, scalar_prefetch = 0 : i64, scratch_operands = 0 : i64, tpu.core_type = #tpu.core_type<tc>, window_params = [{transform_indices = @transform_0, window_bounds = array<i64: 1, 2, 8, 8>}, {transform_indices = @transform_1, window_bounds = array<i64: 1, 2, 6, 8>}, {transform_indices = @transform_2, window_bounds = array<i64: 1, 2, 7, 8>}, {transform_indices = @transform_3, window_bounds = array<i64: 1, 2, 9, 8>}, {transform_indices = @transform_4, window_bounds = array<i64: 1, 2, 6, 8>}, {transform_indices = @transform_5, window_bounds = array<i64: 1, 2, 8, 8>}, {transform_indices = @transform_6, window_bounds = array<i64: 1, 2, 9, 8>}, {transform_indices = @transform_7, window_bounds = array<i64: 1, 2, 6, 8>}, {transform_indices = @transform_8, window_bounds = array<i64: 1, 2, 8, 8>}, {transform_indices = @transform_9, window_bounds = array<i64: 1, 1, 6>}, {transform_indices = @transform_10, window_bounds = array<i64: 1, 1, 9>}, {transform_indices = @transform_11, window_bounds = array<i64: 1, 1, 8>}, {transform_indices = @transform_12, window_bounds = array<i64: 1, 8, 8>}, {transform_indices = @transform_13, window_bounds = array<i64: 1, 7, 9>}, {transform_indices = @transform_14, window_bounds = array<i64: 1, 2, 8, 8>}, {transform_indices = @transform_15, window_bounds = array<i64: 1, 2, 6, 8>}, {transform_indices = @transform_16, window_bounds = array<i64: 1, 2, 6, 8>}, {transform_indices = @transform_17, window_bounds = array<i64: 1, 2, 7, 8>}, {transform_indices = @transform_18, window_bounds = array<i64: 1, 2, 8, 8>}, {transform_indices = @transform_19, window_bounds = array<i64: 1, 2, 7, 8>}]} {
    %c0 = arith.constant 0 : index
    %c0_0 = arith.constant 0 : index
    %c0_1 = arith.constant 0 : index
    %c0_2 = arith.constant 0 : index
    %0 = vector.load %arg1[%c0, %c0_0, %c0_1, %c0_2] : memref<1x2x8x8xf32, #tpu.memory_space<vmem>>, vector<1x2x8x8xf32>
    %1 = vector.shape_cast %0 : vector<1x2x8x8xf32> to vector<2x8x8xf32>
    %c0_3 = arith.constant 0 : index
    %c0_4 = arith.constant 0 : index
    %c0_5 = arith.constant 0 : index
    %c0_6 = arith.constant 0 : index
    %2 = vector.load %arg5[%c0_3, %c0_4, %c0_5, %c0_6] : memref<1x2x6x8xf32, #tpu.memory_space<vmem>>, vector<1x2x6x8xf32>
    %3 = vector.shape_cast %2 : vector<1x2x6x8xf32> to vector<2x6x8xf32>
    %c0_7 = arith.constant 0 : index
    %c0_8 = arith.constant 0 : index
    %c0_9 = arith.constant 0 : index
    %c0_10 = arith.constant 0 : index
    %4 = vector.load %arg8[%c0_7, %c0_8, %c0_9, %c0_10] : memref<1x2x6x8xf32, #tpu.memory_space<vmem>>, vector<1x2x6x8xf32>
    %5 = vector.shape_cast %4 : vector<1x2x6x8xf32> to vector<2x6x8xf32>
    %c0_11 = arith.constant 0 : index
    %c0_12 = arith.constant 0 : index
    %c0_13 = arith.constant 0 : index
    %6 = vector.load %arg10[%c0_11, %c0_12, %c0_13] : memref<1x1x6xf32, #tpu.memory_space<vmem>>, vector<1x1x6xf32>
    %7 = vector.shape_cast %6 : vector<1x1x6xf32> to vector<1x6xf32>
    %8 = arith.truncf %1 : vector<2x8x8xf32> to vector<2x8x8xbf16>
    %9 = arith.truncf %3 : vector<2x6x8xf32> to vector<2x6x8xbf16>
    %cst = arith.constant dense<0.000000e+00> : vector<2x8x6xf32>
    %10 = tpu.matmul %8, %9, %cst {dimension_numbers = #tpu.dot_dimension_numbers<[2], [2], [1], [1], [0, 0, 0, 1, 1, 1], [0], [0]>} : vector<2x8x8xbf16>, vector<2x6x8xbf16>, vector<2x8x6xf32> -> vector<2x8x6xf32>
    %11 = vector.shape_cast %7 : vector<1x6xf32> to vector<1x1x6xf32>
    %cst_14 = arith.constant 0.000000e+00 : f32
    %12 = vector.broadcast %cst_14 : f32 to vector<1x1x6xf32>
    %13 = arith.cmpf oeq, %11, %12 : vector<1x1x6xf32>
    %cst_15 = arith.constant -1.000000e+09 : f32
    %14 = vector.shape_cast %13 : vector<1x1x6xi1> to vector<1x1x6xi1>
    %15 = vector.broadcast %14 : vector<1x1x6xi1> to vector<2x8x6xi1>
    %16 = vector.broadcast %cst_15 : f32 to vector<2x8x6xf32>
    %17 = arith.select %15, %16, %10 : vector<2x8x6xi1>, vector<2x8x6xf32>
    %cst_16 = arith.constant 0.353553385 : f32
    %18 = vector.broadcast %cst_16 : f32 to vector<2x8x6xf32>
    %19 = arith.mulf %17, %18 : vector<2x8x6xf32>
    %cst_17 = arith.constant dense<0xFF800000> : vector<2x8xf32>
    %20 = vector.multi_reduction <maximumf>, %19, %cst_17 [2] : vector<2x8x6xf32> to vector<2x8xf32>
    %21 = vector.shape_cast %20 : vector<2x8xf32> to vector<2x8x1xf32>
    %22 = vector.broadcast %21 : vector<2x8x1xf32> to vector<2x8x6xf32>
    %23 = arith.subf %19, %22 : vector<2x8x6xf32>
    %24 = math.exp %23 : vector<2x8x6xf32>
    %cst_18 = arith.constant dense<0.000000e+00> : vector<2x8xf32>
    %25 = vector.multi_reduction <add>, %24, %cst_18 [2] : vector<2x8x6xf32> to vector<2x8xf32>
    %26 = vector.shape_cast %25 : vector<2x8xf32> to vector<2x8x1xf32>
    %27 = tpu.reciprocal %26 {approx = true} : vector<2x8x1xf32> -> vector<2x8x1xf32>
    %28 = vector.broadcast %27 : vector<2x8x1xf32> to vector<2x8x6xf32>
    %29 = arith.mulf %24, %28 : vector<2x8x6xf32>
    %30 = arith.truncf %29 : vector<2x8x6xf32> to vector<2x8x6xbf16>
    %31 = arith.truncf %5 : vector<2x6x8xf32> to vector<2x6x8xbf16>
    %cst_19 = arith.constant dense<0.000000e+00> : vector<2x8x8xf32>
    %32 = tpu.matmul %30, %31, %cst_19 {dimension_numbers = #tpu.dot_dimension_numbers<[2], [1], [1], [2], [0, 0, 0, 1, 1, 2], [0], [0]>} : vector<2x8x6xbf16>, vector<2x6x8xbf16>, vector<2x8x8xf32> -> vector<2x8x8xf32>
    %c0_20 = arith.constant 0 : index
    %c0_21 = arith.constant 0 : index
    %c0_22 = arith.constant 0 : index
    %c0_23 = arith.constant 0 : index
    %33 = vector.load %arg15[%c0_20, %c0_21, %c0_22, %c0_23] : memref<1x2x8x8xf32, #tpu.memory_space<vmem>>, vector<1x2x8x8xf32>
    %34 = vector.shape_cast %33 : vector<1x2x8x8xf32> to vector<2x8x8xf32>
    %35 = vector.shape_cast %32 : vector<2x8x8xf32> to vector<1x2x8x8xf32>
    tpu.vector_store %arg15[%c0_20, %c0_21, %c0_22, %c0_23], %35 {strides = array<i32>} : memref<1x2x8x8xf32, #tpu.memory_space<vmem>>, vector<1x2x8x8xf32>,
    %c0_24 = arith.constant 0 : index
    %c0_25 = arith.constant 0 : index
    %c0_26 = arith.constant 0 : index
    %c0_27 = arith.constant 0 : index
    %36 = vector.load %arg2[%c0_24, %c0_25, %c0_26, %c0_27] : memref<1x2x6x8xf32, #tpu.memory_space<vmem>>, vector<1x2x6x8xf32>
    %37 = vector.shape_cast %36 : vector<1x2x6x8xf32> to vector<2x6x8xf32>
    %c0_28 = arith.constant 0 : index
    %c0_29 = arith.constant 0 : index
    %c0_30 = arith.constant 0 : index
    %c0_31 = arith.constant 0 : index
    %38 = vector.load %arg4[%c0_28, %c0_29, %c0_30, %c0_31] : memref<1x2x9x8xf32, #tpu.memory_space<vmem>>, vector<1x2x9x8xf32>
    %39 = vector.shape_cast %38 : vector<1x2x9x8xf32> to vector<2x9x8xf32>
    %c0_32 = arith.constant 0 : index
    %c0_33 = arith.constant 0 : index
    %c0_34 = arith.constant 0 : index
    %c0_35 = arith.constant 0 : index
    %40 = vector.load %arg7[%c0_32, %c0_33, %c0_34, %c0_35] : memref<1x2x9x8xf32, #tpu.memory_space<vmem>>, vector<1x2x9x8xf32>
    %41 = vector.shape_cast %40 : vector<1x2x9x8xf32> to vector<2x9x8xf32>
    %c0_36 = arith.constant 0 : index
    %c0_37 = arith.constant 0 : index
    %c0_38 = arith.constant 0 : index
    %42 = vector.load %arg11[%c0_36, %c0_37, %c0_38] : memref<1x1x9xf32, #tpu.memory_space<vmem>>, vector<1x1x9xf32>
    %43 = vector.shape_cast %42 : vector<1x1x9xf32> to vector<1x9xf32>
    %44 = arith.truncf %37 : vector<2x6x8xf32> to vector<2x6x8xbf16>
    %45 = arith.truncf %39 : vector<2x9x8xf32> to vector<2x9x8xbf16>
    %cst_39 = arith.constant dense<0.000000e+00> : vector<2x6x9xf32>
    %46 = tpu.matmul %44, %45, %cst_39 {dimension_numbers = #tpu.dot_dimension_numbers<[2], [2], [1], [1], [0, 0, 0, 1, 1, 1], [0], [0]>} : vector<2x6x8xbf16>, vector<2x9x8xbf16>, vector<2x6x9xf32> -> vector<2x6x9xf32>
    %47 = vector.shape_cast %43 : vector<1x9xf32> to vector<1x1x9xf32>
    %cst_40 = arith.constant 0.000000e+00 : f32
    %48 = vector.broadcast %cst_40 : f32 to vector<1x1x9xf32>
    %49 = arith.cmpf oeq, %47, %48 : vector<1x1x9xf32>
    %cst_41 = arith.constant -1.000000e+09 : f32
    %50 = vector.shape_cast %49 : vector<1x1x9xi1> to vector<1x1x9xi1>
    %51 = vector.broadcast %50 : vector<1x1x9xi1> to vector<2x6x9xi1>
    %52 = vector.broadcast %cst_41 : f32 to vector<2x6x9xf32>
    %53 = arith.select %51, %52, %46 : vector<2x6x9xi1>, vector<2x6x9xf32>
    %cst_42 = arith.constant 0.353553385 : f32
    %54 = vector.broadcast %cst_42 : f32 to vector<2x6x9xf32>
    %55 = arith.mulf %53, %54 : vector<2x6x9xf32>
    %cst_43 = arith.constant dense<0xFF800000> : vector<2x6xf32>
    %56 = vector.multi_reduction <maximumf>, %55, %cst_43 [2] : vector<2x6x9xf32> to vector<2x6xf32>
    %57 = vector.shape_cast %56 : vector<2x6xf32> to vector<2x6x1xf32>
    %58 = vector.broadcast %57 : vector<2x6x1xf32> to vector<2x6x9xf32>
    %59 = arith.subf %55, %58 : vector<2x6x9xf32>
    %60 = math.exp %59 : vector<2x6x9xf32>
    %cst_44 = arith.constant dense<0.000000e+00> : vector<2x6xf32>
    %61 = vector.multi_reduction <add>, %60, %cst_44 [2] : vector<2x6x9xf32> to vector<2x6xf32>
    %62 = vector.shape_cast %61 : vector<2x6xf32> to vector<2x6x1xf32>
    %63 = tpu.reciprocal %62 {approx = true} : vector<2x6x1xf32> -> vector<2x6x1xf32>
    %64 = vector.broadcast %63 : vector<2x6x1xf32> to vector<2x6x9xf32>
    %65 = arith.mulf %60, %64 : vector<2x6x9xf32>
    %66 = arith.truncf %65 : vector<2x6x9xf32> to vector<2x6x9xbf16>
    %67 = arith.truncf %41 : vector<2x9x8xf32> to vector<2x9x8xbf16>
    %cst_45 = arith.constant dense<0.000000e+00> : vector<2x6x8xf32>
    %68 = tpu.matmul %66, %67, %cst_45 {dimension_numbers = #tpu.dot_dimension_numbers<[2], [1], [1], [2], [0, 0, 0, 1, 1, 2], [0], [0]>} : vector<2x6x9xbf16>, vector<2x9x8xbf16>, vector<2x6x8xf32> -> vector<2x6x8xf32>
    %c0_46 = arith.constant 0 : index
    %c0_47 = arith.constant 0 : index
    %c0_48 = arith.constant 0 : index
    %c0_49 = arith.constant 0 : index
    %69 = vector.load %arg16[%c0_46, %c0_47, %c0_48, %c0_49] : memref<1x2x6x8xf32, #tpu.memory_space<vmem>>, vector<1x2x6x8xf32>
    %70 = vector.shape_cast %69 : vector<1x2x6x8xf32> to vector<2x6x8xf32>
    %71 = vector.shape_cast %68 : vector<2x6x8xf32> to vector<1x2x6x8xf32>
    tpu.vector_store %arg16[%c0_46, %c0_47, %c0_48, %c0_49], %71 {strides = array<i32>} : memref<1x2x6x8xf32, #tpu.memory_space<vmem>>, vector<1x2x6x8xf32>,
    %c0_50 = arith.constant 0 : index
    %c0_51 = arith.constant 0 : index
    %c0_52 = arith.constant 0 : index
    %c0_53 = arith.constant 0 : index
    %72 = vector.load %arg2[%c0_50, %c0_51, %c0_52, %c0_53] : memref<1x2x6x8xf32, #tpu.memory_space<vmem>>, vector<1x2x6x8xf32>
    %73 = vector.shape_cast %72 : vector<1x2x6x8xf32> to vector<2x6x8xf32>
    %c0_54 = arith.constant 0 : index
    %c0_55 = arith.constant 0 : index
    %c0_56 = arith.constant 0 : index
    %c0_57 = arith.constant 0 : index
    %74 = vector.load %arg6[%c0_54, %c0_55, %c0_56, %c0_57] : memref<1x2x8x8xf32, #tpu.memory_space<vmem>>, vector<1x2x8x8xf32>
    %75 = vector.shape_cast %74 : vector<1x2x8x8xf32> to vector<2x8x8xf32>
    %c0_58 = arith.constant 0 : index
    %c0_59 = arith.constant 0 : index
    %c0_60 = arith.constant 0 : index
    %c0_61 = arith.constant 0 : index
    %76 = vector.load %arg9[%c0_58, %c0_59, %c0_60, %c0_61] : memref<1x2x8x8xf32, #tpu.memory_space<vmem>>, vector<1x2x8x8xf32>
    %77 = vector.shape_cast %76 : vector<1x2x8x8xf32> to vector<2x8x8xf32>
    %c0_62 = arith.constant 0 : index
    %c0_63 = arith.constant 0 : index
    %c0_64 = arith.constant 0 : index
    %78 = vector.load %arg12[%c0_62, %c0_63, %c0_64] : memref<1x1x8xf32, #tpu.memory_space<vmem>>, vector<1x1x8xf32>
    %79 = vector.shape_cast %78 : vector<1x1x8xf32> to vector<1x8xf32>
    %80 = arith.truncf %73 : vector<2x6x8xf32> to vector<2x6x8xbf16>
    %81 = arith.truncf %75 : vector<2x8x8xf32> to vector<2x8x8xbf16>
    %cst_65 = arith.constant dense<0.000000e+00> : vector<2x6x8xf32>
    %82 = tpu.matmul %80, %81, %cst_65 {dimension_numbers = #tpu.dot_dimension_numbers<[2], [2], [1], [1], [0, 0, 0, 1, 1, 1], [0], [0]>} : vector<2x6x8xbf16>, vector<2x8x8xbf16>, vector<2x6x8xf32> -> vector<2x6x8xf32>
    %83 = vector.shape_cast %79 : vector<1x8xf32> to vector<1x1x8xf32>
    %cst_66 = arith.constant 0.000000e+00 : f32
    %84 = vector.broadcast %cst_66 : f32 to vector<1x1x8xf32>
    %85 = arith.cmpf oeq, %83, %84 : vector<1x1x8xf32>
    %cst_67 = arith.constant -1.000000e+09 : f32
    %86 = vector.shape_cast %85 : vector<1x1x8xi1> to vector<1x1x8xi1>
    %87 = vector.broadcast %86 : vector<1x1x8xi1> to vector<2x6x8xi1>
    %88 = vector.broadcast %cst_67 : f32 to vector<2x6x8xf32>
    %89 = arith.select %87, %88, %82 : vector<2x6x8xi1>, vector<2x6x8xf32>
    %cst_68 = arith.constant 0.353553385 : f32
    %90 = vector.broadcast %cst_68 : f32 to vector<2x6x8xf32>
    %91 = arith.mulf %89, %90 : vector<2x6x8xf32>
    %cst_69 = arith.constant dense<0xFF800000> : vector<2x6xf32>
    %92 = vector.multi_reduction <maximumf>, %91, %cst_69 [2] : vector<2x6x8xf32> to vector<2x6xf32>
    %93 = vector.shape_cast %92 : vector<2x6xf32> to vector<2x6x1xf32>
    %94 = vector.broadcast %93 : vector<2x6x1xf32> to vector<2x6x8xf32>
    %95 = arith.subf %91, %94 : vector<2x6x8xf32>
    %96 = math.exp %95 : vector<2x6x8xf32>
    %cst_70 = arith.constant dense<0.000000e+00> : vector<2x6xf32>
    %97 = vector.multi_reduction <add>, %96, %cst_70 [2] : vector<2x6x8xf32> to vector<2x6xf32>
    %98 = vector.shape_cast %97 : vector<2x6xf32> to vector<2x6x1xf32>
    %99 = tpu.reciprocal %98 {approx = true} : vector<2x6x1xf32> -> vector<2x6x1xf32>
    %100 = vector.broadcast %99 : vector<2x6x1xf32> to vector<2x6x8xf32>
    %101 = arith.mulf %96, %100 : vector<2x6x8xf32>
    %102 = arith.truncf %101 : vector<2x6x8xf32> to vector<2x6x8xbf16>
    %103 = arith.truncf %77 : vector<2x8x8xf32> to vector<2x8x8xbf16>
    %cst_71 = arith.constant dense<0.000000e+00> : vector<2x6x8xf32>
    %104 = tpu.matmul %102, %103, %cst_71 {dimension_numbers = #tpu.dot_dimension_numbers<[2], [1], [1], [2], [0, 0, 0, 1, 1, 2], [0], [0]>} : vector<2x6x8xbf16>, vector<2x8x8xbf16>, vector<2x6x8xf32> -> vector<2x6x8xf32>
    %c0_72 = arith.constant 0 : index
    %c0_73 = arith.constant 0 : index
    %c0_74 = arith.constant 0 : index
    %c0_75 = arith.constant 0 : index
    %105 = vector.load %arg17[%c0_72, %c0_73, %c0_74, %c0_75] : memref<1x2x6x8xf32, #tpu.memory_space<vmem>>, vector<1x2x6x8xf32>
    %106 = vector.shape_cast %105 : vector<1x2x6x8xf32> to vector<2x6x8xf32>
    %107 = vector.shape_cast %104 : vector<2x6x8xf32> to vector<1x2x6x8xf32>
    tpu.vector_store %arg17[%c0_72, %c0_73, %c0_74, %c0_75], %107 {strides = array<i32>} : memref<1x2x6x8xf32, #tpu.memory_space<vmem>>, vector<1x2x6x8xf32>,
    %c0_76 = arith.constant 0 : index
    %c0_77 = arith.constant 0 : index
    %c0_78 = arith.constant 0 : index
    %c0_79 = arith.constant 0 : index
    %108 = vector.load %arg3[%c0_76, %c0_77, %c0_78, %c0_79] : memref<1x2x7x8xf32, #tpu.memory_space<vmem>>, vector<1x2x7x8xf32>
    %109 = vector.shape_cast %108 : vector<1x2x7x8xf32> to vector<2x7x8xf32>
    %c0_80 = arith.constant 0 : index
    %c0_81 = arith.constant 0 : index
    %c0_82 = arith.constant 0 : index
    %c0_83 = arith.constant 0 : index
    %110 = vector.load %arg5[%c0_80, %c0_81, %c0_82, %c0_83] : memref<1x2x6x8xf32, #tpu.memory_space<vmem>>, vector<1x2x6x8xf32>
    %111 = vector.shape_cast %110 : vector<1x2x6x8xf32> to vector<2x6x8xf32>
    %c0_84 = arith.constant 0 : index
    %c0_85 = arith.constant 0 : index
    %c0_86 = arith.constant 0 : index
    %c0_87 = arith.constant 0 : index
    %112 = vector.load %arg8[%c0_84, %c0_85, %c0_86, %c0_87] : memref<1x2x6x8xf32, #tpu.memory_space<vmem>>, vector<1x2x6x8xf32>
    %113 = vector.shape_cast %112 : vector<1x2x6x8xf32> to vector<2x6x8xf32>
    %c0_88 = arith.constant 0 : index
    %c0_89 = arith.constant 0 : index
    %c0_90 = arith.constant 0 : index
    %114 = vector.load %arg10[%c0_88, %c0_89, %c0_90] : memref<1x1x6xf32, #tpu.memory_space<vmem>>, vector<1x1x6xf32>
    %115 = vector.shape_cast %114 : vector<1x1x6xf32> to vector<1x6xf32>
    %116 = arith.truncf %109 : vector<2x7x8xf32> to vector<2x7x8xbf16>
    %117 = arith.truncf %111 : vector<2x6x8xf32> to vector<2x6x8xbf16>
    %cst_91 = arith.constant dense<0.000000e+00> : vector<2x7x6xf32>
    %118 = tpu.matmul %116, %117, %cst_91 {dimension_numbers = #tpu.dot_dimension_numbers<[2], [2], [1], [1], [0, 0, 0, 1, 1, 1], [0], [0]>} : vector<2x7x8xbf16>, vector<2x6x8xbf16>, vector<2x7x6xf32> -> vector<2x7x6xf32>
    %119 = vector.shape_cast %115 : vector<1x6xf32> to vector<1x1x6xf32>
    %cst_92 = arith.constant 0.000000e+00 : f32
    %120 = vector.broadcast %cst_92 : f32 to vector<1x1x6xf32>
    %121 = arith.cmpf oeq, %119, %120 : vector<1x1x6xf32>
    %cst_93 = arith.constant -1.000000e+09 : f32
    %122 = vector.shape_cast %121 : vector<1x1x6xi1> to vector<1x1x6xi1>
    %123 = vector.broadcast %122 : vector<1x1x6xi1> to vector<2x7x6xi1>
    %124 = vector.broadcast %cst_93 : f32 to vector<2x7x6xf32>
    %125 = arith.select %123, %124, %118 : vector<2x7x6xi1>, vector<2x7x6xf32>
    %cst_94 = arith.constant 0.353553385 : f32
    %126 = vector.broadcast %cst_94 : f32 to vector<2x7x6xf32>
    %127 = arith.mulf %125, %126 : vector<2x7x6xf32>
    %cst_95 = arith.constant dense<0xFF800000> : vector<2x7xf32>
    %128 = vector.multi_reduction <maximumf>, %127, %cst_95 [2] : vector<2x7x6xf32> to vector<2x7xf32>
    %129 = vector.shape_cast %128 : vector<2x7xf32> to vector<2x7x1xf32>
    %130 = vector.broadcast %129 : vector<2x7x1xf32> to vector<2x7x6xf32>
    %131 = arith.subf %127, %130 : vector<2x7x6xf32>
    %132 = math.exp %131 : vector<2x7x6xf32>
    %cst_96 = arith.constant dense<0.000000e+00> : vector<2x7xf32>
    %133 = vector.multi_reduction <add>, %132, %cst_96 [2] : vector<2x7x6xf32> to vector<2x7xf32>
    %134 = vector.shape_cast %133 : vector<2x7xf32> to vector<2x7x1xf32>
    %135 = tpu.reciprocal %134 {approx = true} : vector<2x7x1xf32> -> vector<2x7x1xf32>
    %136 = vector.broadcast %135 : vector<2x7x1xf32> to vector<2x7x6xf32>
    %137 = arith.mulf %132, %136 : vector<2x7x6xf32>
    %138 = arith.truncf %137 : vector<2x7x6xf32> to vector<2x7x6xbf16>
    %139 = arith.truncf %113 : vector<2x6x8xf32> to vector<2x6x8xbf16>
    %cst_97 = arith.constant dense<0.000000e+00> : vector<2x7x8xf32>
    %140 = tpu.matmul %138, %139, %cst_97 {dimension_numbers = #tpu.dot_dimension_numbers<[2], [1], [1], [2], [0, 0, 0, 1, 1, 2], [0], [0]>} : vector<2x7x6xbf16>, vector<2x6x8xbf16>, vector<2x7x8xf32> -> vector<2x7x8xf32>
    %c0_98 = arith.constant 0 : index
    %c0_99 = arith.constant 0 : index
    %c0_100 = arith.constant 0 : index
    %c0_101 = arith.constant 0 : index
    %141 = vector.load %arg18[%c0_98, %c0_99, %c0_100, %c0_101] : memref<1x2x7x8xf32, #tpu.memory_space<vmem>>, vector<1x2x7x8xf32>
    %142 = vector.shape_cast %141 : vector<1x2x7x8xf32> to vector<2x7x8xf32>
    %143 = vector.shape_cast %140 : vector<2x7x8xf32> to vector<1x2x7x8xf32>
    tpu.vector_store %arg18[%c0_98, %c0_99, %c0_100, %c0_101], %143 {strides = array<i32>} : memref<1x2x7x8xf32, #tpu.memory_space<vmem>>, vector<1x2x7x8xf32>,
    %c0_102 = arith.constant 0 : index
    %c0_103 = arith.constant 0 : index
    %c0_104 = arith.constant 0 : index
    %c0_105 = arith.constant 0 : index
    %144 = vector.load %arg1[%c0_102, %c0_103, %c0_104, %c0_105] : memref<1x2x8x8xf32, #tpu.memory_space<vmem>>, vector<1x2x8x8xf32>
    %145 = vector.shape_cast %144 : vector<1x2x8x8xf32> to vector<2x8x8xf32>
    %c0_106 = arith.constant 0 : index
    %c0_107 = arith.constant 0 : index
    %c0_108 = arith.constant 0 : index
    %c0_109 = arith.constant 0 : index
    %146 = vector.load %arg6[%c0_106, %c0_107, %c0_108, %c0_109] : memref<1x2x8x8xf32, #tpu.memory_space<vmem>>, vector<1x2x8x8xf32>
    %147 = vector.shape_cast %146 : vector<1x2x8x8xf32> to vector<2x8x8xf32>
    %c0_110 = arith.constant 0 : index
    %c0_111 = arith.constant 0 : index
    %c0_112 = arith.constant 0 : index
    %c0_113 = arith.constant 0 : index
    %148 = vector.load %arg9[%c0_110, %c0_111, %c0_112, %c0_113] : memref<1x2x8x8xf32, #tpu.memory_space<vmem>>, vector<1x2x8x8xf32>
    %149 = vector.shape_cast %148 : vector<1x2x8x8xf32> to vector<2x8x8xf32>
    %c0_114 = arith.constant 0 : index
    %c0_115 = arith.constant 0 : index
    %c0_116 = arith.constant 0 : index
    %150 = vector.load %arg12[%c0_114, %c0_115, %c0_116] : memref<1x1x8xf32, #tpu.memory_space<vmem>>, vector<1x1x8xf32>
    %151 = vector.shape_cast %150 : vector<1x1x8xf32> to vector<1x8xf32>
    %c0_117 = arith.constant 0 : index
    %c0_118 = arith.constant 0 : index
    %c0_119 = arith.constant 0 : index
    %152 = vector.load %arg13[%c0_117, %c0_118, %c0_119] : memref<1x8x8xf32, #tpu.memory_space<vmem>>, vector<1x8x8xf32>
    %153 = vector.shape_cast %152 : vector<1x8x8xf32> to vector<8x8xf32>
    %154 = arith.truncf %145 : vector<2x8x8xf32> to vector<2x8x8xbf16>
    %155 = arith.truncf %147 : vector<2x8x8xf32> to vector<2x8x8xbf16>
    %cst_120 = arith.constant dense<0.000000e+00> : vector<2x8x8xf32>
    %156 = tpu.matmul %154, %155, %cst_120 {dimension_numbers = #tpu.dot_dimension_numbers<[2], [2], [1], [1], [0, 0, 0, 1, 1, 1], [0], [0]>} : vector<2x8x8xbf16>, vector<2x8x8xbf16>, vector<2x8x8xf32> -> vector<2x8x8xf32>
    %157 = vector.shape_cast %153 : vector<8x8xf32> to vector<1x8x8xf32>
    %158 = vector.broadcast %157 : vector<1x8x8xf32> to vector<2x8x8xf32>
    %159 = arith.mulf %156, %158 : vector<2x8x8xf32>
    %160 = vector.shape_cast %151 : vector<1x8xf32> to vector<1x1x8xf32>
    %cst_121 = arith.constant 0.000000e+00 : f32
    %161 = vector.broadcast %cst_121 : f32 to vector<1x1x8xf32>
    %162 = arith.cmpf oeq, %160, %161 : vector<1x1x8xf32>
    %cst_122 = arith.constant -1.000000e+09 : f32
    %163 = vector.shape_cast %162 : vector<1x1x8xi1> to vector<1x1x8xi1>
    %164 = vector.broadcast %163 : vector<1x1x8xi1> to vector<2x8x8xi1>
    %165 = vector.broadcast %cst_122 : f32 to vector<2x8x8xf32>
    %166 = arith.select %164, %165, %159 : vector<2x8x8xi1>, vector<2x8x8xf32>
    %cst_123 = arith.constant 0.353553385 : f32
    %167 = vector.broadcast %cst_123 : f32 to vector<2x8x8xf32>
    %168 = arith.mulf %166, %167 : vector<2x8x8xf32>
    %cst_124 = arith.constant dense<0xFF800000> : vector<2x8xf32>
    %169 = vector.multi_reduction <maximumf>, %168, %cst_124 [2] : vector<2x8x8xf32> to vector<2x8xf32>
    %170 = vector.shape_cast %169 : vector<2x8xf32> to vector<2x8x1xf32>
    %171 = vector.broadcast %170 : vector<2x8x1xf32> to vector<2x8x8xf32>
    %172 = arith.subf %168, %171 : vector<2x8x8xf32>
    %173 = math.exp %172 : vector<2x8x8xf32>
    %cst_125 = arith.constant dense<0.000000e+00> : vector<2x8xf32>
    %174 = vector.multi_reduction <add>, %173, %cst_125 [2] : vector<2x8x8xf32> to vector<2x8xf32>
    %175 = vector.shape_cast %174 : vector<2x8xf32> to vector<2x8x1xf32>
    %176 = tpu.reciprocal %175 {approx = true} : vector<2x8x1xf32> -> vector<2x8x1xf32>
    %177 = vector.broadcast %176 : vector<2x8x1xf32> to vector<2x8x8xf32>
    %178 = arith.mulf %173, %177 : vector<2x8x8xf32>
    %179 = arith.truncf %178 : vector<2x8x8xf32> to vector<2x8x8xbf16>
    %180 = arith.truncf %149 : vector<2x8x8xf32> to vector<2x8x8xbf16>
    %cst_126 = arith.constant dense<0.000000e+00> : vector<2x8x8xf32>
    %181 = tpu.matmul %179, %180, %cst_126 {dimension_numbers = #tpu.dot_dimension_numbers<[2], [1], [1], [2], [0, 0, 0, 1, 1, 2], [0], [0]>} : vector<2x8x8xbf16>, vector<2x8x8xbf16>, vector<2x8x8xf32> -> vector<2x8x8xf32>
    %c0_127 = arith.constant 0 : index
    %c0_128 = arith.constant 0 : index
    %c0_129 = arith.constant 0 : index
    %c0_130 = arith.constant 0 : index
    %182 = vector.load %arg19[%c0_127, %c0_128, %c0_129, %c0_130] : memref<1x2x8x8xf32, #tpu.memory_space<vmem>>, vector<1x2x8x8xf32>
    %183 = vector.shape_cast %182 : vector<1x2x8x8xf32> to vector<2x8x8xf32>
    %184 = vector.shape_cast %181 : vector<2x8x8xf32> to vector<1x2x8x8xf32>
    tpu.vector_store %arg19[%c0_127, %c0_128, %c0_129, %c0_130], %184 {strides = array<i32>} : memref<1x2x8x8xf32, #tpu.memory_space<vmem>>, vector<1x2x8x8xf32>,
    %c0_131 = arith.constant 0 : index
    %c0_132 = arith.constant 0 : index
    %c0_133 = arith.constant 0 : index
    %c0_134 = arith.constant 0 : index
    %185 = vector.load %arg3[%c0_131, %c0_132, %c0_133, %c0_134] : memref<1x2x7x8xf32, #tpu.memory_space<vmem>>, vector<1x2x7x8xf32>
    %186 = vector.shape_cast %185 : vector<1x2x7x8xf32> to vector<2x7x8xf32>
    %c0_135 = arith.constant 0 : index
    %c0_136 = arith.constant 0 : index
    %c0_137 = arith.constant 0 : index
    %c0_138 = arith.constant 0 : index
    %187 = vector.load %arg4[%c0_135, %c0_136, %c0_137, %c0_138] : memref<1x2x9x8xf32, #tpu.memory_space<vmem>>, vector<1x2x9x8xf32>
    %188 = vector.shape_cast %187 : vector<1x2x9x8xf32> to vector<2x9x8xf32>
    %c0_139 = arith.constant 0 : index
    %c0_140 = arith.constant 0 : index
    %c0_141 = arith.constant 0 : index
    %c0_142 = arith.constant 0 : index
    %189 = vector.load %arg7[%c0_139, %c0_140, %c0_141, %c0_142] : memref<1x2x9x8xf32, #tpu.memory_space<vmem>>, vector<1x2x9x8xf32>
    %190 = vector.shape_cast %189 : vector<1x2x9x8xf32> to vector<2x9x8xf32>
    %c0_143 = arith.constant 0 : index
    %c0_144 = arith.constant 0 : index
    %c0_145 = arith.constant 0 : index
    %191 = vector.load %arg11[%c0_143, %c0_144, %c0_145] : memref<1x1x9xf32, #tpu.memory_space<vmem>>, vector<1x1x9xf32>
    %192 = vector.shape_cast %191 : vector<1x1x9xf32> to vector<1x9xf32>
    %c0_146 = arith.constant 0 : index
    %c0_147 = arith.constant 0 : index
    %c0_148 = arith.constant 0 : index
    %193 = vector.load %arg14[%c0_146, %c0_147, %c0_148] : memref<1x7x9xf32, #tpu.memory_space<vmem>>, vector<1x7x9xf32>
    %194 = vector.shape_cast %193 : vector<1x7x9xf32> to vector<7x9xf32>
    %195 = arith.truncf %186 : vector<2x7x8xf32> to vector<2x7x8xbf16>
    %196 = arith.truncf %188 : vector<2x9x8xf32> to vector<2x9x8xbf16>
    %cst_149 = arith.constant dense<0.000000e+00> : vector<2x7x9xf32>
    %197 = tpu.matmul %195, %196, %cst_149 {dimension_numbers = #tpu.dot_dimension_numbers<[2], [2], [1], [1], [0, 0, 0, 1, 1, 1], [0], [0]>} : vector<2x7x8xbf16>, vector<2x9x8xbf16>, vector<2x7x9xf32> -> vector<2x7x9xf32>
    %198 = vector.shape_cast %194 : vector<7x9xf32> to vector<1x7x9xf32>
    %199 = vector.broadcast %198 : vector<1x7x9xf32> to vector<2x7x9xf32>
    %200 = arith.mulf %197, %199 : vector<2x7x9xf32>
    %201 = vector.shape_cast %192 : vector<1x9xf32> to vector<1x1x9xf32>
    %cst_150 = arith.constant 0.000000e+00 : f32
    %202 = vector.broadcast %cst_150 : f32 to vector<1x1x9xf32>
    %203 = arith.cmpf oeq, %201, %202 : vector<1x1x9xf32>
    %cst_151 = arith.constant -1.000000e+09 : f32
    %204 = vector.shape_cast %203 : vector<1x1x9xi1> to vector<1x1x9xi1>
    %205 = vector.broadcast %204 : vector<1x1x9xi1> to vector<2x7x9xi1>
    %206 = vector.broadcast %cst_151 : f32 to vector<2x7x9xf32>
    %207 = arith.select %205, %206, %200 : vector<2x7x9xi1>, vector<2x7x9xf32>
    %cst_152 = arith.constant 0.353553385 : f32
    %208 = vector.broadcast %cst_152 : f32 to vector<2x7x9xf32>
    %209 = arith.mulf %207, %208 : vector<2x7x9xf32>
    %cst_153 = arith.constant dense<0xFF800000> : vector<2x7xf32>
    %210 = vector.multi_reduction <maximumf>, %209, %cst_153 [2] : vector<2x7x9xf32> to vector<2x7xf32>
    %211 = vector.shape_cast %210 : vector<2x7xf32> to vector<2x7x1xf32>
    %212 = vector.broadcast %211 : vector<2x7x1xf32> to vector<2x7x9xf32>
    %213 = arith.subf %209, %212 : vector<2x7x9xf32>
    %214 = math.exp %213 : vector<2x7x9xf32>
    %cst_154 = arith.constant dense<0.000000e+00> : vector<2x7xf32>
    %215 = vector.multi_reduction <add>, %214, %cst_154 [2] : vector<2x7x9xf32> to vector<2x7xf32>
    %216 = vector.shape_cast %215 : vector<2x7xf32> to vector<2x7x1xf32>
    %217 = tpu.reciprocal %216 {approx = true} : vector<2x7x1xf32> -> vector<2x7x1xf32>
    %218 = vector.broadcast %217 : vector<2x7x1xf32> to vector<2x7x9xf32>
    %219 = arith.mulf %214, %218 : vector<2x7x9xf32>
    %220 = arith.truncf %219 : vector<2x7x9xf32> to vector<2x7x9xbf16>
    %221 = arith.truncf %190 : vector<2x9x8xf32> to vector<2x9x8xbf16>
    %cst_155 = arith.constant dense<0.000000e+00> : vector<2x7x8xf32>
    %222 = tpu.matmul %220, %221, %cst_155 {dimension_numbers = #tpu.dot_dimension_numbers<[2], [1], [1], [2], [0, 0, 0, 1, 1, 2], [0], [0]>} : vector<2x7x9xbf16>, vector<2x9x8xbf16>, vector<2x7x8xf32> -> vector<2x7x8xf32>
    %c0_156 = arith.constant 0 : index
    %c0_157 = arith.constant 0 : index
    %c0_158 = arith.constant 0 : index
    %c0_159 = arith.constant 0 : index
    %223 = vector.load %arg20[%c0_156, %c0_157, %c0_158, %c0_159] : memref<1x2x7x8xf32, #tpu.memory_space<vmem>>, vector<1x2x7x8xf32>
    %224 = vector.shape_cast %223 : vector<1x2x7x8xf32> to vector<2x7x8xf32>
    %225 = vector.shape_cast %222 : vector<2x7x8xf32> to vector<1x2x7x8xf32>
    tpu.vector_store %arg20[%c0_156, %c0_157, %c0_158, %c0_159], %225 {strides = array<i32>} : memref<1x2x7x8xf32, #tpu.memory_space<vmem>>, vector<1x2x7x8xf32>,
    return
  }
  func.func @transform_0(%arg0: i32) -> (i32, i32, i32, i32) {
    %c0_i32 = arith.constant 0 : i32
    %c0_i32_0 = arith.constant 0 : i32
    %c0_i32_1 = arith.constant 0 : i32
    %c0_i32_2 = arith.constant 0 : i32
    return %arg0, %c0_i32, %c0_i32_0, %c0_i32_1 : i32, i32, i32, i32
  }
  func.func @transform_1(%arg0: i32) -> (i32, i32, i32, i32) {
    %c0_i32 = arith.constant 0 : i32
    %c0_i32_0 = arith.constant 0 : i32
    %c0_i32_1 = arith.constant 0 : i32
    %c0_i32_2 = arith.constant 0 : i32
    return %arg0, %c0_i32, %c0_i32_0, %c0_i32_1 : i32, i32, i32, i32
  }
  func.func @transform_2(%arg0: i32) -> (i32, i32, i32, i32) {
    %c0_i32 = arith.constant 0 : i32
    %c0_i32_0 = arith.constant 0 : i32
    %c0_i32_1 = arith.constant 0 : i32
    %c0_i32_2 = arith.constant 0 : i32
    return %arg0, %c0_i32, %c0_i32_0, %c0_i32_1 : i32, i32, i32, i32
  }
  func.func @transform_3(%arg0: i32) -> (i32, i32, i32, i32) {
    %c0_i32 = arith.constant 0 : i32
    %c0_i32_0 = arith.constant 0 : i32
    %c0_i32_1 = arith.constant 0 : i32
    %c0_i32_2 = arith.constant 0 : i32
    return %arg0, %c0_i32, %c0_i32_0, %c0_i32_1 : i32, i32, i32, i32
  }
  func.func @transform_4(%arg0: i32) -> (i32, i32, i32, i32) {
    %c0_i32 = arith.constant 0 : i32
    %c0_i32_0 = arith.constant 0 : i32
    %c0_i32_1 = arith.constant 0 : i32
    %c0_i32_2 = arith.constant 0 : i32
    return %arg0, %c0_i32, %c0_i32_0, %c0_i32_1 : i32, i32, i32, i32
  }
  func.func @transform_5(%arg0: i32) -> (i32, i32, i32, i32) {
    %c0_i32 = arith.constant 0 : i32
    %c0_i32_0 = arith.constant 0 : i32
    %c0_i32_1 = arith.constant 0 : i32
    %c0_i32_2 = arith.constant 0 : i32
    return %arg0, %c0_i32, %c0_i32_0, %c0_i32_1 : i32, i32, i32, i32
  }
  func.func @transform_6(%arg0: i32) -> (i32, i32, i32, i32) {
    %c0_i32 = arith.constant 0 : i32
    %c0_i32_0 = arith.constant 0 : i32
    %c0_i32_1 = arith.constant 0 : i32
    %c0_i32_2 = arith.constant 0 : i32
    return %arg0, %c0_i32, %c0_i32_0, %c0_i32_1 : i32, i32, i32, i32
  }
  func.func @transform_7(%arg0: i32) -> (i32, i32, i32, i32) {
    %c0_i32 = arith.constant 0 : i32
    %c0_i32_0 = arith.constant 0 : i32
    %c0_i32_1 = arith.constant 0 : i32
    %c0_i32_2 = arith.constant 0 : i32
    return %arg0, %c0_i32, %c0_i32_0, %c0_i32_1 : i32, i32, i32, i32
  }
  func.func @transform_8(%arg0: i32) -> (i32, i32, i32, i32) {
    %c0_i32 = arith.constant 0 : i32
    %c0_i32_0 = arith.constant 0 : i32
    %c0_i32_1 = arith.constant 0 : i32
    %c0_i32_2 = arith.constant 0 : i32
    return %arg0, %c0_i32, %c0_i32_0, %c0_i32_1 : i32, i32, i32, i32
  }
  func.func @transform_9(%arg0: i32) -> (i32, i32, i32) {
    %c0_i32 = arith.constant 0 : i32
    %c0_i32_0 = arith.constant 0 : i32
    %c0_i32_1 = arith.constant 0 : i32
    return %arg0, %c0_i32, %c0_i32_0 : i32, i32, i32
  }
  func.func @transform_10(%arg0: i32) -> (i32, i32, i32) {
    %c0_i32 = arith.constant 0 : i32
    %c0_i32_0 = arith.constant 0 : i32
    %c0_i32_1 = arith.constant 0 : i32
    return %arg0, %c0_i32, %c0_i32_0 : i32, i32, i32
  }
  func.func @transform_11(%arg0: i32) -> (i32, i32, i32) {
    %c0_i32 = arith.constant 0 : i32
    %c0_i32_0 = arith.constant 0 : i32
    %c0_i32_1 = arith.constant 0 : i32
    return %arg0, %c0_i32, %c0_i32_0 : i32, i32, i32
  }
  func.func @transform_12(%arg0: i32) -> (i32, i32, i32) {
    %c0_i32 = arith.constant 0 : i32
    %c0_i32_0 = arith.constant 0 : i32
    %c0_i32_1 = arith.constant 0 : i32
    return %arg0, %c0_i32, %c0_i32_0 : i32, i32, i32
  }
  func.func @transform_13(%arg0: i32) -> (i32, i32, i32) {
    %c0_i32 = arith.constant 0 : i32
    %c0_i32_0 = arith.constant 0 : i32
    %c0_i32_1 = arith.constant 0 : i32
    return %arg0, %c0_i32, %c0_i32_0 : i32, i32, i32
  }
  func.func @transform_14(%arg0: i32) -> (i32, i32, i32, i32) {
    %c0_i32 = arith.constant 0 : i32
    %c0_i32_0 = arith.constant 0 : i32
    %c0_i32_1 = arith.constant 0 : i32
    %c0_i32_2 = arith.constant 0 : i32
    return %arg0, %c0_i32, %c0_i32_0, %c0_i32_1 : i32, i32, i32, i32
  }
  func.func @transform_15(%arg0: i32) -> (i32, i32, i32, i32) {
    %c0_i32 = arith.constant 0 : i32
    %c0_i32_0 = arith.constant 0 : i32
    %c0_i32_1 = arith.constant 0 : i32
    %c0_i32_2 = arith.constant 0 : i32
    return %arg0, %c0_i32, %c0_i32_0, %c0_i32_1 : i32, i32, i32, i32
  }
  func.func @transform_16(%arg0: i32) -> (i32, i32, i32, i32) {
    %c0_i32 = arith.constant 0 : i32
    %c0_i32_0 = arith.constant 0 : i32
    %c0_i32_1 = arith.constant 0 : i32
    %c0_i32_2 = arith.constant 0 : i32
    return %arg0, %c0_i32, %c0_i32_0, %c0_i32_1 : i32, i32, i32, i32
  }
  func.func @transform_17(%arg0: i32) -> (i32, i32, i32, i32) {
    %c0_i32 = arith.constant 0 : i32
    %c0_i32_0 = arith.constant 0 : i32
    %c0_i32_1 = arith.constant 0 : i32
    %c0_i32_2 = arith.constant 0 : i32
    return %arg0, %c0_i32, %c0_i32_0, %c0_i32_1 : i32, i32, i32, i32
  }
  func.func @transform_18(%arg0: i32) -> (i32, i32, i32, i32) {
    %c0_i32 = arith.constant 0 : i32
    %c0_i32_0 = arith.constant 0 : i32
    %c0_i32_1 = arith.constant 0 : i32
    %c0_i32_2 = arith.constant 0 : i32
    return %arg0, %c0_i32, %c0_i32_0, %c0_i32_1 : i32, i32, i32, i32
  }
  func.func @transform_19(%arg0: i32) -> (i32, i32, i32, i32) {
    %c0_i32 = arith.constant 0 : i32
    %c0_i32_0 = arith.constant 0 : i32
    %c0_i32_1 = arith.constant 0 : i32
    %c0_i32_2 = arith.constant 0 : i32
    return %arg0, %c0_i32, %c0_i32_0, %c0_i32_1 : i32, i32, i32, i32
  }
}

module attributes {stable_mosaic.version = 11 : i64} {
  func.func @_ln_res_kernel(%arg0: i32, %arg1: memref<14x16xf32, #tpu.memory_space<vmem>>, %arg2: memref<14x16xf32, #tpu.memory_space<vmem>>, %arg3: memref<1x16xf32, #tpu.memory_space<vmem>>, %arg4: memref<1x16xf32, #tpu.memory_space<vmem>>, %arg5: memref<14x16xf32, #tpu.memory_space<vmem>>) attributes {dimension_semantics = [#tpu.dimension_semantics<parallel>], iteration_bounds = array<i64: 1>, scalar_prefetch = 0 : i64, scratch_operands = 0 : i64, tpu.core_type = #tpu.core_type<tc>, window_params = [{transform_indices = @transform_0, window_bounds = array<i64: 14, 16>}, {transform_indices = @transform_1, window_bounds = array<i64: 14, 16>}, {pipeline_mode = #tpu.pipeline_mode<synchronous>, transform_indices = @transform_2, window_bounds = array<i64: 1, 16>}, {pipeline_mode = #tpu.pipeline_mode<synchronous>, transform_indices = @transform_3, window_bounds = array<i64: 1, 16>}, {transform_indices = @transform_4, window_bounds = array<i64: 14, 16>}]} {
    %c0 = arith.constant 0 : index
    %c0_0 = arith.constant 0 : index
    %0 = vector.load %arg1[%c0, %c0_0] : memref<14x16xf32, #tpu.memory_space<vmem>>, vector<14x16xf32>
    %c0_1 = arith.constant 0 : index
    %c0_2 = arith.constant 0 : index
    %1 = vector.load %arg2[%c0_1, %c0_2] : memref<14x16xf32, #tpu.memory_space<vmem>>, vector<14x16xf32>
    %2 = arith.addf %0, %1 : vector<14x16xf32>
    %cst = arith.constant dense<0.000000e+00> : vector<14xf32>
    %3 = vector.multi_reduction <add>, %2, %cst [1] : vector<14x16xf32> to vector<14xf32>
    %4 = vector.shape_cast %3 : vector<14xf32> to vector<14x1xf32>
    %cst_3 = arith.constant 1.600000e+01 : f32
    %5 = vector.broadcast %cst_3 : f32 to vector<14x1xf32>
    %6 = arith.divf %4, %5 : vector<14x1xf32>
    %7 = vector.broadcast %6 : vector<14x1xf32> to vector<14x16xf32>
    %8 = arith.subf %2, %7 : vector<14x16xf32>
    %9 = arith.mulf %8, %8 : vector<14x16xf32>
    %cst_4 = arith.constant dense<0.000000e+00> : vector<14xf32>
    %10 = vector.multi_reduction <add>, %9, %cst_4 [1] : vector<14x16xf32> to vector<14xf32>
    %11 = vector.shape_cast %10 : vector<14xf32> to vector<14x1xf32>
    %cst_5 = arith.constant 1.600000e+01 : f32
    %12 = vector.broadcast %cst_5 : f32 to vector<14x1xf32>
    %13 = arith.divf %11, %12 : vector<14x1xf32>
    %cst_6 = arith.constant 9.99999974E-6 : f32
    %14 = vector.broadcast %cst_6 : f32 to vector<14x1xf32>
    %15 = arith.addf %13, %14 : vector<14x1xf32>
    %16 = math.rsqrt %15 : vector<14x1xf32>
    %17 = vector.broadcast %16 : vector<14x1xf32> to vector<14x16xf32>
    %18 = arith.mulf %8, %17 : vector<14x16xf32>
    %c0_7 = arith.constant 0 : index
    %c0_8 = arith.constant 0 : index
    %19 = vector.load %arg3[%c0_7, %c0_8] : memref<1x16xf32, #tpu.memory_space<vmem>>, vector<1x16xf32>
    %20 = vector.broadcast %19 : vector<1x16xf32> to vector<14x16xf32>
    %21 = arith.mulf %18, %20 : vector<14x16xf32>
    %c0_9 = arith.constant 0 : index
    %c0_10 = arith.constant 0 : index
    %22 = vector.load %arg4[%c0_9, %c0_10] : memref<1x16xf32, #tpu.memory_space<vmem>>, vector<1x16xf32>
    %23 = vector.broadcast %22 : vector<1x16xf32> to vector<14x16xf32>
    %24 = arith.addf %21, %23 : vector<14x16xf32>
    %c0_11 = arith.constant 0 : index
    %c0_12 = arith.constant 0 : index
    %25 = vector.load %arg5[%c0_11, %c0_12] : memref<14x16xf32, #tpu.memory_space<vmem>>, vector<14x16xf32>
    tpu.vector_store %arg5[%c0_11, %c0_12], %24 {strides = array<i32>} : memref<14x16xf32, #tpu.memory_space<vmem>>, vector<14x16xf32>,
    return
  }
  func.func @transform_0(%arg0: i32) -> (i32, i32) {
    %c0_i32 = arith.constant 0 : i32
    %c0_i32_0 = arith.constant 0 : i32
    return %arg0, %c0_i32 : i32, i32
  }
  func.func @transform_1(%arg0: i32) -> (i32, i32) {
    %c0_i32 = arith.constant 0 : i32
    %c0_i32_0 = arith.constant 0 : i32
    return %arg0, %c0_i32 : i32, i32
  }
  func.func @transform_2(%arg0: i32) -> (i32, i32) {
    %c0_i32 = arith.constant 0 : i32
    %c0_i32_0 = arith.constant 0 : i32
    %c0_i32_1 = arith.constant 0 : i32
    return %c0_i32, %c0_i32_0 : i32, i32
  }
  func.func @transform_3(%arg0: i32) -> (i32, i32) {
    %c0_i32 = arith.constant 0 : i32
    %c0_i32_0 = arith.constant 0 : i32
    %c0_i32_1 = arith.constant 0 : i32
    return %c0_i32, %c0_i32_0 : i32, i32
  }
  func.func @transform_4(%arg0: i32) -> (i32, i32) {
    %c0_i32 = arith.constant 0 : i32
    %c0_i32_0 = arith.constant 0 : i32
    return %arg0, %c0_i32 : i32, i32
  }
}

module attributes {stable_mosaic.version = 11 : i64} {
  func.func @_linear3_kernel(%arg0: i32, %arg1: memref<14x16xf32, #tpu.memory_space<vmem>>, %arg2: memref<14x16xf32, #tpu.memory_space<vmem>>, %arg3: memref<14x16xf32, #tpu.memory_space<vmem>>, %arg4: memref<16x16xbf16, #tpu.memory_space<vmem>>, %arg5: memref<16x16xbf16, #tpu.memory_space<vmem>>, %arg6: memref<16x16xbf16, #tpu.memory_space<vmem>>, %arg7: memref<1x16xf32, #tpu.memory_space<vmem>>, %arg8: memref<14x16xf32, #tpu.memory_space<vmem>>) attributes {dimension_semantics = [#tpu.dimension_semantics<parallel>], iteration_bounds = array<i64: 1>, scalar_prefetch = 0 : i64, scratch_operands = 0 : i64, tpu.core_type = #tpu.core_type<tc>, window_params = [{transform_indices = @transform_0, window_bounds = array<i64: 14, 16>}, {transform_indices = @transform_1, window_bounds = array<i64: 14, 16>}, {transform_indices = @transform_2, window_bounds = array<i64: 14, 16>}, {pipeline_mode = #tpu.pipeline_mode<synchronous>, transform_indices = @transform_3, window_bounds = array<i64: 16, 16>}, {pipeline_mode = #tpu.pipeline_mode<synchronous>, transform_indices = @transform_4, window_bounds = array<i64: 16, 16>}, {pipeline_mode = #tpu.pipeline_mode<synchronous>, transform_indices = @transform_5, window_bounds = array<i64: 16, 16>}, {pipeline_mode = #tpu.pipeline_mode<synchronous>, transform_indices = @transform_6, window_bounds = array<i64: 1, 16>}, {transform_indices = @transform_7, window_bounds = array<i64: 14, 16>}]} {
    %c0 = arith.constant 0 : index
    %c0_0 = arith.constant 0 : index
    %0 = vector.load %arg1[%c0, %c0_0] : memref<14x16xf32, #tpu.memory_space<vmem>>, vector<14x16xf32>
    %1 = arith.truncf %0 : vector<14x16xf32> to vector<14x16xbf16>
    %c0_1 = arith.constant 0 : index
    %c0_2 = arith.constant 0 : index
    %2 = vector.load %arg4[%c0_1, %c0_2] : memref<16x16xbf16, #tpu.memory_space<vmem>>, vector<16x16xbf16>
    %cst = arith.constant dense<0.000000e+00> : vector<14x16xf32>
    %3 = tpu.matmul %1, %2, %cst {dimension_numbers = #tpu.dot_dimension_numbers<[1], [0], [0], [1], [0, 0, 1, 1], [], []>} : vector<14x16xbf16>, vector<16x16xbf16>, vector<14x16xf32> -> vector<14x16xf32>
    %c0_3 = arith.constant 0 : index
    %c0_4 = arith.constant 0 : index
    %4 = vector.load %arg2[%c0_3, %c0_4] : memref<14x16xf32, #tpu.memory_space<vmem>>, vector<14x16xf32>
    %5 = arith.truncf %4 : vector<14x16xf32> to vector<14x16xbf16>
    %c0_5 = arith.constant 0 : index
    %c0_6 = arith.constant 0 : index
    %6 = vector.load %arg5[%c0_5, %c0_6] : memref<16x16xbf16, #tpu.memory_space<vmem>>, vector<16x16xbf16>
    %cst_7 = arith.constant dense<0.000000e+00> : vector<14x16xf32>
    %7 = tpu.matmul %5, %6, %cst_7 {dimension_numbers = #tpu.dot_dimension_numbers<[1], [0], [0], [1], [0, 0, 1, 1], [], []>} : vector<14x16xbf16>, vector<16x16xbf16>, vector<14x16xf32> -> vector<14x16xf32>
    %8 = arith.addf %3, %7 : vector<14x16xf32>
    %c0_8 = arith.constant 0 : index
    %c0_9 = arith.constant 0 : index
    %9 = vector.load %arg3[%c0_8, %c0_9] : memref<14x16xf32, #tpu.memory_space<vmem>>, vector<14x16xf32>
    %10 = arith.truncf %9 : vector<14x16xf32> to vector<14x16xbf16>
    %c0_10 = arith.constant 0 : index
    %c0_11 = arith.constant 0 : index
    %11 = vector.load %arg6[%c0_10, %c0_11] : memref<16x16xbf16, #tpu.memory_space<vmem>>, vector<16x16xbf16>
    %cst_12 = arith.constant dense<0.000000e+00> : vector<14x16xf32>
    %12 = tpu.matmul %10, %11, %cst_12 {dimension_numbers = #tpu.dot_dimension_numbers<[1], [0], [0], [1], [0, 0, 1, 1], [], []>} : vector<14x16xbf16>, vector<16x16xbf16>, vector<14x16xf32> -> vector<14x16xf32>
    %13 = arith.addf %8, %12 : vector<14x16xf32>
    %c0_13 = arith.constant 0 : index
    %c0_14 = arith.constant 0 : index
    %14 = vector.load %arg7[%c0_13, %c0_14] : memref<1x16xf32, #tpu.memory_space<vmem>>, vector<1x16xf32>
    %15 = vector.broadcast %14 : vector<1x16xf32> to vector<14x16xf32>
    %16 = arith.addf %13, %15 : vector<14x16xf32>
    %c0_15 = arith.constant 0 : index
    %c0_16 = arith.constant 0 : index
    %17 = vector.load %arg8[%c0_15, %c0_16] : memref<14x16xf32, #tpu.memory_space<vmem>>, vector<14x16xf32>
    tpu.vector_store %arg8[%c0_15, %c0_16], %16 {strides = array<i32>} : memref<14x16xf32, #tpu.memory_space<vmem>>, vector<14x16xf32>,
    return
  }
  func.func @transform_0(%arg0: i32) -> (i32, i32) {
    %c0_i32 = arith.constant 0 : i32
    %c0_i32_0 = arith.constant 0 : i32
    return %arg0, %c0_i32 : i32, i32
  }
  func.func @transform_1(%arg0: i32) -> (i32, i32) {
    %c0_i32 = arith.constant 0 : i32
    %c0_i32_0 = arith.constant 0 : i32
    return %arg0, %c0_i32 : i32, i32
  }
  func.func @transform_2(%arg0: i32) -> (i32, i32) {
    %c0_i32 = arith.constant 0 : i32
    %c0_i32_0 = arith.constant 0 : i32
    return %arg0, %c0_i32 : i32, i32
  }
  func.func @transform_3(%arg0: i32) -> (i32, i32) {
    %c0_i32 = arith.constant 0 : i32
    %c0_i32_0 = arith.constant 0 : i32
    %c0_i32_1 = arith.constant 0 : i32
    return %c0_i32, %c0_i32_0 : i32, i32
  }
  func.func @transform_4(%arg0: i32) -> (i32, i32) {
    %c0_i32 = arith.constant 0 : i32
    %c0_i32_0 = arith.constant 0 : i32
    %c0_i32_1 = arith.constant 0 : i32
    return %c0_i32, %c0_i32_0 : i32, i32
  }
  func.func @transform_5(%arg0: i32) -> (i32, i32) {
    %c0_i32 = arith.constant 0 : i32
    %c0_i32_0 = arith.constant 0 : i32
    %c0_i32_1 = arith.constant 0 : i32
    return %c0_i32, %c0_i32_0 : i32, i32
  }
  func.func @transform_6(%arg0: i32) -> (i32, i32) {
    %c0_i32 = arith.constant 0 : i32
    %c0_i32_0 = arith.constant 0 : i32
    %c0_i32_1 = arith.constant 0 : i32
    return %c0_i32, %c0_i32_0 : i32, i32
  }
  func.func @transform_7(%arg0: i32) -> (i32, i32) {
    %c0_i32 = arith.constant 0 : i32
    %c0_i32_0 = arith.constant 0 : i32
    return %arg0, %c0_i32 : i32, i32
  }
}

module attributes {stable_mosaic.version = 11 : i64} {
  func.func @_linear3_kernel(%arg0: i32, %arg1: memref<12x16xf32, #tpu.memory_space<vmem>>, %arg2: memref<12x16xf32, #tpu.memory_space<vmem>>, %arg3: memref<12x16xf32, #tpu.memory_space<vmem>>, %arg4: memref<16x16xbf16, #tpu.memory_space<vmem>>, %arg5: memref<16x16xbf16, #tpu.memory_space<vmem>>, %arg6: memref<16x16xbf16, #tpu.memory_space<vmem>>, %arg7: memref<1x16xf32, #tpu.memory_space<vmem>>, %arg8: memref<12x16xf32, #tpu.memory_space<vmem>>) attributes {dimension_semantics = [#tpu.dimension_semantics<parallel>], iteration_bounds = array<i64: 1>, scalar_prefetch = 0 : i64, scratch_operands = 0 : i64, tpu.core_type = #tpu.core_type<tc>, window_params = [{transform_indices = @transform_0, window_bounds = array<i64: 12, 16>}, {transform_indices = @transform_1, window_bounds = array<i64: 12, 16>}, {transform_indices = @transform_2, window_bounds = array<i64: 12, 16>}, {pipeline_mode = #tpu.pipeline_mode<synchronous>, transform_indices = @transform_3, window_bounds = array<i64: 16, 16>}, {pipeline_mode = #tpu.pipeline_mode<synchronous>, transform_indices = @transform_4, window_bounds = array<i64: 16, 16>}, {pipeline_mode = #tpu.pipeline_mode<synchronous>, transform_indices = @transform_5, window_bounds = array<i64: 16, 16>}, {pipeline_mode = #tpu.pipeline_mode<synchronous>, transform_indices = @transform_6, window_bounds = array<i64: 1, 16>}, {transform_indices = @transform_7, window_bounds = array<i64: 12, 16>}]} {
    %c0 = arith.constant 0 : index
    %c0_0 = arith.constant 0 : index
    %0 = vector.load %arg1[%c0, %c0_0] : memref<12x16xf32, #tpu.memory_space<vmem>>, vector<12x16xf32>
    %1 = arith.truncf %0 : vector<12x16xf32> to vector<12x16xbf16>
    %c0_1 = arith.constant 0 : index
    %c0_2 = arith.constant 0 : index
    %2 = vector.load %arg4[%c0_1, %c0_2] : memref<16x16xbf16, #tpu.memory_space<vmem>>, vector<16x16xbf16>
    %cst = arith.constant dense<0.000000e+00> : vector<12x16xf32>
    %3 = tpu.matmul %1, %2, %cst {dimension_numbers = #tpu.dot_dimension_numbers<[1], [0], [0], [1], [0, 0, 1, 1], [], []>} : vector<12x16xbf16>, vector<16x16xbf16>, vector<12x16xf32> -> vector<12x16xf32>
    %c0_3 = arith.constant 0 : index
    %c0_4 = arith.constant 0 : index
    %4 = vector.load %arg2[%c0_3, %c0_4] : memref<12x16xf32, #tpu.memory_space<vmem>>, vector<12x16xf32>
    %5 = arith.truncf %4 : vector<12x16xf32> to vector<12x16xbf16>
    %c0_5 = arith.constant 0 : index
    %c0_6 = arith.constant 0 : index
    %6 = vector.load %arg5[%c0_5, %c0_6] : memref<16x16xbf16, #tpu.memory_space<vmem>>, vector<16x16xbf16>
    %cst_7 = arith.constant dense<0.000000e+00> : vector<12x16xf32>
    %7 = tpu.matmul %5, %6, %cst_7 {dimension_numbers = #tpu.dot_dimension_numbers<[1], [0], [0], [1], [0, 0, 1, 1], [], []>} : vector<12x16xbf16>, vector<16x16xbf16>, vector<12x16xf32> -> vector<12x16xf32>
    %8 = arith.addf %3, %7 : vector<12x16xf32>
    %c0_8 = arith.constant 0 : index
    %c0_9 = arith.constant 0 : index
    %9 = vector.load %arg3[%c0_8, %c0_9] : memref<12x16xf32, #tpu.memory_space<vmem>>, vector<12x16xf32>
    %10 = arith.truncf %9 : vector<12x16xf32> to vector<12x16xbf16>
    %c0_10 = arith.constant 0 : index
    %c0_11 = arith.constant 0 : index
    %11 = vector.load %arg6[%c0_10, %c0_11] : memref<16x16xbf16, #tpu.memory_space<vmem>>, vector<16x16xbf16>
    %cst_12 = arith.constant dense<0.000000e+00> : vector<12x16xf32>
    %12 = tpu.matmul %10, %11, %cst_12 {dimension_numbers = #tpu.dot_dimension_numbers<[1], [0], [0], [1], [0, 0, 1, 1], [], []>} : vector<12x16xbf16>, vector<16x16xbf16>, vector<12x16xf32> -> vector<12x16xf32>
    %13 = arith.addf %8, %12 : vector<12x16xf32>
    %c0_13 = arith.constant 0 : index
    %c0_14 = arith.constant 0 : index
    %14 = vector.load %arg7[%c0_13, %c0_14] : memref<1x16xf32, #tpu.memory_space<vmem>>, vector<1x16xf32>
    %15 = vector.broadcast %14 : vector<1x16xf32> to vector<12x16xf32>
    %16 = arith.addf %13, %15 : vector<12x16xf32>
    %c0_15 = arith.constant 0 : index
    %c0_16 = arith.constant 0 : index
    %17 = vector.load %arg8[%c0_15, %c0_16] : memref<12x16xf32, #tpu.memory_space<vmem>>, vector<12x16xf32>
    tpu.vector_store %arg8[%c0_15, %c0_16], %16 {strides = array<i32>} : memref<12x16xf32, #tpu.memory_space<vmem>>, vector<12x16xf32>,
    return
  }
  func.func @transform_0(%arg0: i32) -> (i32, i32) {
    %c0_i32 = arith.constant 0 : i32
    %c0_i32_0 = arith.constant 0 : i32
    return %arg0, %c0_i32 : i32, i32
  }
  func.func @transform_1(%arg0: i32) -> (i32, i32) {
    %c0_i32 = arith.constant 0 : i32
    %c0_i32_0 = arith.constant 0 : i32
    return %arg0, %c0_i32 : i32, i32
  }
  func.func @transform_2(%arg0: i32) -> (i32, i32) {
    %c0_i32 = arith.constant 0 : i32
    %c0_i32_0 = arith.constant 0 : i32
    return %arg0, %c0_i32 : i32, i32
  }
  func.func @transform_3(%arg0: i32) -> (i32, i32) {
    %c0_i32 = arith.constant 0 : i32
    %c0_i32_0 = arith.constant 0 : i32
    %c0_i32_1 = arith.constant 0 : i32
    return %c0_i32, %c0_i32_0 : i32, i32
  }
  func.func @transform_4(%arg0: i32) -> (i32, i32) {
    %c0_i32 = arith.constant 0 : i32
    %c0_i32_0 = arith.constant 0 : i32
    %c0_i32_1 = arith.constant 0 : i32
    return %c0_i32, %c0_i32_0 : i32, i32
  }
  func.func @transform_5(%arg0: i32) -> (i32, i32) {
    %c0_i32 = arith.constant 0 : i32
    %c0_i32_0 = arith.constant 0 : i32
    %c0_i32_1 = arith.constant 0 : i32
    return %c0_i32, %c0_i32_0 : i32, i32
  }
  func.func @transform_6(%arg0: i32) -> (i32, i32) {
    %c0_i32 = arith.constant 0 : i32
    %c0_i32_0 = arith.constant 0 : i32
    %c0_i32_1 = arith.constant 0 : i32
    return %c0_i32, %c0_i32_0 : i32, i32
  }
  func.func @transform_7(%arg0: i32) -> (i32, i32) {
    %c0_i32 = arith.constant 0 : i32
    %c0_i32_0 = arith.constant 0 : i32
    return %arg0, %c0_i32 : i32, i32
  }
}

module attributes {stable_mosaic.version = 11 : i64} {
  func.func @_ln_res_kernel(%arg0: i32, %arg1: memref<12x16xf32, #tpu.memory_space<vmem>>, %arg2: memref<12x16xf32, #tpu.memory_space<vmem>>, %arg3: memref<1x16xf32, #tpu.memory_space<vmem>>, %arg4: memref<1x16xf32, #tpu.memory_space<vmem>>, %arg5: memref<12x16xf32, #tpu.memory_space<vmem>>) attributes {dimension_semantics = [#tpu.dimension_semantics<parallel>], iteration_bounds = array<i64: 1>, scalar_prefetch = 0 : i64, scratch_operands = 0 : i64, tpu.core_type = #tpu.core_type<tc>, window_params = [{transform_indices = @transform_0, window_bounds = array<i64: 12, 16>}, {transform_indices = @transform_1, window_bounds = array<i64: 12, 16>}, {pipeline_mode = #tpu.pipeline_mode<synchronous>, transform_indices = @transform_2, window_bounds = array<i64: 1, 16>}, {pipeline_mode = #tpu.pipeline_mode<synchronous>, transform_indices = @transform_3, window_bounds = array<i64: 1, 16>}, {transform_indices = @transform_4, window_bounds = array<i64: 12, 16>}]} {
    %c0 = arith.constant 0 : index
    %c0_0 = arith.constant 0 : index
    %0 = vector.load %arg1[%c0, %c0_0] : memref<12x16xf32, #tpu.memory_space<vmem>>, vector<12x16xf32>
    %c0_1 = arith.constant 0 : index
    %c0_2 = arith.constant 0 : index
    %1 = vector.load %arg2[%c0_1, %c0_2] : memref<12x16xf32, #tpu.memory_space<vmem>>, vector<12x16xf32>
    %2 = arith.addf %0, %1 : vector<12x16xf32>
    %cst = arith.constant dense<0.000000e+00> : vector<12xf32>
    %3 = vector.multi_reduction <add>, %2, %cst [1] : vector<12x16xf32> to vector<12xf32>
    %4 = vector.shape_cast %3 : vector<12xf32> to vector<12x1xf32>
    %cst_3 = arith.constant 1.600000e+01 : f32
    %5 = vector.broadcast %cst_3 : f32 to vector<12x1xf32>
    %6 = arith.divf %4, %5 : vector<12x1xf32>
    %7 = vector.broadcast %6 : vector<12x1xf32> to vector<12x16xf32>
    %8 = arith.subf %2, %7 : vector<12x16xf32>
    %9 = arith.mulf %8, %8 : vector<12x16xf32>
    %cst_4 = arith.constant dense<0.000000e+00> : vector<12xf32>
    %10 = vector.multi_reduction <add>, %9, %cst_4 [1] : vector<12x16xf32> to vector<12xf32>
    %11 = vector.shape_cast %10 : vector<12xf32> to vector<12x1xf32>
    %cst_5 = arith.constant 1.600000e+01 : f32
    %12 = vector.broadcast %cst_5 : f32 to vector<12x1xf32>
    %13 = arith.divf %11, %12 : vector<12x1xf32>
    %cst_6 = arith.constant 9.99999974E-6 : f32
    %14 = vector.broadcast %cst_6 : f32 to vector<12x1xf32>
    %15 = arith.addf %13, %14 : vector<12x1xf32>
    %16 = math.rsqrt %15 : vector<12x1xf32>
    %17 = vector.broadcast %16 : vector<12x1xf32> to vector<12x16xf32>
    %18 = arith.mulf %8, %17 : vector<12x16xf32>
    %c0_7 = arith.constant 0 : index
    %c0_8 = arith.constant 0 : index
    %19 = vector.load %arg3[%c0_7, %c0_8] : memref<1x16xf32, #tpu.memory_space<vmem>>, vector<1x16xf32>
    %20 = vector.broadcast %19 : vector<1x16xf32> to vector<12x16xf32>
    %21 = arith.mulf %18, %20 : vector<12x16xf32>
    %c0_9 = arith.constant 0 : index
    %c0_10 = arith.constant 0 : index
    %22 = vector.load %arg4[%c0_9, %c0_10] : memref<1x16xf32, #tpu.memory_space<vmem>>, vector<1x16xf32>
    %23 = vector.broadcast %22 : vector<1x16xf32> to vector<12x16xf32>
    %24 = arith.addf %21, %23 : vector<12x16xf32>
    %c0_11 = arith.constant 0 : index
    %c0_12 = arith.constant 0 : index
    %25 = vector.load %arg5[%c0_11, %c0_12] : memref<12x16xf32, #tpu.memory_space<vmem>>, vector<12x16xf32>
    tpu.vector_store %arg5[%c0_11, %c0_12], %24 {strides = array<i32>} : memref<12x16xf32, #tpu.memory_space<vmem>>, vector<12x16xf32>,
    return
  }
  func.func @transform_0(%arg0: i32) -> (i32, i32) {
    %c0_i32 = arith.constant 0 : i32
    %c0_i32_0 = arith.constant 0 : i32
    return %arg0, %c0_i32 : i32, i32
  }
  func.func @transform_1(%arg0: i32) -> (i32, i32) {
    %c0_i32 = arith.constant 0 : i32
    %c0_i32_0 = arith.constant 0 : i32
    return %arg0, %c0_i32 : i32, i32
  }
  func.func @transform_2(%arg0: i32) -> (i32, i32) {
    %c0_i32 = arith.constant 0 : i32
    %c0_i32_0 = arith.constant 0 : i32
    %c0_i32_1 = arith.constant 0 : i32
    return %c0_i32, %c0_i32_0 : i32, i32
  }
  func.func @transform_3(%arg0: i32) -> (i32, i32) {
    %c0_i32 = arith.constant 0 : i32
    %c0_i32_0 = arith.constant 0 : i32
    %c0_i32_1 = arith.constant 0 : i32
    return %c0_i32, %c0_i32_0 : i32, i32
  }
  func.func @transform_4(%arg0: i32) -> (i32, i32) {
    %c0_i32 = arith.constant 0 : i32
    %c0_i32_0 = arith.constant 0 : i32
    return %arg0, %c0_i32 : i32, i32
  }
}

module attributes {stable_mosaic.version = 11 : i64} {
  func.func @_linear_kernel(%arg0: i32, %arg1: memref<2x16xf32, #tpu.memory_space<vmem>>, %arg2: memref<16x16xbf16, #tpu.memory_space<vmem>>, %arg3: memref<1x16xf32, #tpu.memory_space<vmem>>, %arg4: memref<2x16xf32, #tpu.memory_space<vmem>>) attributes {dimension_semantics = [#tpu.dimension_semantics<parallel>], iteration_bounds = array<i64: 1>, scalar_prefetch = 0 : i64, scratch_operands = 0 : i64, tpu.core_type = #tpu.core_type<tc>, window_params = [{transform_indices = @transform_0, window_bounds = array<i64: 2, 16>}, {pipeline_mode = #tpu.pipeline_mode<synchronous>, transform_indices = @transform_1, window_bounds = array<i64: 16, 16>}, {pipeline_mode = #tpu.pipeline_mode<synchronous>, transform_indices = @transform_2, window_bounds = array<i64: 1, 16>}, {transform_indices = @transform_3, window_bounds = array<i64: 2, 16>}]} {
    %c0 = arith.constant 0 : index
    %c0_0 = arith.constant 0 : index
    %0 = vector.load %arg1[%c0, %c0_0] : memref<2x16xf32, #tpu.memory_space<vmem>>, vector<2x16xf32>
    %cst = arith.constant 0.000000e+00 : f32
    %1 = vector.broadcast %cst : f32 to vector<2x16xf32>
    %2 = arith.maximumf %0, %1 : vector<2x16xf32>
    %3 = arith.truncf %2 : vector<2x16xf32> to vector<2x16xbf16>
    %c0_1 = arith.constant 0 : index
    %c0_2 = arith.constant 0 : index
    %4 = vector.load %arg2[%c0_1, %c0_2] : memref<16x16xbf16, #tpu.memory_space<vmem>>, vector<16x16xbf16>
    %cst_3 = arith.constant dense<0.000000e+00> : vector<2x16xf32>
    %5 = tpu.matmul %3, %4, %cst_3 {dimension_numbers = #tpu.dot_dimension_numbers<[1], [0], [0], [1], [0, 0, 1, 1], [], []>} : vector<2x16xbf16>, vector<16x16xbf16>, vector<2x16xf32> -> vector<2x16xf32>
    %c0_4 = arith.constant 0 : index
    %c0_5 = arith.constant 0 : index
    %6 = vector.load %arg3[%c0_4, %c0_5] : memref<1x16xf32, #tpu.memory_space<vmem>>, vector<1x16xf32>
    %7 = vector.broadcast %6 : vector<1x16xf32> to vector<2x16xf32>
    %8 = arith.addf %5, %7 : vector<2x16xf32>
    %9 = arith.negf %8 : vector<2x16xf32>
    %10 = math.exp %9 : vector<2x16xf32>
    %cst_6 = arith.constant 1.000000e+00 : f32
    %11 = vector.broadcast %cst_6 : f32 to vector<2x16xf32>
    %12 = arith.addf %11, %10 : vector<2x16xf32>
    %13 = arith.divf %11, %12 : vector<2x16xf32>
    %c0_7 = arith.constant 0 : index
    %c0_8 = arith.constant 0 : index
    %14 = vector.load %arg4[%c0_7, %c0_8] : memref<2x16xf32, #tpu.memory_space<vmem>>, vector<2x16xf32>
    tpu.vector_store %arg4[%c0_7, %c0_8], %13 {strides = array<i32>} : memref<2x16xf32, #tpu.memory_space<vmem>>, vector<2x16xf32>,
    return
  }
  func.func @transform_0(%arg0: i32) -> (i32, i32) {
    %c0_i32 = arith.constant 0 : i32
    %c0_i32_0 = arith.constant 0 : i32
    return %arg0, %c0_i32 : i32, i32
  }
  func.func @transform_1(%arg0: i32) -> (i32, i32) {
    %c0_i32 = arith.constant 0 : i32
    %c0_i32_0 = arith.constant 0 : i32
    %c0_i32_1 = arith.constant 0 : i32
    return %c0_i32, %c0_i32_0 : i32, i32
  }
  func.func @transform_2(%arg0: i32) -> (i32, i32) {
    %c0_i32 = arith.constant 0 : i32
    %c0_i32_0 = arith.constant 0 : i32
    %c0_i32_1 = arith.constant 0 : i32
    return %c0_i32, %c0_i32_0 : i32, i32
  }
  func.func @transform_3(%arg0: i32) -> (i32, i32) {
    %c0_i32 = arith.constant 0 : i32
    %c0_i32_0 = arith.constant 0 : i32
    return %arg0, %c0_i32 : i32, i32
  }
}

module attributes {stable_mosaic.version = 11 : i64} {
  func.func @_linear3_kernel(%arg0: i32, %arg1: memref<16x16xf32, #tpu.memory_space<vmem>>, %arg2: memref<16x16xf32, #tpu.memory_space<vmem>>, %arg3: memref<16x16xf32, #tpu.memory_space<vmem>>, %arg4: memref<16x16xbf16, #tpu.memory_space<vmem>>, %arg5: memref<16x16xbf16, #tpu.memory_space<vmem>>, %arg6: memref<16x16xbf16, #tpu.memory_space<vmem>>, %arg7: memref<1x16xf32, #tpu.memory_space<vmem>>, %arg8: memref<16x16xf32, #tpu.memory_space<vmem>>) attributes {dimension_semantics = [#tpu.dimension_semantics<parallel>], iteration_bounds = array<i64: 1>, scalar_prefetch = 0 : i64, scratch_operands = 0 : i64, tpu.core_type = #tpu.core_type<tc>, window_params = [{transform_indices = @transform_0, window_bounds = array<i64: 16, 16>}, {transform_indices = @transform_1, window_bounds = array<i64: 16, 16>}, {transform_indices = @transform_2, window_bounds = array<i64: 16, 16>}, {pipeline_mode = #tpu.pipeline_mode<synchronous>, transform_indices = @transform_3, window_bounds = array<i64: 16, 16>}, {pipeline_mode = #tpu.pipeline_mode<synchronous>, transform_indices = @transform_4, window_bounds = array<i64: 16, 16>}, {pipeline_mode = #tpu.pipeline_mode<synchronous>, transform_indices = @transform_5, window_bounds = array<i64: 16, 16>}, {pipeline_mode = #tpu.pipeline_mode<synchronous>, transform_indices = @transform_6, window_bounds = array<i64: 1, 16>}, {transform_indices = @transform_7, window_bounds = array<i64: 16, 16>}]} {
    %c0 = arith.constant 0 : index
    %c0_0 = arith.constant 0 : index
    %0 = vector.load %arg1[%c0, %c0_0] : memref<16x16xf32, #tpu.memory_space<vmem>>, vector<16x16xf32>
    %1 = arith.truncf %0 : vector<16x16xf32> to vector<16x16xbf16>
    %c0_1 = arith.constant 0 : index
    %c0_2 = arith.constant 0 : index
    %2 = vector.load %arg4[%c0_1, %c0_2] : memref<16x16xbf16, #tpu.memory_space<vmem>>, vector<16x16xbf16>
    %cst = arith.constant dense<0.000000e+00> : vector<16x16xf32>
    %3 = tpu.matmul %1, %2, %cst {dimension_numbers = #tpu.dot_dimension_numbers<[1], [0], [0], [1], [0, 0, 1, 1], [], []>} : vector<16x16xbf16>, vector<16x16xbf16>, vector<16x16xf32> -> vector<16x16xf32>
    %c0_3 = arith.constant 0 : index
    %c0_4 = arith.constant 0 : index
    %4 = vector.load %arg2[%c0_3, %c0_4] : memref<16x16xf32, #tpu.memory_space<vmem>>, vector<16x16xf32>
    %5 = arith.truncf %4 : vector<16x16xf32> to vector<16x16xbf16>
    %c0_5 = arith.constant 0 : index
    %c0_6 = arith.constant 0 : index
    %6 = vector.load %arg5[%c0_5, %c0_6] : memref<16x16xbf16, #tpu.memory_space<vmem>>, vector<16x16xbf16>
    %cst_7 = arith.constant dense<0.000000e+00> : vector<16x16xf32>
    %7 = tpu.matmul %5, %6, %cst_7 {dimension_numbers = #tpu.dot_dimension_numbers<[1], [0], [0], [1], [0, 0, 1, 1], [], []>} : vector<16x16xbf16>, vector<16x16xbf16>, vector<16x16xf32> -> vector<16x16xf32>
    %8 = arith.addf %3, %7 : vector<16x16xf32>
    %c0_8 = arith.constant 0 : index
    %c0_9 = arith.constant 0 : index
    %9 = vector.load %arg3[%c0_8, %c0_9] : memref<16x16xf32, #tpu.memory_space<vmem>>, vector<16x16xf32>
    %10 = arith.truncf %9 : vector<16x16xf32> to vector<16x16xbf16>
    %c0_10 = arith.constant 0 : index
    %c0_11 = arith.constant 0 : index
    %11 = vector.load %arg6[%c0_10, %c0_11] : memref<16x16xbf16, #tpu.memory_space<vmem>>, vector<16x16xbf16>
    %cst_12 = arith.constant dense<0.000000e+00> : vector<16x16xf32>
    %12 = tpu.matmul %10, %11, %cst_12 {dimension_numbers = #tpu.dot_dimension_numbers<[1], [0], [0], [1], [0, 0, 1, 1], [], []>} : vector<16x16xbf16>, vector<16x16xbf16>, vector<16x16xf32> -> vector<16x16xf32>
    %13 = arith.addf %8, %12 : vector<16x16xf32>
    %c0_13 = arith.constant 0 : index
    %c0_14 = arith.constant 0 : index
    %14 = vector.load %arg7[%c0_13, %c0_14] : memref<1x16xf32, #tpu.memory_space<vmem>>, vector<1x16xf32>
    %15 = vector.broadcast %14 : vector<1x16xf32> to vector<16x16xf32>
    %16 = arith.addf %13, %15 : vector<16x16xf32>
    %c0_15 = arith.constant 0 : index
    %c0_16 = arith.constant 0 : index
    %17 = vector.load %arg8[%c0_15, %c0_16] : memref<16x16xf32, #tpu.memory_space<vmem>>, vector<16x16xf32>
    tpu.vector_store %arg8[%c0_15, %c0_16], %16 {strides = array<i32>} : memref<16x16xf32, #tpu.memory_space<vmem>>, vector<16x16xf32>,
    return
  }
  func.func @transform_0(%arg0: i32) -> (i32, i32) {
    %c0_i32 = arith.constant 0 : i32
    %c0_i32_0 = arith.constant 0 : i32
    return %arg0, %c0_i32 : i32, i32
  }
  func.func @transform_1(%arg0: i32) -> (i32, i32) {
    %c0_i32 = arith.constant 0 : i32
    %c0_i32_0 = arith.constant 0 : i32
    return %arg0, %c0_i32 : i32, i32
  }
  func.func @transform_2(%arg0: i32) -> (i32, i32) {
    %c0_i32 = arith.constant 0 : i32
    %c0_i32_0 = arith.constant 0 : i32
    return %arg0, %c0_i32 : i32, i32
  }
  func.func @transform_3(%arg0: i32) -> (i32, i32) {
    %c0_i32 = arith.constant 0 : i32
    %c0_i32_0 = arith.constant 0 : i32
    %c0_i32_1 = arith.constant 0 : i32
    return %c0_i32, %c0_i32_0 : i32, i32
  }
  func.func @transform_4(%arg0: i32) -> (i32, i32) {
    %c0_i32 = arith.constant 0 : i32
    %c0_i32_0 = arith.constant 0 : i32
    %c0_i32_1 = arith.constant 0 : i32
    return %c0_i32, %c0_i32_0 : i32, i32
  }
  func.func @transform_5(%arg0: i32) -> (i32, i32) {
    %c0_i32 = arith.constant 0 : i32
    %c0_i32_0 = arith.constant 0 : i32
    %c0_i32_1 = arith.constant 0 : i32
    return %c0_i32, %c0_i32_0 : i32, i32
  }
  func.func @transform_6(%arg0: i32) -> (i32, i32) {
    %c0_i32 = arith.constant 0 : i32
    %c0_i32_0 = arith.constant 0 : i32
    %c0_i32_1 = arith.constant 0 : i32
    return %c0_i32, %c0_i32_0 : i32, i32
  }
  func.func @transform_7(%arg0: i32) -> (i32, i32) {
    %c0_i32 = arith.constant 0 : i32
    %c0_i32_0 = arith.constant 0 : i32
    return %arg0, %c0_i32 : i32, i32
  }
}

module attributes {stable_mosaic.version = 11 : i64} {
  func.func @_ln_res_kernel(%arg0: i32, %arg1: memref<16x16xf32, #tpu.memory_space<vmem>>, %arg2: memref<16x16xf32, #tpu.memory_space<vmem>>, %arg3: memref<1x16xf32, #tpu.memory_space<vmem>>, %arg4: memref<1x16xf32, #tpu.memory_space<vmem>>, %arg5: memref<16x16xf32, #tpu.memory_space<vmem>>) attributes {dimension_semantics = [#tpu.dimension_semantics<parallel>], iteration_bounds = array<i64: 1>, scalar_prefetch = 0 : i64, scratch_operands = 0 : i64, tpu.core_type = #tpu.core_type<tc>, window_params = [{transform_indices = @transform_0, window_bounds = array<i64: 16, 16>}, {transform_indices = @transform_1, window_bounds = array<i64: 16, 16>}, {pipeline_mode = #tpu.pipeline_mode<synchronous>, transform_indices = @transform_2, window_bounds = array<i64: 1, 16>}, {pipeline_mode = #tpu.pipeline_mode<synchronous>, transform_indices = @transform_3, window_bounds = array<i64: 1, 16>}, {transform_indices = @transform_4, window_bounds = array<i64: 16, 16>}]} {
    %c0 = arith.constant 0 : index
    %c0_0 = arith.constant 0 : index
    %0 = vector.load %arg1[%c0, %c0_0] : memref<16x16xf32, #tpu.memory_space<vmem>>, vector<16x16xf32>
    %c0_1 = arith.constant 0 : index
    %c0_2 = arith.constant 0 : index
    %1 = vector.load %arg2[%c0_1, %c0_2] : memref<16x16xf32, #tpu.memory_space<vmem>>, vector<16x16xf32>
    %2 = arith.addf %0, %1 : vector<16x16xf32>
    %cst = arith.constant dense<0.000000e+00> : vector<16xf32>
    %3 = vector.multi_reduction <add>, %2, %cst [1] : vector<16x16xf32> to vector<16xf32>
    %4 = vector.shape_cast %3 : vector<16xf32> to vector<16x1xf32>
    %cst_3 = arith.constant 1.600000e+01 : f32
    %5 = vector.broadcast %cst_3 : f32 to vector<16x1xf32>
    %6 = arith.divf %4, %5 : vector<16x1xf32>
    %7 = vector.broadcast %6 : vector<16x1xf32> to vector<16x16xf32>
    %8 = arith.subf %2, %7 : vector<16x16xf32>
    %9 = arith.mulf %8, %8 : vector<16x16xf32>
    %cst_4 = arith.constant dense<0.000000e+00> : vector<16xf32>
    %10 = vector.multi_reduction <add>, %9, %cst_4 [1] : vector<16x16xf32> to vector<16xf32>
    %11 = vector.shape_cast %10 : vector<16xf32> to vector<16x1xf32>
    %cst_5 = arith.constant 1.600000e+01 : f32
    %12 = vector.broadcast %cst_5 : f32 to vector<16x1xf32>
    %13 = arith.divf %11, %12 : vector<16x1xf32>
    %cst_6 = arith.constant 9.99999974E-6 : f32
    %14 = vector.broadcast %cst_6 : f32 to vector<16x1xf32>
    %15 = arith.addf %13, %14 : vector<16x1xf32>
    %16 = math.rsqrt %15 : vector<16x1xf32>
    %17 = vector.broadcast %16 : vector<16x1xf32> to vector<16x16xf32>
    %18 = arith.mulf %8, %17 : vector<16x16xf32>
    %c0_7 = arith.constant 0 : index
    %c0_8 = arith.constant 0 : index
    %19 = vector.load %arg3[%c0_7, %c0_8] : memref<1x16xf32, #tpu.memory_space<vmem>>, vector<1x16xf32>
    %20 = vector.broadcast %19 : vector<1x16xf32> to vector<16x16xf32>
    %21 = arith.mulf %18, %20 : vector<16x16xf32>
    %c0_9 = arith.constant 0 : index
    %c0_10 = arith.constant 0 : index
    %22 = vector.load %arg4[%c0_9, %c0_10] : memref<1x16xf32, #tpu.memory_space<vmem>>, vector<1x16xf32>
    %23 = vector.broadcast %22 : vector<1x16xf32> to vector<16x16xf32>
    %24 = arith.addf %21, %23 : vector<16x16xf32>
    %c0_11 = arith.constant 0 : index
    %c0_12 = arith.constant 0 : index
    %25 = vector.load %arg5[%c0_11, %c0_12] : memref<16x16xf32, #tpu.memory_space<vmem>>, vector<16x16xf32>
    tpu.vector_store %arg5[%c0_11, %c0_12], %24 {strides = array<i32>} : memref<16x16xf32, #tpu.memory_space<vmem>>, vector<16x16xf32>,
    return
  }
  func.func @transform_0(%arg0: i32) -> (i32, i32) {
    %c0_i32 = arith.constant 0 : i32
    %c0_i32_0 = arith.constant 0 : i32
    return %arg0, %c0_i32 : i32, i32
  }
  func.func @transform_1(%arg0: i32) -> (i32, i32) {
    %c0_i32 = arith.constant 0 : i32
    %c0_i32_0 = arith.constant 0 : i32
    return %arg0, %c0_i32 : i32, i32
  }
  func.func @transform_2(%arg0: i32) -> (i32, i32) {
    %c0_i32 = arith.constant 0 : i32
    %c0_i32_0 = arith.constant 0 : i32
    %c0_i32_1 = arith.constant 0 : i32
    return %c0_i32, %c0_i32_0 : i32, i32
  }
  func.func @transform_3(%arg0: i32) -> (i32, i32) {
    %c0_i32 = arith.constant 0 : i32
    %c0_i32_0 = arith.constant 0 : i32
    %c0_i32_1 = arith.constant 0 : i32
    return %c0_i32, %c0_i32_0 : i32, i32
  }
  func.func @transform_4(%arg0: i32) -> (i32, i32) {
    %c0_i32 = arith.constant 0 : i32
    %c0_i32_0 = arith.constant 0 : i32
    return %arg0, %c0_i32 : i32, i32
  }
}

module attributes {stable_mosaic.version = 11 : i64} {
  func.func @_linear_kernel(%arg0: i32, %arg1: memref<14x16xf32, #tpu.memory_space<vmem>>, %arg2: memref<14x16xf32, #tpu.memory_space<vmem>>, %arg3: memref<16x16xbf16, #tpu.memory_space<vmem>>, %arg4: memref<1x16xf32, #tpu.memory_space<vmem>>, %arg5: memref<14x16xf32, #tpu.memory_space<vmem>>) attributes {dimension_semantics = [#tpu.dimension_semantics<parallel>], iteration_bounds = array<i64: 1>, scalar_prefetch = 0 : i64, scratch_operands = 0 : i64, tpu.core_type = #tpu.core_type<tc>, window_params = [{transform_indices = @transform_0, window_bounds = array<i64: 14, 16>}, {transform_indices = @transform_1, window_bounds = array<i64: 14, 16>}, {pipeline_mode = #tpu.pipeline_mode<synchronous>, transform_indices = @transform_2, window_bounds = array<i64: 16, 16>}, {pipeline_mode = #tpu.pipeline_mode<synchronous>, transform_indices = @transform_3, window_bounds = array<i64: 1, 16>}, {transform_indices = @transform_4, window_bounds = array<i64: 14, 16>}]} {
    %c0 = arith.constant 0 : index
    %c0_0 = arith.constant 0 : index
    %0 = vector.load %arg1[%c0, %c0_0] : memref<14x16xf32, #tpu.memory_space<vmem>>, vector<14x16xf32>
    %c0_1 = arith.constant 0 : index
    %c0_2 = arith.constant 0 : index
    %1 = vector.load %arg2[%c0_1, %c0_2] : memref<14x16xf32, #tpu.memory_space<vmem>>, vector<14x16xf32>
    %2 = arith.addf %0, %1 : vector<14x16xf32>
    %3 = arith.truncf %2 : vector<14x16xf32> to vector<14x16xbf16>
    %c0_3 = arith.constant 0 : index
    %c0_4 = arith.constant 0 : index
    %4 = vector.load %arg3[%c0_3, %c0_4] : memref<16x16xbf16, #tpu.memory_space<vmem>>, vector<16x16xbf16>
    %cst = arith.constant dense<0.000000e+00> : vector<14x16xf32>
    %5 = tpu.matmul %3, %4, %cst {dimension_numbers = #tpu.dot_dimension_numbers<[1], [0], [0], [1], [0, 0, 1, 1], [], []>} : vector<14x16xbf16>, vector<16x16xbf16>, vector<14x16xf32> -> vector<14x16xf32>
    %c0_5 = arith.constant 0 : index
    %c0_6 = arith.constant 0 : index
    %6 = vector.load %arg4[%c0_5, %c0_6] : memref<1x16xf32, #tpu.memory_space<vmem>>, vector<1x16xf32>
    %7 = vector.broadcast %6 : vector<1x16xf32> to vector<14x16xf32>
    %8 = arith.addf %5, %7 : vector<14x16xf32>
    %c0_7 = arith.constant 0 : index
    %c0_8 = arith.constant 0 : index
    %9 = vector.load %arg5[%c0_7, %c0_8] : memref<14x16xf32, #tpu.memory_space<vmem>>, vector<14x16xf32>
    tpu.vector_store %arg5[%c0_7, %c0_8], %8 {strides = array<i32>} : memref<14x16xf32, #tpu.memory_space<vmem>>, vector<14x16xf32>,
    return
  }
  func.func @transform_0(%arg0: i32) -> (i32, i32) {
    %c0_i32 = arith.constant 0 : i32
    %c0_i32_0 = arith.constant 0 : i32
    return %arg0, %c0_i32 : i32, i32
  }
  func.func @transform_1(%arg0: i32) -> (i32, i32) {
    %c0_i32 = arith.constant 0 : i32
    %c0_i32_0 = arith.constant 0 : i32
    return %arg0, %c0_i32 : i32, i32
  }
  func.func @transform_2(%arg0: i32) -> (i32, i32) {
    %c0_i32 = arith.constant 0 : i32
    %c0_i32_0 = arith.constant 0 : i32
    %c0_i32_1 = arith.constant 0 : i32
    return %c0_i32, %c0_i32_0 : i32, i32
  }
  func.func @transform_3(%arg0: i32) -> (i32, i32) {
    %c0_i32 = arith.constant 0 : i32
    %c0_i32_0 = arith.constant 0 : i32
    %c0_i32_1 = arith.constant 0 : i32
    return %c0_i32, %c0_i32_0 : i32, i32
  }
  func.func @transform_4(%arg0: i32) -> (i32, i32) {
    %c0_i32 = arith.constant 0 : i32
    %c0_i32_0 = arith.constant 0 : i32
    return %arg0, %c0_i32 : i32, i32
  }
}

module attributes {stable_mosaic.version = 11 : i64} {
  func.func @_intra_attn_kernel(%arg0: i32, %arg1: memref<1x2x8x8xf32, #tpu.memory_space<vmem>>, %arg2: memref<1x2x9x8xf32, #tpu.memory_space<vmem>>, %arg3: memref<1x2x9x8xf32, #tpu.memory_space<vmem>>, %arg4: memref<1x2x6x8xf32, #tpu.memory_space<vmem>>, %arg5: memref<1x2x6x8xf32, #tpu.memory_space<vmem>>, %arg6: memref<1x2x6x8xf32, #tpu.memory_space<vmem>>, %arg7: memref<1x2x7x8xf32, #tpu.memory_space<vmem>>, %arg8: memref<1x2x8x8xf32, #tpu.memory_space<vmem>>, %arg9: memref<1x2x8x8xf32, #tpu.memory_space<vmem>>, %arg10: memref<1x2x1x8xf32, #tpu.memory_space<vmem>>, %arg11: memref<1x2x1x8xf32, #tpu.memory_space<vmem>>, %arg12: memref<1x1x9xf32, #tpu.memory_space<vmem>>, %arg13: memref<1x1x6xf32, #tpu.memory_space<vmem>>, %arg14: memref<1x1x8xf32, #tpu.memory_space<vmem>>, %arg15: memref<1x2x8x8xf32, #tpu.memory_space<vmem>>, %arg16: memref<1x2x6x8xf32, #tpu.memory_space<vmem>>, %arg17: memref<1x2x7x8xf32, #tpu.memory_space<vmem>>) attributes {dimension_semantics = [#tpu.dimension_semantics<parallel>], iteration_bounds = array<i64: 2>, scalar_prefetch = 0 : i64, scratch_operands = 0 : i64, tpu.core_type = #tpu.core_type<tc>, window_params = [{transform_indices = @transform_0, window_bounds = array<i64: 1, 2, 8, 8>}, {transform_indices = @transform_1, window_bounds = array<i64: 1, 2, 9, 8>}, {transform_indices = @transform_2, window_bounds = array<i64: 1, 2, 9, 8>}, {transform_indices = @transform_3, window_bounds = array<i64: 1, 2, 6, 8>}, {transform_indices = @transform_4, window_bounds = array<i64: 1, 2, 6, 8>}, {transform_indices = @transform_5, window_bounds = array<i64: 1, 2, 6, 8>}, {transform_indices = @transform_6, window_bounds = array<i64: 1, 2, 7, 8>}, {transform_indices = @transform_7, window_bounds = array<i64: 1, 2, 8, 8>}, {transform_indices = @transform_8, window_bounds = array<i64: 1, 2, 8, 8>}, {transform_indices = @transform_9, window_bounds = array<i64: 1, 2, 1, 8>}, {transform_indices = @transform_10, window_bounds = array<i64: 1, 2, 1, 8>}, {transform_indices = @transform_11, window_bounds = array<i64: 1, 1, 9>}, {transform_indices = @transform_12, window_bounds = array<i64: 1, 1, 6>}, {transform_indices = @transform_13, window_bounds = array<i64: 1, 1, 8>}, {transform_indices = @transform_14, window_bounds = array<i64: 1, 2, 8, 8>}, {transform_indices = @transform_15, window_bounds = array<i64: 1, 2, 6, 8>}, {transform_indices = @transform_16, window_bounds = array<i64: 1, 2, 7, 8>}]} {
    %c0 = arith.constant 0 : index
    %c0_0 = arith.constant 0 : index
    %c0_1 = arith.constant 0 : index
    %c0_2 = arith.constant 0 : index
    %0 = vector.load %arg10[%c0, %c0_0, %c0_1, %c0_2] : memref<1x2x1x8xf32, #tpu.memory_space<vmem>>, vector<1x2x1x8xf32>
    %1 = vector.shape_cast %0 : vector<1x2x1x8xf32> to vector<2x1x8xf32>
    %cst = arith.constant 1.000000e+00 : f32
    %2 = vector.broadcast %cst : f32 to vector<2x1x8xf32>
    %3 = arith.addf %2, %1 : vector<2x1x8xf32>
    %c0_3 = arith.constant 0 : index
    %c0_4 = arith.constant 0 : index
    %c0_5 = arith.constant 0 : index
    %c0_6 = arith.constant 0 : index
    %4 = vector.load %arg11[%c0_3, %c0_4, %c0_5, %c0_6] : memref<1x2x1x8xf32, #tpu.memory_space<vmem>>, vector<1x2x1x8xf32>
    %5 = vector.shape_cast %4 : vector<1x2x1x8xf32> to vector<2x1x8xf32>
    %cst_7 = arith.constant 1.000000e+00 : f32
    %6 = vector.broadcast %cst_7 : f32 to vector<2x1x8xf32>
    %7 = arith.addf %6, %5 : vector<2x1x8xf32>
    %c0_8 = arith.constant 0 : index
    %c0_9 = arith.constant 0 : index
    %c0_10 = arith.constant 0 : index
    %c0_11 = arith.constant 0 : index
    %8 = vector.load %arg1[%c0_8, %c0_9, %c0_10, %c0_11] : memref<1x2x8x8xf32, #tpu.memory_space<vmem>>, vector<1x2x8x8xf32>
    %9 = vector.shape_cast %8 : vector<1x2x8x8xf32> to vector<2x8x8xf32>
    %10 = vector.broadcast %3 : vector<2x1x8xf32> to vector<2x8x8xf32>
    %11 = arith.mulf %10, %9 : vector<2x8x8xf32>
    %c0_12 = arith.constant 0 : index
    %c0_13 = arith.constant 0 : index
    %c0_14 = arith.constant 0 : index
    %c0_15 = arith.constant 0 : index
    %12 = vector.load %arg2[%c0_12, %c0_13, %c0_14, %c0_15] : memref<1x2x9x8xf32, #tpu.memory_space<vmem>>, vector<1x2x9x8xf32>
    %13 = vector.shape_cast %12 : vector<1x2x9x8xf32> to vector<2x9x8xf32>
    %14 = vector.broadcast %3 : vector<2x1x8xf32> to vector<2x9x8xf32>
    %15 = arith.mulf %14, %13 : vector<2x9x8xf32>
    %c0_16 = arith.constant 0 : index
    %c0_17 = arith.constant 0 : index
    %c0_18 = arith.constant 0 : index
    %c0_19 = arith.constant 0 : index
    %16 = vector.load %arg3[%c0_16, %c0_17, %c0_18, %c0_19] : memref<1x2x9x8xf32, #tpu.memory_space<vmem>>, vector<1x2x9x8xf32>
    %17 = vector.shape_cast %16 : vector<1x2x9x8xf32> to vector<2x9x8xf32>
    %c0_20 = arith.constant 0 : index
    %c0_21 = arith.constant 0 : index
    %c0_22 = arith.constant 0 : index
    %18 = vector.load %arg12[%c0_20, %c0_21, %c0_22] : memref<1x1x9xf32, #tpu.memory_space<vmem>>, vector<1x1x9xf32>
    %19 = vector.shape_cast %18 : vector<1x1x9xf32> to vector<1x9xf32>
    %20 = arith.truncf %11 : vector<2x8x8xf32> to vector<2x8x8xbf16>
    %21 = arith.truncf %15 : vector<2x9x8xf32> to vector<2x9x8xbf16>
    %cst_23 = arith.constant dense<0.000000e+00> : vector<2x8x9xf32>
    %22 = tpu.matmul %20, %21, %cst_23 {dimension_numbers = #tpu.dot_dimension_numbers<[2], [2], [1], [1], [0, 0, 0, 1, 1, 1], [0], [0]>} : vector<2x8x8xbf16>, vector<2x9x8xbf16>, vector<2x8x9xf32> -> vector<2x8x9xf32>
    %23 = vector.shape_cast %19 : vector<1x9xf32> to vector<1x1x9xf32>
    %cst_24 = arith.constant 0.000000e+00 : f32
    %24 = vector.broadcast %cst_24 : f32 to vector<1x1x9xf32>
    %25 = arith.cmpf oeq, %23, %24 : vector<1x1x9xf32>
    %cst_25 = arith.constant -1.000000e+09 : f32
    %26 = vector.shape_cast %25 : vector<1x1x9xi1> to vector<1x1x9xi1>
    %27 = vector.broadcast %26 : vector<1x1x9xi1> to vector<2x8x9xi1>
    %28 = vector.broadcast %cst_25 : f32 to vector<2x8x9xf32>
    %29 = arith.select %27, %28, %22 : vector<2x8x9xi1>, vector<2x8x9xf32>
    %cst_26 = arith.constant 0.353553385 : f32
    %30 = vector.broadcast %cst_26 : f32 to vector<2x8x9xf32>
    %31 = arith.mulf %29, %30 : vector<2x8x9xf32>
    %cst_27 = arith.constant dense<0xFF800000> : vector<2x8xf32>
    %32 = vector.multi_reduction <maximumf>, %31, %cst_27 [2] : vector<2x8x9xf32> to vector<2x8xf32>
    %33 = vector.shape_cast %32 : vector<2x8xf32> to vector<2x8x1xf32>
    %34 = vector.broadcast %33 : vector<2x8x1xf32> to vector<2x8x9xf32>
    %35 = arith.subf %31, %34 : vector<2x8x9xf32>
    %36 = math.exp %35 : vector<2x8x9xf32>
    %cst_28 = arith.constant dense<0.000000e+00> : vector<2x8xf32>
    %37 = vector.multi_reduction <add>, %36, %cst_28 [2] : vector<2x8x9xf32> to vector<2x8xf32>
    %38 = vector.shape_cast %37 : vector<2x8xf32> to vector<2x8x1xf32>
    %39 = tpu.reciprocal %38 {approx = true} : vector<2x8x1xf32> -> vector<2x8x1xf32>
    %40 = vector.broadcast %39 : vector<2x8x1xf32> to vector<2x8x9xf32>
    %41 = arith.mulf %36, %40 : vector<2x8x9xf32>
    %42 = arith.truncf %41 : vector<2x8x9xf32> to vector<2x8x9xbf16>
    %43 = arith.truncf %17 : vector<2x9x8xf32> to vector<2x9x8xbf16>
    %cst_29 = arith.constant dense<0.000000e+00> : vector<2x8x8xf32>
    %44 = tpu.matmul %42, %43, %cst_29 {dimension_numbers = #tpu.dot_dimension_numbers<[2], [1], [1], [2], [0, 0, 0, 1, 1, 2], [0], [0]>} : vector<2x8x9xbf16>, vector<2x9x8xbf16>, vector<2x8x8xf32> -> vector<2x8x8xf32>
    %c0_30 = arith.constant 0 : index
    %c0_31 = arith.constant 0 : index
    %c0_32 = arith.constant 0 : index
    %c0_33 = arith.constant 0 : index
    %45 = vector.load %arg15[%c0_30, %c0_31, %c0_32, %c0_33] : memref<1x2x8x8xf32, #tpu.memory_space<vmem>>, vector<1x2x8x8xf32>
    %46 = vector.shape_cast %45 : vector<1x2x8x8xf32> to vector<2x8x8xf32>
    %47 = vector.shape_cast %44 : vector<2x8x8xf32> to vector<1x2x8x8xf32>
    tpu.vector_store %arg15[%c0_30, %c0_31, %c0_32, %c0_33], %47 {strides = array<i32>} : memref<1x2x8x8xf32, #tpu.memory_space<vmem>>, vector<1x2x8x8xf32>,
    %c0_34 = arith.constant 0 : index
    %c0_35 = arith.constant 0 : index
    %c0_36 = arith.constant 0 : index
    %c0_37 = arith.constant 0 : index
    %48 = vector.load %arg4[%c0_34, %c0_35, %c0_36, %c0_37] : memref<1x2x6x8xf32, #tpu.memory_space<vmem>>, vector<1x2x6x8xf32>
    %49 = vector.shape_cast %48 : vector<1x2x6x8xf32> to vector<2x6x8xf32>
    %50 = vector.broadcast %7 : vector<2x1x8xf32> to vector<2x6x8xf32>
    %51 = arith.mulf %50, %49 : vector<2x6x8xf32>
    %c0_38 = arith.constant 0 : index
    %c0_39 = arith.constant 0 : index
    %c0_40 = arith.constant 0 : index
    %c0_41 = arith.constant 0 : index
    %52 = vector.load %arg5[%c0_38, %c0_39, %c0_40, %c0_41] : memref<1x2x6x8xf32, #tpu.memory_space<vmem>>, vector<1x2x6x8xf32>
    %53 = vector.shape_cast %52 : vector<1x2x6x8xf32> to vector<2x6x8xf32>
    %54 = vector.broadcast %7 : vector<2x1x8xf32> to vector<2x6x8xf32>
    %55 = arith.mulf %54, %53 : vector<2x6x8xf32>
    %c0_42 = arith.constant 0 : index
    %c0_43 = arith.constant 0 : index
    %c0_44 = arith.constant 0 : index
    %c0_45 = arith.constant 0 : index
    %56 = vector.load %arg6[%c0_42, %c0_43, %c0_44, %c0_45] : memref<1x2x6x8xf32, #tpu.memory_space<vmem>>, vector<1x2x6x8xf32>
    %57 = vector.shape_cast %56 : vector<1x2x6x8xf32> to vector<2x6x8xf32>
    %c0_46 = arith.constant 0 : index
    %c0_47 = arith.constant 0 : index
    %c0_48 = arith.constant 0 : index
    %58 = vector.load %arg13[%c0_46, %c0_47, %c0_48] : memref<1x1x6xf32, #tpu.memory_space<vmem>>, vector<1x1x6xf32>
    %59 = vector.shape_cast %58 : vector<1x1x6xf32> to vector<1x6xf32>
    %60 = arith.truncf %51 : vector<2x6x8xf32> to vector<2x6x8xbf16>
    %61 = arith.truncf %55 : vector<2x6x8xf32> to vector<2x6x8xbf16>
    %cst_49 = arith.constant dense<0.000000e+00> : vector<2x6x6xf32>
    %62 = tpu.matmul %60, %61, %cst_49 {dimension_numbers = #tpu.dot_dimension_numbers<[2], [2], [1], [1], [0, 0, 0, 1, 1, 1], [0], [0]>} : vector<2x6x8xbf16>, vector<2x6x8xbf16>, vector<2x6x6xf32> -> vector<2x6x6xf32>
    %63 = vector.shape_cast %59 : vector<1x6xf32> to vector<1x1x6xf32>
    %cst_50 = arith.constant 0.000000e+00 : f32
    %64 = vector.broadcast %cst_50 : f32 to vector<1x1x6xf32>
    %65 = arith.cmpf oeq, %63, %64 : vector<1x1x6xf32>
    %cst_51 = arith.constant -1.000000e+09 : f32
    %66 = vector.shape_cast %65 : vector<1x1x6xi1> to vector<1x1x6xi1>
    %67 = vector.broadcast %66 : vector<1x1x6xi1> to vector<2x6x6xi1>
    %68 = vector.broadcast %cst_51 : f32 to vector<2x6x6xf32>
    %69 = arith.select %67, %68, %62 : vector<2x6x6xi1>, vector<2x6x6xf32>
    %cst_52 = arith.constant 0.353553385 : f32
    %70 = vector.broadcast %cst_52 : f32 to vector<2x6x6xf32>
    %71 = arith.mulf %69, %70 : vector<2x6x6xf32>
    %cst_53 = arith.constant dense<0xFF800000> : vector<2x6xf32>
    %72 = vector.multi_reduction <maximumf>, %71, %cst_53 [2] : vector<2x6x6xf32> to vector<2x6xf32>
    %73 = vector.shape_cast %72 : vector<2x6xf32> to vector<2x6x1xf32>
    %74 = vector.broadcast %73 : vector<2x6x1xf32> to vector<2x6x6xf32>
    %75 = arith.subf %71, %74 : vector<2x6x6xf32>
    %76 = math.exp %75 : vector<2x6x6xf32>
    %cst_54 = arith.constant dense<0.000000e+00> : vector<2x6xf32>
    %77 = vector.multi_reduction <add>, %76, %cst_54 [2] : vector<2x6x6xf32> to vector<2x6xf32>
    %78 = vector.shape_cast %77 : vector<2x6xf32> to vector<2x6x1xf32>
    %79 = tpu.reciprocal %78 {approx = true} : vector<2x6x1xf32> -> vector<2x6x1xf32>
    %80 = vector.broadcast %79 : vector<2x6x1xf32> to vector<2x6x6xf32>
    %81 = arith.mulf %76, %80 : vector<2x6x6xf32>
    %82 = arith.truncf %81 : vector<2x6x6xf32> to vector<2x6x6xbf16>
    %83 = arith.truncf %57 : vector<2x6x8xf32> to vector<2x6x8xbf16>
    %cst_55 = arith.constant dense<0.000000e+00> : vector<2x6x8xf32>
    %84 = tpu.matmul %82, %83, %cst_55 {dimension_numbers = #tpu.dot_dimension_numbers<[2], [1], [1], [2], [0, 0, 0, 1, 1, 2], [0], [0]>} : vector<2x6x6xbf16>, vector<2x6x8xbf16>, vector<2x6x8xf32> -> vector<2x6x8xf32>
    %c0_56 = arith.constant 0 : index
    %c0_57 = arith.constant 0 : index
    %c0_58 = arith.constant 0 : index
    %c0_59 = arith.constant 0 : index
    %85 = vector.load %arg16[%c0_56, %c0_57, %c0_58, %c0_59] : memref<1x2x6x8xf32, #tpu.memory_space<vmem>>, vector<1x2x6x8xf32>
    %86 = vector.shape_cast %85 : vector<1x2x6x8xf32> to vector<2x6x8xf32>
    %87 = vector.shape_cast %84 : vector<2x6x8xf32> to vector<1x2x6x8xf32>
    tpu.vector_store %arg16[%c0_56, %c0_57, %c0_58, %c0_59], %87 {strides = array<i32>} : memref<1x2x6x8xf32, #tpu.memory_space<vmem>>, vector<1x2x6x8xf32>,
    %c0_60 = arith.constant 0 : index
    %c0_61 = arith.constant 0 : index
    %c0_62 = arith.constant 0 : index
    %c0_63 = arith.constant 0 : index
    %88 = vector.load %arg7[%c0_60, %c0_61, %c0_62, %c0_63] : memref<1x2x7x8xf32, #tpu.memory_space<vmem>>, vector<1x2x7x8xf32>
    %89 = vector.shape_cast %88 : vector<1x2x7x8xf32> to vector<2x7x8xf32>
    %c0_64 = arith.constant 0 : index
    %c0_65 = arith.constant 0 : index
    %c0_66 = arith.constant 0 : index
    %c0_67 = arith.constant 0 : index
    %90 = vector.load %arg8[%c0_64, %c0_65, %c0_66, %c0_67] : memref<1x2x8x8xf32, #tpu.memory_space<vmem>>, vector<1x2x8x8xf32>
    %91 = vector.shape_cast %90 : vector<1x2x8x8xf32> to vector<2x8x8xf32>
    %c0_68 = arith.constant 0 : index
    %c0_69 = arith.constant 0 : index
    %c0_70 = arith.constant 0 : index
    %c0_71 = arith.constant 0 : index
    %92 = vector.load %arg9[%c0_68, %c0_69, %c0_70, %c0_71] : memref<1x2x8x8xf32, #tpu.memory_space<vmem>>, vector<1x2x8x8xf32>
    %93 = vector.shape_cast %92 : vector<1x2x8x8xf32> to vector<2x8x8xf32>
    %c0_72 = arith.constant 0 : index
    %c0_73 = arith.constant 0 : index
    %c0_74 = arith.constant 0 : index
    %94 = vector.load %arg14[%c0_72, %c0_73, %c0_74] : memref<1x1x8xf32, #tpu.memory_space<vmem>>, vector<1x1x8xf32>
    %95 = vector.shape_cast %94 : vector<1x1x8xf32> to vector<1x8xf32>
    %96 = arith.truncf %89 : vector<2x7x8xf32> to vector<2x7x8xbf16>
    %97 = arith.truncf %91 : vector<2x8x8xf32> to vector<2x8x8xbf16>
    %cst_75 = arith.constant dense<0.000000e+00> : vector<2x7x8xf32>
    %98 = tpu.matmul %96, %97, %cst_75 {dimension_numbers = #tpu.dot_dimension_numbers<[2], [2], [1], [1], [0, 0, 0, 1, 1, 1], [0], [0]>} : vector<2x7x8xbf16>, vector<2x8x8xbf16>, vector<2x7x8xf32> -> vector<2x7x8xf32>
    %99 = vector.shape_cast %95 : vector<1x8xf32> to vector<1x1x8xf32>
    %cst_76 = arith.constant 0.000000e+00 : f32
    %100 = vector.broadcast %cst_76 : f32 to vector<1x1x8xf32>
    %101 = arith.cmpf oeq, %99, %100 : vector<1x1x8xf32>
    %cst_77 = arith.constant -1.000000e+09 : f32
    %102 = vector.shape_cast %101 : vector<1x1x8xi1> to vector<1x1x8xi1>
    %103 = vector.broadcast %102 : vector<1x1x8xi1> to vector<2x7x8xi1>
    %104 = vector.broadcast %cst_77 : f32 to vector<2x7x8xf32>
    %105 = arith.select %103, %104, %98 : vector<2x7x8xi1>, vector<2x7x8xf32>
    %cst_78 = arith.constant 0.353553385 : f32
    %106 = vector.broadcast %cst_78 : f32 to vector<2x7x8xf32>
    %107 = arith.mulf %105, %106 : vector<2x7x8xf32>
    %cst_79 = arith.constant dense<0xFF800000> : vector<2x7xf32>
    %108 = vector.multi_reduction <maximumf>, %107, %cst_79 [2] : vector<2x7x8xf32> to vector<2x7xf32>
    %109 = vector.shape_cast %108 : vector<2x7xf32> to vector<2x7x1xf32>
    %110 = vector.broadcast %109 : vector<2x7x1xf32> to vector<2x7x8xf32>
    %111 = arith.subf %107, %110 : vector<2x7x8xf32>
    %112 = math.exp %111 : vector<2x7x8xf32>
    %cst_80 = arith.constant dense<0.000000e+00> : vector<2x7xf32>
    %113 = vector.multi_reduction <add>, %112, %cst_80 [2] : vector<2x7x8xf32> to vector<2x7xf32>
    %114 = vector.shape_cast %113 : vector<2x7xf32> to vector<2x7x1xf32>
    %115 = tpu.reciprocal %114 {approx = true} : vector<2x7x1xf32> -> vector<2x7x1xf32>
    %116 = vector.broadcast %115 : vector<2x7x1xf32> to vector<2x7x8xf32>
    %117 = arith.mulf %112, %116 : vector<2x7x8xf32>
    %118 = arith.truncf %117 : vector<2x7x8xf32> to vector<2x7x8xbf16>
    %119 = arith.truncf %93 : vector<2x8x8xf32> to vector<2x8x8xbf16>
    %cst_81 = arith.constant dense<0.000000e+00> : vector<2x7x8xf32>
    %120 = tpu.matmul %118, %119, %cst_81 {dimension_numbers = #tpu.dot_dimension_numbers<[2], [1], [1], [2], [0, 0, 0, 1, 1, 2], [0], [0]>} : vector<2x7x8xbf16>, vector<2x8x8xbf16>, vector<2x7x8xf32> -> vector<2x7x8xf32>
    %c0_82 = arith.constant 0 : index
    %c0_83 = arith.constant 0 : index
    %c0_84 = arith.constant 0 : index
    %c0_85 = arith.constant 0 : index
    %121 = vector.load %arg17[%c0_82, %c0_83, %c0_84, %c0_85] : memref<1x2x7x8xf32, #tpu.memory_space<vmem>>, vector<1x2x7x8xf32>
    %122 = vector.shape_cast %121 : vector<1x2x7x8xf32> to vector<2x7x8xf32>
    %123 = vector.shape_cast %120 : vector<2x7x8xf32> to vector<1x2x7x8xf32>
    tpu.vector_store %arg17[%c0_82, %c0_83, %c0_84, %c0_85], %123 {strides = array<i32>} : memref<1x2x7x8xf32, #tpu.memory_space<vmem>>, vector<1x2x7x8xf32>,
    return
  }
  func.func @transform_0(%arg0: i32) -> (i32, i32, i32, i32) {
    %c0_i32 = arith.constant 0 : i32
    %c0_i32_0 = arith.constant 0 : i32
    %c0_i32_1 = arith.constant 0 : i32
    %c0_i32_2 = arith.constant 0 : i32
    return %arg0, %c0_i32, %c0_i32_0, %c0_i32_1 : i32, i32, i32, i32
  }
  func.func @transform_1(%arg0: i32) -> (i32, i32, i32, i32) {
    %c0_i32 = arith.constant 0 : i32
    %c0_i32_0 = arith.constant 0 : i32
    %c0_i32_1 = arith.constant 0 : i32
    %c0_i32_2 = arith.constant 0 : i32
    return %arg0, %c0_i32, %c0_i32_0, %c0_i32_1 : i32, i32, i32, i32
  }
  func.func @transform_2(%arg0: i32) -> (i32, i32, i32, i32) {
    %c0_i32 = arith.constant 0 : i32
    %c0_i32_0 = arith.constant 0 : i32
    %c0_i32_1 = arith.constant 0 : i32
    %c0_i32_2 = arith.constant 0 : i32
    return %arg0, %c0_i32, %c0_i32_0, %c0_i32_1 : i32, i32, i32, i32
  }
  func.func @transform_3(%arg0: i32) -> (i32, i32, i32, i32) {
    %c0_i32 = arith.constant 0 : i32
    %c0_i32_0 = arith.constant 0 : i32
    %c0_i32_1 = arith.constant 0 : i32
    %c0_i32_2 = arith.constant 0 : i32
    return %arg0, %c0_i32, %c0_i32_0, %c0_i32_1 : i32, i32, i32, i32
  }
  func.func @transform_4(%arg0: i32) -> (i32, i32, i32, i32) {
    %c0_i32 = arith.constant 0 : i32
    %c0_i32_0 = arith.constant 0 : i32
    %c0_i32_1 = arith.constant 0 : i32
    %c0_i32_2 = arith.constant 0 : i32
    return %arg0, %c0_i32, %c0_i32_0, %c0_i32_1 : i32, i32, i32, i32
  }
  func.func @transform_5(%arg0: i32) -> (i32, i32, i32, i32) {
    %c0_i32 = arith.constant 0 : i32
    %c0_i32_0 = arith.constant 0 : i32
    %c0_i32_1 = arith.constant 0 : i32
    %c0_i32_2 = arith.constant 0 : i32
    return %arg0, %c0_i32, %c0_i32_0, %c0_i32_1 : i32, i32, i32, i32
  }
  func.func @transform_6(%arg0: i32) -> (i32, i32, i32, i32) {
    %c0_i32 = arith.constant 0 : i32
    %c0_i32_0 = arith.constant 0 : i32
    %c0_i32_1 = arith.constant 0 : i32
    %c0_i32_2 = arith.constant 0 : i32
    return %arg0, %c0_i32, %c0_i32_0, %c0_i32_1 : i32, i32, i32, i32
  }
  func.func @transform_7(%arg0: i32) -> (i32, i32, i32, i32) {
    %c0_i32 = arith.constant 0 : i32
    %c0_i32_0 = arith.constant 0 : i32
    %c0_i32_1 = arith.constant 0 : i32
    %c0_i32_2 = arith.constant 0 : i32
    return %arg0, %c0_i32, %c0_i32_0, %c0_i32_1 : i32, i32, i32, i32
  }
  func.func @transform_8(%arg0: i32) -> (i32, i32, i32, i32) {
    %c0_i32 = arith.constant 0 : i32
    %c0_i32_0 = arith.constant 0 : i32
    %c0_i32_1 = arith.constant 0 : i32
    %c0_i32_2 = arith.constant 0 : i32
    return %arg0, %c0_i32, %c0_i32_0, %c0_i32_1 : i32, i32, i32, i32
  }
  func.func @transform_9(%arg0: i32) -> (i32, i32, i32, i32) {
    %c0_i32 = arith.constant 0 : i32
    %c0_i32_0 = arith.constant 0 : i32
    %c0_i32_1 = arith.constant 0 : i32
    %c0_i32_2 = arith.constant 0 : i32
    return %arg0, %c0_i32, %c0_i32_0, %c0_i32_1 : i32, i32, i32, i32
  }
  func.func @transform_10(%arg0: i32) -> (i32, i32, i32, i32) {
    %c0_i32 = arith.constant 0 : i32
    %c0_i32_0 = arith.constant 0 : i32
    %c0_i32_1 = arith.constant 0 : i32
    %c0_i32_2 = arith.constant 0 : i32
    return %arg0, %c0_i32, %c0_i32_0, %c0_i32_1 : i32, i32, i32, i32
  }
  func.func @transform_11(%arg0: i32) -> (i32, i32, i32) {
    %c0_i32 = arith.constant 0 : i32
    %c0_i32_0 = arith.constant 0 : i32
    %c0_i32_1 = arith.constant 0 : i32
    return %arg0, %c0_i32, %c0_i32_0 : i32, i32, i32
  }
  func.func @transform_12(%arg0: i32) -> (i32, i32, i32) {
    %c0_i32 = arith.constant 0 : i32
    %c0_i32_0 = arith.constant 0 : i32
    %c0_i32_1 = arith.constant 0 : i32
    return %arg0, %c0_i32, %c0_i32_0 : i32, i32, i32
  }
  func.func @transform_13(%arg0: i32) -> (i32, i32, i32) {
    %c0_i32 = arith.constant 0 : i32
    %c0_i32_0 = arith.constant 0 : i32
    %c0_i32_1 = arith.constant 0 : i32
    return %arg0, %c0_i32, %c0_i32_0 : i32, i32, i32
  }
  func.func @transform_14(%arg0: i32) -> (i32, i32, i32, i32) {
    %c0_i32 = arith.constant 0 : i32
    %c0_i32_0 = arith.constant 0 : i32
    %c0_i32_1 = arith.constant 0 : i32
    %c0_i32_2 = arith.constant 0 : i32
    return %arg0, %c0_i32, %c0_i32_0, %c0_i32_1 : i32, i32, i32, i32
  }
  func.func @transform_15(%arg0: i32) -> (i32, i32, i32, i32) {
    %c0_i32 = arith.constant 0 : i32
    %c0_i32_0 = arith.constant 0 : i32
    %c0_i32_1 = arith.constant 0 : i32
    %c0_i32_2 = arith.constant 0 : i32
    return %arg0, %c0_i32, %c0_i32_0, %c0_i32_1 : i32, i32, i32, i32
  }
  func.func @transform_16(%arg0: i32) -> (i32, i32, i32, i32) {
    %c0_i32 = arith.constant 0 : i32
    %c0_i32_0 = arith.constant 0 : i32
    %c0_i32_1 = arith.constant 0 : i32
    %c0_i32_2 = arith.constant 0 : i32
    return %arg0, %c0_i32, %c0_i32_0, %c0_i32_1 : i32, i32, i32, i32
  }
}

module attributes {stable_mosaic.version = 11 : i64} {
  func.func @_linear_kernel(%arg0: i32, %arg1: memref<12x16xf32, #tpu.memory_space<vmem>>, %arg2: memref<12x16xf32, #tpu.memory_space<vmem>>, %arg3: memref<16x16xbf16, #tpu.memory_space<vmem>>, %arg4: memref<1x16xf32, #tpu.memory_space<vmem>>, %arg5: memref<12x16xf32, #tpu.memory_space<vmem>>) attributes {dimension_semantics = [#tpu.dimension_semantics<parallel>], iteration_bounds = array<i64: 1>, scalar_prefetch = 0 : i64, scratch_operands = 0 : i64, tpu.core_type = #tpu.core_type<tc>, window_params = [{transform_indices = @transform_0, window_bounds = array<i64: 12, 16>}, {transform_indices = @transform_1, window_bounds = array<i64: 12, 16>}, {pipeline_mode = #tpu.pipeline_mode<synchronous>, transform_indices = @transform_2, window_bounds = array<i64: 16, 16>}, {pipeline_mode = #tpu.pipeline_mode<synchronous>, transform_indices = @transform_3, window_bounds = array<i64: 1, 16>}, {transform_indices = @transform_4, window_bounds = array<i64: 12, 16>}]} {
    %c0 = arith.constant 0 : index
    %c0_0 = arith.constant 0 : index
    %0 = vector.load %arg1[%c0, %c0_0] : memref<12x16xf32, #tpu.memory_space<vmem>>, vector<12x16xf32>
    %c0_1 = arith.constant 0 : index
    %c0_2 = arith.constant 0 : index
    %1 = vector.load %arg2[%c0_1, %c0_2] : memref<12x16xf32, #tpu.memory_space<vmem>>, vector<12x16xf32>
    %2 = arith.addf %0, %1 : vector<12x16xf32>
    %3 = arith.truncf %2 : vector<12x16xf32> to vector<12x16xbf16>
    %c0_3 = arith.constant 0 : index
    %c0_4 = arith.constant 0 : index
    %4 = vector.load %arg3[%c0_3, %c0_4] : memref<16x16xbf16, #tpu.memory_space<vmem>>, vector<16x16xbf16>
    %cst = arith.constant dense<0.000000e+00> : vector<12x16xf32>
    %5 = tpu.matmul %3, %4, %cst {dimension_numbers = #tpu.dot_dimension_numbers<[1], [0], [0], [1], [0, 0, 1, 1], [], []>} : vector<12x16xbf16>, vector<16x16xbf16>, vector<12x16xf32> -> vector<12x16xf32>
    %c0_5 = arith.constant 0 : index
    %c0_6 = arith.constant 0 : index
    %6 = vector.load %arg4[%c0_5, %c0_6] : memref<1x16xf32, #tpu.memory_space<vmem>>, vector<1x16xf32>
    %7 = vector.broadcast %6 : vector<1x16xf32> to vector<12x16xf32>
    %8 = arith.addf %5, %7 : vector<12x16xf32>
    %c0_7 = arith.constant 0 : index
    %c0_8 = arith.constant 0 : index
    %9 = vector.load %arg5[%c0_7, %c0_8] : memref<12x16xf32, #tpu.memory_space<vmem>>, vector<12x16xf32>
    tpu.vector_store %arg5[%c0_7, %c0_8], %8 {strides = array<i32>} : memref<12x16xf32, #tpu.memory_space<vmem>>, vector<12x16xf32>,
    return
  }
  func.func @transform_0(%arg0: i32) -> (i32, i32) {
    %c0_i32 = arith.constant 0 : i32
    %c0_i32_0 = arith.constant 0 : i32
    return %arg0, %c0_i32 : i32, i32
  }
  func.func @transform_1(%arg0: i32) -> (i32, i32) {
    %c0_i32 = arith.constant 0 : i32
    %c0_i32_0 = arith.constant 0 : i32
    return %arg0, %c0_i32 : i32, i32
  }
  func.func @transform_2(%arg0: i32) -> (i32, i32) {
    %c0_i32 = arith.constant 0 : i32
    %c0_i32_0 = arith.constant 0 : i32
    %c0_i32_1 = arith.constant 0 : i32
    return %c0_i32, %c0_i32_0 : i32, i32
  }
  func.func @transform_3(%arg0: i32) -> (i32, i32) {
    %c0_i32 = arith.constant 0 : i32
    %c0_i32_0 = arith.constant 0 : i32
    %c0_i32_1 = arith.constant 0 : i32
    return %c0_i32, %c0_i32_0 : i32, i32
  }
  func.func @transform_4(%arg0: i32) -> (i32, i32) {
    %c0_i32 = arith.constant 0 : i32
    %c0_i32_0 = arith.constant 0 : i32
    return %arg0, %c0_i32 : i32, i32
  }
}

module attributes {stable_mosaic.version = 11 : i64} {
  func.func @_linear_kernel(%arg0: i32, %arg1: memref<16x16xf32, #tpu.memory_space<vmem>>, %arg2: memref<16x16xf32, #tpu.memory_space<vmem>>, %arg3: memref<16x16xbf16, #tpu.memory_space<vmem>>, %arg4: memref<1x16xf32, #tpu.memory_space<vmem>>, %arg5: memref<16x16xf32, #tpu.memory_space<vmem>>) attributes {dimension_semantics = [#tpu.dimension_semantics<parallel>], iteration_bounds = array<i64: 1>, scalar_prefetch = 0 : i64, scratch_operands = 0 : i64, tpu.core_type = #tpu.core_type<tc>, window_params = [{transform_indices = @transform_0, window_bounds = array<i64: 16, 16>}, {transform_indices = @transform_1, window_bounds = array<i64: 16, 16>}, {pipeline_mode = #tpu.pipeline_mode<synchronous>, transform_indices = @transform_2, window_bounds = array<i64: 16, 16>}, {pipeline_mode = #tpu.pipeline_mode<synchronous>, transform_indices = @transform_3, window_bounds = array<i64: 1, 16>}, {transform_indices = @transform_4, window_bounds = array<i64: 16, 16>}]} {
    %c0 = arith.constant 0 : index
    %c0_0 = arith.constant 0 : index
    %0 = vector.load %arg1[%c0, %c0_0] : memref<16x16xf32, #tpu.memory_space<vmem>>, vector<16x16xf32>
    %c0_1 = arith.constant 0 : index
    %c0_2 = arith.constant 0 : index
    %1 = vector.load %arg2[%c0_1, %c0_2] : memref<16x16xf32, #tpu.memory_space<vmem>>, vector<16x16xf32>
    %2 = arith.addf %0, %1 : vector<16x16xf32>
    %3 = arith.truncf %2 : vector<16x16xf32> to vector<16x16xbf16>
    %c0_3 = arith.constant 0 : index
    %c0_4 = arith.constant 0 : index
    %4 = vector.load %arg3[%c0_3, %c0_4] : memref<16x16xbf16, #tpu.memory_space<vmem>>, vector<16x16xbf16>
    %cst = arith.constant dense<0.000000e+00> : vector<16x16xf32>
    %5 = tpu.matmul %3, %4, %cst {dimension_numbers = #tpu.dot_dimension_numbers<[1], [0], [0], [1], [0, 0, 1, 1], [], []>} : vector<16x16xbf16>, vector<16x16xbf16>, vector<16x16xf32> -> vector<16x16xf32>
    %c0_5 = arith.constant 0 : index
    %c0_6 = arith.constant 0 : index
    %6 = vector.load %arg4[%c0_5, %c0_6] : memref<1x16xf32, #tpu.memory_space<vmem>>, vector<1x16xf32>
    %7 = vector.broadcast %6 : vector<1x16xf32> to vector<16x16xf32>
    %8 = arith.addf %5, %7 : vector<16x16xf32>
    %c0_7 = arith.constant 0 : index
    %c0_8 = arith.constant 0 : index
    %9 = vector.load %arg5[%c0_7, %c0_8] : memref<16x16xf32, #tpu.memory_space<vmem>>, vector<16x16xf32>
    tpu.vector_store %arg5[%c0_7, %c0_8], %8 {strides = array<i32>} : memref<16x16xf32, #tpu.memory_space<vmem>>, vector<16x16xf32>,
    return
  }
  func.func @transform_0(%arg0: i32) -> (i32, i32) {
    %c0_i32 = arith.constant 0 : i32
    %c0_i32_0 = arith.constant 0 : i32
    return %arg0, %c0_i32 : i32, i32
  }
  func.func @transform_1(%arg0: i32) -> (i32, i32) {
    %c0_i32 = arith.constant 0 : i32
    %c0_i32_0 = arith.constant 0 : i32
    return %arg0, %c0_i32 : i32, i32
  }
  func.func @transform_2(%arg0: i32) -> (i32, i32) {
    %c0_i32 = arith.constant 0 : i32
    %c0_i32_0 = arith.constant 0 : i32
    %c0_i32_1 = arith.constant 0 : i32
    return %c0_i32, %c0_i32_0 : i32, i32
  }
  func.func @transform_3(%arg0: i32) -> (i32, i32) {
    %c0_i32 = arith.constant 0 : i32
    %c0_i32_0 = arith.constant 0 : i32
    %c0_i32_1 = arith.constant 0 : i32
    return %c0_i32, %c0_i32_0 : i32, i32
  }
  func.func @transform_4(%arg0: i32) -> (i32, i32) {
    %c0_i32 = arith.constant 0 : i32
    %c0_i32_0 = arith.constant 0 : i32
    return %arg0, %c0_i32 : i32, i32
  }
}

module attributes {stable_mosaic.version = 11 : i64} {
  func.func @_ln_res_kernel(%arg0: i32, %arg1: memref<16x16xf32, #tpu.memory_space<vmem>>, %arg2: memref<16x16xf32, #tpu.memory_space<vmem>>, %arg3: memref<1x16xf32, #tpu.memory_space<vmem>>, %arg4: memref<1x16xf32, #tpu.memory_space<vmem>>, %arg5: memref<16x16xf32, #tpu.memory_space<vmem>>) attributes {dimension_semantics = [#tpu.dimension_semantics<parallel>], iteration_bounds = array<i64: 1>, scalar_prefetch = 0 : i64, scratch_operands = 0 : i64, tpu.core_type = #tpu.core_type<tc>, window_params = [{transform_indices = @transform_0, window_bounds = array<i64: 16, 16>}, {transform_indices = @transform_1, window_bounds = array<i64: 16, 16>}, {pipeline_mode = #tpu.pipeline_mode<synchronous>, transform_indices = @transform_2, window_bounds = array<i64: 1, 16>}, {pipeline_mode = #tpu.pipeline_mode<synchronous>, transform_indices = @transform_3, window_bounds = array<i64: 1, 16>}, {transform_indices = @transform_4, window_bounds = array<i64: 16, 16>}]} {
    %c0 = arith.constant 0 : index
    %c0_0 = arith.constant 0 : index
    %0 = vector.load %arg1[%c0, %c0_0] : memref<16x16xf32, #tpu.memory_space<vmem>>, vector<16x16xf32>
    %c0_1 = arith.constant 0 : index
    %c0_2 = arith.constant 0 : index
    %1 = vector.load %arg2[%c0_1, %c0_2] : memref<16x16xf32, #tpu.memory_space<vmem>>, vector<16x16xf32>
    %2 = arith.addf %0, %1 : vector<16x16xf32>
    %cst = arith.constant dense<0.000000e+00> : vector<16xf32>
    %3 = vector.multi_reduction <add>, %2, %cst [1] : vector<16x16xf32> to vector<16xf32>
    %4 = vector.shape_cast %3 : vector<16xf32> to vector<16x1xf32>
    %cst_3 = arith.constant 1.600000e+01 : f32
    %5 = vector.broadcast %cst_3 : f32 to vector<16x1xf32>
    %6 = arith.divf %4, %5 : vector<16x1xf32>
    %7 = vector.broadcast %6 : vector<16x1xf32> to vector<16x16xf32>
    %8 = arith.subf %2, %7 : vector<16x16xf32>
    %9 = arith.mulf %8, %8 : vector<16x16xf32>
    %cst_4 = arith.constant dense<0.000000e+00> : vector<16xf32>
    %10 = vector.multi_reduction <add>, %9, %cst_4 [1] : vector<16x16xf32> to vector<16xf32>
    %11 = vector.shape_cast %10 : vector<16xf32> to vector<16x1xf32>
    %cst_5 = arith.constant 1.600000e+01 : f32
    %12 = vector.broadcast %cst_5 : f32 to vector<16x1xf32>
    %13 = arith.divf %11, %12 : vector<16x1xf32>
    %cst_6 = arith.constant 9.99999974E-6 : f32
    %14 = vector.broadcast %cst_6 : f32 to vector<16x1xf32>
    %15 = arith.addf %13, %14 : vector<16x1xf32>
    %16 = math.rsqrt %15 : vector<16x1xf32>
    %17 = vector.broadcast %16 : vector<16x1xf32> to vector<16x16xf32>
    %18 = arith.mulf %8, %17 : vector<16x16xf32>
    %c0_7 = arith.constant 0 : index
    %c0_8 = arith.constant 0 : index
    %19 = vector.load %arg3[%c0_7, %c0_8] : memref<1x16xf32, #tpu.memory_space<vmem>>, vector<1x16xf32>
    %20 = vector.broadcast %19 : vector<1x16xf32> to vector<16x16xf32>
    %21 = arith.mulf %18, %20 : vector<16x16xf32>
    %c0_9 = arith.constant 0 : index
    %c0_10 = arith.constant 0 : index
    %22 = vector.load %arg4[%c0_9, %c0_10] : memref<1x16xf32, #tpu.memory_space<vmem>>, vector<1x16xf32>
    %23 = vector.broadcast %22 : vector<1x16xf32> to vector<16x16xf32>
    %24 = arith.addf %21, %23 : vector<16x16xf32>
    %c0_11 = arith.constant 0 : index
    %c0_12 = arith.constant 0 : index
    %25 = vector.load %arg5[%c0_11, %c0_12] : memref<16x16xf32, #tpu.memory_space<vmem>>, vector<16x16xf32>
    tpu.vector_store %arg5[%c0_11, %c0_12], %24 {strides = array<i32>} : memref<16x16xf32, #tpu.memory_space<vmem>>, vector<16x16xf32>,
    return
  }
  func.func @transform_0(%arg0: i32) -> (i32, i32) {
    %c0_i32 = arith.constant 0 : i32
    %c0_i32_0 = arith.constant 0 : i32
    return %arg0, %c0_i32 : i32, i32
  }
  func.func @transform_1(%arg0: i32) -> (i32, i32) {
    %c0_i32 = arith.constant 0 : i32
    %c0_i32_0 = arith.constant 0 : i32
    return %arg0, %c0_i32 : i32, i32
  }
  func.func @transform_2(%arg0: i32) -> (i32, i32) {
    %c0_i32 = arith.constant 0 : i32
    %c0_i32_0 = arith.constant 0 : i32
    %c0_i32_1 = arith.constant 0 : i32
    return %c0_i32, %c0_i32_0 : i32, i32
  }
  func.func @transform_3(%arg0: i32) -> (i32, i32) {
    %c0_i32 = arith.constant 0 : i32
    %c0_i32_0 = arith.constant 0 : i32
    %c0_i32_1 = arith.constant 0 : i32
    return %c0_i32, %c0_i32_0 : i32, i32
  }
  func.func @transform_4(%arg0: i32) -> (i32, i32) {
    %c0_i32 = arith.constant 0 : i32
    %c0_i32_0 = arith.constant 0 : i32
    return %arg0, %c0_i32 : i32, i32
  }
}

</mosaic_0001>

<bundles_post_ra>
// kernel: multiblock_forward.29
= control target key start
LH: loop header
LB: loop body
LE: loop exit
PB: predicated region body
PF: predicated region fallthrough
CT: control target
= control target key end

     0   :  { %v120_v0 = vmov 0.0   ;;  %vm121_vm0 = vmmov 0   ;;  %v122_v4 = vmov 0   ;;  %vm38_vm1 = vcmask 130048   ;;  %s172_s1 = inlined_call_operand.vmem [shape: bf16[16,48], index: 1, kind: input, shape index: {}]   ;;  %s173_s0 = inlined_call_operand.vmem [shape: f32[16,16], index: 0, kind: input, shape index: {}]   ;;  %s174_s3 = inlined_call_operand.vmem [shape: f32[16,1], index: 3, kind: input, shape index: {}]   ;;  %s175_s2 = inlined_call_operand.vmem [shape: f32[1,48], index: 2, kind: input, shape index: {}]   ;;  %s176_s4 = inlined_call_operand.vmem [shape: f32[16,48], index: 4, kind: output, shape index: {}]  }
   0x1   :  { %109 = vmatprep.subr.bf16.mxu0 %v120_v0  ;;  %v119_v1 = vld [vmem:[%s172_s1] sm:$0xff]   ;;  %111 = vmatprep.mubr.msk.bf16.mxu0 %vm121_vm0, %v120_v0  ;;  %v19_v3 = vld [vmem:[%s173_s0 + $0x8] sm:$0xff]  ;;  %vm97_vm2 = vcmask 392192  }
   0x2   :  { %v18_v2 = vld [vmem:[%s173_s0] sm:$0xff]  ;;  %118 = vset.pattern.permute.xlu0 %v122_v4  ;;  %110 = vmatpush3.bf16.msra.mxu0 %v119_v1  ;;  %v21_v7 = vmax.f32 %v19_v3, 0.0  ;;  %v84_v8 = vld [vmem:[%s174_s3 + $0x8] sm:$0xff] }
   0x3   :  { %v83_v5 = vld [vmem:[%s174_s3] sm:$0xff]  ;;  %v20_v6 = vmax.f32 %v18_v2, 0.0 }
   0x4   :  { %87 = vperm.xlu0 %118, %v83_v5   ;;  %v104_v10 = vld [vmem:[%s175_s2] ss:$0 sm:$0xff] }
   0x5   :  { %v22_v9 = vpack.c.bf16 %v21_v7, %v20_v6 }
   0x7   :  { %112 = vmatmul.mubr.msk.bf16.vlgmr.msra.gmra.mxu0 %vm38_vm1, %v22_v9 }
   0x8   :  { %92 = vperm.xlu0 %118, %v84_v8  }
  0x7f   :  { %v88_v11 = vpop.permute.xlu0 %87 }
  0x83   :  { %v93_v18 = vpop.permute.xlu0 %92 }
  0xc7   :  { %v76_v12 = vpop.f32.mrf.mxu0 }
  0xc8   :  { %v77_v13 = vadd.f32 %v104_v10, %v76_v12 }
  0xc9   :  { %v113_v14 = vpop.f32.mrf.mxu0 }
  0xca   :  { %v95_v15 = vmul.f32 %v88_v11, %v77_v13 }
  0xcb   :  { %v79_v16 = vpop.f32.mrf.mxu0 }
  0xcc   :  { %98 = vst.msk [vmem:[%s176_s4] sm:$0xff] %vm97_vm2, %v95_v15  ;;  %v80_v17 = vadd.f32 %v104_v10, %v79_v16 }
  0xcd   :  { %v114_v19 = vpop.f32.mrf.mxu0 }
  0xce   :  { %v96_v20 = vmul.f32 %v93_v18, %v80_v17 }
  0xd0   :  { %99 = vst.msk [vmem:[%s176_s4 + $0x8] sm:$0xff] %vm97_vm2, %v96_v20 }

// kernel: multiblock_forward.26
= control target key start
LH: loop header
LB: loop body
LE: loop exit
PB: predicated region body
PF: predicated region fallthrough
CT: control target
= control target key end

     0   :  { %v112_v0 = vmov 0.0   ;;  %vm113_vm0 = vmmov 0   ;;  %vm41_vm1 = vcmask 261120   ;;  %vm86_vm2 = vcmask 130048   ;;  %s155_s1 = inlined_call_operand.vmem [shape: bf16[32,16], index: 1, kind: input, shape index: {}]   ;;  %s156_s0 = inlined_call_operand.vmem [shape: f32[16,32], index: 0, kind: input, shape index: {}]   ;;  %s157_s2 = inlined_call_operand.vmem [shape: f32[1,16], index: 2, kind: input, shape index: {}]   ;;  %s158_s3 = inlined_call_operand.vmem [shape: f32[16,16], index: 3, kind: output, shape index: {}]  }
   0x1   :  { %100 = vmatprep.subr.bf16.mxu0 %v112_v0  ;;  %v110_v1 = vld [vmem:[%s155_s1 + $0x8] sm:$0xff]   ;;  %104 = vmatprep.mubr.msk.bf16.mxu0 %vm113_vm0, %v112_v0  ;;  %v111_v2 = vld [vmem:[%s155_s1] sm:$0xff]  }
   0x2   :  { %101 = vmatpush3.bf16.msra.mxu0 %v110_v1  ;;  %v15_v3 = vld [vmem:[%s156_s0] sm:$0xff]  ;;  %v16_v4 = vld [vmem:[%s156_s0 + $0x8] sm:$0xff] }
   0x3   :  { %102 = vmatprep.subr.bf16.mxu0 %v112_v0  ;;  %v17_v5 = vpack.c.bf16 %v16_v4, %v15_v3  ;;  %v93_v6 = vld [vmem:[%s157_s2] ss:$0 sm:$0xff] }
   0x6   :  { %103 = vmatpush3.bf16.msra.mxu0 %v111_v2 }
   0x9   :  { %105 = vmatmul.mubr.msk.bf16.vlgmr.msra.gmra.mxu0 %vm41_vm1, %v17_v5 }
  0xc9   :  { %v79_v7 = vpop.f32.mrf.mxu0 }
  0xca   :  { %v80_v8 = vadd.f32 %v93_v6, %v79_v7 }
  0xcb   :  { %v106_v9 = vpop.f32.mrf.mxu0 }
  0xcc   :  { %87 = vst.msk [vmem:[%s158_s3] sm:$0xff] %vm86_vm2, %v80_v8 }
  0xcd   :  { %v82_v10 = vpop.f32.mrf.mxu0 }
  0xce   :  { %v83_v11 = vadd.f32 %v93_v6, %v82_v10 }
  0xcf   :  { %v107_v12 = vpop.f32.mrf.mxu0 }
  0xd0   :  { %88 = vst.msk [vmem:[%s158_s3 + $0x8] sm:$0xff] %vm86_vm2, %v83_v11 }

// kernel: multiblock_forward.32
= control target key start
LH: loop header
LB: loop body
LE: loop exit
PB: predicated region body
PF: predicated region fallthrough
CT: control target
= control target key end

     0   :  { %vm136_vm0 = vcmask 1040384   ;;  %v1062_v1 = vmov 0   ;;  %vm108_vm1 = vcmask 138240   ;;  %v58_v44 = vlaneseq  ;;  %s1427_s1 = inlined_call_operand.vmem [shape: bf16[17,512], index: 1, kind: input, shape index: {}]   ;;  %s1428_s0 = inlined_call_operand.vmem [shape: f32[18,8,17], index: 0, kind: input, shape index: {}]   ;;  %s1429_s4 = inlined_call_operand.<no memory space> [shape: f32[1,1], index: 4, kind: input, shape index: {}]   ;;  %s1430_s2 = inlined_call_operand.vmem [shape: f32[1,512], index: 2, kind: input, shape index: {}]   ;;  %s1431_s3 = inlined_call_operand.vmem [shape: f32[1,1,512], index: 3, kind: input, shape index: {}]   ;;  %s1432_s5 = inlined_call_operand.vmem [shape: f32[18,8], index: 5, kind: output, shape index: {}]  }
   0x1   :  { %v54_v0 = vld [vmem:[%s1427_s1 + $0x20] sm:$0x11]  ;;  %v138_v2 = vsel %vm136_vm0, 65535, %v1062_v1  ;;  %v55_v3 = vld [vmem:[%s1427_s1 + $0x28] sm:$0x11]  ;;  %183 = vmatprep.mubr.bf16.mxu0 %v1062_v1  ;;  %306 = vmatprep.mubr.bf16.mxu1 %v1062_v1  ;;  %v25_v19 = vld [vmem:[%s1428_s0 + $0x10] sm:$0xff]  ;;  %v10_v43 = vstv %s1429_s4 }
   0x2   :  { %v938_v4 = vcombine.high %v54_v0, %v54_v0  ;;  %v940_v5 = vcombine.high %v55_v3, %v55_v3  ;;  %v937_v6 = vcombine.low %v54_v0, %v54_v0  ;;  %v939_v7 = vcombine.low %v55_v3, %v55_v3  ;;  %979 = vset.pattern.permute.xlu0 %v1062_v1  ;;  %v984_v12 = vld [vmem:[%s1427_s1 + $0x4] ss:$16 sps:$4 sm:$0xff]   ;;  %v986_v13 = vld [vmem:[%s1427_s1 + $0xc] ss:$16 sps:$4 sm:$0xff]   ;;  %v988_v14 = vld [vmem:[%s1427_s1] ss:$16 sps:$4 sm:$0xff]  }
   0x3   :  { %v989_v15 = vld [vmem:[%s1427_s1 + $0x8] ss:$16 sps:$4 sm:$0xff]   ;;  %v23_v16 = vld [vmem:[%s1428_s0] sm:$0xff]  ;;  %v29_v25 = vld [vmem:[%s1428_s0 + $0x30] sm:$0xff]  ;;  %11 = vst [vmem:[#allocation2] sm:$0x1] %v10_v43 }
   0x4   :  { %v143_v8 = vand.u32 %v938_v4, %v138_v2  ;;  %v149_v9 = vand.u32 %v940_v5, %v138_v2  ;;  %v140_v10 = vand.u32 %v937_v6, %v138_v2  ;;  %v146_v11 = vand.u32 %v939_v7, %v138_v2  ;;  %v24_v17 = vld [vmem:[%s1428_s0 + $0x8] sm:$0xff]  ;;  %v26_v20 = vld [vmem:[%s1428_s0 + $0x18] sm:$0xff]  ;;  %v27_v22 = vld [vmem:[%s1428_s0 + $0x20] sm:$0xff] }
   0x5   :  { %v41_v18 = vpack.c.bf16 %v24_v17, %v23_v16  ;;  %v42_v21 = vpack.c.bf16 %v26_v20, %v25_v19  ;;  %v28_v23 = vld [vmem:[%s1428_s0 + $0x28] sm:$0xff]  ;;  %v30_v26 = vld [vmem:[%s1428_s0 + $0x38] sm:$0xff]  ;;  %v31_v28 = vld [vmem:[%s1428_s0 + $0x40] sm:$0xff]  ;;  %v1207_v45 = vshrl.u32 %v58_v44, 7  ;;  %vm899_vm2 = vcmask 1041409  }
   0x6   :  { %163 = vmatprep.subr.bf16.mxu0 %v143_v8  ;;  %286 = vmatprep.subr.bf16.mxu1 %v149_v9  ;;  %v43_v24 = vpack.c.bf16 %v28_v23, %v27_v22  ;;  %v44_v27 = vpack.c.bf16 %v30_v26, %v29_v25  ;;  %v32_v29 = vld [vmem:[%s1428_s0 + $0x48] sm:$0xff]  ;;  %v33_v31 = vld [vmem:[%s1428_s0 + $0x50] sm:$0xff]  ;;  %v34_v32 = vld [vmem:[%s1428_s0 + $0x58] sm:$0xff]  ;;  %vm901_vm3 = vcmask 1042434   ;;  %vm903_vm4 = vcmask 1043459  }
   0x7   :  { %164 = vmatpush1.bf16.msra.mxu0 %v140_v10  ;;  %287 = vmatpush1.bf16.msra.mxu1 %v146_v11  ;;  %v45_v30 = vpack.c.bf16 %v32_v29, %v31_v28  ;;  %v46_v33 = vpack.c.bf16 %v34_v32, %v33_v31  ;;  %v35_v34 = vld [vmem:[%s1428_s0 + $0x60] sm:$0xff]  ;;  %v36_v35 = vld [vmem:[%s1428_s0 + $0x68] sm:$0xff]  ;;  %v37_v37 = vld [vmem:[%s1428_s0 + $0x70] sm:$0xff]  ;;  %v60_v46 = vsub.s32 0, %v1207_v45  ;;  %v68_v47 = vsub.s32 2, %v1207_v45 }
   0x8   :  { %165 = vmatprep.subr.bf16.mxu0 %v984_v12  ;;  %288 = vmatprep.subr.bf16.mxu1 %v986_v13  ;;  %v47_v36 = vpack.c.bf16 %v36_v35, %v35_v34  ;;  %v38_v38 = vld [vmem:[%s1428_s0 + $0x78] sm:$0xff]  ;;  %v39_v40 = vld [vmem:[%s1428_s0 + $0x80] sm:$0xff]  ;;  %v40_v41 = vld [vmem:[%s1428_s0 + $0x88] sm:$0xff]  ;;  %v64_v49 = vsub.s32 1, %v1207_v45  ;;  %v72_v50 = vsub.s32 3, %v1207_v45  ;;  %vm905_vm5 = vcmask 1044484  }
   0x9   :  { %v48_v39 = vpack.c.bf16 %v38_v38, %v37_v37  ;;  %v49_v42 = vpack.c.bf16 %v40_v41, %v39_v40  ;;  %v56_v48 = vld [vmem:[%s1430_s2] sm:$0xf]  ;;  %vm907_vm6 = vcmask 1045509   ;;  %vm909_vm7 = vcmask 1046534  }
   0xa   :  { %v1216_v51 = vrot.slane %v56_v48, %v60_v46  ;;  %v1218_v52 = vrot.slane %v56_v48, %v68_v47  ;;  %v1220_v53 = vrot.slane %v56_v48, %v64_v49  ;;  %v1222_v54 = vrot.slane %v56_v48, %v72_v50  ;;  %v469_v58 = vld [vmem:[%s1431_s3] sm:$0xf] }
   0xb   :  { %166 = vmatpush1.bf16.msra.mxu0 %v988_v14  ;;  %289 = vmatpush1.bf16.msra.mxu1 %v989_v15  ;;  %v1230_v63 = vrot.slane %v469_v58, %v64_v49  ;;  %v1233_v2 = vrot.slane %v469_v58, %v60_v46  ;;  %v1235_v4 = vrot.slane %v469_v58, %v68_v47  ;;  %vm911_vm8 = vcmask 1047559  }
   0xc   :  { %v1239_v13 = vrot.slane %v469_v58, %v72_v50  ;;  %vm924_vm9 = vcmask 64512   ;;  %vm927_vm10 = vcmask 58368  }
   0xe   :  { %941 = vmatmul.mubr.msk.bf16.vlgmr.msra.gmra.mxu0 %vm108_vm1, %v41_v18  ;;  %950 = vmatmul.mubr.msk.bf16.vlgmr.msra.gmra.mxu1 %vm108_vm1, %v41_v18 }
   0xf   :  { %193 = vmatprep.mubr.bf16.mxu0 %v1062_v1  ;;  %316 = vmatprep.mubr.bf16.mxu1 %v1062_v1 }
  0x16   :  { %942 = vmatmul.mubr.msk.bf16.gmra.mxu0 %vm108_vm1, %v42_v21  ;;  %951 = vmatmul.mubr.msk.bf16.gmra.mxu1 %vm108_vm1, %v42_v21 }
  0x17   :  { %203 = vmatprep.mubr.bf16.mxu0 %v1062_v1  ;;  %326 = vmatprep.mubr.bf16.mxu1 %v1062_v1 }
  0x1e   :  { %943 = vmatmul.mubr.msk.bf16.gmra.mxu0 %vm108_vm1, %v43_v24  ;;  %952 = vmatmul.mubr.msk.bf16.gmra.mxu1 %vm108_vm1, %v43_v24 }
  0x1f   :  { %213 = vmatprep.mubr.bf16.mxu0 %v1062_v1  ;;  %336 = vmatprep.mubr.bf16.mxu1 %v1062_v1 }
  0x26   :  { %944 = vmatmul.mubr.msk.bf16.gmra.mxu0 %vm108_vm1, %v44_v27  ;;  %953 = vmatmul.mubr.msk.bf16.gmra.mxu1 %vm108_vm1, %v44_v27 }
  0x27   :  { %223 = vmatprep.mubr.bf16.mxu0 %v1062_v1  ;;  %346 = vmatprep.mubr.bf16.mxu1 %v1062_v1 }
  0x2e   :  { %945 = vmatmul.mubr.msk.bf16.gmra.mxu0 %vm108_vm1, %v45_v30  ;;  %954 = vmatmul.mubr.msk.bf16.gmra.mxu1 %vm108_vm1, %v45_v30 }
  0x2f   :  { %233 = vmatprep.mubr.bf16.mxu0 %v1062_v1  ;;  %356 = vmatprep.mubr.bf16.mxu1 %v1062_v1 }
  0x36   :  { %946 = vmatmul.mubr.msk.bf16.gmra.mxu0 %vm108_vm1, %v46_v33  ;;  %955 = vmatmul.mubr.msk.bf16.gmra.mxu1 %vm108_vm1, %v46_v33 }
  0x37   :  { %243 = vmatprep.mubr.bf16.mxu0 %v1062_v1  ;;  %366 = vmatprep.mubr.bf16.mxu1 %v1062_v1 }
  0x3e   :  { %947 = vmatmul.mubr.msk.bf16.gmra.mxu0 %vm108_vm1, %v47_v36  ;;  %956 = vmatmul.mubr.msk.bf16.gmra.mxu1 %vm108_vm1, %v47_v36 }
  0x3f   :  { %253 = vmatprep.mubr.bf16.mxu0 %v1062_v1  ;;  %376 = vmatprep.mubr.bf16.mxu1 %v1062_v1 }
  0x46   :  { %948 = vmatmul.mubr.msk.bf16.gmra.mxu0 %vm108_vm1, %v48_v39  ;;  %957 = vmatmul.mubr.msk.bf16.gmra.mxu1 %vm108_vm1, %v48_v39 }
  0x47   :  { %263 = vmatprep.mubr.bf16.mxu0 %v1062_v1  ;;  %386 = vmatprep.mubr.bf16.mxu1 %v1062_v1 }
  0x4e   :  { %949 = vmatmul.mubr.msk.bf16.gmra.mxu0 %vm108_vm1, %v49_v42  ;;  %958 = vmatmul.mubr.msk.bf16.gmra.mxu1 %vm108_vm1, %v49_v42 }
  0xce   :  { %v185_v55 = vpop.f32.mrf.mxu0  ;;  %v308_v56 = vpop.f32.mrf.mxu1 }
  0xcf   :  { %v186_v57 = vadd.f32 %v185_v55, %v1216_v51  ;;  %v309_v59 = vadd.f32 %v308_v56, %v1218_v52 }
  0xd0   :  { %v187_v60 = vpop.f32.mrf.mxu0  ;;  %v310_v61 = vpop.f32.mrf.mxu1 }
  0xd1   :  { %v188_v62 = vadd.f32 %v187_v60, %v1220_v53  ;;  %v311_v0 = vadd.f32 %v310_v61, %v1222_v54  ;;  %v397_v1 = vmax.f32 %v186_v57, 0.0  ;;  %v399_v3 = vmax.f32 %v309_v59, 0.0 }
  0xd2   :  { %v189_v5 = vpop.f32.mrf.mxu0  ;;  %v312_v6 = vpop.f32.mrf.mxu1 }
  0xd3   :  { %v398_v7 = vmax.f32 %v188_v62, 0.0  ;;  %v400_v8 = vmax.f32 %v311_v0, 0.0  ;;  %v190_v9 = vadd.f32 %v189_v5, %v1216_v51  ;;  %v313_v10 = vadd.f32 %v312_v6, %v1218_v52 }
  0xd4   :  { %v191_v11 = vpop.f32.mrf.mxu0  ;;  %v314_v12 = vpop.f32.mrf.mxu1  ;;  %v491_v17 = vmul.f32 %v1233_v2, %v397_v1  ;;  %v493_v18 = vmul.f32 %v1235_v4, %v399_v3 }
  0xd5   :  { %v492_v14 = vmul.f32 %v1230_v63, %v398_v7  ;;  %v192_v15 = vadd.f32 %v191_v11, %v1220_v53  ;;  %v315_v16 = vadd.f32 %v314_v12, %v1222_v54  ;;  %v401_v19 = vmax.f32 %v190_v9, 0.0 }
  0xd6   :  { %v195_v20 = vpop.f32.mrf.mxu0  ;;  %v318_v21 = vpop.f32.mrf.mxu1  ;;  %v403_v22 = vmax.f32 %v313_v10, 0.0  ;;  %v494_v28 = vmul.f32 %v1239_v13, %v400_v8 }
  0xd7   :  { %v402_v23 = vmax.f32 %v192_v15, 0.0  ;;  %v196_v24 = vadd.f32 %v195_v20, %v1216_v51  ;;  %v319_v25 = vadd.f32 %v318_v21, %v1218_v52  ;;  %v563_v29 = vadd.f32 %v492_v14, %v491_v17 }
  0xd8   :  { %v197_v26 = vpop.f32.mrf.mxu0  ;;  %v320_v27 = vpop.f32.mrf.mxu1  ;;  %v495_v30 = vmul.f32 %v1233_v2, %v401_v19  ;;  %v404_v32 = vmax.f32 %v315_v16, 0.0  ;;  %v497_v40 = vmul.f32 %v1235_v4, %v403_v22 }
  0xd9   :  { %v496_v31 = vmul.f32 %v1230_v63, %v402_v23  ;;  %v405_v33 = vmax.f32 %v196_v24, 0.0  ;;  %v407_v34 = vmax.f32 %v319_v25, 0.0  ;;  %v198_v35 = vadd.f32 %v197_v26, %v1220_v53 }
  0xda   :  { %v321_v36 = vadd.f32 %v320_v27, %v1222_v54  ;;  %v199_v37 = vpop.f32.mrf.mxu0  ;;  %v322_v38 = vpop.f32.mrf.mxu1  ;;  %v564_v39 = vadd.f32 %v563_v29, %v493_v18  ;;  %v498_v55 = vmul.f32 %v1239_v13, %v404_v32 }
  0xdb   :  { %v568_v41 = vadd.f32 %v496_v31, %v495_v30  ;;  %v200_v42 = vadd.f32 %v199_v37, %v1216_v51  ;;  %v406_v43 = vmax.f32 %v198_v35, 0.0  ;;  %v323_v47 = vadd.f32 %v322_v38, %v1218_v52 }
  0xdc   :  { %v408_v46 = vmax.f32 %v321_v36, 0.0  ;;  %v201_v48 = vpop.f32.mrf.mxu0  ;;  %v324_v49 = vpop.f32.mrf.mxu1  ;;  %v565_v50 = vadd.f32 %v564_v39, %v494_v28  ;;  %v499_v59 = vmul.f32 %v1233_v2, %v405_v33  ;;  %v501_v60 = vmul.f32 %v1235_v4, %v407_v34 }
  0xdd   :  { %v409_v56 = vmax.f32 %v200_v42, 0.0  ;;  %v202_v57 = vadd.f32 %v201_v48, %v1220_v53  ;;  %v569_v58 = vadd.f32 %v568_v41, %v497_v40  ;;  %v500_v61 = vmul.f32 %v1230_v63, %v406_v43 }
  0xde   :  { %v325_v62 = vadd.f32 %v324_v49, %v1222_v54  ;;  %566 = vadd.xlane.f32.xlu0 %v565_v50  ;;  %v205_v0 = vpop.f32.mrf.mxu0  ;;  %v328_v1 = vpop.f32.mrf.mxu1  ;;  %v502_v3 = vmul.f32 %v1239_v13, %v408_v46  ;;  %v411_v8 = vmax.f32 %v323_v47, 0.0 }
  0xdf   :  { %v410_v5 = vmax.f32 %v202_v57, 0.0  ;;  %v206_v6 = vadd.f32 %v205_v0, %v1216_v51  ;;  %v573_v7 = vadd.f32 %v500_v61, %v499_v59  ;;  %v329_v9 = vadd.f32 %v328_v1, %v1218_v52 }
  0xe0   :  { %v207_v10 = vpop.f32.mrf.mxu0  ;;  %v330_v11 = vpop.f32.mrf.mxu1  ;;  %v570_v12 = vadd.f32 %v569_v58, %v498_v55  ;;  %v503_v14 = vmul.f32 %v1233_v2, %v409_v56  ;;  %v412_v18 = vmax.f32 %v325_v62, 0.0  ;;  %v505_v27 = vmul.f32 %v1235_v4, %v411_v8 }
  0xe1   :  { %v504_v15 = vmul.f32 %v1230_v63, %v410_v5  ;;  %v413_v16 = vmax.f32 %v206_v6, 0.0  ;;  %v208_v17 = vadd.f32 %v207_v10, %v1220_v53  ;;  %v415_v19 = vmax.f32 %v329_v9, 0.0 }
  0xe2   :  { %v331_v20 = vadd.f32 %v330_v11, %v1222_v54  ;;  %571 = vadd.xlane.f32.xlu0 %v570_v12  ;;  %v209_v21 = vpop.f32.mrf.mxu0  ;;  %v332_v22 = vpop.f32.mrf.mxu1  ;;  %v574_v23 = vadd.f32 %v573_v7, %v501_v60  ;;  %v506_v37 = vmul.f32 %v1239_v13, %v412_v18 }
  0xe3   :  { %v578_v24 = vadd.f32 %v504_v15, %v503_v14  ;;  %v414_v25 = vmax.f32 %v208_v17, 0.0  ;;  %v210_v26 = vadd.f32 %v209_v21, %v1216_v51  ;;  %v333_v29 = vadd.f32 %v332_v22, %v1218_v52 }
  0xe4   :  { %v416_v28 = vmax.f32 %v331_v20, 0.0  ;;  %v211_v30 = vpop.f32.mrf.mxu0  ;;  %v334_v31 = vpop.f32.mrf.mxu1  ;;  %v575_v32 = vadd.f32 %v574_v23, %v502_v3  ;;  %v507_v33 = vmul.f32 %v1233_v2, %v413_v16  ;;  %v509_v38 = vmul.f32 %v1235_v4, %v415_v19 }
  0xe5   :  { %v508_v34 = vmul.f32 %v1230_v63, %v414_v25  ;;  %v417_v35 = vmax.f32 %v210_v26, 0.0  ;;  %v212_v36 = vadd.f32 %v211_v30, %v1220_v53  ;;  %v335_v39 = vadd.f32 %v334_v31, %v1222_v54 }
  0xe6   :  { %576 = vadd.xlane.f32.xlu0 %v575_v32  ;;  %v215_v40 = vpop.f32.mrf.mxu0  ;;  %v338_v41 = vpop.f32.mrf.mxu1  ;;  %v579_v42 = vadd.f32 %v578_v24, %v505_v27  ;;  %v510_v46 = vmul.f32 %v1239_v13, %v416_v28  ;;  %v419_v48 = vmax.f32 %v333_v29, 0.0 }
  0xe7   :  { %v583_v43 = vadd.f32 %v508_v34, %v507_v33  ;;  %v418_v47 = vmax.f32 %v212_v36, 0.0  ;;  %v216_v49 = vadd.f32 %v215_v40, %v1216_v51  ;;  %v339_v50 = vadd.f32 %v338_v41, %v1218_v52 }
  0xe8   :  { %v217_v55 = vpop.f32.mrf.mxu0  ;;  %v340_v56 = vpop.f32.mrf.mxu1  ;;  %v580_v57 = vadd.f32 %v579_v42, %v506_v37  ;;  %v511_v58 = vmul.f32 %v1233_v2, %v417_v35  ;;  %v420_v62 = vmax.f32 %v335_v39, 0.0  ;;  %v513_v10 = vmul.f32 %v1235_v4, %v419_v48 }
  0xe9   :  { %v512_v59 = vmul.f32 %v1230_v63, %v418_v47  ;;  %v218_v60 = vadd.f32 %v217_v55, %v1220_v53  ;;  %v341_v61 = vadd.f32 %v340_v56, %v1222_v54  ;;  %v421_v0 = vmax.f32 %v216_v49, 0.0 }
  0xea   :  { %v423_v1 = vmax.f32 %v339_v50, 0.0  ;;  %581 = vadd.xlane.f32.xlu0 %v580_v57  ;;  %v219_v3 = vpop.f32.mrf.mxu0  ;;  %v342_v5 = vpop.f32.mrf.mxu1  ;;  %v584_v6 = vadd.f32 %v583_v43, %v509_v38  ;;  %v514_v21 = vmul.f32 %v1239_v13, %v420_v62 }
  0xeb   :  { %v588_v7 = vadd.f32 %v512_v59, %v511_v58  ;;  %v422_v8 = vmax.f32 %v218_v60, 0.0  ;;  %v220_v9 = vadd.f32 %v219_v3, %v1216_v51  ;;  %v424_v11 = vmax.f32 %v341_v61, 0.0 }
  0xec   :  { %v343_v12 = vadd.f32 %v342_v5, %v1218_v52  ;;  %v221_v14 = vpop.f32.mrf.mxu0  ;;  %v344_v15 = vpop.f32.mrf.mxu1  ;;  %v585_v16 = vadd.f32 %v584_v6, %v510_v46  ;;  %v515_v17 = vmul.f32 %v1233_v2, %v421_v0  ;;  %v517_v22 = vmul.f32 %v1235_v4, %v423_v1 }
  0xed   :  { %v516_v18 = vmul.f32 %v1230_v63, %v422_v8  ;;  %v425_v19 = vmax.f32 %v220_v9, 0.0  ;;  %v222_v20 = vadd.f32 %v221_v14, %v1220_v53  ;;  %v345_v23 = vadd.f32 %v344_v15, %v1222_v54 }
  0xee   :  { %586 = vadd.xlane.f32.xlu0 %v585_v16  ;;  %v225_v24 = vpop.f32.mrf.mxu0  ;;  %v348_v25 = vpop.f32.mrf.mxu1  ;;  %v589_v26 = vadd.f32 %v588_v7, %v513_v10  ;;  %v427_v28 = vmax.f32 %v343_v12, 0.0  ;;  %v518_v31 = vmul.f32 %v1239_v13, %v424_v11 }
  0xef   :  { %v593_v27 = vadd.f32 %v516_v18, %v515_v17  ;;  %v426_v29 = vmax.f32 %v222_v20, 0.0  ;;  %v226_v30 = vadd.f32 %v225_v24, %v1216_v51  ;;  %v349_v32 = vadd.f32 %v348_v25, %v1218_v52 }
  0xf0   :  { %v227_v33 = vpop.f32.mrf.mxu0  ;;  %v350_v34 = vpop.f32.mrf.mxu1  ;;  %v590_v35 = vadd.f32 %v589_v26, %v514_v21  ;;  %v519_v36 = vmul.f32 %v1233_v2, %v425_v19  ;;  %v428_v40 = vmax.f32 %v345_v23, 0.0  ;;  %v521_v48 = vmul.f32 %v1235_v4, %v427_v28 }
  0xf1   :  { %v520_v37 = vmul.f32 %v1230_v63, %v426_v29  ;;  %v228_v38 = vadd.f32 %v227_v33, %v1220_v53  ;;  %v351_v39 = vadd.f32 %v350_v34, %v1222_v54  ;;  %v429_v41 = vmax.f32 %v226_v30, 0.0 }
  0xf2   :  { %v431_v42 = vmax.f32 %v349_v32, 0.0  ;;  %591 = vadd.xlane.f32.xlu0 %v590_v35  ;;  %v229_v43 = vpop.f32.mrf.mxu0  ;;  %v352_v46 = vpop.f32.mrf.mxu1  ;;  %v594_v47 = vadd.f32 %v593_v27, %v517_v22  ;;  %v522_v3 = vmul.f32 %v1239_v13, %v428_v40 }
  0xf3   :  { %v598_v49 = vadd.f32 %v520_v37, %v519_v36  ;;  %v430_v50 = vmax.f32 %v228_v38, 0.0  ;;  %v432_v55 = vmax.f32 %v351_v39, 0.0  ;;  %v230_v56 = vadd.f32 %v229_v43, %v1216_v51 }
  0xf4   :  { %v353_v57 = vadd.f32 %v352_v46, %v1218_v52  ;;  %v231_v58 = vpop.f32.mrf.mxu0  ;;  %v354_v59 = vpop.f32.mrf.mxu1  ;;  %v595_v60 = vadd.f32 %v594_v47, %v518_v31  ;;  %v523_v5 = vmul.f32 %v1233_v2, %v429_v41  ;;  %v525_v6 = vmul.f32 %v1235_v4, %v431_v42 }
  0xf5   :  { %v524_v61 = vmul.f32 %v1230_v63, %v430_v50  ;;  %v232_v62 = vadd.f32 %v231_v58, %v1220_v53  ;;  %v355_v0 = vadd.f32 %v354_v59, %v1222_v54  ;;  %v599_v1 = vadd.f32 %v598_v49, %v521_v48 }
  0xf6   :  { %v433_v7 = vmax.f32 %v230_v56, 0.0  ;;  %596 = vadd.xlane.f32.xlu0 %v595_v60  ;;  %v235_v8 = vpop.f32.mrf.mxu0  ;;  %v358_v9 = vpop.f32.mrf.mxu1  ;;  %v435_v10 = vmax.f32 %v353_v57, 0.0  ;;  %v526_v18 = vmul.f32 %v1239_v13, %v432_v55 }
  0xf7   :  { %v434_v11 = vmax.f32 %v232_v62, 0.0  ;;  %v236_v12 = vadd.f32 %v235_v8, %v1216_v51  ;;  %v359_v14 = vadd.f32 %v358_v9, %v1218_v52  ;;  %v600_v17 = vadd.f32 %v599_v1, %v522_v3 }
  0xf8   :  { %v237_v15 = vpop.f32.mrf.mxu0  ;;  %v360_v16 = vpop.f32.mrf.mxu1  ;;  %v603_v19 = vadd.f32 %v524_v61, %v523_v5  ;;  %v527_v20 = vmul.f32 %v1233_v2, %v433_v7  ;;  %v436_v22 = vmax.f32 %v355_v0, 0.0  ;;  %v529_v30 = vmul.f32 %v1235_v4, %v435_v10 }
  0xf9   :  { %v528_v21 = vmul.f32 %v1230_v63, %v434_v11  ;;  %v437_v23 = vmax.f32 %v236_v12, 0.0  ;;  %v439_v24 = vmax.f32 %v359_v14, 0.0  ;;  %v238_v25 = vadd.f32 %v237_v15, %v1220_v53 }
  0xfa   :  { %v361_v26 = vadd.f32 %v360_v16, %v1222_v54  ;;  %601 = vadd.xlane.f32.xlu0 %v600_v17  ;;  %v239_v27 = vpop.f32.mrf.mxu0  ;;  %v362_v28 = vpop.f32.mrf.mxu1  ;;  %v604_v29 = vadd.f32 %v603_v19, %v525_v6  ;;  %v530_v39 = vmul.f32 %v1239_v13, %v436_v22 }
  0xfb   :  { %v608_v31 = vadd.f32 %v528_v21, %v527_v20  ;;  %v240_v32 = vadd.f32 %v239_v27, %v1216_v51  ;;  %v438_v33 = vmax.f32 %v238_v25, 0.0  ;;  %v363_v35 = vadd.f32 %v362_v28, %v1218_v52 }
  0xfc   :  { %v440_v34 = vmax.f32 %v361_v26, 0.0  ;;  %v241_v36 = vpop.f32.mrf.mxu0  ;;  %v364_v37 = vpop.f32.mrf.mxu1  ;;  %v605_v38 = vadd.f32 %v604_v29, %v526_v18  ;;  %v531_v43 = vmul.f32 %v1233_v2, %v437_v23  ;;  %v533_v46 = vmul.f32 %v1235_v4, %v439_v24 }
  0xfd   :  { %v441_v40 = vmax.f32 %v240_v32, 0.0  ;;  %v242_v41 = vadd.f32 %v241_v36, %v1220_v53  ;;  %v609_v42 = vadd.f32 %v608_v31, %v529_v30  ;;  %v532_v47 = vmul.f32 %v1230_v63, %v438_v33 }
  0xfe   :  { %v365_v48 = vadd.f32 %v364_v37, %v1222_v54  ;;  %606 = vadd.xlane.f32.xlu1 %v605_v38  ;;  %v245_v49 = vpop.f32.mrf.mxu0  ;;  %v368_v50 = vpop.f32.mrf.mxu1  ;;  %v443_v55 = vmax.f32 %v363_v35, 0.0  ;;  %v534_v59 = vmul.f32 %v1239_v13, %v440_v34 }
  0xff   :  { %v442_v56 = vmax.f32 %v242_v41, 0.0  ;;  %v246_v57 = vadd.f32 %v245_v49, %v1216_v51  ;;  %v613_v58 = vadd.f32 %v532_v47, %v531_v43  ;;  %v369_v60 = vadd.f32 %v368_v50, %v1218_v52 }
 0x100   :  { %v247_v61 = vpop.f32.mrf.mxu0  ;;  %v370_v62 = vpop.f32.mrf.mxu1  ;;  %v610_v0 = vadd.f32 %v609_v42, %v530_v39  ;;  %v535_v1 = vmul.f32 %v1233_v2, %v441_v40  ;;  %v444_v7 = vmax.f32 %v365_v48, 0.0  ;;  %v537_v14 = vmul.f32 %v1235_v4, %v443_v55 }
 0x101   :  { %v536_v3 = vmul.f32 %v1230_v63, %v442_v56  ;;  %v445_v5 = vmax.f32 %v246_v57, 0.0  ;;  %v248_v6 = vadd.f32 %v247_v61, %v1220_v53  ;;  %v447_v8 = vmax.f32 %v369_v60, 0.0 }
 0x102   :  { %v371_v9 = vadd.f32 %v370_v62, %v1222_v54  ;;  %611 = vadd.xlane.f32.xlu1 %v610_v0  ;;  %v249_v10 = vpop.f32.mrf.mxu0  ;;  %v372_v11 = vpop.f32.mrf.mxu1  ;;  %v614_v12 = vadd.f32 %v613_v58, %v533_v46  ;;  %v538_v28 = vmul.f32 %v1239_v13, %v444_v7 }
 0x103   :  { %v618_v15 = vadd.f32 %v536_v3, %v535_v1  ;;  %v446_v16 = vmax.f32 %v248_v6, 0.0  ;;  %v250_v17 = vadd.f32 %v249_v10, %v1216_v51  ;;  %v539_v18 = vmul.f32 %v1233_v2, %v445_v5 }
 0x104   :  { %v448_v19 = vmax.f32 %v371_v9, 0.0  ;;  %v373_v20 = vadd.f32 %v372_v11, %v1218_v52  ;;  %v251_v21 = vpop.f32.mrf.mxu0  ;;  %v374_v22 = vpop.f32.mrf.mxu1  ;;  %v615_v23 = vadd.f32 %v614_v12, %v534_v59  ;;  %v541_v29 = vmul.f32 %v1235_v4, %v447_v8 }
 0x105   :  { %v540_v24 = vmul.f32 %v1230_v63, %v446_v16  ;;  %v449_v25 = vmax.f32 %v250_v17, 0.0  ;;  %v252_v26 = vadd.f32 %v251_v21, %v1220_v53  ;;  %v375_v27 = vadd.f32 %v374_v22, %v1222_v54 }
 0x106   :  { %616 = vadd.xlane.f32.xlu1 %v615_v23  ;;  %v255_v30 = vpop.f32.mrf.mxu0  ;;  %v378_v31 = vpop.f32.mrf.mxu1  ;;  %v619_v32 = vadd.f32 %v618_v15, %v537_v14  ;;  %v451_v34 = vmax.f32 %v373_v20, 0.0  ;;  %v542_v42 = vmul.f32 %v1239_v13, %v448_v19 }
 0x107   :  { %v623_v33 = vadd.f32 %v540_v24, %v539_v18  ;;  %v450_v35 = vmax.f32 %v252_v26, 0.0  ;;  %v452_v36 = vmax.f32 %v375_v27, 0.0  ;;  %v256_v37 = vadd.f32 %v255_v30, %v1216_v51 }
 0x108   :  { %v379_v38 = vadd.f32 %v378_v31, %v1218_v52  ;;  %v257_v39 = vpop.f32.mrf.mxu0  ;;  %v380_v40 = vpop.f32.mrf.mxu1  ;;  %v620_v41 = vadd.f32 %v619_v32, %v538_v28  ;;  %v543_v43 = vmul.f32 %v1233_v2, %v449_v25  ;;  %v545_v61 = vmul.f32 %v1235_v4, %v451_v34 }
 0x109   :  { %v544_v46 = vmul.f32 %v1230_v63, %v450_v35  ;;  %v258_v47 = vadd.f32 %v257_v39, %v1220_v53  ;;  %v453_v48 = vmax.f32 %v256_v37, 0.0  ;;  %v381_v50 = vadd.f32 %v380_v40, %v1222_v54 }
 0x10a   :  { %v455_v49 = vmax.f32 %v379_v38, 0.0  ;;  %621 = vadd.xlane.f32.xlu1 %v620_v41  ;;  %v259_v55 = vpop.f32.mrf.mxu0  ;;  %v382_v56 = vpop.f32.mrf.mxu1  ;;  %v624_v57 = vadd.f32 %v623_v33, %v541_v29  ;;  %v546_v62 = vmul.f32 %v1239_v13, %v452_v36 }
 0x10b   :  { %v628_v58 = vadd.f32 %v544_v46, %v543_v43  ;;  %v454_v59 = vmax.f32 %v258_v47, 0.0  ;;  %v260_v60 = vadd.f32 %v259_v55, %v1216_v51  ;;  %v383_v0 = vadd.f32 %v382_v56, %v1218_v52 }
 0x10c   :  { %v261_v1 = vpop.f32.mrf.mxu0  ;;  %v384_v3 = vpop.f32.mrf.mxu1  ;;  %v625_v5 = vadd.f32 %v624_v57, %v542_v42  ;;  %v547_v6 = vmul.f32 %v1233_v2, %v453_v48  ;;  %v549_v10 = vmul.f32 %v1235_v4, %v455_v49  ;;  %v456_v11 = vmax.f32 %v381_v50, 0.0 }
 0x10d   :  { %v548_v7 = vmul.f32 %v1230_v63, %v454_v59  ;;  %v457_v8 = vmax.f32 %v260_v60, 0.0  ;;  %v262_v9 = vadd.f32 %v261_v1, %v1220_v53  ;;  %v385_v12 = vadd.f32 %v384_v3, %v1222_v54 }
 0x10e   :  { %626 = vadd.xlane.f32.xlu1 %v625_v5  ;;  %v265_v14 = vpop.f32.mrf.mxu0  ;;  %v388_v15 = vpop.f32.mrf.mxu1  ;;  %v629_v16 = vadd.f32 %v628_v58, %v545_v61  ;;  %v459_v18 = vmax.f32 %v383_v0, 0.0  ;;  %v550_v30 = vmul.f32 %v1239_v13, %v456_v11 }
 0x10f   :  { %v633_v17 = vadd.f32 %v548_v7, %v547_v6  ;;  %v458_v19 = vmax.f32 %v262_v9, 0.0  ;;  %v266_v20 = vadd.f32 %v265_v14, %v1216_v51  ;;  %v551_v21 = vmul.f32 %v1233_v2, %v457_v8  ;;  %v959_v9 = vld [vmem:[#allocation2] ss:$0 sm:$0xff] }
 0x110   :  { %v389_v22 = vadd.f32 %v388_v15, %v1218_v52  ;;  %v267_v23 = vpop.f32.mrf.mxu0  ;;  %v390_v24 = vpop.f32.mrf.mxu1  ;;  %v630_v25 = vadd.f32 %v629_v16, %v546_v62  ;;  %v460_v31 = vmax.f32 %v385_v12, 0.0  ;;  %v553_v36 = vmul.f32 %v1235_v4, %v459_v18 }
 0x111   :  { %v552_v26 = vmul.f32 %v1230_v63, %v458_v19  ;;  %v461_v27 = vmax.f32 %v266_v20, 0.0  ;;  %v268_v28 = vadd.f32 %v267_v23, %v1220_v53  ;;  %v391_v29 = vadd.f32 %v390_v24, %v1222_v54 }
 0x112   :  { %v463_v32 = vmax.f32 %v389_v22, 0.0  ;;  %631 = vadd.xlane.f32.xlu1 %v630_v25  ;;  %v269_v33 = vpop.f32.mrf.mxu0  ;;  %v392_v34 = vpop.f32.mrf.mxu1  ;;  %v634_v35 = vadd.f32 %v633_v17, %v549_v10  ;;  %v554_v56 = vmul.f32 %v1239_v13, %v460_v31 }
 0x113   :  { %v638_v37 = vadd.f32 %v552_v26, %v551_v21  ;;  %v555_v38 = vmul.f32 %v1233_v2, %v461_v27  ;;  %v462_v39 = vmax.f32 %v268_v28, 0.0  ;;  %v464_v40 = vmax.f32 %v391_v29, 0.0 }
 0x114   :  { %v270_v41 = vadd.f32 %v269_v33, %v1216_v51  ;;  %v393_v42 = vadd.f32 %v392_v34, %v1218_v52  ;;  %v271_v43 = vpop.f32.mrf.mxu0  ;;  %v394_v46 = vpop.f32.mrf.mxu1  ;;  %v635_v47 = vadd.f32 %v634_v35, %v550_v30  ;;  %v557_v48 = vmul.f32 %v1235_v4, %v463_v32 }
 0x115   :  { %v556_v49 = vmul.f32 %v1230_v63, %v462_v39  ;;  %v272_v50 = vadd.f32 %v271_v43, %v1220_v53  ;;  %v395_v55 = vadd.f32 %v394_v46, %v1222_v54  ;;  %v639_v58 = vadd.f32 %v638_v37, %v553_v36 }
 0x116   :  { %v465_v57 = vmax.f32 %v270_v41, 0.0  ;;  %636 = vadd.xlane.f32.xlu1 %v635_v47  ;;  %v467_v51 = vmax.f32 %v393_v42, 0.0  ;;  %v558_v52 = vmul.f32 %v1239_v13, %v464_v40 }
 0x117   :  { %v643_v59 = vadd.f32 %v556_v49, %v555_v38  ;;  %v466_v60 = vmax.f32 %v272_v50, 0.0  ;;  %v640_v61 = vadd.f32 %v639_v58, %v554_v56  ;;  %v468_v1 = vmax.f32 %v395_v55, 0.0 }
 0x118   :  { %v559_v62 = vmul.f32 %v1233_v2, %v465_v57  ;;  %v561_v53 = vmul.f32 %v1235_v4, %v467_v51 }
 0x119   :  { %v560_v0 = vmul.f32 %v1230_v63, %v466_v60  ;;  %v644_v3 = vadd.f32 %v643_v59, %v557_v48  ;;  %v562_v6 = vmul.f32 %v1239_v13, %v468_v1 }
 0x11a   :  { %641 = vadd.xlane.f32.xlu1 %v640_v61 }
 0x11b   :  { %v648_v54 = vadd.f32 %v560_v0, %v559_v62  ;;  %v645_v5 = vadd.f32 %v644_v3, %v558_v52 }
 0x11d   :  { %646 = vadd.xlane.f32.xlu0 %v645_v5  ;;  %v649_v7 = vadd.f32 %v648_v54, %v561_v53 }
 0x11f   :  { %v650_v8 = vadd.f32 %v649_v7, %v562_v6 }
 0x121   :  { %651 = vadd.xlane.f32.xlu1 %v650_v8 }
 0x133   :  { %660 = vperm.xlu0 %979, %v959_v9  }
 0x167   :  { %v567_v10 = vpop.xlane.xlu0 %566 }
 0x16b   :  { %v572_v11 = vpop.xlane.xlu0 %571 }
 0x16f   :  { %v577_v2 = vpop.xlane.xlu0 %576 }
 0x173   :  { %v582_v12 = vpop.xlane.xlu0 %581 }
 0x177   :  { %v587_v14 = vpop.xlane.xlu0 %586 }
 0x17b   :  { %v592_v16 = vpop.xlane.xlu0 %591 }
 0x17f   :  { %v597_v4 = vpop.xlane.xlu0 %596 }
 0x183   :  { %v602_v19 = vpop.xlane.xlu0 %601 }
 0x187   :  { %v607_v63 = vpop.xlane.xlu1 %606 }
 0x18b   :  { %v612_v15 = vpop.xlane.xlu1 %611 }
 0x18f   :  { %v617_v17 = vpop.xlane.xlu1 %616 }
 0x193   :  { %v622_v18 = vpop.xlane.xlu1 %621 }
 0x197   :  { %v627_v20 = vpop.xlane.xlu1 %626 }
 0x19b   :  { %v632_v21 = vpop.xlane.xlu1 %631 }
 0x19f   :  { %v637_v29 = vpop.xlane.xlu1 %636 }
 0x1a3   :  { %v642_v46 = vpop.xlane.xlu1 %641 }
 0x1a6   :  { %v647_v13 = vpop.xlane.xlu0 %646 }
 0x1aa   :  { %v652_v59 = vpop.xlane.xlu1 %651 }
 0x1ae   :  { %v661_v22 = vpop.permute.xlu0 %660 }
 0x1af   :  { %v663_v23 = vadd.f32 %v661_v22, %v567_v10  ;;  %v664_v24 = vadd.f32 %v661_v22, %v572_v11  ;;  %v665_v25 = vadd.f32 %v661_v22, %v577_v2  ;;  %v666_v26 = vadd.f32 %v661_v22, %v582_v12 }
 0x1b0   :  { %v667_v27 = vadd.f32 %v661_v22, %v587_v14  ;;  %v668_v28 = vadd.f32 %v661_v22, %v592_v16  ;;  %v669_v30 = vadd.f32 %v661_v22, %v597_v4  ;;  %v670_v33 = vadd.f32 %v661_v22, %v602_v19 }
 0x1b1   :  { %v960_v31 = vmul.f32 -1.442695, %v663_v23  ;;  %v961_v32 = vmul.f32 -1.442695, %v664_v24  ;;  %v962_v34 = vmul.f32 -1.442695, %v665_v25  ;;  %v671_v36 = vadd.f32 %v661_v22, %v607_v63 }
 0x1b2   :  { %v963_v35 = vmul.f32 -1.442695, %v666_v26  ;;  %v964_v37 = vmul.f32 -1.442695, %v667_v27  ;;  %v672_v38 = vadd.f32 %v661_v22, %v612_v15  ;;  %v965_v39 = vmul.f32 -1.442695, %v668_v28 }
 0x1b3   :  { %990 = vpow2.f32 %v960_v31  ;;  %v673_v40 = vadd.f32 %v661_v22, %v617_v17  ;;  %v966_v41 = vmul.f32 -1.442695, %v669_v30  ;;  %v674_v42 = vadd.f32 %v661_v22, %v622_v18 }
 0x1b4   :  { %992 = vpow2.f32 %v961_v32  ;;  %v967_v43 = vmul.f32 -1.442695, %v670_v33  ;;  %v675_v47 = vadd.f32 %v661_v22, %v627_v20  ;;  %v968_v48 = vmul.f32 -1.442695, %v671_v36 }
 0x1b5   :  { %994 = vpow2.f32 %v962_v34  ;;  %v676_v49 = vadd.f32 %v661_v22, %v632_v21  ;;  %v969_v50 = vmul.f32 -1.442695, %v672_v38  ;;  %v677_v55 = vadd.f32 %v661_v22, %v637_v29 }
 0x1b6   :  { %996 = vpow2.f32 %v963_v35  ;;  %v970_v56 = vmul.f32 -1.442695, %v673_v40  ;;  %v678_v57 = vadd.f32 %v661_v22, %v642_v46  ;;  %v971_v58 = vmul.f32 -1.442695, %v674_v42 }
 0x1b7   :  { %998 = vpow2.f32 %v964_v37  ;;  %v679_v51 = vadd.f32 %v661_v22, %v647_v13  ;;  %v972_v60 = vmul.f32 -1.442695, %v675_v47  ;;  %v680_v52 = vadd.f32 %v661_v22, %v652_v59 }
 0x1b8   :  { %1000 = vpow2.f32 %v965_v39  ;;  %v973_v61 = vmul.f32 -1.442695, %v676_v49  ;;  %v974_v62 = vmul.f32 -1.442695, %v677_v55  ;;  %v975_v0 = vmul.f32 -1.442695, %v678_v57 }
 0x1b9   :  { %1002 = vpow2.f32 %v966_v41  ;;  %v976_v1 = vmul.f32 -1.442695, %v679_v51  ;;  %v977_v53 = vmul.f32 -1.442695, %v680_v52  ;;  %v826_v26 = vand.u32 127, %v58_v44 }
 0x1ba   :  { %1004 = vpow2.f32 %v967_v43 }
 0x1bb   :  { %1006 = vpow2.f32 %v968_v48  ;;  %v1381_v35 = vsub.s32 %v826_v26, %v1207_v45 }
 0x1bc   :  { %1008 = vpow2.f32 %v969_v50 }
 0x1bd   :  { %1010 = vpow2.f32 %v970_v56 }
 0x1be   :  { %1012 = vpow2.f32 %v971_v58 }
 0x1bf   :  { %1014 = vpow2.f32 %v972_v60 }
 0x1c0   :  { %v991_v3 = vpop.eup %990  ;;  %1016 = vpow2.f32 %v973_v61 }
 0x1c1   :  { %v993_v54 = vpop.eup %992  ;;  %1018 = vpow2.f32 %v974_v62  ;;  %v735_v5 = vadd.f32 1.0, %v991_v3 }
 0x1c2   :  { %v995_v6 = vpop.eup %994  ;;  %1020 = vpow2.f32 %v975_v0  ;;  %v736_v7 = vadd.f32 1.0, %v993_v54 }
 0x1c3   :  { %v997_v8 = vpop.eup %996  ;;  %1022 = vpow2.f32 %v976_v1  ;;  %v737_v9 = vadd.f32 1.0, %v995_v6 }
 0x1c4   :  { %v999_v10 = vpop.eup %998  ;;  %1024 = vpow2.f32 %v977_v53  ;;  %v738_v11 = vadd.f32 1.0, %v997_v8 }
 0x1c5   :  { %v1001_v2 = vpop.eup %1000  ;;  %v739_v12 = vadd.f32 1.0, %v999_v10  ;;  %1026 = vrcp.f32 %v735_v5 }
 0x1c6   :  { %v1003_v63 = vpop.eup %1002  ;;  %v740_v14 = vadd.f32 1.0, %v1001_v2  ;;  %1028 = vrcp.f32 %v736_v7 }
 0x1c7   :  { %v1005_v15 = vpop.eup %1004  ;;  %v741_v16 = vadd.f32 1.0, %v1003_v63  ;;  %1030 = vrcp.f32 %v737_v9 }
 0x1c8   :  { %v1007_v17 = vpop.eup %1006  ;;  %v742_v4 = vadd.f32 1.0, %v1005_v15  ;;  %1032 = vrcp.f32 %v738_v11 }
 0x1c9   :  { %v1009_v18 = vpop.eup %1008  ;;  %v743_v19 = vadd.f32 1.0, %v1007_v17  ;;  %1034 = vrcp.f32 %v739_v12 }
 0x1ca   :  { %v1011_v20 = vpop.eup %1010  ;;  %v744_v13 = vadd.f32 1.0, %v1009_v18  ;;  %1036 = vrcp.f32 %v740_v14 }
 0x1cb   :  { %v1013_v21 = vpop.eup %1012  ;;  %v745_v22 = vadd.f32 1.0, %v1011_v20  ;;  %1038 = vrcp.f32 %v741_v16 }
 0x1cc   :  { %v1015_v23 = vpop.eup %1014  ;;  %v746_v24 = vadd.f32 1.0, %v1013_v21  ;;  %1040 = vrcp.f32 %v742_v4 }
 0x1cd   :  { %v1017_v25 = vpop.eup %1016  ;;  %v747_v27 = vadd.f32 1.0, %v1015_v23  ;;  %1042 = vrcp.f32 %v743_v19 }
 0x1ce   :  { %v1019_v28 = vpop.eup %1018  ;;  %v748_v29 = vadd.f32 1.0, %v1017_v25  ;;  %1044 = vrcp.f32 %v744_v13 }
 0x1cf   :  { %v1021_v30 = vpop.eup %1020  ;;  %v749_v31 = vadd.f32 1.0, %v1019_v28  ;;  %1046 = vrcp.f32 %v745_v22 }
 0x1d0   :  { %v1023_v32 = vpop.eup %1022  ;;  %v750_v33 = vadd.f32 1.0, %v1021_v30  ;;  %1048 = vrcp.f32 %v746_v24 }
 0x1d1   :  { %v1025_v34 = vpop.eup %1024  ;;  %v751_v36 = vadd.f32 1.0, %v1023_v32  ;;  %1050 = vrcp.f32 %v747_v27 }
 0x1d2   :  { %v1027_v37 = vpop.eup %1026  ;;  %v752_v38 = vadd.f32 1.0, %v1025_v34  ;;  %1052 = vrcp.f32 %v748_v29 }
 0x1d3   :  { %v1029_v44 = vpop.eup %1028  ;;  %1054 = vrcp.f32 %v749_v31  ;;  %v789_v39 = vadd.f32 1.0, %v1027_v37 }
 0x1d4   :  { %v1031_v40 = vpop.eup %1030  ;;  %1056 = vrcp.f32 %v750_v33  ;;  %v790_v41 = vadd.f32 1.0, %v1029_v44 }
 0x1d5   :  { %v1033_v42 = vpop.eup %1032  ;;  %1058 = vrcp.f32 %v751_v36  ;;  %v791_v43 = vadd.f32 1.0, %v1031_v40  ;;  %v830_v46 = vrot.slane %v789_v39, %v1381_v35 }
 0x1d6   :  { %v1035_v47 = vpop.eup %1034  ;;  %1060 = vrcp.f32 %v752_v38  ;;  %v792_v45 = vadd.f32 1.0, %v1033_v42  ;;  %v834_v48 = vrot.slane %v790_v41, %v1381_v35 }
 0x1d7   :  { %v1037_v49 = vpop.eup %1036  ;;  %v793_v50 = vadd.f32 1.0, %v1035_v47  ;;  %v838_v55 = vrot.slane %v791_v43, %v1381_v35 }
 0x1d8   :  { %v1039_v56 = vpop.eup %1038  ;;  %v794_v57 = vadd.f32 1.0, %v1037_v49  ;;  %v842_v58 = vrot.slane %v792_v45, %v1381_v35  ;;  %v900_v59 = vsel %vm899_vm2, %v834_v48, %v830_v46 }
 0x1d9   :  { %v1041_v51 = vpop.eup %1040  ;;  %v795_v60 = vadd.f32 1.0, %v1039_v56  ;;  %v846_v52 = vrot.slane %v793_v50, %v1381_v35  ;;  %v902_v61 = vsel %vm901_vm3, %v838_v55, %v900_v59 }
 0x1da   :  { %v1043_v62 = vpop.eup %1042  ;;  %v796_v0 = vadd.f32 1.0, %v1041_v51  ;;  %v850_v1 = vrot.slane %v794_v57, %v1381_v35  ;;  %v904_v3 = vsel %vm903_vm4, %v842_v58, %v902_v61 }
 0x1db   :  { %v1045_v53 = vpop.eup %1044  ;;  %v797_v54 = vadd.f32 1.0, %v1043_v62  ;;  %v854_v5 = vrot.slane %v795_v60, %v1381_v35  ;;  %v906_v6 = vsel %vm905_vm5, %v846_v52, %v904_v3 }
 0x1dc   :  { %v1047_v7 = vpop.eup %1046  ;;  %v798_v8 = vadd.f32 1.0, %v1045_v53  ;;  %v858_v9 = vrot.slane %v796_v0, %v1381_v35  ;;  %v908_v10 = vsel %vm907_vm6, %v850_v1, %v906_v6 }
 0x1dd   :  { %v1049_v11 = vpop.eup %1048  ;;  %v799_v2 = vadd.f32 1.0, %v1047_v7  ;;  %v862_v12 = vrot.slane %v797_v54, %v1381_v35  ;;  %v910_v63 = vsel %vm909_vm7, %v854_v5, %v908_v10 }
 0x1de   :  { %v1051_v14 = vpop.eup %1050  ;;  %v800_v15 = vadd.f32 1.0, %v1049_v11  ;;  %v866_v16 = vrot.slane %v798_v8, %v1381_v35  ;;  %v912_v17 = vsel %vm911_vm8, %v858_v9, %v910_v63 }
 0x1df   :  { %v1053_v4 = vpop.eup %1052  ;;  %v801_v18 = vadd.f32 1.0, %v1051_v14  ;;  %v870_v19 = vrot.slane %v799_v2, %v1381_v35  ;;  %925 = vst.msk [vmem:[%s1432_s5] sm:$0xff] %vm924_vm9, %v912_v17 }
 0x1e0   :  { %v1055_v20 = vpop.eup %1054  ;;  %v802_v13 = vadd.f32 1.0, %v1053_v4  ;;  %v874_v21 = vrot.slane %v800_v15, %v1381_v35  ;;  %v913_v22 = vsel %vm899_vm2, %v866_v16, %v862_v12 }
 0x1e1   :  { %v1057_v23 = vpop.eup %1056  ;;  %v803_v24 = vadd.f32 1.0, %v1055_v20  ;;  %v878_v25 = vrot.slane %v801_v18, %v1381_v35  ;;  %v914_v26 = vsel %vm901_vm3, %v870_v19, %v913_v22 }
 0x1e2   :  { %v1059_v27 = vpop.eup %1058  ;;  %v804_v28 = vadd.f32 1.0, %v1057_v23  ;;  %v882_v29 = vrot.slane %v802_v13, %v1381_v35  ;;  %v915_v30 = vsel %vm903_vm4, %v874_v21, %v914_v26 }
 0x1e3   :  { %v1061_v31 = vpop.eup %1060  ;;  %v805_v32 = vadd.f32 1.0, %v1059_v27  ;;  %v886_v33 = vrot.slane %v803_v24, %v1381_v35  ;;  %v916_v34 = vsel %vm905_vm5, %v878_v25, %v915_v30 }
 0x1e4   :  { %v806_v36 = vadd.f32 1.0, %v1061_v31  ;;  %v890_v37 = vrot.slane %v804_v28, %v1381_v35  ;;  %v917_v38 = vsel %vm907_vm6, %v882_v29, %v916_v34 }
 0x1e5   :  { %v894_v44 = vrot.slane %v805_v32, %v1381_v35  ;;  %v918_v39 = vsel %vm909_vm7, %v886_v33, %v917_v38 }
 0x1e6   :  { %v898_v40 = vrot.slane %v806_v36, %v1381_v35  ;;  %v919_v41 = vsel %vm911_vm8, %v890_v37, %v918_v39 }
 0x1e7   :  { %926 = vst.msk [vmem:[%s1432_s5 + $0x8] sm:$0xff] %vm924_vm9, %v919_v41 }
 0x1e8   :  { %v920_v42 = vsel %vm899_vm2, %v898_v40, %v894_v44 }
 0x1e9   :  { %928 = vst.msk [vmem:[%s1432_s5 + $0x10] sm:$0x3] %vm927_vm10, %v920_v42 }

// kernel: multiblock_forward.27
= control target key start
LH: loop header
LB: loop body
LE: loop exit
PB: predicated region body
PF: predicated region fallthrough
CT: control target
= control target key end

     0   :  { %v113_v0 = vmov 0.0   ;;  %vm114_vm0 = vmmov 0   ;;  %vm41_vm1 = vcmask 261120   ;;  %vm86_vm2 = vcmask 130048   ;;  %s156_s1 = inlined_call_operand.vmem [shape: bf16[32,16], index: 1, kind: input, shape index: {}]   ;;  %s157_s0 = inlined_call_operand.vmem [shape: f32[12,32], index: 0, kind: input, shape index: {}]   ;;  %s158_s2 = inlined_call_operand.vmem [shape: f32[1,16], index: 2, kind: input, shape index: {}]   ;;  %s159_s3 = inlined_call_operand.vmem [shape: f32[12,16], index: 3, kind: output, shape index: {}]  }
   0x1   :  { %101 = vmatprep.subr.bf16.mxu0 %v113_v0  ;;  %v111_v1 = vld [vmem:[%s156_s1 + $0x8] sm:$0xff]   ;;  %105 = vmatprep.mubr.msk.bf16.mxu0 %vm114_vm0, %v113_v0  ;;  %v112_v2 = vld [vmem:[%s156_s1] sm:$0xff]   ;;  %vm88_vm3 = vcmask 125952  }
   0x2   :  { %102 = vmatpush3.bf16.msra.mxu0 %v111_v1  ;;  %v15_v3 = vld [vmem:[%s157_s0] sm:$0xff]  ;;  %v16_v4 = vld [vmem:[%s157_s0 + $0x8] sm:$0xf] }
   0x3   :  { %103 = vmatprep.subr.bf16.mxu0 %v113_v0  ;;  %v17_v5 = vpack.c.bf16 %v16_v4, %v15_v3  ;;  %v94_v6 = vld [vmem:[%s158_s2] ss:$0 sm:$0xff] }
   0x6   :  { %104 = vmatpush3.bf16.msra.mxu0 %v112_v2 }
   0x9   :  { %106 = vmatmul.mubr.msk.bf16.vlgmr.msra.gmra.mxu0 %vm41_vm1, %v17_v5 }
  0xc9   :  { %v79_v7 = vpop.f32.mrf.mxu0 }
  0xca   :  { %v80_v8 = vadd.f32 %v94_v6, %v79_v7 }
  0xcb   :  { %v107_v9 = vpop.f32.mrf.mxu0 }
  0xcc   :  { %87 = vst.msk [vmem:[%s159_s3] sm:$0xff] %vm86_vm2, %v80_v8 }
  0xcd   :  { %v82_v10 = vpop.f32.mrf.mxu0 }
  0xce   :  { %v83_v11 = vadd.f32 %v94_v6, %v82_v10 }
  0xcf   :  { %v108_v12 = vpop.f32.mrf.mxu0 }
  0xd0   :  { %89 = vst.msk [vmem:[%s159_s3 + $0x8] sm:$0xf] %vm88_vm3, %v83_v11 }

// kernel: multiblock_forward.30
= control target key start
LH: loop header
LB: loop body
LE: loop exit
PB: predicated region body
PF: predicated region fallthrough
CT: control target
= control target key end

     0   :  { %v121_v0 = vmov 0.0   ;;  %vm122_vm0 = vmmov 0   ;;  %v123_v4 = vmov 0   ;;  %vm38_vm1 = vcmask 130048   ;;  %s173_s1 = inlined_call_operand.vmem [shape: bf16[16,48], index: 1, kind: input, shape index: {}]   ;;  %s174_s0 = inlined_call_operand.vmem [shape: f32[12,16], index: 0, kind: input, shape index: {}]   ;;  %s175_s3 = inlined_call_operand.vmem [shape: f32[12,1], index: 3, kind: input, shape index: {}]   ;;  %s176_s2 = inlined_call_operand.vmem [shape: f32[1,48], index: 2, kind: input, shape index: {}]   ;;  %s177_s4 = inlined_call_operand.vmem [shape: f32[12,48], index: 4, kind: output, shape index: {}]  }
   0x1   :  { %110 = vmatprep.subr.bf16.mxu0 %v121_v0  ;;  %v120_v1 = vld [vmem:[%s173_s1] sm:$0xff]   ;;  %112 = vmatprep.mubr.msk.bf16.mxu0 %vm122_vm0, %v121_v0  ;;  %v19_v3 = vld [vmem:[%s174_s0 + $0x8] sm:$0xf]  ;;  %vm97_vm2 = vcmask 392192   ;;  %vm99_vm3 = vcmask 388096  }
   0x2   :  { %v18_v2 = vld [vmem:[%s174_s0] sm:$0xff]  ;;  %119 = vset.pattern.permute.xlu0 %v123_v4  ;;  %111 = vmatpush3.bf16.msra.mxu0 %v120_v1  ;;  %v21_v7 = vmax.f32 %v19_v3, 0.0  ;;  %v84_v8 = vld [vmem:[%s175_s3 + $0x8] sm:$0xf] }
   0x3   :  { %v83_v5 = vld [vmem:[%s175_s3] sm:$0xff]  ;;  %v20_v6 = vmax.f32 %v18_v2, 0.0 }
   0x4   :  { %87 = vperm.xlu0 %119, %v83_v5   ;;  %v105_v10 = vld [vmem:[%s176_s2] ss:$0 sm:$0xff] }
   0x5   :  { %v22_v9 = vpack.c.bf16 %v21_v7, %v20_v6 }
   0x7   :  { %113 = vmatmul.mubr.msk.bf16.vlgmr.msra.gmra.mxu0 %vm38_vm1, %v22_v9 }
   0x8   :  { %92 = vperm.xlu0 %119, %v84_v8  }
  0x7f   :  { %v88_v11 = vpop.permute.xlu0 %87 }
  0x83   :  { %v93_v18 = vpop.permute.xlu0 %92 }
  0xc7   :  { %v76_v12 = vpop.f32.mrf.mxu0 }
  0xc8   :  { %v77_v13 = vadd.f32 %v105_v10, %v76_v12 }
  0xc9   :  { %v114_v14 = vpop.f32.mrf.mxu0 }
  0xca   :  { %v95_v15 = vmul.f32 %v88_v11, %v77_v13 }
  0xcb   :  { %v79_v16 = vpop.f32.mrf.mxu0 }
  0xcc   :  { %98 = vst.msk [vmem:[%s177_s4] sm:$0xff] %vm97_vm2, %v95_v15  ;;  %v80_v17 = vadd.f32 %v105_v10, %v79_v16 }
  0xcd   :  { %v115_v19 = vpop.f32.mrf.mxu0 }
  0xce   :  { %v96_v20 = vmul.f32 %v93_v18, %v80_v17 }
  0xd0   :  { %100 = vst.msk [vmem:[%s177_s4 + $0x8] sm:$0xf] %vm99_vm3, %v96_v20 }

// kernel: multiblock_forward.31
= control target key start
LH: loop header
LB: loop body
LE: loop exit
PB: predicated region body
PF: predicated region fallthrough
CT: control target
= control target key end

     0   :  { %v121_v0 = vmov 0.0   ;;  %vm122_vm0 = vmmov 0   ;;  %v123_v4 = vmov 0   ;;  %vm38_vm1 = vcmask 130048   ;;  %s173_s1 = inlined_call_operand.vmem [shape: bf16[16,48], index: 1, kind: input, shape index: {}]   ;;  %s174_s0 = inlined_call_operand.vmem [shape: f32[14,16], index: 0, kind: input, shape index: {}]   ;;  %s175_s3 = inlined_call_operand.vmem [shape: f32[14,1], index: 3, kind: input, shape index: {}]   ;;  %s176_s2 = inlined_call_operand.vmem [shape: f32[1,48], index: 2, kind: input, shape index: {}]   ;;  %s177_s4 = inlined_call_operand.vmem [shape: f32[14,48], index: 4, kind: output, shape index: {}]  }
   0x1   :  { %110 = vmatprep.subr.bf16.mxu0 %v121_v0  ;;  %v120_v1 = vld [vmem:[%s173_s1] sm:$0xff]   ;;  %112 = vmatprep.mubr.msk.bf16.mxu0 %vm122_vm0, %v121_v0  ;;  %v19_v3 = vld [vmem:[%s174_s0 + $0x8] sm:$0x3f]  ;;  %vm97_vm2 = vcmask 392192   ;;  %vm99_vm3 = vcmask 390144  }
   0x2   :  { %v18_v2 = vld [vmem:[%s174_s0] sm:$0xff]  ;;  %119 = vset.pattern.permute.xlu0 %v123_v4  ;;  %111 = vmatpush3.bf16.msra.mxu0 %v120_v1  ;;  %v21_v7 = vmax.f32 %v19_v3, 0.0  ;;  %v84_v8 = vld [vmem:[%s175_s3 + $0x8] sm:$0x3f] }
   0x3   :  { %v83_v5 = vld [vmem:[%s175_s3] sm:$0xff]  ;;  %v20_v6 = vmax.f32 %v18_v2, 0.0 }
   0x4   :  { %87 = vperm.xlu0 %119, %v83_v5   ;;  %v105_v10 = vld [vmem:[%s176_s2] ss:$0 sm:$0xff] }
   0x5   :  { %v22_v9 = vpack.c.bf16 %v21_v7, %v20_v6 }
   0x7   :  { %113 = vmatmul.mubr.msk.bf16.vlgmr.msra.gmra.mxu0 %vm38_vm1, %v22_v9 }
   0x8   :  { %92 = vperm.xlu0 %119, %v84_v8  }
  0x7f   :  { %v88_v11 = vpop.permute.xlu0 %87 }
  0x83   :  { %v93_v18 = vpop.permute.xlu0 %92 }
  0xc7   :  { %v76_v12 = vpop.f32.mrf.mxu0 }
  0xc8   :  { %v77_v13 = vadd.f32 %v105_v10, %v76_v12 }
  0xc9   :  { %v114_v14 = vpop.f32.mrf.mxu0 }
  0xca   :  { %v95_v15 = vmul.f32 %v88_v11, %v77_v13 }
  0xcb   :  { %v79_v16 = vpop.f32.mrf.mxu0 }
  0xcc   :  { %98 = vst.msk [vmem:[%s177_s4] sm:$0xff] %vm97_vm2, %v95_v15  ;;  %v80_v17 = vadd.f32 %v105_v10, %v79_v16 }
  0xcd   :  { %v115_v19 = vpop.f32.mrf.mxu0 }
  0xce   :  { %v96_v20 = vmul.f32 %v93_v18, %v80_v17 }
  0xd0   :  { %100 = vst.msk [vmem:[%s177_s4 + $0x8] sm:$0x3f] %vm99_vm3, %v96_v20 }

// kernel: multiblock_forward.28
= control target key start
LH: loop header
LB: loop body
LE: loop exit
PB: predicated region body
PF: predicated region fallthrough
CT: control target
= control target key end

     0   :  { %v113_v0 = vmov 0.0   ;;  %vm114_vm0 = vmmov 0   ;;  %vm41_vm1 = vcmask 261120   ;;  %vm86_vm2 = vcmask 130048   ;;  %s156_s1 = inlined_call_operand.vmem [shape: bf16[32,16], index: 1, kind: input, shape index: {}]   ;;  %s157_s0 = inlined_call_operand.vmem [shape: f32[14,32], index: 0, kind: input, shape index: {}]   ;;  %s158_s2 = inlined_call_operand.vmem [shape: f32[1,16], index: 2, kind: input, shape index: {}]   ;;  %s159_s3 = inlined_call_operand.vmem [shape: f32[14,16], index: 3, kind: output, shape index: {}]  }
   0x1   :  { %101 = vmatprep.subr.bf16.mxu0 %v113_v0  ;;  %v111_v1 = vld [vmem:[%s156_s1 + $0x8] sm:$0xff]   ;;  %105 = vmatprep.mubr.msk.bf16.mxu0 %vm114_vm0, %v113_v0  ;;  %v112_v2 = vld [vmem:[%s156_s1] sm:$0xff]   ;;  %vm88_vm3 = vcmask 128000  }
   0x2   :  { %102 = vmatpush3.bf16.msra.mxu0 %v111_v1  ;;  %v15_v3 = vld [vmem:[%s157_s0] sm:$0xff]  ;;  %v16_v4 = vld [vmem:[%s157_s0 + $0x8] sm:$0x3f] }
   0x3   :  { %103 = vmatprep.subr.bf16.mxu0 %v113_v0  ;;  %v17_v5 = vpack.c.bf16 %v16_v4, %v15_v3  ;;  %v94_v6 = vld [vmem:[%s158_s2] ss:$0 sm:$0xff] }
   0x6   :  { %104 = vmatpush3.bf16.msra.mxu0 %v112_v2 }
   0x9   :  { %106 = vmatmul.mubr.msk.bf16.vlgmr.msra.gmra.mxu0 %vm41_vm1, %v17_v5 }
  0xc9   :  { %v79_v7 = vpop.f32.mrf.mxu0 }
  0xca   :  { %v80_v8 = vadd.f32 %v94_v6, %v79_v7 }
  0xcb   :  { %v107_v9 = vpop.f32.mrf.mxu0 }
  0xcc   :  { %87 = vst.msk [vmem:[%s159_s3] sm:$0xff] %vm86_vm2, %v80_v8 }
  0xcd   :  { %v82_v10 = vpop.f32.mrf.mxu0 }
  0xce   :  { %v83_v11 = vadd.f32 %v94_v6, %v82_v10 }
  0xcf   :  { %v108_v12 = vpop.f32.mrf.mxu0 }
  0xd0   :  { %89 = vst.msk [vmem:[%s159_s3 + $0x8] sm:$0x3f] %vm88_vm3, %v83_v11 }

// kernel: multiblock_forward.39
= control target key start
LH: loop header
LB: loop body
LE: loop exit
PB: predicated region body
PF: predicated region fallthrough
CT: control target
= control target key end

     0   :  { %vm23_vm0 = vcmask 130048   ;;  %vm27_vm1 = vcmask 128000   ;;  %s137_s0 = inlined_call_operand.vmem [shape: f32[14,16], index: 0, kind: input, shape index: {}]   ;;  %s138_s1 = inlined_call_operand.vmem [shape: f32[14,16], index: 1, kind: input, shape index: {}]   ;;  %s139_s2 = inlined_call_operand.vmem [shape: f32[1,16], index: 2, kind: input, shape index: {}]   ;;  %s140_s3 = inlined_call_operand.vmem [shape: f32[1,16], index: 3, kind: input, shape index: {}]   ;;  %s141_s4 = inlined_call_operand.vmem [shape: f32[14,16], index: 4, kind: output, shape index: {}]  }
   0x1   :  { %v17_v0 = vld [vmem:[%s137_s0] sm:$0xff]  ;;  %v18_v2 = vld [vmem:[%s137_s0 + $0x8] sm:$0x3f] }
   0x2   :  { %v19_v1 = vld [vmem:[%s138_s1] sm:$0xff]  ;;  %v20_v4 = vld [vmem:[%s138_s1 + $0x8] sm:$0x3f] }
   0x3   :  { %v21_v3 = vadd.f32 %v19_v1, %v17_v0  ;;  %v22_v5 = vadd.f32 %v20_v4, %v18_v2  ;;  %v76_v25 = vld [vmem:[%s139_s2] ss:$0 sm:$0xff] }
   0x4   :  { %v77_v27 = vld [vmem:[%s140_s3] ss:$0 sm:$0xff] }
   0x5   :  { %v24_v6 = vsel %vm23_vm0, %v21_v3, 0.0  ;;  %v28_v7 = vsel %vm27_vm1, %v22_v5, 0.0 }
   0x6   :  { %25 = vadd.xlane.f32.xlu0 %v24_v6 }
   0xa   :  { %29 = vadd.xlane.f32.xlu0 %v28_v7 }
  0x8f   :  { %v26_v8 = vpop.xlane.xlu0 %25 }
  0x90   :  { %v32_v9 = vmul.f32 0.0625, %v26_v8 }
  0x92   :  { %v34_v10 = vsub.f32 %v21_v3, %v32_v9 }
  0x93   :  { %v30_v11 = vpop.xlane.xlu0 %29 }
  0x94   :  { %v33_v12 = vmul.f32 0.0625, %v30_v11  ;;  %v36_v13 = vmul.f32 %v34_v10, %v34_v10 }
  0x96   :  { %v35_v14 = vsub.f32 %v22_v5, %v33_v12  ;;  %v38_v15 = vsel %vm23_vm0, %v36_v13, 0.0 }
  0x97   :  { %39 = vadd.xlane.f32.xlu1 %v38_v15 }
  0x98   :  { %v37_v16 = vmul.f32 %v35_v14, %v35_v14 }
  0x9a   :  { %v41_v17 = vsel %vm27_vm1, %v37_v16, 0.0 }
  0x9b   :  { %42 = vadd.xlane.f32.xlu1 %v41_v17 }
 0x120   :  { %v40_v18 = vpop.xlane.xlu1 %39 }
 0x121   :  { %v44_v19 = vmul.f32 0.0625, %v40_v18 }
 0x123   :  { %v46_v20 = vadd.f32 1e-05, %v44_v19 }
 0x124   :  { %v43_v21 = vpop.xlane.xlu1 %42 }
 0x125   :  { %78 = vrsqrt.f32 %v46_v20  ;;  %v45_v22 = vmul.f32 0.0625, %v43_v21 }
 0x127   :  { %v47_v23 = vadd.f32 1e-05, %v45_v22 }
 0x129   :  { %80 = vrsqrt.f32 %v47_v23 }
 0x132   :  { %v79_v24 = vpop.eup %78 }
 0x133   :  { %v50_v26 = vmul.f32 %v79_v24, %v34_v10 }
 0x135   :  { %v59_v28 = vmul.f32 %v76_v25, %v50_v26 }
 0x136   :  { %v81_v29 = vpop.eup %80 }
 0x137   :  { %v68_v30 = vadd.f32 %v77_v27, %v59_v28  ;;  %v51_v31 = vmul.f32 %v81_v29, %v35_v14 }
 0x139   :  { %70 = vst.msk [vmem:[%s141_s4] sm:$0xff] %vm23_vm0, %v68_v30  ;;  %v60_v32 = vmul.f32 %v76_v25, %v51_v31 }
 0x13b   :  { %v69_v33 = vadd.f32 %v77_v27, %v60_v32 }
 0x13d   :  { %71 = vst.msk [vmem:[%s141_s4 + $0x8] sm:$0x3f] %vm27_vm1, %v69_v33 }

// kernel: multiblock_forward.36
= control target key start
LH: loop header
LB: loop body
LE: loop exit
PB: predicated region body
PF: predicated region fallthrough
CT: control target
= control target key end

     0   :  { %v247_v0 = vmov 0.0   ;;  %vm248_vm0 = vmmov 0   ;;  %vm43_vm1 = vcmask 130048   ;;  %vm205_vm2 = vcmask 128000   ;;  %s332_s4 = inlined_call_operand.vmem [shape: bf16[16,16], index: 4, kind: input, shape index: {}]   ;;  %s333_s3 = inlined_call_operand.vmem [shape: bf16[16,16], index: 3, kind: input, shape index: {}]   ;;  %s334_s1 = inlined_call_operand.vmem [shape: f32[14,16], index: 1, kind: input, shape index: {}]   ;;  %s335_s0 = inlined_call_operand.vmem [shape: f32[14,16], index: 0, kind: input, shape index: {}]   ;;  %s336_s5 = inlined_call_operand.vmem [shape: bf16[16,16], index: 5, kind: input, shape index: {}]   ;;  %s337_s2 = inlined_call_operand.vmem [shape: f32[14,16], index: 2, kind: input, shape index: {}]   ;;  %s338_s6 = inlined_call_operand.vmem [shape: f32[1,16], index: 6, kind: input, shape index: {}]   ;;  %s339_s7 = inlined_call_operand.vmem [shape: f32[14,16], index: 7, kind: output, shape index: {}]  }
   0x1   :  { %224 = vmatprep.subr.bf16.mxu0 %v247_v0  ;;  %230 = vmatprep.subr.bf16.mxu1 %v247_v0  ;;  %v244_v1 = vld [vmem:[%s332_s4] sm:$0xff]   ;;  %v33_v4 = vld [vmem:[%s334_s1 + $0x8] sm:$0x3f] }
   0x2   :  { %v245_v2 = vld [vmem:[%s333_s3] sm:$0xff]   ;;  %226 = vmatprep.mubr.msk.bf16.mxu0 %vm248_vm0, %v247_v0  ;;  %232 = vmatprep.mubr.msk.bf16.mxu1 %vm248_vm0, %v247_v0  ;;  %v28_v7 = vld [vmem:[%s335_s0 + $0x8] sm:$0x3f] }
   0x3   :  { %225 = vmatpush3.bf16.msra.mxu0 %v244_v1  ;;  %v32_v3 = vld [vmem:[%s334_s1] sm:$0xff]  ;;  %231 = vmatpush3.bf16.msra.mxu1 %v245_v2  ;;  %v139_v11 = vld [vmem:[%s337_s2 + $0x8] sm:$0x3f] }
   0x4   :  { %v27_v5 = vld [vmem:[%s335_s0] sm:$0xff]  ;;  %v34_v6 = vpack.c.bf16 %v33_v4, %v32_v3  ;;  %236 = vmatprep.subr.bf16.mxu0 %v247_v0 }
   0x5   :  { %v29_v8 = vpack.c.bf16 %v28_v7, %v27_v5  ;;  %v246_v9 = vld [vmem:[%s336_s5] sm:$0xff]  }
   0x6   :  { %227 = vmatmul.mubr.msk.bf16.vlgmr.msra.gmra.mxu0 %vm43_vm1, %v34_v6  ;;  %v138_v10 = vld [vmem:[%s337_s2] sm:$0xff] }
   0x7   :  { %233 = vmatmul.mubr.msk.bf16.vlgmr.msra.gmra.mxu1 %vm43_vm1, %v29_v8  ;;  %237 = vmatpush3.bf16.msra.mxu0 %v246_v9  ;;  %v140_v12 = vpack.c.bf16 %v139_v11, %v138_v10  ;;  %v217_v23 = vld [vmem:[%s338_s6] ss:$0 sm:$0xff] }
   0x8   :  { %238 = vmatprep.mubr.msk.bf16.mxu0 %vm248_vm0, %v247_v0 }
   0xe   :  { %239 = vmatmul.mubr.msk.bf16.vlgmr.msra.gmra.mxu0 %vm43_vm1, %v140_v12 }
  0xc6   :  { %v81_v13 = vpop.f32.mrf.mxu0 }
  0xc7   :  { %v131_v14 = vpop.f32.mrf.mxu1 }
  0xc8   :  { %v228_v15 = vpop.f32.mrf.mxu0  ;;  %v132_v20 = vadd.f32 %v131_v14, %v81_v13 }
  0xc9   :  { %v234_v16 = vpop.f32.mrf.mxu1 }
  0xca   :  { %v84_v17 = vpop.f32.mrf.mxu0 }
  0xcb   :  { %v134_v18 = vpop.f32.mrf.mxu1 }
  0xcc   :  { %v229_v19 = vpop.f32.mrf.mxu0  ;;  %v135_v26 = vadd.f32 %v134_v18, %v84_v17 }
  0xcd   :  { %v235_v21 = vpop.f32.mrf.mxu1 }
  0xce   :  { %v186_v22 = vpop.f32.mrf.mxu0 }
  0xcf   :  { %v193_v24 = vadd.f32 %v186_v22, %v132_v20 }
  0xd0   :  { %v240_v25 = vpop.f32.mrf.mxu0 }
  0xd1   :  { %v202_v27 = vadd.f32 %v217_v23, %v193_v24 }
  0xd2   :  { %v189_v28 = vpop.f32.mrf.mxu0 }
  0xd3   :  { %204 = vst.msk [vmem:[%s339_s7] sm:$0xff] %vm43_vm1, %v202_v27  ;;  %v194_v29 = vadd.f32 %v189_v28, %v135_v26 }
  0xd4   :  { %v241_v30 = vpop.f32.mrf.mxu0 }
  0xd5   :  { %v203_v31 = vadd.f32 %v217_v23, %v194_v29 }
  0xd7   :  { %206 = vst.msk [vmem:[%s339_s7 + $0x8] sm:$0x3f] %vm205_vm2, %v203_v31 }

// kernel: multiblock_forward.35
= control target key start
LH: loop header
LB: loop body
LE: loop exit
PB: predicated region body
PF: predicated region fallthrough
CT: control target
= control target key end

     0   :  { %v247_v0 = vmov 0.0   ;;  %vm248_vm0 = vmmov 0   ;;  %vm43_vm1 = vcmask 130048   ;;  %vm205_vm2 = vcmask 125952   ;;  %s332_s4 = inlined_call_operand.vmem [shape: bf16[16,16], index: 4, kind: input, shape index: {}]   ;;  %s333_s3 = inlined_call_operand.vmem [shape: bf16[16,16], index: 3, kind: input, shape index: {}]   ;;  %s334_s1 = inlined_call_operand.vmem [shape: f32[12,16], index: 1, kind: input, shape index: {}]   ;;  %s335_s0 = inlined_call_operand.vmem [shape: f32[12,16], index: 0, kind: input, shape index: {}]   ;;  %s336_s5 = inlined_call_operand.vmem [shape: bf16[16,16], index: 5, kind: input, shape index: {}]   ;;  %s337_s2 = inlined_call_operand.vmem [shape: f32[12,16], index: 2, kind: input, shape index: {}]   ;;  %s338_s6 = inlined_call_operand.vmem [shape: f32[1,16], index: 6, kind: input, shape index: {}]   ;;  %s339_s7 = inlined_call_operand.vmem [shape: f32[12,16], index: 7, kind: output, shape index: {}]  }
   0x1   :  { %224 = vmatprep.subr.bf16.mxu0 %v247_v0  ;;  %230 = vmatprep.subr.bf16.mxu1 %v247_v0  ;;  %v244_v1 = vld [vmem:[%s332_s4] sm:$0xff]   ;;  %v33_v4 = vld [vmem:[%s334_s1 + $0x8] sm:$0xf] }
   0x2   :  { %v245_v2 = vld [vmem:[%s333_s3] sm:$0xff]   ;;  %226 = vmatprep.mubr.msk.bf16.mxu0 %vm248_vm0, %v247_v0  ;;  %232 = vmatprep.mubr.msk.bf16.mxu1 %vm248_vm0, %v247_v0  ;;  %v28_v7 = vld [vmem:[%s335_s0 + $0x8] sm:$0xf] }
   0x3   :  { %225 = vmatpush3.bf16.msra.mxu0 %v244_v1  ;;  %v32_v3 = vld [vmem:[%s334_s1] sm:$0xff]  ;;  %231 = vmatpush3.bf16.msra.mxu1 %v245_v2  ;;  %v139_v11 = vld [vmem:[%s337_s2 + $0x8] sm:$0xf] }
   0x4   :  { %v27_v5 = vld [vmem:[%s335_s0] sm:$0xff]  ;;  %v34_v6 = vpack.c.bf16 %v33_v4, %v32_v3  ;;  %236 = vmatprep.subr.bf16.mxu0 %v247_v0 }
   0x5   :  { %v29_v8 = vpack.c.bf16 %v28_v7, %v27_v5  ;;  %v246_v9 = vld [vmem:[%s336_s5] sm:$0xff]  }
   0x6   :  { %227 = vmatmul.mubr.msk.bf16.vlgmr.msra.gmra.mxu0 %vm43_vm1, %v34_v6  ;;  %v138_v10 = vld [vmem:[%s337_s2] sm:$0xff] }
   0x7   :  { %233 = vmatmul.mubr.msk.bf16.vlgmr.msra.gmra.mxu1 %vm43_vm1, %v29_v8  ;;  %237 = vmatpush3.bf16.msra.mxu0 %v246_v9  ;;  %v140_v12 = vpack.c.bf16 %v139_v11, %v138_v10  ;;  %v217_v23 = vld [vmem:[%s338_s6] ss:$0 sm:$0xff] }
   0x8   :  { %238 = vmatprep.mubr.msk.bf16.mxu0 %vm248_vm0, %v247_v0 }
   0xe   :  { %239 = vmatmul.mubr.msk.bf16.vlgmr.msra.gmra.mxu0 %vm43_vm1, %v140_v12 }
  0xc6   :  { %v81_v13 = vpop.f32.mrf.mxu0 }
  0xc7   :  { %v131_v14 = vpop.f32.mrf.mxu1 }
  0xc8   :  { %v228_v15 = vpop.f32.mrf.mxu0  ;;  %v132_v20 = vadd.f32 %v131_v14, %v81_v13 }
  0xc9   :  { %v234_v16 = vpop.f32.mrf.mxu1 }
  0xca   :  { %v84_v17 = vpop.f32.mrf.mxu0 }
  0xcb   :  { %v134_v18 = vpop.f32.mrf.mxu1 }
  0xcc   :  { %v229_v19 = vpop.f32.mrf.mxu0  ;;  %v135_v26 = vadd.f32 %v134_v18, %v84_v17 }
  0xcd   :  { %v235_v21 = vpop.f32.mrf.mxu1 }
  0xce   :  { %v186_v22 = vpop.f32.mrf.mxu0 }
  0xcf   :  { %v193_v24 = vadd.f32 %v186_v22, %v132_v20 }
  0xd0   :  { %v240_v25 = vpop.f32.mrf.mxu0 }
  0xd1   :  { %v202_v27 = vadd.f32 %v217_v23, %v193_v24 }
  0xd2   :  { %v189_v28 = vpop.f32.mrf.mxu0 }
  0xd3   :  { %204 = vst.msk [vmem:[%s339_s7] sm:$0xff] %vm43_vm1, %v202_v27  ;;  %v194_v29 = vadd.f32 %v189_v28, %v135_v26 }
  0xd4   :  { %v241_v30 = vpop.f32.mrf.mxu0 }
  0xd5   :  { %v203_v31 = vadd.f32 %v217_v23, %v194_v29 }
  0xd7   :  { %206 = vst.msk [vmem:[%s339_s7 + $0x8] sm:$0xf] %vm205_vm2, %v203_v31 }

// kernel: multiblock_forward.38
= control target key start
LH: loop header
LB: loop body
LE: loop exit
PB: predicated region body
PF: predicated region fallthrough
CT: control target
= control target key end

     0   :  { %vm23_vm0 = vcmask 130048   ;;  %vm27_vm1 = vcmask 125952   ;;  %s137_s0 = inlined_call_operand.vmem [shape: f32[12,16], index: 0, kind: input, shape index: {}]   ;;  %s138_s1 = inlined_call_operand.vmem [shape: f32[12,16], index: 1, kind: input, shape index: {}]   ;;  %s139_s2 = inlined_call_operand.vmem [shape: f32[1,16], index: 2, kind: input, shape index: {}]   ;;  %s140_s3 = inlined_call_operand.vmem [shape: f32[1,16], index: 3, kind: input, shape index: {}]   ;;  %s141_s4 = inlined_call_operand.vmem [shape: f32[12,16], index: 4, kind: output, shape index: {}]  }
   0x1   :  { %v17_v0 = vld [vmem:[%s137_s0] sm:$0xff]  ;;  %v18_v2 = vld [vmem:[%s137_s0 + $0x8] sm:$0xf] }
   0x2   :  { %v19_v1 = vld [vmem:[%s138_s1] sm:$0xff]  ;;  %v20_v4 = vld [vmem:[%s138_s1 + $0x8] sm:$0xf] }
   0x3   :  { %v21_v3 = vadd.f32 %v19_v1, %v17_v0  ;;  %v22_v5 = vadd.f32 %v20_v4, %v18_v2  ;;  %v76_v25 = vld [vmem:[%s139_s2] ss:$0 sm:$0xff] }
   0x4   :  { %v77_v27 = vld [vmem:[%s140_s3] ss:$0 sm:$0xff] }
   0x5   :  { %v24_v6 = vsel %vm23_vm0, %v21_v3, 0.0  ;;  %v28_v7 = vsel %vm27_vm1, %v22_v5, 0.0 }
   0x6   :  { %25 = vadd.xlane.f32.xlu0 %v24_v6 }
   0xa   :  { %29 = vadd.xlane.f32.xlu0 %v28_v7 }
  0x8f   :  { %v26_v8 = vpop.xlane.xlu0 %25 }
  0x90   :  { %v32_v9 = vmul.f32 0.0625, %v26_v8 }
  0x92   :  { %v34_v10 = vsub.f32 %v21_v3, %v32_v9 }
  0x93   :  { %v30_v11 = vpop.xlane.xlu0 %29 }
  0x94   :  { %v33_v12 = vmul.f32 0.0625, %v30_v11  ;;  %v36_v13 = vmul.f32 %v34_v10, %v34_v10 }
  0x96   :  { %v35_v14 = vsub.f32 %v22_v5, %v33_v12  ;;  %v38_v15 = vsel %vm23_vm0, %v36_v13, 0.0 }
  0x97   :  { %39 = vadd.xlane.f32.xlu1 %v38_v15 }
  0x98   :  { %v37_v16 = vmul.f32 %v35_v14, %v35_v14 }
  0x9a   :  { %v41_v17 = vsel %vm27_vm1, %v37_v16, 0.0 }
  0x9b   :  { %42 = vadd.xlane.f32.xlu1 %v41_v17 }
 0x120   :  { %v40_v18 = vpop.xlane.xlu1 %39 }
 0x121   :  { %v44_v19 = vmul.f32 0.0625, %v40_v18 }
 0x123   :  { %v46_v20 = vadd.f32 1e-05, %v44_v19 }
 0x124   :  { %v43_v21 = vpop.xlane.xlu1 %42 }
 0x125   :  { %78 = vrsqrt.f32 %v46_v20  ;;  %v45_v22 = vmul.f32 0.0625, %v43_v21 }
 0x127   :  { %v47_v23 = vadd.f32 1e-05, %v45_v22 }
 0x129   :  { %80 = vrsqrt.f32 %v47_v23 }
 0x132   :  { %v79_v24 = vpop.eup %78 }
 0x133   :  { %v50_v26 = vmul.f32 %v79_v24, %v34_v10 }
 0x135   :  { %v59_v28 = vmul.f32 %v76_v25, %v50_v26 }
 0x136   :  { %v81_v29 = vpop.eup %80 }
 0x137   :  { %v68_v30 = vadd.f32 %v77_v27, %v59_v28  ;;  %v51_v31 = vmul.f32 %v81_v29, %v35_v14 }
 0x139   :  { %70 = vst.msk [vmem:[%s141_s4] sm:$0xff] %vm23_vm0, %v68_v30  ;;  %v60_v32 = vmul.f32 %v76_v25, %v51_v31 }
 0x13b   :  { %v69_v33 = vadd.f32 %v77_v27, %v60_v32 }
 0x13d   :  { %71 = vst.msk [vmem:[%s141_s4 + $0x8] sm:$0xf] %vm27_vm1, %v69_v33 }

// kernel: multiblock_forward.41
= control target key start
LH: loop header
LB: loop body
LE: loop exit
PB: predicated region body
PF: predicated region fallthrough
CT: control target
= control target key end

     0   :  { %v108_v0 = vmov 0.0   ;;  %vm109_vm0 = vmmov 0   ;;  %vm33_vm1 = vcmask 130048   ;;  %vm83_vm2 = vcmask 123904   ;;  %s142_s1 = inlined_call_operand.vmem [shape: bf16[16,16], index: 1, kind: input, shape index: {}]   ;;  %s143_s0 = inlined_call_operand.vmem [shape: f32[2,16], index: 0, kind: input, shape index: {}]   ;;  %s144_s2 = inlined_call_operand.vmem [shape: f32[1,16], index: 2, kind: input, shape index: {}]   ;;  %s145_s3 = inlined_call_operand.vmem [shape: f32[2,16], index: 3, kind: output, shape index: {}]  }
   0x1   :  { %95 = vmatprep.subr.bf16.mxu0 %v108_v0  ;;  %v103_v1 = vld [vmem:[%s142_s1] sm:$0xff]   ;;  %97 = vmatprep.mubr.msk.bf16.mxu0 %vm109_vm0, %v108_v0 }
   0x2   :  { %v15_v2 = vld [vmem:[%s143_s0] sm:$0x3]  ;;  %96 = vmatpush3.bf16.msra.mxu0 %v103_v1 }
   0x3   :  { %v16_v3 = vmax.f32 %v15_v2, 0.0  ;;  %v89_v5 = vld [vmem:[%s144_s2] ss:$0 sm:$0xff] }
   0x5   :  { %v17_v4 = vpack.c.bf16 %v16_v3, %v16_v3 }
   0x7   :  { %98 = vmatmul.mubr.msk.bf16.vlgmr.msra.gmra.mxu0 %vm33_vm1, %v17_v4 }
  0xc7   :  { %v71_v6 = vpop.f32.mrf.mxu0 }
  0xc8   :  { %v72_v7 = vadd.f32 %v89_v5, %v71_v6 }
  0xc9   :  { %v99_v8 = vpop.f32.mrf.mxu0 }
  0xca   :  { %v92_v9 = vmul.f32 -1.442695, %v72_v7 }
  0xcb   :  { %v74_v10 = vpop.f32.mrf.mxu0 }
  0xcc   :  { %104 = vpow2.f32 %v92_v9 }
  0xcd   :  { %v100_v11 = vpop.f32.mrf.mxu0 }
  0xd9   :  { %v105_v12 = vpop.eup %104 }
  0xda   :  { %v80_v13 = vadd.f32 1.0, %v105_v12 }
  0xdc   :  { %106 = vrcp.f32 %v80_v13 }
  0xe9   :  { %v107_v14 = vpop.eup %106 }
  0xea   :  { %84 = vst.msk [vmem:[%s145_s3] sm:$0x3] %vm83_vm2, %v107_v14 }

// kernel: multiblock_forward.33
= control target key start
LH: loop header
LB: loop body
LE: loop exit
PB: predicated region body
PF: predicated region fallthrough
CT: control target
= control target key end

     0   :  { %s3512_s0 = inlined_call_operand.vmem [shape: f32[2,2,8,8], index: 0, kind: input, shape index: {}]   ;;  %s3513_s1 = inlined_call_operand.vmem [shape: f32[2,2,6,8], index: 1, kind: input, shape index: {}]   ;;  %s3514_s2 = inlined_call_operand.vmem [shape: f32[2,2,7,8], index: 2, kind: input, shape index: {}]   ;;  %s3515_s3 = inlined_call_operand.vmem [shape: f32[2,2,9,8], index: 3, kind: input, shape index: {}]   ;;  %s3516_s4 = inlined_call_operand.vmem [shape: f32[2,2,6,8], index: 4, kind: input, shape index: {}]   ;;  %s3517_s5 = inlined_call_operand.vmem [shape: f32[2,2,8,8], index: 5, kind: input, shape index: {}]   ;;  %s3518_s6 = inlined_call_operand.vmem [shape: f32[2,2,9,8], index: 6, kind: input, shape index: {}]   ;;  %s3519_s7 = inlined_call_operand.vmem [shape: f32[2,2,6,8], index: 7, kind: input, shape index: {}]   ;;  %s3520_s8 = inlined_call_operand.vmem [shape: f32[2,2,8,8], index: 8, kind: input, shape index: {}]   ;;  %s3521_s9 = inlined_call_operand.vmem [shape: f32[2,1,6], index: 9, kind: input, shape index: {}]   ;;  %s3522_s10 = inlined_call_operand.vmem [shape: f32[2,1,9], index: 10, kind: input, shape index: {}]   ;;  %s3523_s11 = inlined_call_operand.vmem [shape: f32[2,1,8], index: 11, kind: input, shape index: {}]   ;;  %s3524_s12 = inlined_call_operand.vmem [shape: f32[2,8,8], index: 12, kind: input, shape index: {}]   ;;  %s3525_s13 = inlined_call_operand.vmem [shape: f32[2,7,9], index: 13, kind: input, shape index: {}]   ;;  %s3526_s14 = inlined_call_operand.vmem [shape: f32[2,2,8,8], index: 14, kind: output, shape index: {0}]   ;;  %s3527_s15 = inlined_call_operand.vmem [shape: f32[2,2,6,8], index: 15, kind: output, shape index: {1}]   ;;  %s3528_s16 = inlined_call_operand.vmem [shape: f32[2,2,6,8], index: 16, kind: output, shape index: {2}]   ;;  %s3529_s17 = inlined_call_operand.vmem [shape: f32[2,2,7,8], index: 17, kind: output, shape index: {3}]   ;;  %s3530_s18 = inlined_call_operand.vmem [shape: f32[2,2,8,8], index: 18, kind: output, shape index: {4}]   ;;  %s3531_s19 = inlined_call_operand.vmem [shape: f32[2,2,7,8], index: 19, kind: output, shape index: {5}]  }
   0x1   :  { %3532 = sst [smem:[#allocation2_spill]] %s3512_s0  ;;  %s3141_s0 = smov 0  }
   0x2   :  { %3533 = sst [smem:[#allocation3_spill]] %s3513_s1 }
   0x3   :  { %3534 = sst [smem:[#allocation4_spill]] %s3514_s2 }
   0x4   :  { %3535 = sst [smem:[#allocation5_spill]] %s3515_s3 }
   0x5 LB: > { %s2699_s30 = sadd.s32 4294967295, %s3035_s0   ;;  %p2703_p0 = scmp.ge.s32.totalorder %s3035_s0, 1  ;;  %s3035_s0 = sphi %s3141_s0, %s30_s0  }
   0x6   : > { %p670_p1 = scmp.lt.s32.totalorder %s3035_s0, 3 }
   0x8   : > { %p671_p2 = pnand %p2703_p0, %p670_p1 }
   0x9   : > { %p808_p3 = scmp.lt.s32.totalorder (!%p671_p2), %s2699_s30, 1  ;;  %s3536_s24 = sld [smem:[#allocation2_spill]] (!%p671_p2) }
   0xa   : > { %674 = sbr.rel (%p671_p2) target bundleno = 3336 (0xd08), region = 76  ;;  %s3538_s28 = sld [smem:[#allocation3_spill]] (!%p671_p2) }
   0xb   : > { %s3539_s2 = sld [smem:[#allocation4_spill]] (!%p671_p2) }
   0xf   : > { %v3037_v0 = vmov 0.0   ;;  %s3543_s30 = smov (!%p808_p3, %s2699_s30), 1  ;;  %vm3038_vm0 = vmmov 0   ;;  %vm912_vm1 = vcmask 64512   ;;  %v1007_v11 = vlaneseq }
  0x10   : > { %2825 = vmatprep.subr.bf16.mxu0 %v3037_v0  ;;  %2831 = vmatprep.subr.bf16.mxu1 %v3037_v0  ;;  %s3158_s20 = sshll.u32 %s3543_s30, 4  ;;  %s3192_s27 = scalar_lea.vmem %s3521_s9, %s3543_s30  ;;  %v3039_v15 = vmov 0   ;;  %vm1016_vm4 = vcmask 48128   ;;  %vm1046_vm5 = vcmask 1042432   ;;  %vm1256_vm8 = vcmask 70656  }
  0x11   : > { %2827 = vmatprep.mubr.msk.bf16.mxu0 %vm3038_vm0, %v3037_v0  ;;  %2833 = vmatprep.mubr.msk.bf16.mxu1 %vm3038_vm0, %v3037_v0  ;;  %s3164_s22 = scalar_lea.vmem %s3516_s4, %s3158_s20  ;;  %s812_s25 = scalar_lea.vmem %s3536_s24, %s3158_s20  ;;  %v907_v12 = vld [vmem:[%s3192_s27] sm:$0x1]  ;;  %v1008_v13 = vshrl.u32 %v1007_v11, 7  ;;  %vm1287_vm9 = vcmask 1043456   ;;  %vm1288_vm10 = vcmask 1044480   ;;  %vm1283_vm11 = vcmask 72704  }
  0x12   : > { %v903_v1 = vld [vmem:[%s3164_s22] sm:$0x3f]  ;;  %v904_v2 = vld [vmem:[%s3164_s22 + $0x8] sm:$0x3f]  ;;  %vm1005_vm2 = vcmp.eq.f32.partialorder %v907_v12, 0.0  ;;  %s3207_s21 = scalar_lea.vmem %s3519_s7, %s3158_s20  ;;  %s2765_s1 = sshll.u32 %s3543_s30, 5 }
  0x13   : > { %v910_v3 = vpack.c.bf16 %v903_v1, %v903_v1  ;;  %v911_v4 = vpack.c.bf16 %v904_v2, %v904_v2  ;;  %v901_v7 = vld [vmem:[%s812_s25] sm:$0xff]  ;;  %v902_v8 = vld [vmem:[%s812_s25 + $0x8] sm:$0xff]  ;;  %v3195_v14 = vsub.s32 0, %v1008_v13  ;;  %v1006_v16 = vsel %vm1005_vm2, 1, %v3039_v15  ;;  %s3537_s24 = sld [smem:[#allocation5_spill]]  ;;  %s3238_s29 = scalar_lea.vmem %s3538_s28, %s3158_s20 }
  0x14   : > { %v3176_v9 = vpack.c.bf16 %v901_v7, %v901_v7  ;;  %v3178_v10 = vpack.c.bf16 %v902_v8, %v902_v8  ;;  %v905_v42 = vld [vmem:[%s3207_s21] sm:$0x3f]  ;;  %v906_v43 = vld [vmem:[%s3207_s21 + $0x8] sm:$0x3f]  ;;  %s874_s28 = scalar_lea.vmem %s3526_s14, %s3158_s20  ;;  %s3281_s3 = scalar_lea.vmem %s3518_s6, %s2765_s1  ;;  %vm1380_vm13 = vcmask 62464  }
  0x15   : > { %v917_v5 = vsel %vm912_vm1, %v910_v3, 0  ;;  %v963_v6 = vsel %vm912_vm1, %v911_v4, 0  ;;  %v1010_v17 = vrot.slane %v1006_v16, %v3195_v14  ;;  %v1041_v44 = vpack.c.bf16 %v905_v42, %v905_v42  ;;  %v1138_v62 = vld [vmem:[%s3238_s29] sm:$0x3f]  ;;  %v1139_v3 = vld [vmem:[%s3238_s29 + $0x8] sm:$0x3f]  ;;  %s3368_s23 = scalar_lea.vmem %s3539_s2, %s3158_s20  ;;  %s884_s26 = scalar_lea.vmem %s3528_s16, %s3158_s20 }
  0x16   : > { %2826 = vmatpush3.bf16.xpose.msra.mxu0 %v917_v5  ;;  %2832 = vmatpush3.bf16.xpose.msra.mxu1 %v963_v6  ;;  %v1042_v45 = vpack.c.bf16 %v906_v43, %v906_v43  ;;  %v1149_v2 = vpack.c.bf16 %v1138_v62, %v1138_v62  ;;  %v1150_v4 = vpack.c.bf16 %v1139_v3, %v1139_v3  ;;  %s2722_s2 = sshll.u32 %s3543_s30, 3 }
  0x17   : > { %2837 = vmatprep.subr.bf16.mxu0 %v3037_v0  ;;  %2843 = vmatprep.subr.bf16.mxu1 %v3037_v0  ;;  %vm1011_vm3 = vcmp.eq.s32.totalorder %v1010_v17, 1  ;;  %v1048_v46 = vsel %vm1046_vm5, %v1041_v44, 0  ;;  %v3284_v44 = vld [vmem:[%s3281_s3] sm:$0xff] }
  0x18   : > { %v1094_v47 = vsel %vm1046_vm5, %v1042_v45, 0  ;;  %v1145_v45 = vld [vmem:[%s3281_s3 + $0x8] sm:$0x1] }
  0x19   : > { %s3221_s25 = scalar_lea.vmem %s3537_s24, %s2765_s1  ;;  %s3261_s24 = scalar_lea.vmem %s3522_s10, %s3543_s30 }
  0x1a   : > { %v3224_v50 = vld [vmem:[%s3221_s25] sm:$0xff]  ;;  %v1141_v51 = vld [vmem:[%s3221_s25 + $0x8] sm:$0x1]  ;;  %v3229_v54 = vld [vmem:[%s3221_s25 + $0x10] sm:$0xff]  ;;  %s3332_s1 = scalar_lea.vmem %s3523_s11, %s3543_s30 }
  0x1b   : > { %v1151_v52 = vpack.c.bf16 %v1141_v51, %v3224_v50  ;;  %v1143_v55 = vld [vmem:[%s3221_s25 + $0x18] sm:$0x1]  ;;  %v1148_v5 = vld [vmem:[%s3261_s24] sm:$0x1] }
  0x1c   : > { %v1152_v59 = vpack.c.bf16 %v1143_v55, %v3229_v54  ;;  %vm1245_vm6 = vcmp.eq.f32.partialorder %v1148_v5, 0.0  ;;  %v1147_v51 = vld [vmem:[%s3281_s3 + $0x18] sm:$0x1] }
  0x1d   : > { %2828 = vmatmul.mubr.msk.bf16.vlgmr.msra.gmra.mxu0 %vm912_vm1, %v3176_v9  ;;  %2834 = vmatmul.mubr.msk.bf16.vlgmr.msra.gmra.mxu1 %vm912_vm1, %v3178_v10  ;;  %v1157_v58 = vsel %vm912_vm1, %v1151_v52, 0  ;;  %v1246_v6 = vsel %vm1245_vm6, 1, %v3039_v15 }
  0x1e   : > { %2839 = vmatprep.mubr.msk.bf16.mxu0 %vm3038_vm0, %v3037_v0  ;;  %2845 = vmatprep.mubr.msk.bf16.mxu1 %vm3038_vm0, %v3037_v0  ;;  %v1203_v1 = vsel %vm912_vm1, %v1152_v59, 0  ;;  %v1250_v11 = vrot.slane %v1246_v6, %v3195_v14  ;;  %v1383_v6 = vld [vmem:[%s3238_s29] sm:$0x3f] }
  0x1f   : > { %2838 = vmatpush3.bf16.msra.mxu0 %v1048_v46  ;;  %2844 = vmatpush3.bf16.msra.mxu1 %v1094_v47  ;;  %v1281_v46 = vpack.c.bf16 %v1145_v45, %v3284_v44  ;;  %v3040_v47 = vmov 65535  }
  0x20   : > { %2849 = vmatprep.subr.bf16.mxu0 %v3037_v0  ;;  %2855 = vmatprep.subr.bf16.mxu1 %v3037_v0  ;;  %vm1251_vm7 = vcmp.eq.s32.totalorder %v1250_v11, 1  ;;  %v1390_v11 = vpack.c.bf16 %v1383_v6, %v1383_v6 }
  0xdd   : > { %v953_v18 = vpop.f32.mrf.mxu0  ;;  %v999_v19 = vpop.f32.mrf.mxu1 }
  0xde   : > { %v1012_v20 = vsel %vm1011_vm3, -1e+09, %v953_v18  ;;  %v1013_v21 = vsel %vm1011_vm3, -1e+09, %v999_v19  ;;  %vm1731_vm3 = vcmask 47104  }
  0xdf   : > { %v1014_v22 = vmul.f32 0.35355338, %v1012_v20  ;;  %v1015_v23 = vmul.f32 0.35355338, %v1013_v21  ;;  %v2829_v24 = vpop.f32.mrf.mxu0  ;;  %v2835_v25 = vpop.f32.mrf.mxu1 }
  0xe1   : > { %v956_v26 = vpop.f32.mrf.mxu0  ;;  %v1002_v27 = vpop.f32.mrf.mxu1  ;;  %v1017_v28 = vsel %vm1016_vm4, %v1014_v22, -inf  ;;  %v1020_v31 = vsel %vm1016_vm4, %v1015_v23, -inf }
  0xe2   : > { %1018 = vmax.xlane.f32.xlu0 %v1017_v28 }
  0xe3   : > { %v2830_v29 = vpop.f32.mrf.mxu0  ;;  %v2836_v30 = vpop.f32.mrf.mxu1 }
  0xe6   : > { %1021 = vmax.xlane.f32.xlu0 %v1020_v31 }
 0x16b   : > { %v1019_v32 = vpop.xlane.xlu0 %1018 }
 0x16c   : > { %v1023_v33 = vsub.f32 %v1014_v22, %v1019_v32 }
 0x16e   : > { %v1025_v34 = vmul.f32 1.442695, %v1023_v33 }
 0x16f   : > { %v1022_v35 = vpop.xlane.xlu0 %1021 }
 0x170   : > { %2981 = vpow2.f32 %v1025_v34  ;;  %v1024_v36 = vsub.f32 %v1015_v23, %v1022_v35 }
 0x172   : > { %v1027_v37 = vmul.f32 1.442695, %v1024_v36 }
 0x174   : > { %2983 = vpow2.f32 %v1027_v37 }
 0x17d   : > { %v2982_v38 = vpop.eup %2981 }
 0x17e   : > { %v1029_v39 = vsel %vm1016_vm4, %v2982_v38, 0.0 }
 0x17f   : > { %1030 = vadd.xlane.f32.xlu1 %v1029_v39 }
 0x181   : > { %v2984_v40 = vpop.eup %2983 }
 0x182   : > { %v1032_v41 = vsel %vm1016_vm4, %v2984_v40, 0.0 }
 0x183   : > { %1033 = vadd.xlane.f32.xlu1 %v1032_v41 }
 0x208   : > { %v1031_v48 = vpop.xlane.xlu1 %1030 }
 0x209   : > { %2985 = vrcp.f32 %v1031_v48  ;;  %v1289_v48 = vsel %vm1287_vm9, 4294967295, %v3040_v47 }
 0x20a   : > { %v3293_v52 = vsel %vm1288_vm10, %v1289_v48, 0 }
 0x20b   : > { %v1292_v55 = vand.u32 %v3293_v52, %v1281_v46 }
 0x20c   : > { %v1034_v49 = vpop.xlane.xlu1 %1033 }
 0x20d   : > { %2987 = vrcp.f32 %v1034_v49  ;;  %v3290_v49 = vld [vmem:[%s3281_s3 + $0x10] sm:$0xff] }
 0x216   : > { %v2986_v53 = vpop.eup %2985 }
 0x217   : > { %v1037_v56 = vmul.f32 %v2986_v53, %v2982_v38  ;;  %v1282_v53 = vpack.c.bf16 %v1147_v51, %v3290_v49 }
 0x219   : > { %v1039_v57 = vpack.c.bf16 %v1037_v56, %v1037_v56  ;;  %v1338_v56 = vand.u32 %v3293_v52, %v1282_v53 }
 0x21a   : > { %v2988_v60 = vpop.eup %2987 }
 0x21b   : > { %2840 = vmatmul.mubr.msk.bf16.vlgmr.msra.gmra.mxu0 %vm1016_vm4, %v1039_v57  ;;  %v1038_v61 = vmul.f32 %v2988_v60, %v2984_v40 }
 0x21c   : > { %2850 = vmatpush3.bf16.xpose.msra.mxu0 %v1157_v58  ;;  %2851 = vmatprep.mubr.msk.bf16.mxu0 %vm3038_vm0, %v3037_v0 }
 0x21d   : > { %v1040_v63 = vpack.c.bf16 %v1038_v61, %v1038_v61  ;;  %2861 = vmatprep.subr.bf16.mxu0 %v3037_v0 }
 0x21f   : > { %2846 = vmatmul.mubr.msk.bf16.vlgmr.msra.gmra.mxu1 %vm1016_vm4, %v1040_v63 }
 0x220   : > { %2856 = vmatpush3.bf16.xpose.msra.mxu1 %v1203_v1  ;;  %2857 = vmatprep.mubr.msk.bf16.mxu1 %vm3038_vm0, %v3037_v0 }
 0x221   : > { %2867 = vmatprep.subr.bf16.mxu1 %v3037_v0 }
 0x223   : > { %2852 = vmatmul.mubr.msk.bf16.vlgmr.msra.gmra.mxu0 %vm912_vm1, %v1149_v2 }
 0x224   : > { %2863 = vmatprep.mubr.msk.bf16.mxu0 %vm3038_vm0, %v3037_v0  ;;  %2862 = vmatpush3.bf16.msra.mxu0 %v1292_v55 }
 0x225   : > { %2873 = vmatprep.subr.bf16.mxu0 %v3037_v0 }
 0x227   : > { %2858 = vmatmul.mubr.msk.bf16.vlgmr.msra.gmra.mxu1 %vm912_vm1, %v1150_v4 }
 0x228   : > { %2869 = vmatprep.mubr.msk.bf16.mxu1 %vm3038_vm0, %v3037_v0  ;;  %2868 = vmatpush3.bf16.msra.mxu1 %v1338_v56 }
 0x229   : > { %2879 = vmatprep.subr.bf16.mxu1 %v3037_v0 }
 0x2db   : > { %v1084_v7 = vpop.f32.mrf.mxu0 }
 0x2dc   : > { %1136 = vst.msk [vmem:[%s874_s28] sm:$0xff] %vm912_vm1, %v1084_v7 }
 0x2dd   : > { %v2841_v8 = vpop.f32.mrf.mxu0 }
 0x2df   : > { %v1087_v12 = vpop.f32.mrf.mxu0  ;;  %v1130_v13 = vpop.f32.mrf.mxu1 }
 0x2e0   : > { %1137 = vst.msk [vmem:[%s874_s28 + $0x8] sm:$0xff] %vm912_vm1, %v1130_v13  ;;  %s837_s28 = scalar_lea.vmem %s3517_s5, %s3158_s20  ;;  %v1384_v12 = vld [vmem:[%s3238_s29 + $0x8] sm:$0x3f]  ;;  %s852_s29 = scalar_lea.vmem %s3520_s8, %s3158_s20 }
 0x2e1   : > { %v2842_v16 = vpop.f32.mrf.mxu0  ;;  %v2847_v17 = vpop.f32.mrf.mxu1  ;;  %v1385_v59 = vld [vmem:[%s837_s28] sm:$0xff]  ;;  %v1386_v62 = vld [vmem:[%s837_s28 + $0x8] sm:$0xff]  ;;  %v1391_v13 = vpack.c.bf16 %v1384_v12, %v1384_v12  ;;  %s879_s28 = scalar_lea.vmem %s3527_s15, %s3158_s20 }
 0x2e2   : > { %v1392_v60 = vpack.c.bf16 %v1385_v59, %v1385_v59  ;;  %v1393_v3 = vpack.c.bf16 %v1386_v62, %v1386_v62  ;;  %v1389_v16 = vld [vmem:[%s3332_s1] sm:$0x1] }
 0x2e3   : > { %v1133_v18 = vpop.f32.mrf.mxu1  ;;  %v1193_v19 = vpop.f32.mrf.mxu0  ;;  %vm1486_vm12 = vcmp.eq.f32.partialorder %v1389_v16, 0.0  ;;  %v1387_v56 = vld [vmem:[%s852_s29] sm:$0xff] }
 0x2e4   : > { %v1252_v20 = vsel %vm1251_vm7, -1e+09, %v1193_v19  ;;  %v3305_v2 = vsel %vm912_vm1, %v1392_v60, 0  ;;  %v3313_v8 = vsel %vm912_vm1, %v1393_v3, 0  ;;  %v1487_v17 = vsel %vm1486_vm12, 1, %v3039_v15 }
 0x2e5   : > { %v1254_v21 = vmul.f32 0.35355338, %v1252_v20  ;;  %v2848_v22 = vpop.f32.mrf.mxu1  ;;  %v2853_v23 = vpop.f32.mrf.mxu0  ;;  %v1491_v20 = vrot.slane %v1487_v17, %v3195_v14  ;;  %v1617_v17 = vld [vmem:[%s3368_s23] sm:$0x7f] }
 0x2e7   : > { %v1196_v24 = vpop.f32.mrf.mxu0  ;;  %v1239_v25 = vpop.f32.mrf.mxu1  ;;  %v1257_v26 = vsel %vm1256_vm8, %v1254_v21, -inf  ;;  %vm1492_vm14 = vcmp.eq.s32.totalorder %v1491_v20, 1  ;;  %v1624_v20 = vpack.c.bf16 %v1617_v17, %v1617_v17 }
 0x2e8   : > { %v1253_v27 = vsel %vm1251_vm7, -1e+09, %v1239_v25  ;;  %1258 = vmax.xlane.f32.xlu0 %v1257_v26 }
 0x2e9   : > { %v1255_v28 = vmul.f32 0.35355338, %v1253_v27  ;;  %v2854_v29 = vpop.f32.mrf.mxu0  ;;  %v2859_v30 = vpop.f32.mrf.mxu1 }
 0x2eb   : > { %v1242_v31 = vpop.f32.mrf.mxu1  ;;  %v1260_v32 = vsel %vm1256_vm8, %v1255_v28, -inf }
 0x2ec   : > { %1261 = vmax.xlane.f32.xlu1 %v1260_v32 }
 0x2ed   : > { %v2860_v33 = vpop.f32.mrf.mxu1 }
 0x371   : > { %v1259_v34 = vpop.xlane.xlu0 %1258 }
 0x372   : > { %v1263_v35 = vsub.f32 %v1254_v21, %v1259_v34 }
 0x374   : > { %v1265_v36 = vmul.f32 1.442695, %v1263_v35 }
 0x375   : > { %v1262_v37 = vpop.xlane.xlu1 %1261 }
 0x376   : > { %2989 = vpow2.f32 %v1265_v36  ;;  %v1264_v38 = vsub.f32 %v1255_v28, %v1262_v37 }
 0x378   : > { %v1267_v39 = vmul.f32 1.442695, %v1264_v38 }
 0x37a   : > { %2991 = vpow2.f32 %v1267_v39 }
 0x383   : > { %v2990_v40 = vpop.eup %2989 }
 0x384   : > { %v1269_v41 = vsel %vm1256_vm8, %v2990_v40, 0.0 }
 0x385   : > { %1270 = vadd.xlane.f32.xlu0 %v1269_v41 }
 0x387   : > { %v2992_v42 = vpop.eup %2991 }
 0x388   : > { %v1272_v43 = vsel %vm1256_vm8, %v2992_v42, 0.0  ;;  %vm2211_vm8 = vcmask 71680  }
 0x389   : > { %1273 = vadd.xlane.f32.xlu1 %v1272_v43 }
 0x40e   : > { %v1271_v57 = vpop.xlane.xlu0 %1270 }
 0x40f   : > { %2993 = vrcp.f32 %v1271_v57  ;;  %v1388_v57 = vld [vmem:[%s852_s29 + $0x8] sm:$0xff] }
 0x410   : > { %v1522_v59 = vpack.c.bf16 %v1388_v57, %v1388_v57 }
 0x412   : > { %v1274_v58 = vpop.xlane.xlu1 %1273 }
 0x413   : > { %2995 = vrcp.f32 %v1274_v58  ;;  %v1521_v58 = vpack.c.bf16 %v1387_v56, %v1387_v56 }
 0x415   : > { %v3352_v60 = vsel %vm1287_vm9, %v1521_v58, 0 }
 0x41c   : > { %v2994_v61 = vpop.eup %2993 }
 0x41d   : > { %v1277_v63 = vmul.f32 %v2994_v61, %v2990_v40  ;;  %v3355_v61 = vsel %vm1287_vm9, %v1522_v59, 0 }
 0x41f   : > { %v1279_v1 = vpack.c.bf16 %v1277_v63, %v1277_v63 }
 0x420   : > { %v2996_v4 = vpop.eup %2995 }
 0x421   : > { %2864 = vmatmul.mubr.msk.bf16.vlgmr.msra.gmra.mxu0 %vm1283_vm11, %v1279_v1  ;;  %v1278_v5 = vmul.f32 %v2996_v4, %v2992_v42  ;;  %v1619_v1 = vld [vmem:[%s3164_s22] sm:$0x3f] }
 0x422   : > { %2874 = vmatpush3.bf16.xpose.msra.mxu0 %v3305_v2  ;;  %2875 = vmatprep.mubr.msk.bf16.mxu0 %vm3038_vm0, %v3037_v0  ;;  %v1626_v3 = vpack.c.bf16 %v1619_v1, %v1619_v1 }
 0x423   : > { %v1280_v7 = vpack.c.bf16 %v1278_v5, %v1278_v5  ;;  %2885 = vmatprep.subr.bf16.mxu0 %v3037_v0  ;;  %v1620_v5 = vld [vmem:[%s3164_s22 + $0x8] sm:$0x3f] }
 0x424   : > { %v1627_v12 = vpack.c.bf16 %v1620_v5, %v1620_v5 }
 0x425   : > { %2870 = vmatmul.mubr.msk.bf16.vlgmr.msra.gmra.mxu1 %vm1283_vm11, %v1280_v7 }
 0x426   : > { %2880 = vmatpush3.bf16.xpose.msra.mxu1 %v3313_v8  ;;  %2881 = vmatprep.mubr.msk.bf16.mxu1 %vm3038_vm0, %v3037_v0 }
 0x427   : > { %2891 = vmatprep.subr.bf16.mxu1 %v3037_v0 }
 0x429   : > { %2876 = vmatmul.mubr.msk.bf16.vlgmr.msra.gmra.mxu0 %vm912_vm1, %v1390_v11  ;;  %v1632_v11 = vsel %vm912_vm1, %v1626_v3, 0  ;;  %v1621_v3 = vld [vmem:[%s3207_s21] sm:$0x3f] }
 0x42a   : > { %2887 = vmatprep.mubr.msk.bf16.mxu0 %vm3038_vm0, %v3037_v0  ;;  %2886 = vmatpush3.bf16.msra.mxu0 %v3352_v60  ;;  %v1756_v5 = vpack.c.bf16 %v1621_v3, %v1621_v3 }
 0x42b   : > { %2897 = vmatprep.subr.bf16.mxu0 %v3037_v0 }
 0x42d   : > { %2882 = vmatmul.mubr.msk.bf16.vlgmr.msra.gmra.mxu1 %vm912_vm1, %v1391_v13 }
 0x42e   : > { %2893 = vmatprep.mubr.msk.bf16.mxu1 %vm3038_vm0, %v3037_v0  ;;  %2892 = vmatpush3.bf16.msra.mxu1 %v3355_v61 }
 0x42f   : > { %2903 = vmatprep.subr.bf16.mxu1 %v3037_v0 }
 0x4e1   : > { %v1328_v18 = vpop.f32.mrf.mxu0 }
 0x4e2   : > { %1381 = vst.msk [vmem:[%s879_s28] sm:$0x3f] %vm1380_vm13, %v1328_v18 }
 0x4e3   : > { %v2865_v19 = vpop.f32.mrf.mxu0 }
 0x4e4   : > { %v1678_v19 = vsel %vm912_vm1, %v1627_v12, 0 }
 0x4e5   : > { %v1331_v21 = vpop.f32.mrf.mxu0  ;;  %v1374_v22 = vpop.f32.mrf.mxu1 }
 0x4e6   : > { %1382 = vst.msk [vmem:[%s879_s28 + $0x8] sm:$0x3f] %vm1380_vm13, %v1374_v22  ;;  %v1618_v21 = vld [vmem:[%s3368_s23 + $0x8] sm:$0x7f]  ;;  %s889_s28 = scalar_lea.vmem %s3529_s17, %s3158_s20 }
 0x4e7   : > { %v2866_v23 = vpop.f32.mrf.mxu0  ;;  %v2871_v24 = vpop.f32.mrf.mxu1  ;;  %v1625_v22 = vpack.c.bf16 %v1618_v21, %v1618_v21 }
 0x4e8   : > { %v1623_v23 = vld [vmem:[%s3192_s27] sm:$0x1]  ;;  %s894_s27 = scalar_lea.vmem %s3530_s18, %s3158_s20 }
 0x4e9   : > { %v1377_v25 = vpop.f32.mrf.mxu1  ;;  %v1434_v26 = vpop.f32.mrf.mxu0  ;;  %vm1720_vm15 = vcmp.eq.f32.partialorder %v1623_v23, 0.0 }
 0x4ea   : > { %v1493_v27 = vsel %vm1492_vm14, -1e+09, %v1434_v26  ;;  %v1721_v24 = vsel %vm1720_vm15, 1, %v3039_v15 }
 0x4eb   : > { %v1495_v28 = vmul.f32 0.35355338, %v1493_v27  ;;  %v2872_v29 = vpop.f32.mrf.mxu1  ;;  %v2877_v30 = vpop.f32.mrf.mxu0  ;;  %v1725_v27 = vrot.slane %v1721_v24, %v3195_v14 }
 0x4ed   : > { %v1437_v31 = vpop.f32.mrf.mxu0  ;;  %v1480_v32 = vpop.f32.mrf.mxu1  ;;  %v1497_v33 = vsel %vm1380_vm13, %v1495_v28, -inf  ;;  %vm1726_vm2 = vcmp.eq.s32.totalorder %v1725_v27, 1 }
 0x4ee   : > { %v1494_v34 = vsel %vm1492_vm14, -1e+09, %v1480_v32  ;;  %1498 = vmax.xlane.f32.xlu0 %v1497_v33 }
 0x4ef   : > { %v1496_v35 = vmul.f32 0.35355338, %v1494_v34  ;;  %v2878_v36 = vpop.f32.mrf.mxu0  ;;  %v2883_v37 = vpop.f32.mrf.mxu1 }
 0x4f1   : > { %v1483_v38 = vpop.f32.mrf.mxu1  ;;  %v1500_v39 = vsel %vm1380_vm13, %v1496_v35, -inf }
 0x4f2   : > { %1501 = vmax.xlane.f32.xlu1 %v1500_v39 }
 0x4f3   : > { %v2884_v40 = vpop.f32.mrf.mxu1 }
 0x577   : > { %v1499_v41 = vpop.xlane.xlu0 %1498 }
 0x578   : > { %v1503_v42 = vsub.f32 %v1495_v28, %v1499_v41 }
 0x57a   : > { %v1505_v43 = vmul.f32 1.442695, %v1503_v42 }
 0x57b   : > { %v1502_v45 = vpop.xlane.xlu1 %1501 }
 0x57c   : > { %2997 = vpow2.f32 %v1505_v43  ;;  %v1504_v46 = vsub.f32 %v1496_v35, %v1502_v45 }
 0x57e   : > { %v1507_v47 = vmul.f32 1.442695, %v1504_v46 }
 0x580   : > { %2999 = vpow2.f32 %v1507_v47 }
 0x589   : > { %v2998_v48 = vpop.eup %2997 }
 0x58a   : > { %v1509_v51 = vsel %vm1380_vm13, %v2998_v48, 0.0 }
 0x58b   : > { %1510 = vadd.xlane.f32.xlu0 %v1509_v51 }
 0x58d   : > { %v3000_v53 = vpop.eup %2999 }
 0x58e   : > { %v1512_v55 = vsel %vm1380_vm13, %v3000_v53, 0.0 }
 0x58f   : > { %1513 = vadd.xlane.f32.xlu1 %v1512_v55 }
 0x614   : > { %v1511_v62 = vpop.xlane.xlu0 %1510 }
 0x615   : > { %3001 = vrcp.f32 %v1511_v62 }
 0x618   : > { %v1514_v63 = vpop.xlane.xlu1 %1513 }
 0x619   : > { %3003 = vrcp.f32 %v1514_v63 }
 0x622   : > { %v3002_v4 = vpop.eup %3001 }
 0x623   : > { %v1517_v6 = vmul.f32 %v3002_v4, %v2998_v48  ;;  %v1622_v4 = vld [vmem:[%s3207_s21 + $0x8] sm:$0x3f] }
 0x625   : > { %v1519_v7 = vpack.c.bf16 %v1517_v6, %v1517_v6  ;;  %v1757_v6 = vpack.c.bf16 %v1622_v4, %v1622_v4  ;;  %v2095_v4 = vld [vmem:[%s3221_s25 + $0x18] sm:$0x1] }
 0x626   : > { %v3004_v13 = vpop.eup %3003 }
 0x627   : > { %2888 = vmatmul.mubr.msk.bf16.vlgmr.msra.gmra.mxu0 %vm912_vm1, %v1519_v7  ;;  %v1518_v16 = vmul.f32 %v3004_v13, %v3000_v53  ;;  %v1762_v7 = vsel %vm1046_vm5, %v1756_v5, 0 }
 0x628   : > { %2898 = vmatpush3.bf16.xpose.msra.mxu0 %v1632_v11  ;;  %2899 = vmatprep.mubr.msk.bf16.mxu0 %vm3038_vm0, %v3037_v0  ;;  %v1808_v11 = vsel %vm1046_vm5, %v1757_v6, 0 }
 0x629   : > { %v1520_v18 = vpack.c.bf16 %v1518_v16, %v1518_v16  ;;  %2909 = vmatprep.subr.bf16.mxu0 %v3037_v0 }
 0x62b   : > { %2894 = vmatmul.mubr.msk.bf16.vlgmr.msra.gmra.mxu1 %vm912_vm1, %v1520_v18 }
 0x62c   : > { %2904 = vmatpush3.bf16.xpose.msra.mxu1 %v1678_v19  ;;  %2905 = vmatprep.mubr.msk.bf16.mxu1 %vm3038_vm0, %v3037_v0 }
 0x62d   : > { %2915 = vmatprep.subr.bf16.mxu1 %v3037_v0 }
 0x62f   : > { %2900 = vmatmul.mubr.msk.bf16.vlgmr.msra.gmra.mxu0 %vm912_vm1, %v1624_v20 }
 0x630   : > { %2911 = vmatprep.mubr.msk.bf16.mxu0 %vm3038_vm0, %v3037_v0  ;;  %2910 = vmatpush3.bf16.msra.mxu0 %v1762_v7 }
 0x631   : > { %2921 = vmatprep.subr.bf16.mxu0 %v3037_v0 }
 0x633   : > { %2906 = vmatmul.mubr.msk.bf16.vlgmr.msra.gmra.mxu1 %vm912_vm1, %v1625_v22 }
 0x634   : > { %2917 = vmatprep.mubr.msk.bf16.mxu1 %vm3038_vm0, %v3037_v0  ;;  %2916 = vmatpush3.bf16.msra.mxu1 %v1808_v11  ;;  %v2105_v11 = vpack.c.bf16 %v2095_v4, %v3229_v54  ;;  %v2091_v54 = vld [vmem:[%s3368_s23 + $0x8] sm:$0x7f] }
 0x635   : > { %2927 = vmatprep.subr.bf16.mxu1 %v3037_v0 }
 0x6e7   : > { %v1563_v25 = vpop.f32.mrf.mxu0 }
 0x6e8   : > { %1615 = vst.msk [vmem:[%s884_s26] sm:$0x3f] %vm1380_vm13, %v1563_v25 }
 0x6e9   : > { %v2889_v26 = vpop.f32.mrf.mxu0 }
 0x6eb   : > { %v1566_v28 = vpop.f32.mrf.mxu0  ;;  %v1609_v29 = vpop.f32.mrf.mxu1 }
 0x6ec   : > { %1616 = vst.msk [vmem:[%s884_s26 + $0x8] sm:$0x3f] %vm1380_vm13, %v1609_v29  ;;  %s865_s26 = scalar_lea.vmem %s3524_s12, %s2722_s2 }
 0x6ed   : > { %v2890_v30 = vpop.f32.mrf.mxu0  ;;  %v2895_v31 = vpop.f32.mrf.mxu1  ;;  %v1860_v25 = vld [vmem:[%s865_s26] sm:$0xff] }
 0x6ef   : > { %v1612_v32 = vpop.f32.mrf.mxu1  ;;  %v1668_v33 = vpop.f32.mrf.mxu0 }
 0x6f0   : > { %v1727_v34 = vsel %vm1726_vm2, -1e+09, %v1668_v33 }
 0x6f1   : > { %v1729_v35 = vmul.f32 0.35355338, %v1727_v34  ;;  %v2896_v36 = vpop.f32.mrf.mxu1  ;;  %v2901_v37 = vpop.f32.mrf.mxu0 }
 0x6f3   : > { %v1671_v38 = vpop.f32.mrf.mxu0  ;;  %v1714_v39 = vpop.f32.mrf.mxu1  ;;  %v1732_v40 = vsel %vm1731_vm3, %v1729_v35, -inf }
 0x6f4   : > { %v1728_v41 = vsel %vm1726_vm2, -1e+09, %v1714_v39  ;;  %1733 = vmax.xlane.f32.xlu0 %v1732_v40 }
 0x6f5   : > { %v1730_v42 = vmul.f32 0.35355338, %v1728_v41  ;;  %v2902_v43 = vpop.f32.mrf.mxu0  ;;  %v2907_v45 = vpop.f32.mrf.mxu1 }
 0x6f7   : > { %v1717_v46 = vpop.f32.mrf.mxu1  ;;  %v1735_v47 = vsel %vm1731_vm3, %v1730_v42, -inf }
 0x6f8   : > { %1736 = vmax.xlane.f32.xlu1 %v1735_v47 }
 0x6f9   : > { %v2908_v48 = vpop.f32.mrf.mxu1 }
 0x77d   : > { %v1734_v51 = vpop.xlane.xlu0 %1733 }
 0x77e   : > { %v1738_v53 = vsub.f32 %v1729_v35, %v1734_v51 }
 0x780   : > { %v1740_v55 = vmul.f32 1.442695, %v1738_v53 }
 0x781   : > { %v1737_v56 = vpop.xlane.xlu1 %1736 }
 0x782   : > { %3005 = vpow2.f32 %v1740_v55  ;;  %v1739_v57 = vsub.f32 %v1730_v42, %v1737_v56 }
 0x784   : > { %v1742_v58 = vmul.f32 1.442695, %v1739_v57 }
 0x786   : > { %3007 = vpow2.f32 %v1742_v58 }
 0x78f   : > { %v3006_v59 = vpop.eup %3005 }
 0x790   : > { %v1744_v62 = vsel %vm1731_vm3, %v3006_v59, 0.0 }
 0x791   : > { %1745 = vadd.xlane.f32.xlu0 %v1744_v62 }
 0x793   : > { %v3008_v63 = vpop.eup %3007 }
 0x794   : > { %v1747_v1 = vsel %vm1731_vm3, %v3008_v63, 0.0 }
 0x795   : > { %1748 = vadd.xlane.f32.xlu1 %v1747_v1 }
 0x81a   : > { %v1746_v12 = vpop.xlane.xlu0 %1745 }
 0x81b   : > { %3009 = vrcp.f32 %v1746_v12 }
 0x81e   : > { %v1749_v13 = vpop.xlane.xlu1 %1748 }
 0x81f   : > { %3011 = vrcp.f32 %v1749_v13 }
 0x828   : > { %v3010_v16 = vpop.eup %3009 }
 0x829   : > { %v1752_v17 = vmul.f32 %v3010_v16, %v3006_v59  ;;  %v2090_v16 = vld [vmem:[%s3368_s23] sm:$0x7f] }
 0x82b   : > { %v1754_v18 = vpack.c.bf16 %v1752_v17, %v1752_v17  ;;  %v2156_v17 = vsel %vm912_vm1, %v2105_v11, 0 }
 0x82c   : > { %v3012_v19 = vpop.eup %3011 }
 0x82d   : > { %2912 = vmatmul.mubr.msk.bf16.vlgmr.msra.gmra.mxu0 %vm1016_vm4, %v1754_v18  ;;  %v1753_v20 = vmul.f32 %v3012_v19, %v3008_v63  ;;  %v2093_v63 = vld [vmem:[%s3221_s25 + $0x8] sm:$0x1]  ;;  %v2102_v18 = vpack.c.bf16 %v2090_v16, %v2090_v16  ;;  %v2103_v19 = vpack.c.bf16 %v2091_v54, %v2091_v54 }
 0x82e   : > { %2922 = vmatpush3.bf16.xpose.msra.mxu0 %v3305_v2  ;;  %2923 = vmatprep.mubr.msk.bf16.mxu0 %vm3038_vm0, %v3037_v0  ;;  %v1859_v2 = vld [vmem:[%s3332_s1] sm:$0x1]  ;;  %v2104_v1 = vpack.c.bf16 %v2093_v63, %v3224_v50 }
 0x82f   : > { %v1755_v21 = vpack.c.bf16 %v1753_v20, %v1753_v20  ;;  %2933 = vmatprep.subr.bf16.mxu0 %v3037_v0  ;;  %vm1959_vm5 = vcmp.eq.f32.partialorder %v1859_v2, 0.0  ;;  %v2100_v20 = vld [vmem:[%s3261_s24] sm:$0x1] }
 0x830   : > { %v2110_v7 = vsel %vm912_vm1, %v2104_v1, 0  ;;  %vm2200_vm7 = vcmp.eq.f32.partialorder %v2100_v20, 0.0 }
 0x831   : > { %2918 = vmatmul.mubr.msk.bf16.vlgmr.msra.gmra.mxu1 %vm1016_vm4, %v1755_v21  ;;  %vm1850_vm4 = vcmask 63488   ;;  %v2201_v2 = vsel %vm2200_vm7, 1, %v3039_v15 }
 0x832   : > { %2928 = vmatpush3.bf16.xpose.msra.mxu1 %v3313_v8  ;;  %2929 = vmatprep.mubr.msk.bf16.mxu1 %vm3038_vm0, %v3037_v0 }
 0x833   : > { %2939 = vmatprep.subr.bf16.mxu1 %v3037_v0 }
 0x835   : > { %2924 = vmatmul.mubr.msk.bf16.vlgmr.msra.gmra.mxu0 %vm912_vm1, %v3176_v9 }
 0x836   : > { %2934 = vmatpush3.bf16.msra.mxu0 %v3352_v60  ;;  %2935 = vmatprep.mubr.msk.bf16.mxu0 %vm3038_vm0, %v3037_v0 }
 0x837   : > { %2945 = vmatprep.subr.bf16.mxu0 %v3037_v0 }
 0x839   : > { %2930 = vmatmul.mubr.msk.bf16.vlgmr.msra.gmra.mxu1 %vm912_vm1, %v3178_v10  ;;  %v1960_v10 = vsel %vm1959_vm5, 1, %v3039_v15 }
 0x83a   : > { %2940 = vmatpush3.bf16.msra.mxu1 %v3355_v61  ;;  %2941 = vmatprep.mubr.msk.bf16.mxu1 %vm3038_vm0, %v3037_v0  ;;  %v1964_v22 = vrot.slane %v1960_v10, %v3195_v14 }
 0x83b   : > { %2951 = vmatprep.subr.bf16.mxu1 %v3037_v0 }
 0x83c   : > { %vm1965_vm6 = vcmp.eq.s32.totalorder %v1964_v22, 1 }
 0x8ed   : > { %v1798_v9 = vpop.f32.mrf.mxu0 }
 0x8ee   : > { %1851 = vst.msk [vmem:[%s889_s28] sm:$0x7f] %vm1850_vm4, %v1798_v9 }
 0x8ef   : > { %v2913_v8 = vpop.f32.mrf.mxu0 }
 0x8f1   : > { %v1801_v60 = vpop.f32.mrf.mxu0  ;;  %v1844_v61 = vpop.f32.mrf.mxu1 }
 0x8f2   : > { %1852 = vst.msk [vmem:[%s889_s28 + $0x8] sm:$0x7f] %vm1850_vm4, %v1844_v61  ;;  %s869_s28 = scalar_lea.vmem %s3525_s13, %s2722_s2 }
 0x8f3   : > { %v2914_v23 = vpop.f32.mrf.mxu0  ;;  %v2919_v24 = vpop.f32.mrf.mxu1  ;;  %v2101_v22 = vld [vmem:[%s869_s28] sm:$0x7f] }
 0x8f5   : > { %v1847_v26 = vpop.f32.mrf.mxu1  ;;  %v1905_v27 = vpop.f32.mrf.mxu0 }
 0x8f6   : > { %v1957_v28 = vmul.f32 %v1905_v27, %v1860_v25 }
 0x8f7   : > { %v2920_v29 = vpop.f32.mrf.mxu1  ;;  %v2925_v30 = vpop.f32.mrf.mxu0 }
 0x8f8   : > { %v1966_v31 = vsel %vm1965_vm6, -1e+09, %v1957_v28 }
 0x8f9   : > { %v1908_v32 = vpop.f32.mrf.mxu0  ;;  %v1951_v33 = vpop.f32.mrf.mxu1  ;;  %v1968_v34 = vmul.f32 0.35355338, %v1966_v31 }
 0x8fa   : > { %v1958_v35 = vmul.f32 %v1951_v33, %v1860_v25 }
 0x8fb   : > { %v2926_v36 = vpop.f32.mrf.mxu0  ;;  %v2931_v37 = vpop.f32.mrf.mxu1  ;;  %v1970_v38 = vsel %vm912_vm1, %v1968_v34, -inf }
 0x8fc   : > { %v1967_v39 = vsel %vm1965_vm6, -1e+09, %v1958_v35  ;;  %1971 = vmax.xlane.f32.xlu0 %v1970_v38 }
 0x8fd   : > { %v1954_v40 = vpop.f32.mrf.mxu1  ;;  %v1969_v41 = vmul.f32 0.35355338, %v1967_v39 }
 0x8ff   : > { %v2932_v42 = vpop.f32.mrf.mxu1  ;;  %v1973_v43 = vsel %vm912_vm1, %v1969_v41, -inf }
 0x900   : > { %1974 = vmax.xlane.f32.xlu1 %v1973_v43 }
 0x985   : > { %v1972_v45 = vpop.xlane.xlu0 %1971 }
 0x986   : > { %v1976_v46 = vsub.f32 %v1968_v34, %v1972_v45 }
 0x988   : > { %v1978_v47 = vmul.f32 1.442695, %v1976_v46 }
 0x989   : > { %v1975_v48 = vpop.xlane.xlu1 %1974 }
 0x98a   : > { %3013 = vpow2.f32 %v1978_v47  ;;  %v1977_v51 = vsub.f32 %v1969_v41, %v1975_v48 }
 0x98c   : > { %v1980_v53 = vmul.f32 1.442695, %v1977_v51 }
 0x98e   : > { %3015 = vpow2.f32 %v1980_v53 }
 0x997   : > { %v3014_v55 = vpop.eup %3013 }
 0x998   : > { %v1982_v56 = vsel %vm912_vm1, %v3014_v55, 0.0 }
 0x999   : > { %1983 = vadd.xlane.f32.xlu0 %v1982_v56  ;;  %v2099_v56 = vld [vmem:[%s3281_s3 + $0x18] sm:$0x1] }
 0x99b   : > { %v3016_v57 = vpop.eup %3015 }
 0x99c   : > { %v1985_v58 = vsel %vm912_vm1, %v3016_v57, 0.0 }
 0x99d   : > { %1986 = vadd.xlane.f32.xlu1 %v1985_v58  ;;  %v2237_v58 = vpack.c.bf16 %v2099_v56, %v3290_v49 }
 0xa22   : > { %v1984_v59 = vpop.xlane.xlu0 %1983 }
 0xa23   : > { %3017 = vrcp.f32 %v1984_v59 }
 0xa26   : > { %v1987_v62 = vpop.xlane.xlu1 %1986 }
 0xa27   : > { %3019 = vrcp.f32 %v1987_v62  ;;  %v2288_v62 = vand.u32 %v2237_v58, %v3293_v52 }
 0xa30   : > { %v3018_v3 = vpop.eup %3017 }
 0xa31   : > { %v1990_v5 = vmul.f32 %v3018_v3, %v3014_v55  ;;  %v2097_v55 = vld [vmem:[%s3281_s3 + $0x8] sm:$0x1]  ;;  %s899_s3 = scalar_lea.vmem %s3531_s19, %s3158_s20 }
 0xa33   : > { %v1992_v6 = vpack.c.bf16 %v1990_v5, %v1990_v5 }
 0xa34   : > { %v3020_v12 = vpop.eup %3019 }
 0xa35   : > { %2936 = vmatmul.mubr.msk.bf16.vlgmr.msra.gmra.mxu0 %vm912_vm1, %v1992_v6  ;;  %v1991_v13 = vmul.f32 %v3020_v12, %v3016_v57  ;;  %v2236_v57 = vpack.c.bf16 %v2097_v55, %v3284_v44 }
 0xa36   : > { %2946 = vmatpush3.bf16.xpose.msra.mxu0 %v2110_v7  ;;  %2947 = vmatprep.mubr.msk.bf16.mxu0 %vm3038_vm0, %v3037_v0 }
 0xa37   : > { %v1993_v50 = vpack.c.bf16 %v1991_v13, %v1991_v13  ;;  %2957 = vmatprep.subr.bf16.mxu0 %v3037_v0  ;;  %v2242_v59 = vand.u32 %v2236_v57, %v3293_v52 }
 0xa39   : > { %2942 = vmatmul.mubr.msk.bf16.vlgmr.msra.gmra.mxu1 %vm912_vm1, %v1993_v50 }
 0xa3a   : > { %2952 = vmatpush3.bf16.xpose.msra.mxu1 %v2156_v17  ;;  %2953 = vmatprep.mubr.msk.bf16.mxu1 %vm3038_vm0, %v3037_v0 }
 0xa3b   : > { %2963 = vmatprep.subr.bf16.mxu1 %v3037_v0 }
 0xa3d   : > { %2948 = vmatmul.mubr.msk.bf16.vlgmr.msra.gmra.mxu0 %vm912_vm1, %v2102_v18 }
 0xa3e   : > { %2959 = vmatprep.mubr.msk.bf16.mxu0 %vm3038_vm0, %v3037_v0  ;;  %2958 = vmatpush3.bf16.msra.mxu0 %v2242_v59 }
 0xa41   : > { %2954 = vmatmul.mubr.msk.bf16.vlgmr.msra.gmra.mxu1 %vm912_vm1, %v2103_v19 }
 0xa42   : > { %2965 = vmatprep.mubr.msk.bf16.mxu1 %vm3038_vm0, %v3037_v0  ;;  %v2205_v0 = vrot.slane %v2201_v2, %v3195_v14  ;;  %2964 = vmatpush3.bf16.msra.mxu1 %v2288_v62 }
 0xa44   : > { %vm3483_vm0 = vcmp.eq.s32.totalorder %v2205_v0, 1 }
 0xaf5   : > { %v2036_v21 = vpop.f32.mrf.mxu0 }
 0xaf6   : > { %2088 = vst.msk [vmem:[%s894_s27] sm:$0xff] %vm912_vm1, %v2036_v21 }
 0xaf7   : > { %v2937_v9 = vpop.f32.mrf.mxu0 }
 0xaf9   : > { %v2039_v10 = vpop.f32.mrf.mxu0  ;;  %v2082_v8 = vpop.f32.mrf.mxu1 }
 0xafa   : > { %2089 = vst.msk [vmem:[%s894_s27 + $0x8] sm:$0xff] %vm912_vm1, %v2082_v8 }
 0xafb   : > { %v2938_v60 = vpop.f32.mrf.mxu0  ;;  %v2943_v61 = vpop.f32.mrf.mxu1 }
 0xafd   : > { %v2085_v23 = vpop.f32.mrf.mxu1  ;;  %v2146_v24 = vpop.f32.mrf.mxu0 }
 0xafe   : > { %v2198_v15 = vmul.f32 %v2146_v24, %v2101_v22 }
 0xaff   : > { %v2944_v26 = vpop.f32.mrf.mxu1  ;;  %v2949_v27 = vpop.f32.mrf.mxu0 }
 0xb00   : > { %v2207_v28 = vsel %vm3483_vm0, -1e+09, %v2198_v15 }
 0xb01   : > { %v2149_v29 = vpop.f32.mrf.mxu0  ;;  %v2192_v14 = vpop.f32.mrf.mxu1  ;;  %v2209_v30 = vmul.f32 0.35355338, %v2207_v28 }
 0xb02   : > { %v2199_v31 = vmul.f32 %v2192_v14, %v2101_v22 }
 0xb03   : > { %v2950_v32 = vpop.f32.mrf.mxu0  ;;  %v2955_v33 = vpop.f32.mrf.mxu1  ;;  %v2212_v34 = vsel %vm2211_vm8, %v2209_v30, -inf }
 0xb04   : > { %v2208_v35 = vsel %vm3483_vm0, -1e+09, %v2199_v31  ;;  %2213 = vmax.xlane.f32.xlu0 %v2212_v34 }
 0xb05   : > { %v2195_v36 = vpop.f32.mrf.mxu1  ;;  %v2210_v37 = vmul.f32 0.35355338, %v2208_v35 }
 0xb07   : > { %v2956_v38 = vpop.f32.mrf.mxu1  ;;  %v2215_v39 = vsel %vm2211_vm8, %v2210_v37, -inf }
 0xb08   : > { %2216 = vmax.xlane.f32.xlu1 %v2215_v39 }
 0xb8d   : > { %v2214_v40 = vpop.xlane.xlu0 %2213 }
 0xb8e   : > { %v2218_v41 = vsub.f32 %v2209_v30, %v2214_v40 }
 0xb90   : > { %v2220_v42 = vmul.f32 1.442695, %v2218_v41 }
 0xb91   : > { %v2217_v43 = vpop.xlane.xlu1 %2216 }
 0xb92   : > { %3021 = vpow2.f32 %v2220_v42  ;;  %v2219_v45 = vsub.f32 %v2210_v37, %v2217_v43 }
 0xb94   : > { %v2222_v46 = vmul.f32 1.442695, %v2219_v45 }
 0xb96   : > { %3023 = vpow2.f32 %v2222_v46 }
 0xb9f   : > { %v3022_v47 = vpop.eup %3021 }
 0xba0   : > { %v2224_v48 = vsel %vm2211_vm8, %v3022_v47, 0.0 }
 0xba1   : > { %2225 = vadd.xlane.f32.xlu0 %v2224_v48 }
 0xba3   : > { %v3024_v51 = vpop.eup %3023 }
 0xba4   : > { %v2227_v53 = vsel %vm2211_vm8, %v3024_v51, 0.0 }
 0xba5   : > { %2228 = vadd.xlane.f32.xlu1 %v2227_v53 }
 0xc2a   : > { %v2226_v63 = vpop.xlane.xlu0 %2225 }
 0xc2b   : > { %3025 = vrcp.f32 %v2226_v63 }
 0xc2e   : > { %v2229_v1 = vpop.xlane.xlu1 %2228 }
 0xc2f   : > { %3027 = vrcp.f32 %v2229_v1 }
 0xc38   : > { %v3026_v3 = vpop.eup %3025 }
 0xc39   : > { %v2232_v4 = vmul.f32 %v3026_v3, %v3022_v47 }
 0xc3b   : > { %v2234_v5 = vpack.c.bf16 %v2232_v4, %v2232_v4 }
 0xc3c   : > { %v3028_v6 = vpop.eup %3027 }
 0xc3d   : > { %2960 = vmatmul.mubr.msk.bf16.vlgmr.msra.gmra.mxu0 %vm1283_vm11, %v2234_v5  ;;  %v2233_v44 = vmul.f32 %v3028_v6, %v3024_v51 }
 0xc3f   : > { %v2235_v7 = vpack.c.bf16 %v2233_v44, %v2233_v44 }
 0xc41   : > { %2966 = vmatmul.mubr.msk.bf16.vlgmr.msra.gmra.mxu1 %vm1283_vm11, %v2235_v7 }
 0xcfd   : > { %v2278_v49 = vpop.f32.mrf.mxu0 }
 0xcfe   : > { %2330 = vst.msk [vmem:[%s899_s3] sm:$0x7f] %vm1850_vm4, %v2278_v49 }
 0xcff   : > { %v2961_v52 = vpop.f32.mrf.mxu0 }
 0xd01   : > { %v2281_v11 = vpop.f32.mrf.mxu0  ;;  %v2324_v12 = vpop.f32.mrf.mxu1 }
 0xd02   : > { %2331 = vst.msk [vmem:[%s899_s3 + $0x8] sm:$0x7f] %vm1850_vm4, %v2324_v12 }
 0xd03   : > { %v2962_v13 = vpop.f32.mrf.mxu0  ;;  %v2967_v16 = vpop.f32.mrf.mxu1 }
 0xd05   : > { %v2327_v50 = vpop.f32.mrf.mxu1 }
 0xd07   : > { %v2968_v17 = vpop.f32.mrf.mxu1 }
 0xd08 PF: > { %s30_s0 = sadd.s32 1, %s3035_s0  }
 0xd09   : > { %p27_p4 = scmp.ge.s32.totalorder %s30_s0, 4  }
 0xd0b   :  { %29 = sbr.rel (!%p27_p4) target bundleno = 5 (0x5), region = 205 }

// kernel: multiblock_forward.37
= control target key start
LH: loop header
LB: loop body
LE: loop exit
PB: predicated region body
PF: predicated region fallthrough
CT: control target
= control target key end

     0   :  { %vm23_vm0 = vcmask 130048   ;;  %s136_s0 = inlined_call_operand.vmem [shape: f32[16,16], index: 0, kind: input, shape index: {}]   ;;  %s137_s1 = inlined_call_operand.vmem [shape: f32[16,16], index: 1, kind: input, shape index: {}]   ;;  %s138_s2 = inlined_call_operand.vmem [shape: f32[1,16], index: 2, kind: input, shape index: {}]   ;;  %s139_s3 = inlined_call_operand.vmem [shape: f32[1,16], index: 3, kind: input, shape index: {}]   ;;  %s140_s4 = inlined_call_operand.vmem [shape: f32[16,16], index: 4, kind: output, shape index: {}]  }
   0x1   :  { %v17_v0 = vld [vmem:[%s136_s0] sm:$0xff]  ;;  %v18_v2 = vld [vmem:[%s136_s0 + $0x8] sm:$0xff] }
   0x2   :  { %v19_v1 = vld [vmem:[%s137_s1] sm:$0xff]  ;;  %v20_v4 = vld [vmem:[%s137_s1 + $0x8] sm:$0xff] }
   0x3   :  { %v21_v3 = vadd.f32 %v19_v1, %v17_v0  ;;  %v22_v5 = vadd.f32 %v20_v4, %v18_v2  ;;  %v75_v25 = vld [vmem:[%s138_s2] ss:$0 sm:$0xff] }
   0x4   :  { %v76_v27 = vld [vmem:[%s139_s3] ss:$0 sm:$0xff] }
   0x5   :  { %v24_v6 = vsel %vm23_vm0, %v21_v3, 0.0  ;;  %v27_v7 = vsel %vm23_vm0, %v22_v5, 0.0 }
   0x6   :  { %25 = vadd.xlane.f32.xlu0 %v24_v6 }
   0xa   :  { %28 = vadd.xlane.f32.xlu0 %v27_v7 }
  0x8f   :  { %v26_v8 = vpop.xlane.xlu0 %25 }
  0x90   :  { %v31_v9 = vmul.f32 0.0625, %v26_v8 }
  0x92   :  { %v33_v10 = vsub.f32 %v21_v3, %v31_v9 }
  0x93   :  { %v29_v11 = vpop.xlane.xlu0 %28 }
  0x94   :  { %v32_v12 = vmul.f32 0.0625, %v29_v11  ;;  %v35_v13 = vmul.f32 %v33_v10, %v33_v10 }
  0x96   :  { %v34_v14 = vsub.f32 %v22_v5, %v32_v12  ;;  %v37_v15 = vsel %vm23_vm0, %v35_v13, 0.0 }
  0x97   :  { %38 = vadd.xlane.f32.xlu1 %v37_v15 }
  0x98   :  { %v36_v16 = vmul.f32 %v34_v14, %v34_v14 }
  0x9a   :  { %v40_v17 = vsel %vm23_vm0, %v36_v16, 0.0 }
  0x9b   :  { %41 = vadd.xlane.f32.xlu1 %v40_v17 }
 0x120   :  { %v39_v18 = vpop.xlane.xlu1 %38 }
 0x121   :  { %v43_v19 = vmul.f32 0.0625, %v39_v18 }
 0x123   :  { %v45_v20 = vadd.f32 1e-05, %v43_v19 }
 0x124   :  { %v42_v21 = vpop.xlane.xlu1 %41 }
 0x125   :  { %77 = vrsqrt.f32 %v45_v20  ;;  %v44_v22 = vmul.f32 0.0625, %v42_v21 }
 0x127   :  { %v46_v23 = vadd.f32 1e-05, %v44_v22 }
 0x129   :  { %79 = vrsqrt.f32 %v46_v23 }
 0x132   :  { %v78_v24 = vpop.eup %77 }
 0x133   :  { %v49_v26 = vmul.f32 %v78_v24, %v33_v10 }
 0x135   :  { %v58_v28 = vmul.f32 %v75_v25, %v49_v26 }
 0x136   :  { %v80_v29 = vpop.eup %79 }
 0x137   :  { %v67_v30 = vadd.f32 %v76_v27, %v58_v28  ;;  %v50_v31 = vmul.f32 %v80_v29, %v34_v14 }
 0x139   :  { %69 = vst.msk [vmem:[%s140_s4] sm:$0xff] %vm23_vm0, %v67_v30  ;;  %v59_v32 = vmul.f32 %v75_v25, %v50_v31 }
 0x13b   :  { %v68_v33 = vadd.f32 %v76_v27, %v59_v32 }
 0x13d   :  { %70 = vst.msk [vmem:[%s140_s4 + $0x8] sm:$0xff] %vm23_vm0, %v68_v33 }

// kernel: multiblock_forward.34
= control target key start
LH: loop header
LB: loop body
LE: loop exit
PB: predicated region body
PF: predicated region fallthrough
CT: control target
= control target key end

     0   :  { %v246_v0 = vmov 0.0   ;;  %vm247_vm0 = vmmov 0   ;;  %vm43_vm1 = vcmask 130048   ;;  %s332_s4 = inlined_call_operand.vmem [shape: bf16[16,16], index: 4, kind: input, shape index: {}]   ;;  %s333_s3 = inlined_call_operand.vmem [shape: bf16[16,16], index: 3, kind: input, shape index: {}]   ;;  %s334_s1 = inlined_call_operand.vmem [shape: f32[16,16], index: 1, kind: input, shape index: {}]   ;;  %s335_s0 = inlined_call_operand.vmem [shape: f32[16,16], index: 0, kind: input, shape index: {}]   ;;  %s336_s5 = inlined_call_operand.vmem [shape: bf16[16,16], index: 5, kind: input, shape index: {}]   ;;  %s337_s2 = inlined_call_operand.vmem [shape: f32[16,16], index: 2, kind: input, shape index: {}]   ;;  %s338_s6 = inlined_call_operand.vmem [shape: f32[1,16], index: 6, kind: input, shape index: {}]   ;;  %s339_s7 = inlined_call_operand.vmem [shape: f32[16,16], index: 7, kind: output, shape index: {}]  }
   0x1   :  { %223 = vmatprep.subr.bf16.mxu0 %v246_v0  ;;  %229 = vmatprep.subr.bf16.mxu1 %v246_v0  ;;  %v243_v1 = vld [vmem:[%s332_s4] sm:$0xff]   ;;  %v33_v4 = vld [vmem:[%s334_s1 + $0x8] sm:$0xff] }
   0x2   :  { %v244_v2 = vld [vmem:[%s333_s3] sm:$0xff]   ;;  %225 = vmatprep.mubr.msk.bf16.mxu0 %vm247_vm0, %v246_v0  ;;  %231 = vmatprep.mubr.msk.bf16.mxu1 %vm247_vm0, %v246_v0  ;;  %v28_v7 = vld [vmem:[%s335_s0 + $0x8] sm:$0xff] }
   0x3   :  { %224 = vmatpush3.bf16.msra.mxu0 %v243_v1  ;;  %v32_v3 = vld [vmem:[%s334_s1] sm:$0xff]  ;;  %230 = vmatpush3.bf16.msra.mxu1 %v244_v2  ;;  %v139_v11 = vld [vmem:[%s337_s2 + $0x8] sm:$0xff] }
   0x4   :  { %v27_v5 = vld [vmem:[%s335_s0] sm:$0xff]  ;;  %v34_v6 = vpack.c.bf16 %v33_v4, %v32_v3  ;;  %235 = vmatprep.subr.bf16.mxu0 %v246_v0 }
   0x5   :  { %v29_v8 = vpack.c.bf16 %v28_v7, %v27_v5  ;;  %v245_v9 = vld [vmem:[%s336_s5] sm:$0xff]  }
   0x6   :  { %226 = vmatmul.mubr.msk.bf16.vlgmr.msra.gmra.mxu0 %vm43_vm1, %v34_v6  ;;  %v138_v10 = vld [vmem:[%s337_s2] sm:$0xff] }
   0x7   :  { %232 = vmatmul.mubr.msk.bf16.vlgmr.msra.gmra.mxu1 %vm43_vm1, %v29_v8  ;;  %236 = vmatpush3.bf16.msra.mxu0 %v245_v9  ;;  %v140_v12 = vpack.c.bf16 %v139_v11, %v138_v10  ;;  %v216_v23 = vld [vmem:[%s338_s6] ss:$0 sm:$0xff] }
   0x8   :  { %237 = vmatprep.mubr.msk.bf16.mxu0 %vm247_vm0, %v246_v0 }
   0xe   :  { %238 = vmatmul.mubr.msk.bf16.vlgmr.msra.gmra.mxu0 %vm43_vm1, %v140_v12 }
  0xc6   :  { %v81_v13 = vpop.f32.mrf.mxu0 }
  0xc7   :  { %v131_v14 = vpop.f32.mrf.mxu1 }
  0xc8   :  { %v227_v15 = vpop.f32.mrf.mxu0  ;;  %v132_v20 = vadd.f32 %v131_v14, %v81_v13 }
  0xc9   :  { %v233_v16 = vpop.f32.mrf.mxu1 }
  0xca   :  { %v84_v17 = vpop.f32.mrf.mxu0 }
  0xcb   :  { %v134_v18 = vpop.f32.mrf.mxu1 }
  0xcc   :  { %v228_v19 = vpop.f32.mrf.mxu0  ;;  %v135_v26 = vadd.f32 %v134_v18, %v84_v17 }
  0xcd   :  { %v234_v21 = vpop.f32.mrf.mxu1 }
  0xce   :  { %v186_v22 = vpop.f32.mrf.mxu0 }
  0xcf   :  { %v193_v24 = vadd.f32 %v186_v22, %v132_v20 }
  0xd0   :  { %v239_v25 = vpop.f32.mrf.mxu0 }
  0xd1   :  { %v202_v27 = vadd.f32 %v216_v23, %v193_v24 }
  0xd2   :  { %v189_v28 = vpop.f32.mrf.mxu0 }
  0xd3   :  { %204 = vst.msk [vmem:[%s339_s7] sm:$0xff] %vm43_vm1, %v202_v27  ;;  %v194_v29 = vadd.f32 %v189_v28, %v135_v26 }
  0xd4   :  { %v240_v30 = vpop.f32.mrf.mxu0 }
  0xd5   :  { %v203_v31 = vadd.f32 %v216_v23, %v194_v29 }
  0xd7   :  { %205 = vst.msk [vmem:[%s339_s7 + $0x8] sm:$0xff] %vm43_vm1, %v203_v31 }

// kernel: multiblock_forward.48
= control target key start
LH: loop header
LB: loop body
LE: loop exit
PB: predicated region body
PF: predicated region fallthrough
CT: control target
= control target key end

     0   :  { %v106_v0 = vmov 0.0   ;;  %vm107_vm0 = vmmov 0   ;;  %vm40_vm1 = vcmask 130048   ;;  %vm86_vm2 = vcmask 128000   ;;  %s157_s2 = inlined_call_operand.vmem [shape: bf16[16,16], index: 2, kind: input, shape index: {}]   ;;  %s158_s0 = inlined_call_operand.vmem [shape: f32[14,16], index: 0, kind: input, shape index: {}]   ;;  %s159_s1 = inlined_call_operand.vmem [shape: f32[14,16], index: 1, kind: input, shape index: {}]   ;;  %s160_s3 = inlined_call_operand.vmem [shape: f32[1,16], index: 3, kind: input, shape index: {}]   ;;  %s161_s4 = inlined_call_operand.vmem [shape: f32[14,16], index: 4, kind: output, shape index: {}]  }
   0x1   :  { %97 = vmatprep.subr.bf16.mxu0 %v106_v0  ;;  %v105_v1 = vld [vmem:[%s157_s2] sm:$0xff]   ;;  %99 = vmatprep.mubr.msk.bf16.mxu0 %vm107_vm0, %v106_v0  ;;  %v19_v3 = vld [vmem:[%s158_s0 + $0x8] sm:$0x3f] }
   0x2   :  { %v18_v2 = vld [vmem:[%s158_s0] sm:$0xff]  ;;  %98 = vmatpush3.bf16.msra.mxu0 %v105_v1  ;;  %v21_v5 = vld [vmem:[%s159_s1 + $0x8] sm:$0x3f] }
   0x3   :  { %v20_v4 = vld [vmem:[%s159_s1] sm:$0xff]  ;;  %v23_v7 = vadd.f32 %v21_v5, %v19_v3 }
   0x4   :  { %v22_v6 = vadd.f32 %v20_v4, %v18_v2  ;;  %v92_v9 = vld [vmem:[%s160_s3] ss:$0 sm:$0xff] }
   0x6   :  { %v24_v8 = vpack.c.bf16 %v23_v7, %v22_v6 }
   0x8   :  { %100 = vmatmul.mubr.msk.bf16.vlgmr.msra.gmra.mxu0 %vm40_vm1, %v24_v8 }
  0xc8   :  { %v78_v10 = vpop.f32.mrf.mxu0 }
  0xc9   :  { %v79_v11 = vadd.f32 %v92_v9, %v78_v10 }
  0xca   :  { %v101_v12 = vpop.f32.mrf.mxu0 }
  0xcb   :  { %85 = vst.msk [vmem:[%s161_s4] sm:$0xff] %vm40_vm1, %v79_v11 }
  0xcc   :  { %v81_v13 = vpop.f32.mrf.mxu0 }
  0xcd   :  { %v82_v14 = vadd.f32 %v92_v9, %v81_v13 }
  0xce   :  { %v102_v15 = vpop.f32.mrf.mxu0 }
  0xcf   :  { %87 = vst.msk [vmem:[%s161_s4 + $0x8] sm:$0x3f] %vm86_vm2, %v82_v14 }

// kernel: multiblock_forward.47
= control target key start
LH: loop header
LB: loop body
LE: loop exit
PB: predicated region body
PF: predicated region fallthrough
CT: control target
= control target key end

     0   :  { %v106_v0 = vmov 0.0   ;;  %vm107_vm0 = vmmov 0   ;;  %vm40_vm1 = vcmask 130048   ;;  %vm86_vm2 = vcmask 125952   ;;  %s157_s2 = inlined_call_operand.vmem [shape: bf16[16,16], index: 2, kind: input, shape index: {}]   ;;  %s158_s0 = inlined_call_operand.vmem [shape: f32[12,16], index: 0, kind: input, shape index: {}]   ;;  %s159_s1 = inlined_call_operand.vmem [shape: f32[12,16], index: 1, kind: input, shape index: {}]   ;;  %s160_s3 = inlined_call_operand.vmem [shape: f32[1,16], index: 3, kind: input, shape index: {}]   ;;  %s161_s4 = inlined_call_operand.vmem [shape: f32[12,16], index: 4, kind: output, shape index: {}]  }
   0x1   :  { %97 = vmatprep.subr.bf16.mxu0 %v106_v0  ;;  %v105_v1 = vld [vmem:[%s157_s2] sm:$0xff]   ;;  %99 = vmatprep.mubr.msk.bf16.mxu0 %vm107_vm0, %v106_v0  ;;  %v19_v3 = vld [vmem:[%s158_s0 + $0x8] sm:$0xf] }
   0x2   :  { %v18_v2 = vld [vmem:[%s158_s0] sm:$0xff]  ;;  %98 = vmatpush3.bf16.msra.mxu0 %v105_v1  ;;  %v21_v5 = vld [vmem:[%s159_s1 + $0x8] sm:$0xf] }
   0x3   :  { %v20_v4 = vld [vmem:[%s159_s1] sm:$0xff]  ;;  %v23_v7 = vadd.f32 %v21_v5, %v19_v3 }
   0x4   :  { %v22_v6 = vadd.f32 %v20_v4, %v18_v2  ;;  %v92_v9 = vld [vmem:[%s160_s3] ss:$0 sm:$0xff] }
   0x6   :  { %v24_v8 = vpack.c.bf16 %v23_v7, %v22_v6 }
   0x8   :  { %100 = vmatmul.mubr.msk.bf16.vlgmr.msra.gmra.mxu0 %vm40_vm1, %v24_v8 }
  0xc8   :  { %v78_v10 = vpop.f32.mrf.mxu0 }
  0xc9   :  { %v79_v11 = vadd.f32 %v92_v9, %v78_v10 }
  0xca   :  { %v101_v12 = vpop.f32.mrf.mxu0 }
  0xcb   :  { %85 = vst.msk [vmem:[%s161_s4] sm:$0xff] %vm40_vm1, %v79_v11 }
  0xcc   :  { %v81_v13 = vpop.f32.mrf.mxu0 }
  0xcd   :  { %v82_v14 = vadd.f32 %v92_v9, %v81_v13 }
  0xce   :  { %v102_v15 = vpop.f32.mrf.mxu0 }
  0xcf   :  { %87 = vst.msk [vmem:[%s161_s4 + $0x8] sm:$0xf] %vm86_vm2, %v82_v14 }

// kernel: multiblock_forward.46
= control target key start
LH: loop header
LB: loop body
LE: loop exit
PB: predicated region body
PF: predicated region fallthrough
CT: control target
= control target key end

     0   :  { %v105_v0 = vmov 0.0   ;;  %vm106_vm0 = vmmov 0   ;;  %vm40_vm1 = vcmask 130048   ;;  %s156_s2 = inlined_call_operand.vmem [shape: bf16[16,16], index: 2, kind: input, shape index: {}]   ;;  %s157_s0 = inlined_call_operand.vmem [shape: f32[16,16], index: 0, kind: input, shape index: {}]   ;;  %s158_s1 = inlined_call_operand.vmem [shape: f32[16,16], index: 1, kind: input, shape index: {}]   ;;  %s159_s3 = inlined_call_operand.vmem [shape: f32[1,16], index: 3, kind: input, shape index: {}]   ;;  %s160_s4 = inlined_call_operand.vmem [shape: f32[16,16], index: 4, kind: output, shape index: {}]  }
   0x1   :  { %96 = vmatprep.subr.bf16.mxu0 %v105_v0  ;;  %v104_v1 = vld [vmem:[%s156_s2] sm:$0xff]   ;;  %98 = vmatprep.mubr.msk.bf16.mxu0 %vm106_vm0, %v105_v0  ;;  %v19_v3 = vld [vmem:[%s157_s0 + $0x8] sm:$0xff] }
   0x2   :  { %v18_v2 = vld [vmem:[%s157_s0] sm:$0xff]  ;;  %97 = vmatpush3.bf16.msra.mxu0 %v104_v1  ;;  %v21_v5 = vld [vmem:[%s158_s1 + $0x8] sm:$0xff] }
   0x3   :  { %v20_v4 = vld [vmem:[%s158_s1] sm:$0xff]  ;;  %v23_v7 = vadd.f32 %v21_v5, %v19_v3 }
   0x4   :  { %v22_v6 = vadd.f32 %v20_v4, %v18_v2  ;;  %v91_v9 = vld [vmem:[%s159_s3] ss:$0 sm:$0xff] }
   0x6   :  { %v24_v8 = vpack.c.bf16 %v23_v7, %v22_v6 }
   0x8   :  { %99 = vmatmul.mubr.msk.bf16.vlgmr.msra.gmra.mxu0 %vm40_vm1, %v24_v8 }
  0xc8   :  { %v78_v10 = vpop.f32.mrf.mxu0 }
  0xc9   :  { %v79_v11 = vadd.f32 %v91_v9, %v78_v10 }
  0xca   :  { %v100_v12 = vpop.f32.mrf.mxu0 }
  0xcb   :  { %85 = vst.msk [vmem:[%s160_s4] sm:$0xff] %vm40_vm1, %v79_v11 }
  0xcc   :  { %v81_v13 = vpop.f32.mrf.mxu0 }
  0xcd   :  { %v82_v14 = vadd.f32 %v91_v9, %v81_v13 }
  0xce   :  { %v101_v15 = vpop.f32.mrf.mxu0 }
  0xcf   :  { %86 = vst.msk [vmem:[%s160_s4 + $0x8] sm:$0xff] %vm40_vm1, %v82_v14 }

// kernel: multiblock_forward.45
= control target key start
LH: loop header
LB: loop body
LE: loop exit
PB: predicated region body
PF: predicated region fallthrough
CT: control target
= control target key end

     0   :  { %s2097_s21 = smov 0   ;;  %s2270_s0 = inlined_call_operand.vmem [shape: f32[2,2,8,8], index: 0, kind: input, shape index: {}]   ;;  %s2271_s1 = inlined_call_operand.vmem [shape: f32[2,2,9,8], index: 1, kind: input, shape index: {}]   ;;  %s2272_s2 = inlined_call_operand.vmem [shape: f32[2,2,9,8], index: 2, kind: input, shape index: {}]   ;;  %s2273_s3 = inlined_call_operand.vmem [shape: f32[2,2,6,8], index: 3, kind: input, shape index: {}]   ;;  %s2274_s4 = inlined_call_operand.vmem [shape: f32[2,2,6,8], index: 4, kind: input, shape index: {}]   ;;  %s2275_s5 = inlined_call_operand.vmem [shape: f32[2,2,6,8], index: 5, kind: input, shape index: {}]   ;;  %s2276_s6 = inlined_call_operand.vmem [shape: f32[2,2,7,8], index: 6, kind: input, shape index: {}]   ;;  %s2277_s7 = inlined_call_operand.vmem [shape: f32[2,2,8,8], index: 7, kind: input, shape index: {}]   ;;  %s2278_s8 = inlined_call_operand.vmem [shape: f32[2,2,8,8], index: 8, kind: input, shape index: {}]   ;;  %s2279_s9 = inlined_call_operand.vmem [shape: f32[2,2,1,8], index: 9, kind: input, shape index: {}]   ;;  %s2280_s10 = inlined_call_operand.vmem [shape: f32[2,2,1,8], index: 10, kind: input, shape index: {}]   ;;  %s2281_s11 = inlined_call_operand.vmem [shape: f32[2,1,9], index: 11, kind: input, shape index: {}]   ;;  %s2282_s12 = inlined_call_operand.vmem [shape: f32[2,1,6], index: 12, kind: input, shape index: {}]   ;;  %s2283_s13 = inlined_call_operand.vmem [shape: f32[2,1,8], index: 13, kind: input, shape index: {}]   ;;  %s2284_s14 = inlined_call_operand.vmem [shape: f32[2,2,8,8], index: 14, kind: output, shape index: {0}]   ;;  %s2285_s15 = inlined_call_operand.vmem [shape: f32[2,2,6,8], index: 15, kind: output, shape index: {1}]   ;;  %s2286_s16 = inlined_call_operand.vmem [shape: f32[2,2,7,8], index: 16, kind: output, shape index: {2}]  }
   0x1   :  { %2287 = sst [smem:[#allocation2_spill]] %s2270_s0 }
   0x2 LB: > { %s1811_s22 = sadd.s32 4294967295, %s2006_s21   ;;  %p1815_p0 = scmp.ge.s32.totalorder %s2006_s21, 1  ;;  %s2006_s21 = sphi %s2097_s21, %s27_s21  }
   0x3   : > { %p589_p1 = scmp.lt.s32.totalorder %s2006_s21, 3 }
   0x5   : > { %p590_p2 = pnand %p1815_p0, %p589_p1 }
   0x6   : > { %p706_p3 = scmp.lt.s32.totalorder (!%p590_p2), %s1811_s22, 1  ;;  %s2288_s19 = sld [smem:[#allocation2_spill]] (!%p590_p2) }
   0x7   : > { %593 = sbr.rel (%p590_p2) target bundleno = 1781 (0x6f5), region = 76 }
   0xc   : > { %v796_v0 = vlaneseq  ;;  %v2008_v1 = vmov 0.0   ;;  %s2290_s22 = smov (!%p706_p3, %s1811_s22), 1  ;;  %vm2009_vm0 = vmmov 0   ;;  %vm825_vm1 = vcmask 64512  }
   0xd   : > { %1892 = vmatprep.subr.bf16.mxu0 %v2008_v1  ;;  %1898 = vmatprep.subr.bf16.mxu1 %v2008_v1  ;;  %s1857_s23 = sshll.u32 %s2290_s22, 5  ;;  %s1834_s24 = sshll.u32 %s2290_s22, 1  ;;  %v2010_v29 = vmov 0   ;;  %vm929_vm4 = vcmask 72704   ;;  %vm959_vm5 = vcmask 1043456   ;;  %vm960_vm6 = vcmask 1044480  }
   0xe   : > { %v797_v2 = vshrl.u32 %v796_v0, 7  ;;  %1894 = vmatprep.mubr.msk.bf16.mxu0 %vm2009_vm0, %v2008_v1  ;;  %1900 = vmatprep.mubr.msk.bf16.mxu1 %vm2009_vm0, %v2008_v1  ;;  %s715_s27 = scalar_lea.vmem %s2271_s1, %s1857_s23  ;;  %s754_s30 = scalar_lea.vmem %s2279_s9, %s1834_s24  ;;  %v2011_v59 = vmov 65535   ;;  %vm1184_vm9 = vcmask 46080   ;;  %vm1215_vm10 = vcmask 1042432  }
   0xf   : > { %v784_v4 = vld [vmem:[%s754_s30] sm:$0x1]  ;;  %v785_v5 = vld [vmem:[%s754_s30 + $0x1] sm:$0x1]  ;;  %s2128_s0 = sshll.u32 %s2290_s22, 4  ;;  %v810_v10 = vld [vmem:[%s715_s27 + $0x10] sm:$0xff]  ;;  %s720_s30 = scalar_lea.vmem %s2272_s2, %s1857_s23 }
  0x10   : > { %v2125_v3 = vsub.s32 0, %v797_v2  ;;  %v786_v6 = vadd.f32 1.0, %v784_v4  ;;  %v808_v7 = vld [vmem:[%s715_s27] sm:$0xff]  ;;  %v787_v8 = vadd.f32 1.0, %v785_v5  ;;  %v809_v9 = vld [vmem:[%s715_s27 + $0x8] sm:$0x1]  ;;  %s710_s20 = scalar_lea.vmem %s2288_s19, %s2128_s0  ;;  %s758_s18 = scalar_lea.vmem %s2280_s10, %s1834_s24 }
  0x11   : > { %v811_v11 = vld [vmem:[%s715_s27 + $0x18] sm:$0x1]  ;;  %v792_v18 = vld [vmem:[%s710_s20] sm:$0xff]  ;;  %v793_v19 = vld [vmem:[%s710_s20 + $0x8] sm:$0xff]  ;;  %s761_s27 = scalar_lea.vmem %s2281_s11, %s2290_s22  ;;  %v961_v60 = vsel %vm959_vm5, 4294967295, %v2011_v59  ;;  %s730_s25 = scalar_lea.vmem %s2274_s4, %s2128_s0  ;;  %vm1211_vm11 = vcmask 48128  }
  0x12   : > { %v799_v12 = vrot.slane %v786_v6, %v2125_v3  ;;  %v803_v13 = vrot.slane %v787_v8, %v2125_v3  ;;  %v820_v28 = vld [vmem:[%s761_s27] sm:$0x1]  ;;  %v817_v57 = vld [vmem:[%s720_s30 + $0x8] sm:$0x1]  ;;  %v818_v61 = vld [vmem:[%s720_s30 + $0x10] sm:$0xff]  ;;  %v962_v63 = vsel %vm960_vm6, %v961_v60, 0  ;;  %s725_s27 = scalar_lea.vmem %s2273_s3, %s2128_s0  ;;  %s750_s26 = scalar_lea.vmem %s2278_s8, %s2128_s0 }
  0x13   : > { %vm918_vm2 = vcmp.eq.f32.partialorder %v820_v28, 0.0  ;;  %v816_v56 = vld [vmem:[%s720_s30] sm:$0xff]  ;;  %v819_v62 = vld [vmem:[%s720_s30 + $0x18] sm:$0x1]  ;;  %s764_s30 = scalar_lea.vmem %s2282_s12, %s2290_s22  ;;  %vm1305_vm13 = vcmask 62464   ;;  %vm1422_vm15 = vcmask 63488   ;;  %s782_s29 = scalar_lea.vmem %s2286_s16, %s2128_s0 }
  0x14   : > { %v812_v14 = vmul.f32 %v808_v7, %v799_v12  ;;  %v813_v15 = vmul.f32 %v809_v9, %v799_v12  ;;  %v814_v16 = vmul.f32 %v810_v10, %v803_v13  ;;  %v815_v17 = vmul.f32 %v811_v11, %v803_v13  ;;  %v788_v5 = vld [vmem:[%s758_s18] sm:$0x1]  ;;  %v789_v8 = vld [vmem:[%s758_s18 + $0x1] sm:$0x1]  ;;  %s772_s18 = scalar_lea.vmem %s2284_s14, %s2128_s0 }
  0x15   : > { %v806_v24 = vmul.f32 %v799_v12, %v792_v18  ;;  %v807_v25 = vmul.f32 %v803_v13, %v793_v19  ;;  %v919_v30 = vsel %vm918_vm2, 1, %v2010_v29  ;;  %v954_v58 = vpack.c.bf16 %v817_v57, %v816_v56  ;;  %v1070_v12 = vld [vmem:[%s730_s25] sm:$0x3f] }
  0x16   : > { %v823_v20 = vpack.c.bf16 %v813_v15, %v812_v14  ;;  %v824_v21 = vpack.c.bf16 %v815_v17, %v814_v16  ;;  %v923_v31 = vrot.slane %v919_v30, %v2125_v3  ;;  %v955_v0 = vpack.c.bf16 %v819_v62, %v818_v61  ;;  %v1071_v15 = vld [vmem:[%s730_s25 + $0x8] sm:$0x3f]  ;;  %s735_s25 = scalar_lea.vmem %s2275_s5, %s2128_s0 }
  0x17   : > { %v821_v26 = vpack.c.bf16 %v806_v24, %v806_v24  ;;  %v822_v27 = vpack.c.bf16 %v807_v25, %v807_v25  ;;  %v964_v2 = vand.u32 %v962_v63, %v954_v58  ;;  %v790_v7 = vadd.f32 1.0, %v788_v5 }
  0x18   : > { %v830_v22 = vsel %vm825_vm1, %v823_v20, 0  ;;  %v876_v23 = vsel %vm825_vm1, %v824_v21, 0  ;;  %vm924_vm3 = vcmp.eq.s32.totalorder %v923_v31, 1  ;;  %v1010_v4 = vand.u32 %v962_v63, %v955_v0  ;;  %v1054_v20 = vld [vmem:[%s725_s27] sm:$0x3f] }
  0x19   : > { %1893 = vmatpush3.bf16.xpose.msra.mxu0 %v830_v22  ;;  %1899 = vmatpush3.bf16.xpose.msra.mxu1 %v876_v23  ;;  %v1061_v10 = vrot.slane %v790_v7, %v2125_v3  ;;  %v791_v11 = vadd.f32 1.0, %v789_v8  ;;  %v1074_v7 = vld [vmem:[%s735_s25] sm:$0x3f]  ;;  %v1075_v8 = vld [vmem:[%s735_s25 + $0x8] sm:$0x3f]  ;;  %s777_s25 = scalar_lea.vmem %s2285_s15, %s2128_s0 }
  0x1a   : > { %1904 = vmatprep.subr.bf16.mxu0 %v2008_v1  ;;  %1910 = vmatprep.subr.bf16.mxu1 %v2008_v1 }
  0x1b   : > { %v1072_v13 = vmul.f32 %v1070_v12, %v1061_v10  ;;  %v1065_v14 = vrot.slane %v791_v11, %v2125_v3  ;;  %v1068_v25 = vmul.f32 %v1061_v10, %v1054_v20  ;;  %v1210_v10 = vpack.c.bf16 %v1075_v8, %v1075_v8 }
  0x1d   : > { %v1079_v16 = vpack.c.bf16 %v1072_v13, %v1072_v13  ;;  %v1073_v17 = vmul.f32 %v1071_v15, %v1065_v14  ;;  %v1077_v31 = vpack.c.bf16 %v1068_v25, %v1068_v25  ;;  %v1263_v12 = vsel %vm1215_vm10, %v1210_v10, 0 }
  0x1f   : > { %v1085_v22 = vsel %vm825_vm1, %v1079_v16, 0  ;;  %v1080_v23 = vpack.c.bf16 %v1073_v17, %v1073_v17 }
  0x20   : > { %1895 = vmatmul.mubr.msk.bf16.vlgmr.msra.gmra.mxu0 %vm825_vm1, %v821_v26  ;;  %1901 = vmatmul.mubr.msk.bf16.vlgmr.msra.gmra.mxu1 %vm825_vm1, %v822_v27  ;;  %v1055_v27 = vld [vmem:[%s725_s27 + $0x8] sm:$0x3f]  ;;  %s745_s27 = scalar_lea.vmem %s2277_s7, %s2128_s0 }
  0x21   : > { %1906 = vmatprep.mubr.msk.bf16.mxu0 %vm2009_vm0, %v2008_v1  ;;  %1912 = vmatprep.mubr.msk.bf16.mxu1 %vm2009_vm0, %v2008_v1  ;;  %v1131_v30 = vsel %vm825_vm1, %v1080_v23, 0  ;;  %v1310_v15 = vld [vmem:[%s745_s27] sm:$0xff] }
  0x22   : > { %1905 = vmatpush3.bf16.msra.mxu0 %v964_v2  ;;  %1911 = vmatpush3.bf16.msra.mxu1 %v1010_v4  ;;  %v1317_v16 = vpack.c.bf16 %v1310_v15, %v1310_v15 }
  0x23   : > { %1916 = vmatprep.subr.bf16.mxu0 %v2008_v1  ;;  %1922 = vmatprep.subr.bf16.mxu1 %v2008_v1 }
  0xe0   : > { %v866_v32 = vpop.f32.mrf.mxu0  ;;  %v912_v33 = vpop.f32.mrf.mxu1 }
  0xe1   : > { %v925_v34 = vsel %vm924_vm3, -1e+09, %v866_v32  ;;  %v926_v35 = vsel %vm924_vm3, -1e+09, %v912_v33  ;;  %v1069_v32 = vmul.f32 %v1065_v14, %v1055_v27 }
  0xe2   : > { %v927_v36 = vmul.f32 0.35355338, %v925_v34  ;;  %v928_v37 = vmul.f32 0.35355338, %v926_v35  ;;  %v1896_v38 = vpop.f32.mrf.mxu0  ;;  %v1902_v39 = vpop.f32.mrf.mxu1  ;;  %v1076_v34 = vld [vmem:[%s764_s30] sm:$0x1]  ;;  %s740_s30 = scalar_lea.vmem %s2276_s6, %s2128_s0 }
  0xe3   : > { %v1078_v33 = vpack.c.bf16 %v1069_v32, %v1069_v32  ;;  %vm1173_vm7 = vcmp.eq.f32.partialorder %v1076_v34, 0.0  ;;  %v1308_v25 = vld [vmem:[%s740_s30] sm:$0x7f] }
  0xe4   : > { %v869_v40 = vpop.f32.mrf.mxu0  ;;  %v915_v41 = vpop.f32.mrf.mxu1  ;;  %v930_v42 = vsel %vm929_vm4, %v927_v36, -inf  ;;  %v933_v45 = vsel %vm929_vm4, %v928_v37, -inf  ;;  %v1174_v35 = vsel %vm1173_vm7, 1, %v2010_v29 }
  0xe5   : > { %931 = vmax.xlane.f32.xlu0 %v930_v42  ;;  %v1178_v38 = vrot.slane %v1174_v35, %v2125_v3 }
  0xe6   : > { %v1897_v43 = vpop.f32.mrf.mxu0  ;;  %v1903_v44 = vpop.f32.mrf.mxu1 }
  0xe7   : > { %vm1179_vm8 = vcmp.eq.s32.totalorder %v1178_v38, 1 }
  0xe9   : > { %934 = vmax.xlane.f32.xlu0 %v933_v45 }
 0x16e   : > { %v932_v46 = vpop.xlane.xlu0 %931 }
 0x16f   : > { %v936_v47 = vsub.f32 %v927_v36, %v932_v46 }
 0x171   : > { %v938_v48 = vmul.f32 1.442695, %v936_v47 }
 0x172   : > { %v935_v49 = vpop.xlane.xlu0 %934 }
 0x173   : > { %1976 = vpow2.f32 %v938_v48  ;;  %v937_v50 = vsub.f32 %v928_v37, %v935_v49 }
 0x175   : > { %v940_v51 = vmul.f32 1.442695, %v937_v50 }
 0x177   : > { %1978 = vpow2.f32 %v940_v51 }
 0x180   : > { %v1977_v52 = vpop.eup %1976 }
 0x181   : > { %v942_v53 = vsel %vm929_vm4, %v1977_v52, 0.0 }
 0x182   : > { %943 = vadd.xlane.f32.xlu1 %v942_v53 }
 0x184   : > { %v1979_v54 = vpop.eup %1978 }
 0x185   : > { %v945_v55 = vsel %vm929_vm4, %v1979_v54, 0.0 }
 0x186   : > { %946 = vadd.xlane.f32.xlu1 %v945_v55 }
 0x20b   : > { %v944_v6 = vpop.xlane.xlu1 %943 }
 0x20c   : > { %1980 = vrcp.f32 %v944_v6 }
 0x20f   : > { %v947_v9 = vpop.xlane.xlu1 %946 }
 0x210   : > { %1982 = vrcp.f32 %v947_v9  ;;  %v1209_v9 = vpack.c.bf16 %v1074_v7, %v1074_v7 }
 0x212   : > { %v1217_v11 = vsel %vm1215_vm10, %v1209_v9, 0 }
 0x219   : > { %v1981_v18 = vpop.eup %1980 }
 0x21a   : > { %v950_v19 = vmul.f32 %v1981_v18, %v1977_v52  ;;  %v1311_v18 = vld [vmem:[%s745_s27 + $0x8] sm:$0xff] }
 0x21c   : > { %v952_v21 = vpack.c.bf16 %v950_v19, %v950_v19 }
 0x21d   : > { %v1983_v24 = vpop.eup %1982 }
 0x21e   : > { %1907 = vmatmul.mubr.msk.bf16.vlgmr.msra.gmra.mxu0 %vm929_vm4, %v952_v21  ;;  %v951_v26 = vmul.f32 %v1983_v24, %v1979_v54  ;;  %v1323_v21 = vsel %vm825_vm1, %v1317_v16, 0 }
 0x21f   : > { %1917 = vmatpush3.bf16.xpose.msra.mxu0 %v1085_v22  ;;  %1918 = vmatprep.mubr.msk.bf16.mxu0 %vm2009_vm0, %v2008_v1  ;;  %v1318_v22 = vpack.c.bf16 %v1311_v18, %v1311_v18 }
 0x220   : > { %v953_v28 = vpack.c.bf16 %v951_v26, %v951_v26  ;;  %1928 = vmatprep.subr.bf16.mxu0 %v2008_v1 }
 0x221   : > { %v1369_v27 = vsel %vm825_vm1, %v1318_v22, 0 }
 0x222   : > { %1913 = vmatmul.mubr.msk.bf16.vlgmr.msra.gmra.mxu1 %vm929_vm4, %v953_v28  ;;  %v1315_v28 = vpack.c.bf16 %v1308_v25, %v1308_v25 }
 0x223   : > { %1923 = vmatpush3.bf16.xpose.msra.mxu1 %v1131_v30  ;;  %1924 = vmatprep.mubr.msk.bf16.mxu1 %vm2009_vm0, %v2008_v1  ;;  %v1309_v30 = vld [vmem:[%s740_s30 + $0x8] sm:$0x7f] }
 0x224   : > { %1934 = vmatprep.subr.bf16.mxu1 %v2008_v1 }
 0x226   : > { %1919 = vmatmul.mubr.msk.bf16.vlgmr.msra.gmra.mxu0 %vm825_vm1, %v1077_v31  ;;  %v1316_v31 = vpack.c.bf16 %v1309_v30, %v1309_v30 }
 0x227   : > { %1930 = vmatprep.mubr.msk.bf16.mxu0 %vm2009_vm0, %v2008_v1  ;;  %1929 = vmatpush3.bf16.msra.mxu0 %v1217_v11 }
 0x228   : > { %1940 = vmatprep.subr.bf16.mxu0 %v2008_v1 }
 0x22a   : > { %1925 = vmatmul.mubr.msk.bf16.vlgmr.msra.gmra.mxu1 %vm825_vm1, %v1078_v33 }
 0x22b   : > { %1936 = vmatprep.mubr.msk.bf16.mxu1 %vm2009_vm0, %v2008_v1  ;;  %1935 = vmatpush3.bf16.msra.mxu1 %v1263_v12 }
 0x22c   : > { %1946 = vmatprep.subr.bf16.mxu1 %v2008_v1 }
 0x2de   : > { %v1000_v36 = vpop.f32.mrf.mxu0 }
 0x2df   : > { %1052 = vst.msk [vmem:[%s772_s18] sm:$0xff] %vm825_vm1, %v1000_v36 }
 0x2e0   : > { %v1908_v37 = vpop.f32.mrf.mxu0 }
 0x2e2   : > { %v1003_v39 = vpop.f32.mrf.mxu0  ;;  %v1046_v40 = vpop.f32.mrf.mxu1 }
 0x2e3   : > { %1053 = vst.msk [vmem:[%s772_s18 + $0x8] sm:$0xff] %vm825_vm1, %v1046_v40  ;;  %s767_s18 = scalar_lea.vmem %s2283_s13, %s2290_s22 }
 0x2e4   : > { %v1909_v41 = vpop.f32.mrf.mxu0  ;;  %v1914_v42 = vpop.f32.mrf.mxu1  ;;  %v1314_v32 = vld [vmem:[%s767_s18] sm:$0x1] }
 0x2e5   : > { %vm1411_vm12 = vcmp.eq.f32.partialorder %v1314_v32, 0.0 }
 0x2e6   : > { %v1049_v43 = vpop.f32.mrf.mxu1  ;;  %v1121_v44 = vpop.f32.mrf.mxu0  ;;  %v1412_v33 = vsel %vm1411_vm12, 1, %v2010_v29 }
 0x2e7   : > { %v1180_v45 = vsel %vm1179_vm8, -1e+09, %v1121_v44  ;;  %v1416_v36 = vrot.slane %v1412_v33, %v2125_v3 }
 0x2e8   : > { %v1182_v46 = vmul.f32 0.35355338, %v1180_v45  ;;  %v1915_v47 = vpop.f32.mrf.mxu1  ;;  %v1920_v48 = vpop.f32.mrf.mxu0 }
 0x2e9   : > { %vm1417_vm14 = vcmp.eq.s32.totalorder %v1416_v36, 1 }
 0x2ea   : > { %v1124_v49 = vpop.f32.mrf.mxu0  ;;  %v1167_v50 = vpop.f32.mrf.mxu1  ;;  %v1185_v51 = vsel %vm1184_vm9, %v1182_v46, -inf }
 0x2eb   : > { %v1181_v52 = vsel %vm1179_vm8, -1e+09, %v1167_v50  ;;  %1186 = vmax.xlane.f32.xlu0 %v1185_v51 }
 0x2ec   : > { %v1183_v53 = vmul.f32 0.35355338, %v1181_v52  ;;  %v1921_v54 = vpop.f32.mrf.mxu0  ;;  %v1926_v55 = vpop.f32.mrf.mxu1 }
 0x2ee   : > { %v1170_v56 = vpop.f32.mrf.mxu1  ;;  %v1188_v57 = vsel %vm1184_vm9, %v1183_v53, -inf }
 0x2ef   : > { %1189 = vmax.xlane.f32.xlu1 %v1188_v57 }
 0x2f0   : > { %v1927_v58 = vpop.f32.mrf.mxu1 }
 0x374   : > { %v1187_v59 = vpop.xlane.xlu0 %1186 }
 0x375   : > { %v1191_v60 = vsub.f32 %v1182_v46, %v1187_v59 }
 0x377   : > { %v1193_v61 = vmul.f32 1.442695, %v1191_v60 }
 0x378   : > { %v1190_v62 = vpop.xlane.xlu1 %1189 }
 0x379   : > { %1984 = vpow2.f32 %v1193_v61  ;;  %v1192_v63 = vsub.f32 %v1183_v53, %v1190_v62 }
 0x37b   : > { %v1195_v0 = vmul.f32 1.442695, %v1192_v63 }
 0x37d   : > { %1986 = vpow2.f32 %v1195_v0  ;;  %v1312_v0 = vld [vmem:[%s750_s26] sm:$0xff] }
 0x386   : > { %v1985_v2 = vpop.eup %1984 }
 0x387   : > { %v1197_v4 = vsel %vm1184_vm9, %v1985_v2, 0.0 }
 0x388   : > { %1198 = vadd.xlane.f32.xlu0 %v1197_v4  ;;  %v1447_v4 = vpack.c.bf16 %v1312_v0, %v1312_v0 }
 0x38a   : > { %v1987_v5 = vpop.eup %1986 }
 0x38b   : > { %v1200_v6 = vsel %vm1184_vm9, %v1987_v5, 0.0 }
 0x38c   : > { %1201 = vadd.xlane.f32.xlu1 %v1200_v6  ;;  %v1453_v6 = vsel %vm959_vm5, %v1447_v4, 0 }
 0x411   : > { %v1199_v13 = vpop.xlane.xlu0 %1198 }
 0x412   : > { %1988 = vrcp.f32 %v1199_v13 }
 0x415   : > { %v1202_v14 = vpop.xlane.xlu1 %1201 }
 0x416   : > { %1990 = vrcp.f32 %v1202_v14 }
 0x41f   : > { %v1989_v17 = vpop.eup %1988 }
 0x420   : > { %v1205_v19 = vmul.f32 %v1989_v17, %v1985_v2  ;;  %v1313_v2 = vld [vmem:[%s750_s26 + $0x8] sm:$0xff] }
 0x422   : > { %v1207_v20 = vpack.c.bf16 %v1205_v19, %v1205_v19 }
 0x423   : > { %v1991_v23 = vpop.eup %1990 }
 0x424   : > { %1931 = vmatmul.mubr.msk.bf16.vlgmr.msra.gmra.mxu0 %vm1211_vm11, %v1207_v20  ;;  %v1206_v24 = vmul.f32 %v1991_v23, %v1987_v5  ;;  %v1448_v5 = vpack.c.bf16 %v1313_v2, %v1313_v2 }
 0x425   : > { %1941 = vmatpush3.bf16.xpose.msra.mxu0 %v1323_v21  ;;  %1942 = vmatprep.mubr.msk.bf16.mxu0 %vm2009_vm0, %v2008_v1 }
 0x426   : > { %v1208_v26 = vpack.c.bf16 %v1206_v24, %v1206_v24  ;;  %1952 = vmatprep.subr.bf16.mxu0 %v2008_v1  ;;  %v1499_v7 = vsel %vm959_vm5, %v1448_v5, 0 }
 0x428   : > { %1937 = vmatmul.mubr.msk.bf16.vlgmr.msra.gmra.mxu1 %vm1211_vm11, %v1208_v26 }
 0x429   : > { %1947 = vmatpush3.bf16.xpose.msra.mxu1 %v1369_v27  ;;  %1948 = vmatprep.mubr.msk.bf16.mxu1 %vm2009_vm0, %v2008_v1 }
 0x42a   : > { %1958 = vmatprep.subr.bf16.mxu1 %v2008_v1 }
 0x42c   : > { %1943 = vmatmul.mubr.msk.bf16.vlgmr.msra.gmra.mxu0 %vm825_vm1, %v1315_v28 }
 0x42d   : > { %1954 = vmatprep.mubr.msk.bf16.mxu0 %vm2009_vm0, %v2008_v1  ;;  %1953 = vmatpush3.bf16.msra.mxu0 %v1453_v6 }
 0x430   : > { %1949 = vmatmul.mubr.msk.bf16.vlgmr.msra.gmra.mxu1 %vm825_vm1, %v1316_v31 }
 0x431   : > { %1960 = vmatprep.mubr.msk.bf16.mxu1 %vm2009_vm0, %v2008_v1  ;;  %1959 = vmatpush3.bf16.msra.mxu1 %v1499_v7 }
 0x4e4   : > { %v1253_v34 = vpop.f32.mrf.mxu0 }
 0x4e5   : > { %1306 = vst.msk [vmem:[%s777_s25] sm:$0x3f] %vm1305_vm13, %v1253_v34 }
 0x4e6   : > { %v1932_v35 = vpop.f32.mrf.mxu0 }
 0x4e8   : > { %v1256_v37 = vpop.f32.mrf.mxu0  ;;  %v1299_v1 = vpop.f32.mrf.mxu1 }
 0x4e9   : > { %1307 = vst.msk [vmem:[%s777_s25 + $0x8] sm:$0x3f] %vm1305_vm13, %v1299_v1 }
 0x4ea   : > { %v1933_v38 = vpop.f32.mrf.mxu0  ;;  %v1938_v39 = vpop.f32.mrf.mxu1 }
 0x4ec   : > { %v1302_v40 = vpop.f32.mrf.mxu1  ;;  %v1359_v41 = vpop.f32.mrf.mxu0 }
 0x4ed   : > { %v1418_v42 = vsel %vm1417_vm14, -1e+09, %v1359_v41 }
 0x4ee   : > { %v1420_v43 = vmul.f32 0.35355338, %v1418_v42  ;;  %v1939_v44 = vpop.f32.mrf.mxu1  ;;  %v1944_v45 = vpop.f32.mrf.mxu0 }
 0x4f0   : > { %v1362_v46 = vpop.f32.mrf.mxu0  ;;  %v1405_v29 = vpop.f32.mrf.mxu1  ;;  %v1423_v47 = vsel %vm1422_vm15, %v1420_v43, -inf }
 0x4f1   : > { %v1419_v48 = vsel %vm1417_vm14, -1e+09, %v1405_v29  ;;  %1424 = vmax.xlane.f32.xlu0 %v1423_v47 }
 0x4f2   : > { %v1421_v3 = vmul.f32 0.35355338, %v1419_v48  ;;  %v1945_v49 = vpop.f32.mrf.mxu0  ;;  %v1950_v50 = vpop.f32.mrf.mxu1 }
 0x4f4   : > { %v1408_v51 = vpop.f32.mrf.mxu1  ;;  %v1426_v52 = vsel %vm1422_vm15, %v1421_v3, -inf }
 0x4f5   : > { %1427 = vmax.xlane.f32.xlu1 %v1426_v52 }
 0x4f6   : > { %v1951_v53 = vpop.f32.mrf.mxu1 }
 0x57a   : > { %v1425_v54 = vpop.xlane.xlu0 %1424 }
 0x57b   : > { %v1429_v55 = vsub.f32 %v1420_v43, %v1425_v54 }
 0x57d   : > { %v1431_v56 = vmul.f32 1.442695, %v1429_v55 }
 0x57e   : > { %v1428_v57 = vpop.xlane.xlu1 %1427 }
 0x57f   : > { %1992 = vpow2.f32 %v1431_v56  ;;  %v1430_v58 = vsub.f32 %v1421_v3, %v1428_v57 }
 0x581   : > { %v1433_v59 = vmul.f32 1.442695, %v1430_v58 }
 0x583   : > { %1994 = vpow2.f32 %v1433_v59 }
 0x58c   : > { %v1993_v60 = vpop.eup %1992 }
 0x58d   : > { %v1435_v61 = vsel %vm1422_vm15, %v1993_v60, 0.0 }
 0x58e   : > { %1436 = vadd.xlane.f32.xlu0 %v1435_v61 }
 0x590   : > { %v1995_v62 = vpop.eup %1994 }
 0x591   : > { %v1438_v63 = vsel %vm1422_vm15, %v1995_v62, 0.0 }
 0x592   : > { %1439 = vadd.xlane.f32.xlu1 %v1438_v63 }
 0x617   : > { %v1437_v8 = vpop.xlane.xlu0 %1436 }
 0x618   : > { %1996 = vrcp.f32 %v1437_v8 }
 0x61b   : > { %v1440_v9 = vpop.xlane.xlu1 %1439 }
 0x61c   : > { %1998 = vrcp.f32 %v1440_v9 }
 0x625   : > { %v1997_v10 = vpop.eup %1996 }
 0x626   : > { %v1443_v11 = vmul.f32 %v1997_v10, %v1993_v60 }
 0x628   : > { %v1445_v12 = vpack.c.bf16 %v1443_v11, %v1443_v11 }
 0x629   : > { %v1999_v13 = vpop.eup %1998 }
 0x62a   : > { %1955 = vmatmul.mubr.msk.bf16.vlgmr.msra.gmra.mxu0 %vm825_vm1, %v1445_v12  ;;  %v1444_v14 = vmul.f32 %v1999_v13, %v1995_v62 }
 0x62c   : > { %v1446_v15 = vpack.c.bf16 %v1444_v14, %v1444_v14 }
 0x62e   : > { %1961 = vmatmul.mubr.msk.bf16.vlgmr.msra.gmra.mxu1 %vm825_vm1, %v1446_v15 }
 0x6ea   : > { %v1489_v16 = vpop.f32.mrf.mxu0 }
 0x6eb   : > { %1541 = vst.msk [vmem:[%s782_s29] sm:$0x7f] %vm1422_vm15, %v1489_v16 }
 0x6ec   : > { %v1956_v17 = vpop.f32.mrf.mxu0 }
 0x6ee   : > { %v1492_v18 = vpop.f32.mrf.mxu0  ;;  %v1535_v19 = vpop.f32.mrf.mxu1 }
 0x6ef   : > { %1542 = vst.msk [vmem:[%s782_s29 + $0x8] sm:$0x7f] %vm1422_vm15, %v1535_v19 }
 0x6f0   : > { %v1957_v20 = vpop.f32.mrf.mxu0  ;;  %v1962_v21 = vpop.f32.mrf.mxu1 }
 0x6f2   : > { %v1538_v22 = vpop.f32.mrf.mxu1 }
 0x6f4   : > { %v1963_v23 = vpop.f32.mrf.mxu1 }
 0x6f5 PF: > { %s27_s21 = sadd.s32 1, %s2006_s21  }
 0x6f6   : > { %p24_p4 = scmp.ge.s32.totalorder %s27_s21, 4  }
 0x6f8   :  { %26 = sbr.rel (!%p24_p4) target bundleno = 2 (0x2), region = 169 }

// kernel: multiblock_forward.49
= control target key start
LH: loop header
LB: loop body
LE: loop exit
PB: predicated region body
PF: predicated region fallthrough
CT: control target
= control target key end

     0   :  { %vm24_vm0 = vcmask 130048   ;;  %s174_s0 = inlined_call_operand.vmem [shape: f32[16,16], index: 0, kind: input, shape index: {}]   ;;  %s175_s1 = inlined_call_operand.vmem [shape: f32[16,16], index: 1, kind: input, shape index: {}]   ;;  %s176_s2 = inlined_call_operand.vmem [shape: f32[1,16], index: 2, kind: input, shape index: {}]   ;;  %s177_s3 = inlined_call_operand.vmem [shape: f32[1,16], index: 3, kind: input, shape index: {}]   ;;  %s178_s4 = inlined_call_operand.hbm [shape: f32[16,16], index: 4, kind: output, shape index: {}]  }
   0x1   :  { %v18_v0 = vld [vmem:[%s174_s0] sm:$0xff]  ;;  %v19_v2 = vld [vmem:[%s174_s0 + $0x8] sm:$0xff] }
   0x2   :  { %v20_v1 = vld [vmem:[%s175_s1] sm:$0xff]  ;;  %v21_v4 = vld [vmem:[%s175_s1 + $0x8] sm:$0xff] }
   0x3   :  { %v22_v3 = vadd.f32 %v20_v1, %v18_v0 }
   0x4   :  { %9 = vsyncpa [#allocation3], 0  ;;  %v23_v5 = vadd.f32 %v21_v4, %v19_v2  ;;  %v88_v25 = vld [vmem:[%s176_s2] ss:$0 sm:$0xff]  ;;  %s119_s25 = smov [#allocation2]  }
   0x5   :  { %v25_v6 = vsel %vm24_vm0, %v22_v3, 0.0  ;;  %v89_v27 = vld [vmem:[%s177_s3] ss:$0 sm:$0xff]  ;;  %s77_s26 = sshll.u32 %s119_s25, 4  ;;  %s78_s26 = int_to_ptr.vmem [resolvable:$true] %s77_s26 }
   0x6   :  { %26 = vadd.xlane.f32.xlu0 %v25_v6  ;;  %v28_v7 = vsel %vm24_vm0, %v23_v5, 0.0  ;;  %s97_s27 = scalar_lea.vmem %s78_s26, 256  ;;  %p102_p1 = scmp.lt.s32.totalorder %s78_s26, %s78_s26 }
   0x7   :  { %p98_p0 = scmp.ne.s32.totalorder %s78_s26, %s97_s27  ;;  %p103_p2 = scmp.lt.s32.totalorder %s97_s27, %s97_s27 }
   0x9   :  { %p104_p3 = por %p103_p2, %p102_p1 }
   0xa   :  { %29 = vadd.xlane.f32.xlu0 %v28_v7 }
   0xb   :  { %p105_p4 = pnand %p104_p3, %p98_p0 }
  0x8f   :  { %v27_v8 = vpop.xlane.xlu0 %26 }
  0x90   :  { %v32_v9 = vmul.f32 0.0625, %v27_v8 }
  0x92   :  { %v34_v10 = vsub.f32 %v22_v3, %v32_v9 }
  0x93   :  { %v30_v11 = vpop.xlane.xlu0 %29 }
  0x94   :  { %v33_v12 = vmul.f32 0.0625, %v30_v11  ;;  %v36_v13 = vmul.f32 %v34_v10, %v34_v10 }
  0x96   :  { %v35_v14 = vsub.f32 %v23_v5, %v33_v12  ;;  %v38_v15 = vsel %vm24_vm0, %v36_v13, 0.0 }
  0x97   :  { %39 = vadd.xlane.f32.xlu1 %v38_v15 }
  0x98   :  { %v37_v16 = vmul.f32 %v35_v14, %v35_v14 }
  0x9a   :  { %v41_v17 = vsel %vm24_vm0, %v37_v16, 0.0 }
  0x9b   :  { %42 = vadd.xlane.f32.xlu1 %v41_v17 }
 0x120   :  { %v40_v18 = vpop.xlane.xlu1 %39 }
 0x121   :  { %v44_v19 = vmul.f32 0.0625, %v40_v18 }
 0x123   :  { %v46_v20 = vadd.f32 1e-05, %v44_v19 }
 0x124   :  { %v43_v21 = vpop.xlane.xlu1 %42 }
 0x125   :  { %93 = vrsqrt.f32 %v46_v20  ;;  %v45_v22 = vmul.f32 0.0625, %v43_v21 }
 0x127   :  { %v47_v23 = vadd.f32 1e-05, %v45_v22 }
 0x129   :  { %95 = vrsqrt.f32 %v47_v23 }
 0x132   :  { %v94_v24 = vpop.eup %93 }
 0x133   :  { %v50_v26 = vmul.f32 %v94_v24, %v34_v10 }
 0x135   :  { %v59_v28 = vmul.f32 %v88_v25, %v50_v26 }
 0x136   :  { %v96_v29 = vpop.eup %95 }
 0x137   :  { %v51_v30 = vmul.f32 %v96_v29, %v35_v14  ;;  %v68_v31 = vadd.f32 %v89_v27, %v59_v28 }
 0x139   :  { %v60_v32 = vmul.f32 %v88_v25, %v51_v30  ;;  %70 = vst.msk [vmem:[#allocation2] sm:$0xff] %vm24_vm0, %v68_v31 }
 0x13b   :  { %v69_v33 = vadd.f32 %v89_v27, %v60_v32 }
 0x13d   :  { %71 = vst.msk [vmem:[#allocation2 + $0x8] sm:$0xff] %vm24_vm0, %v69_v33 }
 0x13e   :  { %108 = shalt.err (!%p105_p4)
}
 0x13f   :  { %s120_s2 = smov 128   ;;  %s121_s3 = smov 8  }
 0x140   :  { %83 = dma.vmem_to_hbm [thread:$0]  %s78_s26, 256, %s178_s4, [#allocation3], %s120_s2, %s120_s2, %s121_s3  }
 0x141   :  { %117 = dma.done.wait [#allocation3], 256  }
 0x142   :  { %118 = vsyncadd [#allocation3], 4294967040 }
 0x143   :  { %87 = vsyncpa [#allocation3], 1 }

</bundles_post_ra>
